<compile_context>
chip_gen: v7x
topology: tpu7x:2x2x1
jax: 0.10.0
libtpu: 0.0.40
codegen_flags: <defaults>
</compile_context>

<pallas_src>
import functools

import numpy as np
import jax
import jax.numpy as jnp
from jax import lax
from jax.experimental import pallas as pl
from jax.experimental.pallas import tpu as pltpu


# ---------------------------------------------------------------------------
# Parameter setup (deterministic, mirrors build_gauss_kernel exactly)
# ---------------------------------------------------------------------------
def build_gauss_kernel_np(size=5, sigma=1.0):
    if size % 2 != 1:
        raise ValueError("kernel size must be uneven")
    grid = np.float32(np.mgrid[0:size, 0:size].T)
    gaussian = lambda x: np.exp((x - size // 2) ** 2 / (-2 * sigma ** 2)) ** 2
    kernel = np.sum(gaussian(grid), axis=2)
    kernel /= np.sum(kernel)
    return np.float32(kernel)  # (size, size); identical for every channel


# ---------------------------------------------------------------------------
# Generation-aware VMEM budgeting & channel-block selection
# ---------------------------------------------------------------------------
def _vmem_limit_bytes():
    cap = None
    try:
        info = pltpu.get_tpu_info()
        cap = getattr(info, "vmem_capacity_bytes", None)
    except Exception:
        cap = None
    if not cap:
        cap = 64 * 1024 * 1024          # v7x physical VMEM -> safe everywhere
    # leave headroom for Mosaic internal scratch; cap at 100 MiB on v5e/v6e
    return int(min(cap * 3 // 4, 100 * 1024 * 1024))


def _pick_bc_block(BC, H, W, vmem_budget):
    """Largest divisor of BC whose real per-grid-step working set fits the
    budget, capped so the 'parallel' axis has >= 2 steps (v7x has 2 TCs)."""
    # Per-channel level-0 working set (f32): x,t inputs double-buffered (4x),
    # d, padded p, bcol, brow, f, pooling temporaries, plus ~1/3 extra for the
    # unrolled smaller levels  ->  ~14 image-sized arrays per channel.
    per_ch = 14 * H * W * 4
    limit = max(1, int(vmem_budget) // max(per_ch, 1))
    cap = BC if BC < 2 else max(1, BC // 2)          # >= 2 blocks for megacore
    target = max(1, min(BC, limit, cap))
    for d in range(target, 0, -1):
        if BC % d == 0:
            return d
    return 1


# ---------------------------------------------------------------------------
# Fused pyramid kernel (whole LapLoss for one channel block per grid step)
# ---------------------------------------------------------------------------
def _make_pyramid_kernel(bc, H, W, max_levels, ksize, kern_np, bc_total):
    pad = ksize // 2

    # additive separability of build_gauss_kernel: K[i,j] = g[i] + g[j]
    a0 = float(kern_np[0, 0]) / 2.0
    gvec = kern_np[:, 0].astype(np.float64) - a0
    separable = bool(
        np.allclose(kern_np, gvec[:, None] + gvec[None, :], rtol=1e-5, atol=1e-6))
    gvals = [float(v) for v in gvec]
    ktaps = [[float(kern_np[i, j]) for j in range(ksize)] for i in range(ksize)]

    def replicate_pad(img, h, w):
        # edge padding built entirely in VMEM (no HBM traffic for the halo)
        rows = [img[:, 0:1, :]] * pad + [img] + [img[:, h - 1:h, :]] * pad
        ph = jnp.concatenate(rows, axis=1)                       # (bc, h+2p, w)
        cols = [ph[:, :, 0:1]] * pad + [ph] + [ph[:, :, w - 1:w]] * pad
        return jnp.concatenate(cols, axis=2)                     # (bc, h+2p, w+2p)

    def gauss(img, h, w):
        p = replicate_pad(img, h, w)
        if separable:
            # horizontal 5-wide box sum (padded rows kept) + its vertical taps
            bcol = p[:, :, 0:w]
            for dj in range(1, ksize):
                bcol = bcol + p[:, :, dj:dj + w]                 # (bc, h+2p, w)
            out = gvals[0] * bcol[:, 0:h, :]
            for di in range(1, ksize):
                out = out + gvals[di] * bcol[:, di:di + h, :]
            # bcol dead here -> lower peak liveness before building brow
            brow = p[:, 0:h, :]
            for di in range(1, ksize):
                brow = brow + p[:, di:di + h, :]                 # (bc, h, w+2p)
            for dj in range(ksize):
                out = out + gvals[dj] * brow[:, :, dj:dj + w]
            return out
        # generic fallback for non-separable kernels: hoist the column shifts
        cs = [p[:, :, dj:dj + w] for dj in range(ksize)]
        acc = None
        for di in range(ksize):
            for dj in range(ksize):
                term = ktaps[di][dj] * cs[dj][:, di:di + h, :]
                acc = term if acc is None else acc + term
        return acc

    def pool(f, h, w):
        ho, wo = h // 2, w // 2
        # lane-direction pool matrix (w, wo), built in-kernel from 2-D iotas
        rw = lax.broadcasted_iota(jnp.int32, (w, wo), 0)
        cw = lax.broadcasted_iota(jnp.int32, (w, wo), 1)
        awt = jnp.where((rw == 2 * cw) | (rw == 2 * cw + 1),
                        0.5, 0.0).astype(jnp.float32)
        if h % 8 == 0:
            # ONE lane-dense 2D MXU dot: (bc*h, w) @ (w, wo)
            g = jnp.dot(f.reshape(bc * h, w), awt,
                        preferred_element_type=jnp.float32)
            g = g.reshape(bc, h, wo)
        else:
            g = jnp.einsum('bhw,bwv->bhv', f,
                           jnp.broadcast_to(awt[None], (bc, w, wo)),
                           preferred_element_type=jnp.float32)
        # row-direction pool (small batched matmul; see TODO at top of file)
        rh = lax.broadcasted_iota(jnp.int32, (ho, h), 0)
        ch = lax.broadcasted_iota(jnp.int32, (ho, h), 1)
        ah = jnp.where((ch == 2 * rh) | (ch == 2 * rh + 1),
                       0.5, 0.0).astype(jnp.float32)
        return jnp.einsum('boh,bhv->bov',
                          jnp.broadcast_to(ah[None], (bc, ho, h)), g,
                          preferred_element_type=jnp.float32)

    inv_counts = [1.0 / float(bc_total * (H >> l) * (W >> l))
                  for l in range(max_levels + 1)]

    def kernel(x_ref, t_ref, loss_ref):
        # everything downstream is linear, so only d = x - t is needed
        d = x_ref[...].astype(jnp.float32) - t_ref[...].astype(jnp.float32)
        total = jnp.float32(0.0)
        h, w = H, W
        for lvl in range(max_levels):
            f = gauss(d, h, w)
            total = total + jnp.sum(jnp.abs(d - f)) * np.float32(inv_counts[lvl])
            d = pool(f, h, w)          # stays in VMEM, feeds the next level
            h, w = h // 2, w // 2
        total = total + jnp.sum(jnp.abs(d)) * np.float32(inv_counts[max_levels])
        loss_ref[...] = total.reshape(1, 1, 1)

    return kernel


# ---------------------------------------------------------------------------
# LapLoss forward (wrapper = one pallas_call + a sum over channel-block partials)
# ---------------------------------------------------------------------------
def lap_loss(x, t, max_levels=5, k_size=5, sigma=2.0):
    if x.ndim == 5:
        B, N, C, H, W = x.shape
        x = x.reshape(B * N, C, H, W)
        t = t.reshape(B * N, C, H, W)
    B, C, H, W = x.shape
    if (H % (1 << max_levels)) or (W % (1 << max_levels)):
        # TODO(synk): support avg_pool2d floor semantics for odd level sizes.
        raise ValueError("H and W must be divisible by 2**max_levels")
    kern = build_gauss_kernel_np(k_size, sigma)

    BC = B * C
    cx = x.reshape(BC, H, W)   # keep incoming dtype; upcast happens in VMEM
    ct = t.reshape(BC, H, W)

    vmem_limit = _vmem_limit_bytes()
    bc_blk = _pick_bc_block(BC, H, W, vmem_limit)
    nblk = BC // bc_blk

    kernel = _make_pyramid_kernel(bc_blk, H, W, max_levels, k_size, kern, BC)
    parts = pl.pallas_call(
        kernel,
        out_shape=jax.ShapeDtypeStruct((nblk, 1, 1), jnp.float32),
        grid=(nblk,),
        in_specs=[
            pl.BlockSpec((bc_blk, H, W), lambda b: (b, 0, 0)),
            pl.BlockSpec((bc_blk, H, W), lambda b: (b, 0, 0)),
        ],
        out_specs=pl.BlockSpec((1, 1, 1), lambda b: (b, 0, 0)),
        compiler_params=pltpu.CompilerParams(
            dimension_semantics=("parallel",),
            vmem_limit_bytes=vmem_limit,
        ),
    )(cx, ct)
    return jnp.sum(parts)


# ---------------------------------------------------------------------------
# Pure-JAX reference (same math as the PyTorch module) for a correctness check
# ---------------------------------------------------------------------------
def lap_loss_ref(x, t, max_levels=5, k_size=5, sigma=2.0):
    B, C, H, W = x.shape
    kern = build_gauss_kernel_np(k_size, sigma)
    pad = k_size // 2

    def conv(img):
        p = jnp.pad(img, ((0, 0), (pad, pad), (pad, pad)), mode="edge")
        out = jnp.zeros_like(img)
        for di in range(k_size):
            for dj in range(k_size):
                out = out + float(kern[di, dj]) * p[:, di:di + img.shape[1],
                                                    dj:dj + img.shape[2]]
        return out

    cx = x.reshape(B * C, H, W).astype(jnp.float32)
    ct = t.reshape(B * C, H, W).astype(jnp.float32)
    total = jnp.float32(0.0)
    for _ in range(max_levels):
        fx, ft = conv(cx), conv(ct)
        total = total + jnp.mean(jnp.abs((cx - fx) - (ct - ft)))
        BC, Hc, Wc = cx.shape
        cx = fx.reshape(BC, Hc // 2, 2, Wc // 2, 2).mean(axis=(2, 4))
        ct = ft.reshape(BC, Hc // 2, 2, Wc // 2, 2).mean(axis=(2, 4))
    total = total + jnp.mean(jnp.abs(cx - ct))
    return total


if __name__ == "__main__":
    key = jax.random.PRNGKey(0)
    k1, k2 = jax.random.split(key)
    # 64x64 keeps every level valid for max_levels=5 (64->32->16->8->4->2),
    # matching the replicate-pad / pooling constraints of the PyTorch module.
    x = jax.random.uniform(k1, (2, 3, 64, 64), dtype=jnp.float32)
    t = jax.random.uniform(k2, (2, 3, 64, 64), dtype=jnp.float32)

    lap_fn = jax.jit(functools.partial(lap_loss, max_levels=5, k_size=5, sigma=2.0))
    out = jax.block_until_ready(lap_fn(x, t))

    ref = jax.block_until_ready(lap_loss_ref(x, t, max_levels=5, k_size=5, sigma=2.0))
    np.testing.assert_allclose(np.asarray(out), np.asarray(ref), rtol=2e-4, atol=2e-5)

    print("KERNEL_OK")
</pallas_src>

<mosaic_0001>
module attributes {stable_mosaic.version = 11 : i64} {
  func.func @kernel(%arg0: i32, %arg1: memref<3x64x64xf32, #tpu.memory_space<vmem>>, %arg2: memref<3x64x64xf32, #tpu.memory_space<vmem>>, %arg3: memref<1x1x1xf32, #tpu.memory_space<vmem>>) attributes {dimension_semantics = [#tpu.dimension_semantics<parallel>], iteration_bounds = array<i64: 2>, scalar_prefetch = 0 : i64, scratch_operands = 0 : i64, tpu.core_type = #tpu.core_type<tc>, window_params = [{transform_indices = @transform_0, window_bounds = array<i64: 3, 64, 64>}, {transform_indices = @transform_1, window_bounds = array<i64: 3, 64, 64>}, {transform_indices = @transform_2, window_bounds = array<i64: 1, 1, 1>}]} {
    %c0 = arith.constant 0 : index
    %c0_0 = arith.constant 0 : index
    %c0_1 = arith.constant 0 : index
    %0 = vector.load %arg1[%c0, %c0_0, %c0_1] : memref<3x64x64xf32, #tpu.memory_space<vmem>>, vector<3x64x64xf32>
    %c0_2 = arith.constant 0 : index
    %c0_3 = arith.constant 0 : index
    %c0_4 = arith.constant 0 : index
    %1 = vector.load %arg2[%c0_2, %c0_3, %c0_4] : memref<3x64x64xf32, #tpu.memory_space<vmem>>, vector<3x64x64xf32>
    %2 = arith.subf %0, %1 : vector<3x64x64xf32>
    %3 = vector.extract_strided_slice %2 {offsets = [0, 0, 0], sizes = [3, 1, 64], strides = [1, 1, 1]} : vector<3x64x64xf32> to vector<3x1x64xf32>
    %4 = vector.extract_strided_slice %2 {offsets = [0, 63, 0], sizes = [3, 1, 64], strides = [1, 1, 1]} : vector<3x64x64xf32> to vector<3x1x64xf32>
    %5 = tpu.concatenate %3, %3, %2, %4, %4 in 1 : vector<3x1x64xf32>, vector<3x1x64xf32>, vector<3x64x64xf32>, vector<3x1x64xf32>, vector<3x1x64xf32> -> vector<3x68x64xf32>
    %6 = vector.extract_strided_slice %5 {offsets = [0, 0, 0], sizes = [3, 68, 1], strides = [1, 1, 1]} : vector<3x68x64xf32> to vector<3x68x1xf32>
    %7 = vector.extract_strided_slice %5 {offsets = [0, 0, 63], sizes = [3, 68, 1], strides = [1, 1, 1]} : vector<3x68x64xf32> to vector<3x68x1xf32>
    %8 = tpu.concatenate %6, %6, %5, %7, %7 in 2 : vector<3x68x1xf32>, vector<3x68x1xf32>, vector<3x68x64xf32>, vector<3x68x1xf32>, vector<3x68x1xf32> -> vector<3x68x68xf32>
    %9 = vector.extract_strided_slice %8 {offsets = [0, 0, 0], sizes = [3, 68, 64], strides = [1, 1, 1]} : vector<3x68x68xf32> to vector<3x68x64xf32>
    %10 = vector.extract_strided_slice %8 {offsets = [0, 0, 1], sizes = [3, 68, 64], strides = [1, 1, 1]} : vector<3x68x68xf32> to vector<3x68x64xf32>
    %11 = arith.addf %9, %10 : vector<3x68x64xf32>
    %12 = vector.extract_strided_slice %8 {offsets = [0, 0, 2], sizes = [3, 68, 64], strides = [1, 1, 1]} : vector<3x68x68xf32> to vector<3x68x64xf32>
    %13 = arith.addf %11, %12 : vector<3x68x64xf32>
    %14 = vector.extract_strided_slice %8 {offsets = [0, 0, 3], sizes = [3, 68, 64], strides = [1, 1, 1]} : vector<3x68x68xf32> to vector<3x68x64xf32>
    %15 = arith.addf %13, %14 : vector<3x68x64xf32>
    %16 = vector.extract_strided_slice %8 {offsets = [0, 0, 4], sizes = [3, 68, 64], strides = [1, 1, 1]} : vector<3x68x68xf32> to vector<3x68x64xf32>
    %17 = arith.addf %15, %16 : vector<3x68x64xf32>
    %18 = vector.extract_strided_slice %17 {offsets = [0, 0, 0], sizes = [3, 64, 64], strides = [1, 1, 1]} : vector<3x68x64xf32> to vector<3x64x64xf32>
    %cst = arith.constant 0.011170336 : f32
    %19 = vector.broadcast %cst : f32 to vector<3x64x64xf32>
    %20 = arith.mulf %19, %18 : vector<3x64x64xf32>
    %21 = vector.extract_strided_slice %17 {offsets = [0, 1, 0], sizes = [3, 64, 64], strides = [1, 1, 1]} : vector<3x68x64xf32> to vector<3x64x64xf32>
    %cst_5 = arith.constant 0.0236476026 : f32
    %22 = vector.broadcast %cst_5 : f32 to vector<3x64x64xf32>
    %23 = arith.mulf %22, %21 : vector<3x64x64xf32>
    %24 = arith.addf %20, %23 : vector<3x64x64xf32>
    %25 = vector.extract_strided_slice %17 {offsets = [0, 2, 0], sizes = [3, 64, 64], strides = [1, 1, 1]} : vector<3x68x64xf32> to vector<3x64x64xf32>
    %cst_6 = arith.constant 0.0303641222 : f32
    %26 = vector.broadcast %cst_6 : f32 to vector<3x64x64xf32>
    %27 = arith.mulf %26, %25 : vector<3x64x64xf32>
    %28 = arith.addf %24, %27 : vector<3x64x64xf32>
    %29 = vector.extract_strided_slice %17 {offsets = [0, 3, 0], sizes = [3, 64, 64], strides = [1, 1, 1]} : vector<3x68x64xf32> to vector<3x64x64xf32>
    %cst_7 = arith.constant 0.0236476026 : f32
    %30 = vector.broadcast %cst_7 : f32 to vector<3x64x64xf32>
    %31 = arith.mulf %30, %29 : vector<3x64x64xf32>
    %32 = arith.addf %28, %31 : vector<3x64x64xf32>
    %33 = vector.extract_strided_slice %17 {offsets = [0, 4, 0], sizes = [3, 64, 64], strides = [1, 1, 1]} : vector<3x68x64xf32> to vector<3x64x64xf32>
    %cst_8 = arith.constant 0.011170336 : f32
    %34 = vector.broadcast %cst_8 : f32 to vector<3x64x64xf32>
    %35 = arith.mulf %34, %33 : vector<3x64x64xf32>
    %36 = arith.addf %32, %35 : vector<3x64x64xf32>
    %37 = vector.extract_strided_slice %8 {offsets = [0, 0, 0], sizes = [3, 64, 68], strides = [1, 1, 1]} : vector<3x68x68xf32> to vector<3x64x68xf32>
    %38 = vector.extract_strided_slice %8 {offsets = [0, 1, 0], sizes = [3, 64, 68], strides = [1, 1, 1]} : vector<3x68x68xf32> to vector<3x64x68xf32>
    %39 = arith.addf %37, %38 : vector<3x64x68xf32>
    %40 = vector.extract_strided_slice %8 {offsets = [0, 2, 0], sizes = [3, 64, 68], strides = [1, 1, 1]} : vector<3x68x68xf32> to vector<3x64x68xf32>
    %41 = arith.addf %39, %40 : vector<3x64x68xf32>
    %42 = vector.extract_strided_slice %8 {offsets = [0, 3, 0], sizes = [3, 64, 68], strides = [1, 1, 1]} : vector<3x68x68xf32> to vector<3x64x68xf32>
    %43 = arith.addf %41, %42 : vector<3x64x68xf32>
    %44 = vector.extract_strided_slice %8 {offsets = [0, 4, 0], sizes = [3, 64, 68], strides = [1, 1, 1]} : vector<3x68x68xf32> to vector<3x64x68xf32>
    %45 = arith.addf %43, %44 : vector<3x64x68xf32>
    %46 = vector.extract_strided_slice %45 {offsets = [0, 0, 0], sizes = [3, 64, 64], strides = [1, 1, 1]} : vector<3x64x68xf32> to vector<3x64x64xf32>
    %cst_9 = arith.constant 0.011170336 : f32
    %47 = vector.broadcast %cst_9 : f32 to vector<3x64x64xf32>
    %48 = arith.mulf %47, %46 : vector<3x64x64xf32>
    %49 = arith.addf %36, %48 : vector<3x64x64xf32>
    %50 = vector.extract_strided_slice %45 {offsets = [0, 0, 1], sizes = [3, 64, 64], strides = [1, 1, 1]} : vector<3x64x68xf32> to vector<3x64x64xf32>
    %cst_10 = arith.constant 0.0236476026 : f32
    %51 = vector.broadcast %cst_10 : f32 to vector<3x64x64xf32>
    %52 = arith.mulf %51, %50 : vector<3x64x64xf32>
    %53 = arith.addf %49, %52 : vector<3x64x64xf32>
    %54 = vector.extract_strided_slice %45 {offsets = [0, 0, 2], sizes = [3, 64, 64], strides = [1, 1, 1]} : vector<3x64x68xf32> to vector<3x64x64xf32>
    %cst_11 = arith.constant 0.0303641222 : f32
    %55 = vector.broadcast %cst_11 : f32 to vector<3x64x64xf32>
    %56 = arith.mulf %55, %54 : vector<3x64x64xf32>
    %57 = arith.addf %53, %56 : vector<3x64x64xf32>
    %58 = vector.extract_strided_slice %45 {offsets = [0, 0, 3], sizes = [3, 64, 64], strides = [1, 1, 1]} : vector<3x64x68xf32> to vector<3x64x64xf32>
    %cst_12 = arith.constant 0.0236476026 : f32
    %59 = vector.broadcast %cst_12 : f32 to vector<3x64x64xf32>
    %60 = arith.mulf %59, %58 : vector<3x64x64xf32>
    %61 = arith.addf %57, %60 : vector<3x64x64xf32>
    %62 = vector.extract_strided_slice %45 {offsets = [0, 0, 4], sizes = [3, 64, 64], strides = [1, 1, 1]} : vector<3x64x68xf32> to vector<3x64x64xf32>
    %cst_13 = arith.constant 0.011170336 : f32
    %63 = vector.broadcast %cst_13 : f32 to vector<3x64x64xf32>
    %64 = arith.mulf %63, %62 : vector<3x64x64xf32>
    %65 = arith.addf %61, %64 : vector<3x64x64xf32>
    %66 = arith.subf %2, %65 : vector<3x64x64xf32>
    %67 = math.absf %66 : vector<3x64x64xf32>
    %68 = vector.shape_cast %67 : vector<3x64x64xf32> to vector<1x3x64x64xf32>
    %cst_14 = arith.constant dense<0.000000e+00> : vector<1xf32>
    %69 = vector.multi_reduction <add>, %68, %cst_14 [1, 2, 3] : vector<1x3x64x64xf32> to vector<1xf32>
    %70 = vector.shape_cast %69 : vector<1xf32> to vector<1x1x1x1xf32>
    %71 = vector.extract %70[0, 0, 0, 0] : f32 from vector<1x1x1x1xf32>
    %cst_15 = arith.constant 4.06901054E-5 : f32
    %72 = arith.mulf %71, %cst_15 : f32
    %cst_16 = arith.constant 0.000000e+00 : f32
    %73 = arith.addf %cst_16, %72 : f32
    %74 = tpu.iota {dimensions = array<i32: 0>} : vector<64x32xi32>
    %75 = tpu.iota {dimensions = array<i32: 1>} : vector<64x32xi32>
    %c2_i32 = arith.constant 2 : i32
    %76 = vector.broadcast %c2_i32 : i32 to vector<64x32xi32>
    %77 = arith.muli %76, %75 : vector<64x32xi32>
    %78 = arith.cmpi eq, %74, %77 : vector<64x32xi32>
    %c2_i32_17 = arith.constant 2 : i32
    %79 = vector.broadcast %c2_i32_17 : i32 to vector<64x32xi32>
    %80 = arith.muli %79, %75 : vector<64x32xi32>
    %c1_i32 = arith.constant 1 : i32
    %81 = vector.broadcast %c1_i32 : i32 to vector<64x32xi32>
    %82 = arith.addi %80, %81 : vector<64x32xi32>
    %83 = arith.cmpi eq, %74, %82 : vector<64x32xi32>
    %84 = arith.ori %78, %83 : vector<64x32xi1>
    %cst_18 = arith.constant 5.000000e-01 : f32
    %cst_19 = arith.constant 0.000000e+00 : f32
    %85 = vector.broadcast %cst_18 : f32 to vector<64x32xf32>
    %86 = vector.broadcast %cst_19 : f32 to vector<64x32xf32>
    %87 = arith.select %84, %85, %86 : vector<64x32xi1>, vector<64x32xf32>
    %88 = vector.shape_cast %65 : vector<3x64x64xf32> to vector<192x64xf32>
    %cst_20 = arith.constant dense<0.000000e+00> : vector<192x32xf32>
    %89 = tpu.matmul %88, %87, %cst_20 {dimension_numbers = #tpu.dot_dimension_numbers<[1], [0], [0], [1], [0, 0, 1, 1], [], []>} : vector<192x64xf32>, vector<64x32xf32>, vector<192x32xf32> -> vector<192x32xf32>
    %90 = vector.shape_cast %89 : vector<192x32xf32> to vector<3x64x32xf32>
    %91 = tpu.iota {dimensions = array<i32: 0>} : vector<32x64xi32>
    %92 = tpu.iota {dimensions = array<i32: 1>} : vector<32x64xi32>
    %c2_i32_21 = arith.constant 2 : i32
    %93 = vector.broadcast %c2_i32_21 : i32 to vector<32x64xi32>
    %94 = arith.muli %93, %91 : vector<32x64xi32>
    %95 = arith.cmpi eq, %92, %94 : vector<32x64xi32>
    %c2_i32_22 = arith.constant 2 : i32
    %96 = vector.broadcast %c2_i32_22 : i32 to vector<32x64xi32>
    %97 = arith.muli %96, %91 : vector<32x64xi32>
    %c1_i32_23 = arith.constant 1 : i32
    %98 = vector.broadcast %c1_i32_23 : i32 to vector<32x64xi32>
    %99 = arith.addi %97, %98 : vector<32x64xi32>
    %100 = arith.cmpi eq, %92, %99 : vector<32x64xi32>
    %101 = arith.ori %95, %100 : vector<32x64xi1>
    %cst_24 = arith.constant 5.000000e-01 : f32
    %cst_25 = arith.constant 0.000000e+00 : f32
    %102 = vector.broadcast %cst_24 : f32 to vector<32x64xf32>
    %103 = vector.broadcast %cst_25 : f32 to vector<32x64xf32>
    %104 = arith.select %101, %102, %103 : vector<32x64xi1>, vector<32x64xf32>
    %105 = vector.shape_cast %104 : vector<32x64xf32> to vector<1x32x64xf32>
    %106 = vector.shape_cast %105 : vector<1x32x64xf32> to vector<1x32x64xf32>
    %107 = vector.broadcast %106 : vector<1x32x64xf32> to vector<3x32x64xf32>
    "tpu.trace_start"() <{level = 10 : i32, message = "boh,bhv->bov"}> : () -> ()
    %cst_26 = arith.constant dense<0.000000e+00> : vector<3x32x32xf32>
    %108 = tpu.matmul %107, %90, %cst_26 {dimension_numbers = #tpu.dot_dimension_numbers<[2], [1], [1], [2], [0, 0, 0, 1, 1, 2], [0], [0]>} : vector<3x32x64xf32>, vector<3x64x32xf32>, vector<3x32x32xf32> -> vector<3x32x32xf32>
    "tpu.trace_stop"() : () -> ()
    %109 = vector.extract_strided_slice %108 {offsets = [0, 0, 0], sizes = [3, 1, 32], strides = [1, 1, 1]} : vector<3x32x32xf32> to vector<3x1x32xf32>
    %110 = vector.extract_strided_slice %108 {offsets = [0, 31, 0], sizes = [3, 1, 32], strides = [1, 1, 1]} : vector<3x32x32xf32> to vector<3x1x32xf32>
    %111 = tpu.concatenate %109, %109, %108, %110, %110 in 1 : vector<3x1x32xf32>, vector<3x1x32xf32>, vector<3x32x32xf32>, vector<3x1x32xf32>, vector<3x1x32xf32> -> vector<3x36x32xf32>
    %112 = vector.extract_strided_slice %111 {offsets = [0, 0, 0], sizes = [3, 36, 1], strides = [1, 1, 1]} : vector<3x36x32xf32> to vector<3x36x1xf32>
    %113 = vector.extract_strided_slice %111 {offsets = [0, 0, 31], sizes = [3, 36, 1], strides = [1, 1, 1]} : vector<3x36x32xf32> to vector<3x36x1xf32>
    %114 = tpu.concatenate %112, %112, %111, %113, %113 in 2 : vector<3x36x1xf32>, vector<3x36x1xf32>, vector<3x36x32xf32>, vector<3x36x1xf32>, vector<3x36x1xf32> -> vector<3x36x36xf32>
    %115 = vector.extract_strided_slice %114 {offsets = [0, 0, 0], sizes = [3, 36, 32], strides = [1, 1, 1]} : vector<3x36x36xf32> to vector<3x36x32xf32>
    %116 = vector.extract_strided_slice %114 {offsets = [0, 0, 1], sizes = [3, 36, 32], strides = [1, 1, 1]} : vector<3x36x36xf32> to vector<3x36x32xf32>
    %117 = arith.addf %115, %116 : vector<3x36x32xf32>
    %118 = vector.extract_strided_slice %114 {offsets = [0, 0, 2], sizes = [3, 36, 32], strides = [1, 1, 1]} : vector<3x36x36xf32> to vector<3x36x32xf32>
    %119 = arith.addf %117, %118 : vector<3x36x32xf32>
    %120 = vector.extract_strided_slice %114 {offsets = [0, 0, 3], sizes = [3, 36, 32], strides = [1, 1, 1]} : vector<3x36x36xf32> to vector<3x36x32xf32>
    %121 = arith.addf %119, %120 : vector<3x36x32xf32>
    %122 = vector.extract_strided_slice %114 {offsets = [0, 0, 4], sizes = [3, 36, 32], strides = [1, 1, 1]} : vector<3x36x36xf32> to vector<3x36x32xf32>
    %123 = arith.addf %121, %122 : vector<3x36x32xf32>
    %124 = vector.extract_strided_slice %123 {offsets = [0, 0, 0], sizes = [3, 32, 32], strides = [1, 1, 1]} : vector<3x36x32xf32> to vector<3x32x32xf32>
    %cst_27 = arith.constant 0.011170336 : f32
    %125 = vector.broadcast %cst_27 : f32 to vector<3x32x32xf32>
    %126 = arith.mulf %125, %124 : vector<3x32x32xf32>
    %127 = vector.extract_strided_slice %123 {offsets = [0, 1, 0], sizes = [3, 32, 32], strides = [1, 1, 1]} : vector<3x36x32xf32> to vector<3x32x32xf32>
    %cst_28 = arith.constant 0.0236476026 : f32
    %128 = vector.broadcast %cst_28 : f32 to vector<3x32x32xf32>
    %129 = arith.mulf %128, %127 : vector<3x32x32xf32>
    %130 = arith.addf %126, %129 : vector<3x32x32xf32>
    %131 = vector.extract_strided_slice %123 {offsets = [0, 2, 0], sizes = [3, 32, 32], strides = [1, 1, 1]} : vector<3x36x32xf32> to vector<3x32x32xf32>
    %cst_29 = arith.constant 0.0303641222 : f32
    %132 = vector.broadcast %cst_29 : f32 to vector<3x32x32xf32>
    %133 = arith.mulf %132, %131 : vector<3x32x32xf32>
    %134 = arith.addf %130, %133 : vector<3x32x32xf32>
    %135 = vector.extract_strided_slice %123 {offsets = [0, 3, 0], sizes = [3, 32, 32], strides = [1, 1, 1]} : vector<3x36x32xf32> to vector<3x32x32xf32>
    %cst_30 = arith.constant 0.0236476026 : f32
    %136 = vector.broadcast %cst_30 : f32 to vector<3x32x32xf32>
    %137 = arith.mulf %136, %135 : vector<3x32x32xf32>
    %138 = arith.addf %134, %137 : vector<3x32x32xf32>
    %139 = vector.extract_strided_slice %123 {offsets = [0, 4, 0], sizes = [3, 32, 32], strides = [1, 1, 1]} : vector<3x36x32xf32> to vector<3x32x32xf32>
    %cst_31 = arith.constant 0.011170336 : f32
    %140 = vector.broadcast %cst_31 : f32 to vector<3x32x32xf32>
    %141 = arith.mulf %140, %139 : vector<3x32x32xf32>
    %142 = arith.addf %138, %141 : vector<3x32x32xf32>
    %143 = vector.extract_strided_slice %114 {offsets = [0, 0, 0], sizes = [3, 32, 36], strides = [1, 1, 1]} : vector<3x36x36xf32> to vector<3x32x36xf32>
    %144 = vector.extract_strided_slice %114 {offsets = [0, 1, 0], sizes = [3, 32, 36], strides = [1, 1, 1]} : vector<3x36x36xf32> to vector<3x32x36xf32>
    %145 = arith.addf %143, %144 : vector<3x32x36xf32>
    %146 = vector.extract_strided_slice %114 {offsets = [0, 2, 0], sizes = [3, 32, 36], strides = [1, 1, 1]} : vector<3x36x36xf32> to vector<3x32x36xf32>
    %147 = arith.addf %145, %146 : vector<3x32x36xf32>
    %148 = vector.extract_strided_slice %114 {offsets = [0, 3, 0], sizes = [3, 32, 36], strides = [1, 1, 1]} : vector<3x36x36xf32> to vector<3x32x36xf32>
    %149 = arith.addf %147, %148 : vector<3x32x36xf32>
    %150 = vector.extract_strided_slice %114 {offsets = [0, 4, 0], sizes = [3, 32, 36], strides = [1, 1, 1]} : vector<3x36x36xf32> to vector<3x32x36xf32>
    %151 = arith.addf %149, %150 : vector<3x32x36xf32>
    %152 = vector.extract_strided_slice %151 {offsets = [0, 0, 0], sizes = [3, 32, 32], strides = [1, 1, 1]} : vector<3x32x36xf32> to vector<3x32x32xf32>
    %cst_32 = arith.constant 0.011170336 : f32
    %153 = vector.broadcast %cst_32 : f32 to vector<3x32x32xf32>
    %154 = arith.mulf %153, %152 : vector<3x32x32xf32>
    %155 = arith.addf %142, %154 : vector<3x32x32xf32>
    %156 = vector.extract_strided_slice %151 {offsets = [0, 0, 1], sizes = [3, 32, 32], strides = [1, 1, 1]} : vector<3x32x36xf32> to vector<3x32x32xf32>
    %cst_33 = arith.constant 0.0236476026 : f32
    %157 = vector.broadcast %cst_33 : f32 to vector<3x32x32xf32>
    %158 = arith.mulf %157, %156 : vector<3x32x32xf32>
    %159 = arith.addf %155, %158 : vector<3x32x32xf32>
    %160 = vector.extract_strided_slice %151 {offsets = [0, 0, 2], sizes = [3, 32, 32], strides = [1, 1, 1]} : vector<3x32x36xf32> to vector<3x32x32xf32>
    %cst_34 = arith.constant 0.0303641222 : f32
    %161 = vector.broadcast %cst_34 : f32 to vector<3x32x32xf32>
    %162 = arith.mulf %161, %160 : vector<3x32x32xf32>
    %163 = arith.addf %159, %162 : vector<3x32x32xf32>
    %164 = vector.extract_strided_slice %151 {offsets = [0, 0, 3], sizes = [3, 32, 32], strides = [1, 1, 1]} : vector<3x32x36xf32> to vector<3x32x32xf32>
    %cst_35 = arith.constant 0.0236476026 : f32
    %165 = vector.broadcast %cst_35 : f32 to vector<3x32x32xf32>
    %166 = arith.mulf %165, %164 : vector<3x32x32xf32>
    %167 = arith.addf %163, %166 : vector<3x32x32xf32>
    %168 = vector.extract_strided_slice %151 {offsets = [0, 0, 4], sizes = [3, 32, 32], strides = [1, 1, 1]} : vector<3x32x36xf32> to vector<3x32x32xf32>
    %cst_36 = arith.constant 0.011170336 : f32
    %169 = vector.broadcast %cst_36 : f32 to vector<3x32x32xf32>
    %170 = arith.mulf %169, %168 : vector<3x32x32xf32>
    %171 = arith.addf %167, %170 : vector<3x32x32xf32>
    %172 = arith.subf %108, %171 : vector<3x32x32xf32>
    %173 = math.absf %172 : vector<3x32x32xf32>
    %174 = vector.shape_cast %173 : vector<3x32x32xf32> to vector<1x3x32x32xf32>
    %cst_37 = arith.constant dense<0.000000e+00> : vector<1xf32>
    %175 = vector.multi_reduction <add>, %174, %cst_37 [1, 2, 3] : vector<1x3x32x32xf32> to vector<1xf32>
    %176 = vector.shape_cast %175 : vector<1xf32> to vector<1x1x1x1xf32>
    %177 = vector.extract %176[0, 0, 0, 0] : f32 from vector<1x1x1x1xf32>
    %cst_38 = arith.constant 1.62760422E-4 : f32
    %178 = arith.mulf %177, %cst_38 : f32
    %179 = arith.addf %73, %178 : f32
    %180 = tpu.iota {dimensions = array<i32: 0>} : vector<32x16xi32>
    %181 = tpu.iota {dimensions = array<i32: 1>} : vector<32x16xi32>
    %c2_i32_39 = arith.constant 2 : i32
    %182 = vector.broadcast %c2_i32_39 : i32 to vector<32x16xi32>
    %183 = arith.muli %182, %181 : vector<32x16xi32>
    %184 = arith.cmpi eq, %180, %183 : vector<32x16xi32>
    %c2_i32_40 = arith.constant 2 : i32
    %185 = vector.broadcast %c2_i32_40 : i32 to vector<32x16xi32>
    %186 = arith.muli %185, %181 : vector<32x16xi32>
    %c1_i32_41 = arith.constant 1 : i32
    %187 = vector.broadcast %c1_i32_41 : i32 to vector<32x16xi32>
    %188 = arith.addi %186, %187 : vector<32x16xi32>
    %189 = arith.cmpi eq, %180, %188 : vector<32x16xi32>
    %190 = arith.ori %184, %189 : vector<32x16xi1>
    %cst_42 = arith.constant 5.000000e-01 : f32
    %cst_43 = arith.constant 0.000000e+00 : f32
    %191 = vector.broadcast %cst_42 : f32 to vector<32x16xf32>
    %192 = vector.broadcast %cst_43 : f32 to vector<32x16xf32>
    %193 = arith.select %190, %191, %192 : vector<32x16xi1>, vector<32x16xf32>
    %194 = vector.shape_cast %171 : vector<3x32x32xf32> to vector<96x32xf32>
    %cst_44 = arith.constant dense<0.000000e+00> : vector<96x16xf32>
    %195 = tpu.matmul %194, %193, %cst_44 {dimension_numbers = #tpu.dot_dimension_numbers<[1], [0], [0], [1], [0, 0, 1, 1], [], []>} : vector<96x32xf32>, vector<32x16xf32>, vector<96x16xf32> -> vector<96x16xf32>
    %196 = vector.shape_cast %195 : vector<96x16xf32> to vector<3x32x16xf32>
    %197 = tpu.iota {dimensions = array<i32: 0>} : vector<16x32xi32>
    %198 = tpu.iota {dimensions = array<i32: 1>} : vector<16x32xi32>
    %c2_i32_45 = arith.constant 2 : i32
    %199 = vector.broadcast %c2_i32_45 : i32 to vector<16x32xi32>
    %200 = arith.muli %199, %197 : vector<16x32xi32>
    %201 = arith.cmpi eq, %198, %200 : vector<16x32xi32>
    %c2_i32_46 = arith.constant 2 : i32
    %202 = vector.broadcast %c2_i32_46 : i32 to vector<16x32xi32>
    %203 = arith.muli %202, %197 : vector<16x32xi32>
    %c1_i32_47 = arith.constant 1 : i32
    %204 = vector.broadcast %c1_i32_47 : i32 to vector<16x32xi32>
    %205 = arith.addi %203, %204 : vector<16x32xi32>
    %206 = arith.cmpi eq, %198, %205 : vector<16x32xi32>
    %207 = arith.ori %201, %206 : vector<16x32xi1>
    %cst_48 = arith.constant 5.000000e-01 : f32
    %cst_49 = arith.constant 0.000000e+00 : f32
    %208 = vector.broadcast %cst_48 : f32 to vector<16x32xf32>
    %209 = vector.broadcast %cst_49 : f32 to vector<16x32xf32>
    %210 = arith.select %207, %208, %209 : vector<16x32xi1>, vector<16x32xf32>
    %211 = vector.shape_cast %210 : vector<16x32xf32> to vector<1x16x32xf32>
    %212 = vector.shape_cast %211 : vector<1x16x32xf32> to vector<1x16x32xf32>
    %213 = vector.broadcast %212 : vector<1x16x32xf32> to vector<3x16x32xf32>
    "tpu.trace_start"() <{level = 10 : i32, message = "boh,bhv->bov"}> : () -> ()
    %cst_50 = arith.constant dense<0.000000e+00> : vector<3x16x16xf32>
    %214 = tpu.matmul %213, %196, %cst_50 {dimension_numbers = #tpu.dot_dimension_numbers<[2], [1], [1], [2], [0, 0, 0, 1, 1, 2], [0], [0]>} : vector<3x16x32xf32>, vector<3x32x16xf32>, vector<3x16x16xf32> -> vector<3x16x16xf32>
    "tpu.trace_stop"() : () -> ()
    %215 = vector.extract_strided_slice %214 {offsets = [0, 0, 0], sizes = [3, 1, 16], strides = [1, 1, 1]} : vector<3x16x16xf32> to vector<3x1x16xf32>
    %216 = vector.extract_strided_slice %214 {offsets = [0, 15, 0], sizes = [3, 1, 16], strides = [1, 1, 1]} : vector<3x16x16xf32> to vector<3x1x16xf32>
    %217 = tpu.concatenate %215, %215, %214, %216, %216 in 1 : vector<3x1x16xf32>, vector<3x1x16xf32>, vector<3x16x16xf32>, vector<3x1x16xf32>, vector<3x1x16xf32> -> vector<3x20x16xf32>
    %218 = vector.extract_strided_slice %217 {offsets = [0, 0, 0], sizes = [3, 20, 1], strides = [1, 1, 1]} : vector<3x20x16xf32> to vector<3x20x1xf32>
    %219 = vector.extract_strided_slice %217 {offsets = [0, 0, 15], sizes = [3, 20, 1], strides = [1, 1, 1]} : vector<3x20x16xf32> to vector<3x20x1xf32>
    %220 = tpu.concatenate %218, %218, %217, %219, %219 in 2 : vector<3x20x1xf32>, vector<3x20x1xf32>, vector<3x20x16xf32>, vector<3x20x1xf32>, vector<3x20x1xf32> -> vector<3x20x20xf32>
    %221 = vector.extract_strided_slice %220 {offsets = [0, 0, 0], sizes = [3, 20, 16], strides = [1, 1, 1]} : vector<3x20x20xf32> to vector<3x20x16xf32>
    %222 = vector.extract_strided_slice %220 {offsets = [0, 0, 1], sizes = [3, 20, 16], strides = [1, 1, 1]} : vector<3x20x20xf32> to vector<3x20x16xf32>
    %223 = arith.addf %221, %222 : vector<3x20x16xf32>
    %224 = vector.extract_strided_slice %220 {offsets = [0, 0, 2], sizes = [3, 20, 16], strides = [1, 1, 1]} : vector<3x20x20xf32> to vector<3x20x16xf32>
    %225 = arith.addf %223, %224 : vector<3x20x16xf32>
    %226 = vector.extract_strided_slice %220 {offsets = [0, 0, 3], sizes = [3, 20, 16], strides = [1, 1, 1]} : vector<3x20x20xf32> to vector<3x20x16xf32>
    %227 = arith.addf %225, %226 : vector<3x20x16xf32>
    %228 = vector.extract_strided_slice %220 {offsets = [0, 0, 4], sizes = [3, 20, 16], strides = [1, 1, 1]} : vector<3x20x20xf32> to vector<3x20x16xf32>
    %229 = arith.addf %227, %228 : vector<3x20x16xf32>
    %230 = vector.extract_strided_slice %229 {offsets = [0, 0, 0], sizes = [3, 16, 16], strides = [1, 1, 1]} : vector<3x20x16xf32> to vector<3x16x16xf32>
    %cst_51 = arith.constant 0.011170336 : f32
    %231 = vector.broadcast %cst_51 : f32 to vector<3x16x16xf32>
    %232 = arith.mulf %231, %230 : vector<3x16x16xf32>
    %233 = vector.extract_strided_slice %229 {offsets = [0, 1, 0], sizes = [3, 16, 16], strides = [1, 1, 1]} : vector<3x20x16xf32> to vector<3x16x16xf32>
    %cst_52 = arith.constant 0.0236476026 : f32
    %234 = vector.broadcast %cst_52 : f32 to vector<3x16x16xf32>
    %235 = arith.mulf %234, %233 : vector<3x16x16xf32>
    %236 = arith.addf %232, %235 : vector<3x16x16xf32>
    %237 = vector.extract_strided_slice %229 {offsets = [0, 2, 0], sizes = [3, 16, 16], strides = [1, 1, 1]} : vector<3x20x16xf32> to vector<3x16x16xf32>
    %cst_53 = arith.constant 0.0303641222 : f32
    %238 = vector.broadcast %cst_53 : f32 to vector<3x16x16xf32>
    %239 = arith.mulf %238, %237 : vector<3x16x16xf32>
    %240 = arith.addf %236, %239 : vector<3x16x16xf32>
    %241 = vector.extract_strided_slice %229 {offsets = [0, 3, 0], sizes = [3, 16, 16], strides = [1, 1, 1]} : vector<3x20x16xf32> to vector<3x16x16xf32>
    %cst_54 = arith.constant 0.0236476026 : f32
    %242 = vector.broadcast %cst_54 : f32 to vector<3x16x16xf32>
    %243 = arith.mulf %242, %241 : vector<3x16x16xf32>
    %244 = arith.addf %240, %243 : vector<3x16x16xf32>
    %245 = vector.extract_strided_slice %229 {offsets = [0, 4, 0], sizes = [3, 16, 16], strides = [1, 1, 1]} : vector<3x20x16xf32> to vector<3x16x16xf32>
    %cst_55 = arith.constant 0.011170336 : f32
    %246 = vector.broadcast %cst_55 : f32 to vector<3x16x16xf32>
    %247 = arith.mulf %246, %245 : vector<3x16x16xf32>
    %248 = arith.addf %244, %247 : vector<3x16x16xf32>
    %249 = vector.extract_strided_slice %220 {offsets = [0, 0, 0], sizes = [3, 16, 20], strides = [1, 1, 1]} : vector<3x20x20xf32> to vector<3x16x20xf32>
    %250 = vector.extract_strided_slice %220 {offsets = [0, 1, 0], sizes = [3, 16, 20], strides = [1, 1, 1]} : vector<3x20x20xf32> to vector<3x16x20xf32>
    %251 = arith.addf %249, %250 : vector<3x16x20xf32>
    %252 = vector.extract_strided_slice %220 {offsets = [0, 2, 0], sizes = [3, 16, 20], strides = [1, 1, 1]} : vector<3x20x20xf32> to vector<3x16x20xf32>
    %253 = arith.addf %251, %252 : vector<3x16x20xf32>
    %254 = vector.extract_strided_slice %220 {offsets = [0, 3, 0], sizes = [3, 16, 20], strides = [1, 1, 1]} : vector<3x20x20xf32> to vector<3x16x20xf32>
    %255 = arith.addf %253, %254 : vector<3x16x20xf32>
    %256 = vector.extract_strided_slice %220 {offsets = [0, 4, 0], sizes = [3, 16, 20], strides = [1, 1, 1]} : vector<3x20x20xf32> to vector<3x16x20xf32>
    %257 = arith.addf %255, %256 : vector<3x16x20xf32>
    %258 = vector.extract_strided_slice %257 {offsets = [0, 0, 0], sizes = [3, 16, 16], strides = [1, 1, 1]} : vector<3x16x20xf32> to vector<3x16x16xf32>
    %cst_56 = arith.constant 0.011170336 : f32
    %259 = vector.broadcast %cst_56 : f32 to vector<3x16x16xf32>
    %260 = arith.mulf %259, %258 : vector<3x16x16xf32>
    %261 = arith.addf %248, %260 : vector<3x16x16xf32>
    %262 = vector.extract_strided_slice %257 {offsets = [0, 0, 1], sizes = [3, 16, 16], strides = [1, 1, 1]} : vector<3x16x20xf32> to vector<3x16x16xf32>
    %cst_57 = arith.constant 0.0236476026 : f32
    %263 = vector.broadcast %cst_57 : f32 to vector<3x16x16xf32>
    %264 = arith.mulf %263, %262 : vector<3x16x16xf32>
    %265 = arith.addf %261, %264 : vector<3x16x16xf32>
    %266 = vector.extract_strided_slice %257 {offsets = [0, 0, 2], sizes = [3, 16, 16], strides = [1, 1, 1]} : vector<3x16x20xf32> to vector<3x16x16xf32>
    %cst_58 = arith.constant 0.0303641222 : f32
    %267 = vector.broadcast %cst_58 : f32 to vector<3x16x16xf32>
    %268 = arith.mulf %267, %266 : vector<3x16x16xf32>
    %269 = arith.addf %265, %268 : vector<3x16x16xf32>
    %270 = vector.extract_strided_slice %257 {offsets = [0, 0, 3], sizes = [3, 16, 16], strides = [1, 1, 1]} : vector<3x16x20xf32> to vector<3x16x16xf32>
    %cst_59 = arith.constant 0.0236476026 : f32
    %271 = vector.broadcast %cst_59 : f32 to vector<3x16x16xf32>
    %272 = arith.mulf %271, %270 : vector<3x16x16xf32>
    %273 = arith.addf %269, %272 : vector<3x16x16xf32>
    %274 = vector.extract_strided_slice %257 {offsets = [0, 0, 4], sizes = [3, 16, 16], strides = [1, 1, 1]} : vector<3x16x20xf32> to vector<3x16x16xf32>
    %cst_60 = arith.constant 0.011170336 : f32
    %275 = vector.broadcast %cst_60 : f32 to vector<3x16x16xf32>
    %276 = arith.mulf %275, %274 : vector<3x16x16xf32>
    %277 = arith.addf %273, %276 : vector<3x16x16xf32>
    %278 = arith.subf %214, %277 : vector<3x16x16xf32>
    %279 = math.absf %278 : vector<3x16x16xf32>
    %280 = vector.shape_cast %279 : vector<3x16x16xf32> to vector<1x3x16x16xf32>
    %cst_61 = arith.constant dense<0.000000e+00> : vector<1xf32>
    %281 = vector.multi_reduction <add>, %280, %cst_61 [1, 2, 3] : vector<1x3x16x16xf32> to vector<1xf32>
    %282 = vector.shape_cast %281 : vector<1xf32> to vector<1x1x1x1xf32>
    %283 = vector.extract %282[0, 0, 0, 0] : f32 from vector<1x1x1x1xf32>
    %cst_62 = arith.constant 6.51041686E-4 : f32
    %284 = arith.mulf %283, %cst_62 : f32
    %285 = arith.addf %179, %284 : f32
    %286 = tpu.iota {dimensions = array<i32: 0>} : vector<16x8xi32>
    %287 = tpu.iota {dimensions = array<i32: 1>} : vector<16x8xi32>
    %c2_i32_63 = arith.constant 2 : i32
    %288 = vector.broadcast %c2_i32_63 : i32 to vector<16x8xi32>
    %289 = arith.muli %288, %287 : vector<16x8xi32>
    %290 = arith.cmpi eq, %286, %289 : vector<16x8xi32>
    %c2_i32_64 = arith.constant 2 : i32
    %291 = vector.broadcast %c2_i32_64 : i32 to vector<16x8xi32>
    %292 = arith.muli %291, %287 : vector<16x8xi32>
    %c1_i32_65 = arith.constant 1 : i32
    %293 = vector.broadcast %c1_i32_65 : i32 to vector<16x8xi32>
    %294 = arith.addi %292, %293 : vector<16x8xi32>
    %295 = arith.cmpi eq, %286, %294 : vector<16x8xi32>
    %296 = arith.ori %290, %295 : vector<16x8xi1>
    %cst_66 = arith.constant 5.000000e-01 : f32
    %cst_67 = arith.constant 0.000000e+00 : f32
    %297 = vector.broadcast %cst_66 : f32 to vector<16x8xf32>
    %298 = vector.broadcast %cst_67 : f32 to vector<16x8xf32>
    %299 = arith.select %296, %297, %298 : vector<16x8xi1>, vector<16x8xf32>
    %300 = vector.shape_cast %277 : vector<3x16x16xf32> to vector<48x16xf32>
    %cst_68 = arith.constant dense<0.000000e+00> : vector<48x8xf32>
    %301 = tpu.matmul %300, %299, %cst_68 {dimension_numbers = #tpu.dot_dimension_numbers<[1], [0], [0], [1], [0, 0, 1, 1], [], []>} : vector<48x16xf32>, vector<16x8xf32>, vector<48x8xf32> -> vector<48x8xf32>
    %302 = vector.shape_cast %301 : vector<48x8xf32> to vector<3x16x8xf32>
    %303 = tpu.iota {dimensions = array<i32: 0>} : vector<8x16xi32>
    %304 = tpu.iota {dimensions = array<i32: 1>} : vector<8x16xi32>
    %c2_i32_69 = arith.constant 2 : i32
    %305 = vector.broadcast %c2_i32_69 : i32 to vector<8x16xi32>
    %306 = arith.muli %305, %303 : vector<8x16xi32>
    %307 = arith.cmpi eq, %304, %306 : vector<8x16xi32>
    %c2_i32_70 = arith.constant 2 : i32
    %308 = vector.broadcast %c2_i32_70 : i32 to vector<8x16xi32>
    %309 = arith.muli %308, %303 : vector<8x16xi32>
    %c1_i32_71 = arith.constant 1 : i32
    %310 = vector.broadcast %c1_i32_71 : i32 to vector<8x16xi32>
    %311 = arith.addi %309, %310 : vector<8x16xi32>
    %312 = arith.cmpi eq, %304, %311 : vector<8x16xi32>
    %313 = arith.ori %307, %312 : vector<8x16xi1>
    %cst_72 = arith.constant 5.000000e-01 : f32
    %cst_73 = arith.constant 0.000000e+00 : f32
    %314 = vector.broadcast %cst_72 : f32 to vector<8x16xf32>
    %315 = vector.broadcast %cst_73 : f32 to vector<8x16xf32>
    %316 = arith.select %313, %314, %315 : vector<8x16xi1>, vector<8x16xf32>
    %317 = vector.shape_cast %316 : vector<8x16xf32> to vector<1x8x16xf32>
    %318 = vector.shape_cast %317 : vector<1x8x16xf32> to vector<1x8x16xf32>
    %319 = vector.broadcast %318 : vector<1x8x16xf32> to vector<3x8x16xf32>
    "tpu.trace_start"() <{level = 10 : i32, message = "boh,bhv->bov"}> : () -> ()
    %cst_74 = arith.constant dense<0.000000e+00> : vector<3x8x8xf32>
    %320 = tpu.matmul %319, %302, %cst_74 {dimension_numbers = #tpu.dot_dimension_numbers<[2], [1], [1], [2], [0, 0, 0, 1, 1, 2], [0], [0]>} : vector<3x8x16xf32>, vector<3x16x8xf32>, vector<3x8x8xf32> -> vector<3x8x8xf32>
    "tpu.trace_stop"() : () -> ()
    %321 = vector.extract_strided_slice %320 {offsets = [0, 0, 0], sizes = [3, 1, 8], strides = [1, 1, 1]} : vector<3x8x8xf32> to vector<3x1x8xf32>
    %322 = vector.extract_strided_slice %320 {offsets = [0, 7, 0], sizes = [3, 1, 8], strides = [1, 1, 1]} : vector<3x8x8xf32> to vector<3x1x8xf32>
    %323 = tpu.concatenate %321, %321, %320, %322, %322 in 1 : vector<3x1x8xf32>, vector<3x1x8xf32>, vector<3x8x8xf32>, vector<3x1x8xf32>, vector<3x1x8xf32> -> vector<3x12x8xf32>
    %324 = vector.extract_strided_slice %323 {offsets = [0, 0, 0], sizes = [3, 12, 1], strides = [1, 1, 1]} : vector<3x12x8xf32> to vector<3x12x1xf32>
    %325 = vector.extract_strided_slice %323 {offsets = [0, 0, 7], sizes = [3, 12, 1], strides = [1, 1, 1]} : vector<3x12x8xf32> to vector<3x12x1xf32>
    %326 = tpu.concatenate %324, %324, %323, %325, %325 in 2 : vector<3x12x1xf32>, vector<3x12x1xf32>, vector<3x12x8xf32>, vector<3x12x1xf32>, vector<3x12x1xf32> -> vector<3x12x12xf32>
    %327 = vector.extract_strided_slice %326 {offsets = [0, 0, 0], sizes = [3, 12, 8], strides = [1, 1, 1]} : vector<3x12x12xf32> to vector<3x12x8xf32>
    %328 = vector.extract_strided_slice %326 {offsets = [0, 0, 1], sizes = [3, 12, 8], strides = [1, 1, 1]} : vector<3x12x12xf32> to vector<3x12x8xf32>
    %329 = arith.addf %327, %328 : vector<3x12x8xf32>
    %330 = vector.extract_strided_slice %326 {offsets = [0, 0, 2], sizes = [3, 12, 8], strides = [1, 1, 1]} : vector<3x12x12xf32> to vector<3x12x8xf32>
    %331 = arith.addf %329, %330 : vector<3x12x8xf32>
    %332 = vector.extract_strided_slice %326 {offsets = [0, 0, 3], sizes = [3, 12, 8], strides = [1, 1, 1]} : vector<3x12x12xf32> to vector<3x12x8xf32>
    %333 = arith.addf %331, %332 : vector<3x12x8xf32>
    %334 = vector.extract_strided_slice %326 {offsets = [0, 0, 4], sizes = [3, 12, 8], strides = [1, 1, 1]} : vector<3x12x12xf32> to vector<3x12x8xf32>
    %335 = arith.addf %333, %334 : vector<3x12x8xf32>
    %336 = vector.extract_strided_slice %335 {offsets = [0, 0, 0], sizes = [3, 8, 8], strides = [1, 1, 1]} : vector<3x12x8xf32> to vector<3x8x8xf32>
    %cst_75 = arith.constant 0.011170336 : f32
    %337 = vector.broadcast %cst_75 : f32 to vector<3x8x8xf32>
    %338 = arith.mulf %337, %336 : vector<3x8x8xf32>
    %339 = vector.extract_strided_slice %335 {offsets = [0, 1, 0], sizes = [3, 8, 8], strides = [1, 1, 1]} : vector<3x12x8xf32> to vector<3x8x8xf32>
    %cst_76 = arith.constant 0.0236476026 : f32
    %340 = vector.broadcast %cst_76 : f32 to vector<3x8x8xf32>
    %341 = arith.mulf %340, %339 : vector<3x8x8xf32>
    %342 = arith.addf %338, %341 : vector<3x8x8xf32>
    %343 = vector.extract_strided_slice %335 {offsets = [0, 2, 0], sizes = [3, 8, 8], strides = [1, 1, 1]} : vector<3x12x8xf32> to vector<3x8x8xf32>
    %cst_77 = arith.constant 0.0303641222 : f32
    %344 = vector.broadcast %cst_77 : f32 to vector<3x8x8xf32>
    %345 = arith.mulf %344, %343 : vector<3x8x8xf32>
    %346 = arith.addf %342, %345 : vector<3x8x8xf32>
    %347 = vector.extract_strided_slice %335 {offsets = [0, 3, 0], sizes = [3, 8, 8], strides = [1, 1, 1]} : vector<3x12x8xf32> to vector<3x8x8xf32>
    %cst_78 = arith.constant 0.0236476026 : f32
    %348 = vector.broadcast %cst_78 : f32 to vector<3x8x8xf32>
    %349 = arith.mulf %348, %347 : vector<3x8x8xf32>
    %350 = arith.addf %346, %349 : vector<3x8x8xf32>
    %351 = vector.extract_strided_slice %335 {offsets = [0, 4, 0], sizes = [3, 8, 8], strides = [1, 1, 1]} : vector<3x12x8xf32> to vector<3x8x8xf32>
    %cst_79 = arith.constant 0.011170336 : f32
    %352 = vector.broadcast %cst_79 : f32 to vector<3x8x8xf32>
    %353 = arith.mulf %352, %351 : vector<3x8x8xf32>
    %354 = arith.addf %350, %353 : vector<3x8x8xf32>
    %355 = vector.extract_strided_slice %326 {offsets = [0, 0, 0], sizes = [3, 8, 12], strides = [1, 1, 1]} : vector<3x12x12xf32> to vector<3x8x12xf32>
    %356 = vector.extract_strided_slice %326 {offsets = [0, 1, 0], sizes = [3, 8, 12], strides = [1, 1, 1]} : vector<3x12x12xf32> to vector<3x8x12xf32>
    %357 = arith.addf %355, %356 : vector<3x8x12xf32>
    %358 = vector.extract_strided_slice %326 {offsets = [0, 2, 0], sizes = [3, 8, 12], strides = [1, 1, 1]} : vector<3x12x12xf32> to vector<3x8x12xf32>
    %359 = arith.addf %357, %358 : vector<3x8x12xf32>
    %360 = vector.extract_strided_slice %326 {offsets = [0, 3, 0], sizes = [3, 8, 12], strides = [1, 1, 1]} : vector<3x12x12xf32> to vector<3x8x12xf32>
    %361 = arith.addf %359, %360 : vector<3x8x12xf32>
    %362 = vector.extract_strided_slice %326 {offsets = [0, 4, 0], sizes = [3, 8, 12], strides = [1, 1, 1]} : vector<3x12x12xf32> to vector<3x8x12xf32>
    %363 = arith.addf %361, %362 : vector<3x8x12xf32>
    %364 = vector.extract_strided_slice %363 {offsets = [0, 0, 0], sizes = [3, 8, 8], strides = [1, 1, 1]} : vector<3x8x12xf32> to vector<3x8x8xf32>
    %cst_80 = arith.constant 0.011170336 : f32
    %365 = vector.broadcast %cst_80 : f32 to vector<3x8x8xf32>
    %366 = arith.mulf %365, %364 : vector<3x8x8xf32>
    %367 = arith.addf %354, %366 : vector<3x8x8xf32>
    %368 = vector.extract_strided_slice %363 {offsets = [0, 0, 1], sizes = [3, 8, 8], strides = [1, 1, 1]} : vector<3x8x12xf32> to vector<3x8x8xf32>
    %cst_81 = arith.constant 0.0236476026 : f32
    %369 = vector.broadcast %cst_81 : f32 to vector<3x8x8xf32>
    %370 = arith.mulf %369, %368 : vector<3x8x8xf32>
    %371 = arith.addf %367, %370 : vector<3x8x8xf32>
    %372 = vector.extract_strided_slice %363 {offsets = [0, 0, 2], sizes = [3, 8, 8], strides = [1, 1, 1]} : vector<3x8x12xf32> to vector<3x8x8xf32>
    %cst_82 = arith.constant 0.0303641222 : f32
    %373 = vector.broadcast %cst_82 : f32 to vector<3x8x8xf32>
    %374 = arith.mulf %373, %372 : vector<3x8x8xf32>
    %375 = arith.addf %371, %374 : vector<3x8x8xf32>
    %376 = vector.extract_strided_slice %363 {offsets = [0, 0, 3], sizes = [3, 8, 8], strides = [1, 1, 1]} : vector<3x8x12xf32> to vector<3x8x8xf32>
    %cst_83 = arith.constant 0.0236476026 : f32
    %377 = vector.broadcast %cst_83 : f32 to vector<3x8x8xf32>
    %378 = arith.mulf %377, %376 : vector<3x8x8xf32>
    %379 = arith.addf %375, %378 : vector<3x8x8xf32>
    %380 = vector.extract_strided_slice %363 {offsets = [0, 0, 4], sizes = [3, 8, 8], strides = [1, 1, 1]} : vector<3x8x12xf32> to vector<3x8x8xf32>
    %cst_84 = arith.constant 0.011170336 : f32
    %381 = vector.broadcast %cst_84 : f32 to vector<3x8x8xf32>
    %382 = arith.mulf %381, %380 : vector<3x8x8xf32>
    %383 = arith.addf %379, %382 : vector<3x8x8xf32>
    %384 = arith.subf %320, %383 : vector<3x8x8xf32>
    %385 = math.absf %384 : vector<3x8x8xf32>
    %386 = vector.shape_cast %385 : vector<3x8x8xf32> to vector<1x3x8x8xf32>
    %cst_85 = arith.constant dense<0.000000e+00> : vector<1xf32>
    %387 = vector.multi_reduction <add>, %386, %cst_85 [1, 2, 3] : vector<1x3x8x8xf32> to vector<1xf32>
    %388 = vector.shape_cast %387 : vector<1xf32> to vector<1x1x1x1xf32>
    %389 = vector.extract %388[0, 0, 0, 0] : f32 from vector<1x1x1x1xf32>
    %cst_86 = arith.constant 0.00260416674 : f32
    %390 = arith.mulf %389, %cst_86 : f32
    %391 = arith.addf %285, %390 : f32
    %392 = tpu.iota {dimensions = array<i32: 0>} : vector<8x4xi32>
    %393 = tpu.iota {dimensions = array<i32: 1>} : vector<8x4xi32>
    %c2_i32_87 = arith.constant 2 : i32
    %394 = vector.broadcast %c2_i32_87 : i32 to vector<8x4xi32>
    %395 = arith.muli %394, %393 : vector<8x4xi32>
    %396 = arith.cmpi eq, %392, %395 : vector<8x4xi32>
    %c2_i32_88 = arith.constant 2 : i32
    %397 = vector.broadcast %c2_i32_88 : i32 to vector<8x4xi32>
    %398 = arith.muli %397, %393 : vector<8x4xi32>
    %c1_i32_89 = arith.constant 1 : i32
    %399 = vector.broadcast %c1_i32_89 : i32 to vector<8x4xi32>
    %400 = arith.addi %398, %399 : vector<8x4xi32>
    %401 = arith.cmpi eq, %392, %400 : vector<8x4xi32>
    %402 = arith.ori %396, %401 : vector<8x4xi1>
    %cst_90 = arith.constant 5.000000e-01 : f32
    %cst_91 = arith.constant 0.000000e+00 : f32
    %403 = vector.broadcast %cst_90 : f32 to vector<8x4xf32>
    %404 = vector.broadcast %cst_91 : f32 to vector<8x4xf32>
    %405 = arith.select %402, %403, %404 : vector<8x4xi1>, vector<8x4xf32>
    %406 = vector.shape_cast %383 : vector<3x8x8xf32> to vector<24x8xf32>
    %cst_92 = arith.constant dense<0.000000e+00> : vector<24x4xf32>
    %407 = tpu.matmul %406, %405, %cst_92 {dimension_numbers = #tpu.dot_dimension_numbers<[1], [0], [0], [1], [0, 0, 1, 1], [], []>} : vector<24x8xf32>, vector<8x4xf32>, vector<24x4xf32> -> vector<24x4xf32>
    %408 = vector.shape_cast %407 : vector<24x4xf32> to vector<3x8x4xf32>
    %409 = tpu.iota {dimensions = array<i32: 0>} : vector<4x8xi32>
    %410 = tpu.iota {dimensions = array<i32: 1>} : vector<4x8xi32>
    %c2_i32_93 = arith.constant 2 : i32
    %411 = vector.broadcast %c2_i32_93 : i32 to vector<4x8xi32>
    %412 = arith.muli %411, %409 : vector<4x8xi32>
    %413 = arith.cmpi eq, %410, %412 : vector<4x8xi32>
    %c2_i32_94 = arith.constant 2 : i32
    %414 = vector.broadcast %c2_i32_94 : i32 to vector<4x8xi32>
    %415 = arith.muli %414, %409 : vector<4x8xi32>
    %c1_i32_95 = arith.constant 1 : i32
    %416 = vector.broadcast %c1_i32_95 : i32 to vector<4x8xi32>
    %417 = arith.addi %415, %416 : vector<4x8xi32>
    %418 = arith.cmpi eq, %410, %417 : vector<4x8xi32>
    %419 = arith.ori %413, %418 : vector<4x8xi1>
    %cst_96 = arith.constant 5.000000e-01 : f32
    %cst_97 = arith.constant 0.000000e+00 : f32
    %420 = vector.broadcast %cst_96 : f32 to vector<4x8xf32>
    %421 = vector.broadcast %cst_97 : f32 to vector<4x8xf32>
    %422 = arith.select %419, %420, %421 : vector<4x8xi1>, vector<4x8xf32>
    %423 = vector.shape_cast %422 : vector<4x8xf32> to vector<1x4x8xf32>
    %424 = vector.shape_cast %423 : vector<1x4x8xf32> to vector<1x4x8xf32>
    %425 = vector.broadcast %424 : vector<1x4x8xf32> to vector<3x4x8xf32>
    "tpu.trace_start"() <{level = 10 : i32, message = "boh,bhv->bov"}> : () -> ()
    %cst_98 = arith.constant dense<0.000000e+00> : vector<3x4x4xf32>
    %426 = tpu.matmul %425, %408, %cst_98 {dimension_numbers = #tpu.dot_dimension_numbers<[2], [1], [1], [2], [0, 0, 0, 1, 1, 2], [0], [0]>} : vector<3x4x8xf32>, vector<3x8x4xf32>, vector<3x4x4xf32> -> vector<3x4x4xf32>
    "tpu.trace_stop"() : () -> ()
    %427 = vector.extract_strided_slice %426 {offsets = [0, 0, 0], sizes = [3, 1, 4], strides = [1, 1, 1]} : vector<3x4x4xf32> to vector<3x1x4xf32>
    %428 = vector.extract_strided_slice %426 {offsets = [0, 3, 0], sizes = [3, 1, 4], strides = [1, 1, 1]} : vector<3x4x4xf32> to vector<3x1x4xf32>
    %429 = tpu.concatenate %427, %427, %426, %428, %428 in 1 : vector<3x1x4xf32>, vector<3x1x4xf32>, vector<3x4x4xf32>, vector<3x1x4xf32>, vector<3x1x4xf32> -> vector<3x8x4xf32>
    %430 = vector.extract_strided_slice %429 {offsets = [0, 0, 0], sizes = [3, 8, 1], strides = [1, 1, 1]} : vector<3x8x4xf32> to vector<3x8x1xf32>
    %431 = vector.extract_strided_slice %429 {offsets = [0, 0, 3], sizes = [3, 8, 1], strides = [1, 1, 1]} : vector<3x8x4xf32> to vector<3x8x1xf32>
    %432 = tpu.concatenate %430, %430, %429, %431, %431 in 2 : vector<3x8x1xf32>, vector<3x8x1xf32>, vector<3x8x4xf32>, vector<3x8x1xf32>, vector<3x8x1xf32> -> vector<3x8x8xf32>
    %433 = vector.extract_strided_slice %432 {offsets = [0, 0, 0], sizes = [3, 8, 4], strides = [1, 1, 1]} : vector<3x8x8xf32> to vector<3x8x4xf32>
    %434 = vector.extract_strided_slice %432 {offsets = [0, 0, 1], sizes = [3, 8, 4], strides = [1, 1, 1]} : vector<3x8x8xf32> to vector<3x8x4xf32>
    %435 = arith.addf %433, %434 : vector<3x8x4xf32>
    %436 = vector.extract_strided_slice %432 {offsets = [0, 0, 2], sizes = [3, 8, 4], strides = [1, 1, 1]} : vector<3x8x8xf32> to vector<3x8x4xf32>
    %437 = arith.addf %435, %436 : vector<3x8x4xf32>
    %438 = vector.extract_strided_slice %432 {offsets = [0, 0, 3], sizes = [3, 8, 4], strides = [1, 1, 1]} : vector<3x8x8xf32> to vector<3x8x4xf32>
    %439 = arith.addf %437, %438 : vector<3x8x4xf32>
    %440 = vector.extract_strided_slice %432 {offsets = [0, 0, 4], sizes = [3, 8, 4], strides = [1, 1, 1]} : vector<3x8x8xf32> to vector<3x8x4xf32>
    %441 = arith.addf %439, %440 : vector<3x8x4xf32>
    %442 = vector.extract_strided_slice %441 {offsets = [0, 0, 0], sizes = [3, 4, 4], strides = [1, 1, 1]} : vector<3x8x4xf32> to vector<3x4x4xf32>
    %cst_99 = arith.constant 0.011170336 : f32
    %443 = vector.broadcast %cst_99 : f32 to vector<3x4x4xf32>
    %444 = arith.mulf %443, %442 : vector<3x4x4xf32>
    %445 = vector.extract_strided_slice %441 {offsets = [0, 1, 0], sizes = [3, 4, 4], strides = [1, 1, 1]} : vector<3x8x4xf32> to vector<3x4x4xf32>
    %cst_100 = arith.constant 0.0236476026 : f32
    %446 = vector.broadcast %cst_100 : f32 to vector<3x4x4xf32>
    %447 = arith.mulf %446, %445 : vector<3x4x4xf32>
    %448 = arith.addf %444, %447 : vector<3x4x4xf32>
    %449 = vector.extract_strided_slice %441 {offsets = [0, 2, 0], sizes = [3, 4, 4], strides = [1, 1, 1]} : vector<3x8x4xf32> to vector<3x4x4xf32>
    %cst_101 = arith.constant 0.0303641222 : f32
    %450 = vector.broadcast %cst_101 : f32 to vector<3x4x4xf32>
    %451 = arith.mulf %450, %449 : vector<3x4x4xf32>
    %452 = arith.addf %448, %451 : vector<3x4x4xf32>
    %453 = vector.extract_strided_slice %441 {offsets = [0, 3, 0], sizes = [3, 4, 4], strides = [1, 1, 1]} : vector<3x8x4xf32> to vector<3x4x4xf32>
    %cst_102 = arith.constant 0.0236476026 : f32
    %454 = vector.broadcast %cst_102 : f32 to vector<3x4x4xf32>
    %455 = arith.mulf %454, %453 : vector<3x4x4xf32>
    %456 = arith.addf %452, %455 : vector<3x4x4xf32>
    %457 = vector.extract_strided_slice %441 {offsets = [0, 4, 0], sizes = [3, 4, 4], strides = [1, 1, 1]} : vector<3x8x4xf32> to vector<3x4x4xf32>
    %cst_103 = arith.constant 0.011170336 : f32
    %458 = vector.broadcast %cst_103 : f32 to vector<3x4x4xf32>
    %459 = arith.mulf %458, %457 : vector<3x4x4xf32>
    %460 = arith.addf %456, %459 : vector<3x4x4xf32>
    %461 = vector.extract_strided_slice %432 {offsets = [0, 0, 0], sizes = [3, 4, 8], strides = [1, 1, 1]} : vector<3x8x8xf32> to vector<3x4x8xf32>
    %462 = vector.extract_strided_slice %432 {offsets = [0, 1, 0], sizes = [3, 4, 8], strides = [1, 1, 1]} : vector<3x8x8xf32> to vector<3x4x8xf32>
    %463 = arith.addf %461, %462 : vector<3x4x8xf32>
    %464 = vector.extract_strided_slice %432 {offsets = [0, 2, 0], sizes = [3, 4, 8], strides = [1, 1, 1]} : vector<3x8x8xf32> to vector<3x4x8xf32>
    %465 = arith.addf %463, %464 : vector<3x4x8xf32>
    %466 = vector.extract_strided_slice %432 {offsets = [0, 3, 0], sizes = [3, 4, 8], strides = [1, 1, 1]} : vector<3x8x8xf32> to vector<3x4x8xf32>
    %467 = arith.addf %465, %466 : vector<3x4x8xf32>
    %468 = vector.extract_strided_slice %432 {offsets = [0, 4, 0], sizes = [3, 4, 8], strides = [1, 1, 1]} : vector<3x8x8xf32> to vector<3x4x8xf32>
    %469 = arith.addf %467, %468 : vector<3x4x8xf32>
    %470 = vector.extract_strided_slice %469 {offsets = [0, 0, 0], sizes = [3, 4, 4], strides = [1, 1, 1]} : vector<3x4x8xf32> to vector<3x4x4xf32>
    %cst_104 = arith.constant 0.011170336 : f32
    %471 = vector.broadcast %cst_104 : f32 to vector<3x4x4xf32>
    %472 = arith.mulf %471, %470 : vector<3x4x4xf32>
    %473 = arith.addf %460, %472 : vector<3x4x4xf32>
    %474 = vector.extract_strided_slice %469 {offsets = [0, 0, 1], sizes = [3, 4, 4], strides = [1, 1, 1]} : vector<3x4x8xf32> to vector<3x4x4xf32>
    %cst_105 = arith.constant 0.0236476026 : f32
    %475 = vector.broadcast %cst_105 : f32 to vector<3x4x4xf32>
    %476 = arith.mulf %475, %474 : vector<3x4x4xf32>
    %477 = arith.addf %473, %476 : vector<3x4x4xf32>
    %478 = vector.extract_strided_slice %469 {offsets = [0, 0, 2], sizes = [3, 4, 4], strides = [1, 1, 1]} : vector<3x4x8xf32> to vector<3x4x4xf32>
    %cst_106 = arith.constant 0.0303641222 : f32
    %479 = vector.broadcast %cst_106 : f32 to vector<3x4x4xf32>
    %480 = arith.mulf %479, %478 : vector<3x4x4xf32>
    %481 = arith.addf %477, %480 : vector<3x4x4xf32>
    %482 = vector.extract_strided_slice %469 {offsets = [0, 0, 3], sizes = [3, 4, 4], strides = [1, 1, 1]} : vector<3x4x8xf32> to vector<3x4x4xf32>
    %cst_107 = arith.constant 0.0236476026 : f32
    %483 = vector.broadcast %cst_107 : f32 to vector<3x4x4xf32>
    %484 = arith.mulf %483, %482 : vector<3x4x4xf32>
    %485 = arith.addf %481, %484 : vector<3x4x4xf32>
    %486 = vector.extract_strided_slice %469 {offsets = [0, 0, 4], sizes = [3, 4, 4], strides = [1, 1, 1]} : vector<3x4x8xf32> to vector<3x4x4xf32>
    %cst_108 = arith.constant 0.011170336 : f32
    %487 = vector.broadcast %cst_108 : f32 to vector<3x4x4xf32>
    %488 = arith.mulf %487, %486 : vector<3x4x4xf32>
    %489 = arith.addf %485, %488 : vector<3x4x4xf32>
    %490 = arith.subf %426, %489 : vector<3x4x4xf32>
    %491 = math.absf %490 : vector<3x4x4xf32>
    %492 = vector.shape_cast %491 : vector<3x4x4xf32> to vector<1x3x4x4xf32>
    %cst_109 = arith.constant dense<0.000000e+00> : vector<1xf32>
    %493 = vector.multi_reduction <add>, %492, %cst_109 [1, 2, 3] : vector<1x3x4x4xf32> to vector<1xf32>
    %494 = vector.shape_cast %493 : vector<1xf32> to vector<1x1x1x1xf32>
    %495 = vector.extract %494[0, 0, 0, 0] : f32 from vector<1x1x1x1xf32>
    %cst_110 = arith.constant 0.010416667 : f32
    %496 = arith.mulf %495, %cst_110 : f32
    %497 = arith.addf %391, %496 : f32
    %498 = tpu.iota {dimensions = array<i32: 0>} : vector<4x2xi32>
    %499 = tpu.iota {dimensions = array<i32: 1>} : vector<4x2xi32>
    %c2_i32_111 = arith.constant 2 : i32
    %500 = vector.broadcast %c2_i32_111 : i32 to vector<4x2xi32>
    %501 = arith.muli %500, %499 : vector<4x2xi32>
    %502 = arith.cmpi eq, %498, %501 : vector<4x2xi32>
    %c2_i32_112 = arith.constant 2 : i32
    %503 = vector.broadcast %c2_i32_112 : i32 to vector<4x2xi32>
    %504 = arith.muli %503, %499 : vector<4x2xi32>
    %c1_i32_113 = arith.constant 1 : i32
    %505 = vector.broadcast %c1_i32_113 : i32 to vector<4x2xi32>
    %506 = arith.addi %504, %505 : vector<4x2xi32>
    %507 = arith.cmpi eq, %498, %506 : vector<4x2xi32>
    %508 = arith.ori %502, %507 : vector<4x2xi1>
    %cst_114 = arith.constant 5.000000e-01 : f32
    %cst_115 = arith.constant 0.000000e+00 : f32
    %509 = vector.broadcast %cst_114 : f32 to vector<4x2xf32>
    %510 = vector.broadcast %cst_115 : f32 to vector<4x2xf32>
    %511 = arith.select %508, %509, %510 : vector<4x2xi1>, vector<4x2xf32>
    %512 = vector.shape_cast %511 : vector<4x2xf32> to vector<1x4x2xf32>
    %513 = vector.shape_cast %512 : vector<1x4x2xf32> to vector<1x4x2xf32>
    %514 = vector.broadcast %513 : vector<1x4x2xf32> to vector<3x4x2xf32>
    "tpu.trace_start"() <{level = 10 : i32, message = "bhw,bwv->bhv"}> : () -> ()
    %cst_116 = arith.constant dense<0.000000e+00> : vector<3x4x2xf32>
    %515 = tpu.matmul %489, %514, %cst_116 {dimension_numbers = #tpu.dot_dimension_numbers<[2], [1], [1], [2], [0, 0, 0, 1, 1, 2], [0], [0]>} : vector<3x4x4xf32>, vector<3x4x2xf32>, vector<3x4x2xf32> -> vector<3x4x2xf32>
    "tpu.trace_stop"() : () -> ()
    %516 = tpu.iota {dimensions = array<i32: 0>} : vector<2x4xi32>
    %517 = tpu.iota {dimensions = array<i32: 1>} : vector<2x4xi32>
    %c2_i32_117 = arith.constant 2 : i32
    %518 = vector.broadcast %c2_i32_117 : i32 to vector<2x4xi32>
    %519 = arith.muli %518, %516 : vector<2x4xi32>
    %520 = arith.cmpi eq, %517, %519 : vector<2x4xi32>
    %c2_i32_118 = arith.constant 2 : i32
    %521 = vector.broadcast %c2_i32_118 : i32 to vector<2x4xi32>
    %522 = arith.muli %521, %516 : vector<2x4xi32>
    %c1_i32_119 = arith.constant 1 : i32
    %523 = vector.broadcast %c1_i32_119 : i32 to vector<2x4xi32>
    %524 = arith.addi %522, %523 : vector<2x4xi32>
    %525 = arith.cmpi eq, %517, %524 : vector<2x4xi32>
    %526 = arith.ori %520, %525 : vector<2x4xi1>
    %cst_120 = arith.constant 5.000000e-01 : f32
    %cst_121 = arith.constant 0.000000e+00 : f32
    %527 = vector.broadcast %cst_120 : f32 to vector<2x4xf32>
    %528 = vector.broadcast %cst_121 : f32 to vector<2x4xf32>
    %529 = arith.select %526, %527, %528 : vector<2x4xi1>, vector<2x4xf32>
    %530 = vector.shape_cast %529 : vector<2x4xf32> to vector<1x2x4xf32>
    %531 = vector.shape_cast %530 : vector<1x2x4xf32> to vector<1x2x4xf32>
    %532 = vector.broadcast %531 : vector<1x2x4xf32> to vector<3x2x4xf32>
    "tpu.trace_start"() <{level = 10 : i32, message = "boh,bhv->bov"}> : () -> ()
    %cst_122 = arith.constant dense<0.000000e+00> : vector<3x2x2xf32>
    %533 = tpu.matmul %532, %515, %cst_122 {dimension_numbers = #tpu.dot_dimension_numbers<[2], [1], [1], [2], [0, 0, 0, 1, 1, 2], [0], [0]>} : vector<3x2x4xf32>, vector<3x4x2xf32>, vector<3x2x2xf32> -> vector<3x2x2xf32>
    "tpu.trace_stop"() : () -> ()
    %534 = math.absf %533 : vector<3x2x2xf32>
    %535 = vector.shape_cast %534 : vector<3x2x2xf32> to vector<1x3x2x2xf32>
    %cst_123 = arith.constant dense<0.000000e+00> : vector<1xf32>
    %536 = vector.multi_reduction <add>, %535, %cst_123 [1, 2, 3] : vector<1x3x2x2xf32> to vector<1xf32>
    %537 = vector.shape_cast %536 : vector<1xf32> to vector<1x1x1x1xf32>
    %538 = vector.extract %537[0, 0, 0, 0] : f32 from vector<1x1x1x1xf32>
    %cst_124 = arith.constant 0.0416666679 : f32
    %539 = arith.mulf %538, %cst_124 : f32
    %540 = arith.addf %497, %539 : f32
    %541 = vector.broadcast %540 : f32 to vector<1x1x1xf32>
    %c0_125 = arith.constant 0 : index
    %c0_126 = arith.constant 0 : index
    %c0_127 = arith.constant 0 : index
    %542 = vector.load %arg3[%c0_125, %c0_126, %c0_127] : memref<1x1x1xf32, #tpu.memory_space<vmem>>, vector<1x1x1xf32>
    tpu.vector_store %arg3[%c0_125, %c0_126, %c0_127], %541 {strides = array<i32>} : memref<1x1x1xf32, #tpu.memory_space<vmem>>, vector<1x1x1xf32>,
    return
  }
  func.func @transform_0(%arg0: i32) -> (i32, i32, i32) {
    %c0_i32 = arith.constant 0 : i32
    %c0_i32_0 = arith.constant 0 : i32
    %c0_i32_1 = arith.constant 0 : i32
    return %arg0, %c0_i32, %c0_i32_0 : i32, i32, i32
  }
  func.func @transform_1(%arg0: i32) -> (i32, i32, i32) {
    %c0_i32 = arith.constant 0 : i32
    %c0_i32_0 = arith.constant 0 : i32
    %c0_i32_1 = arith.constant 0 : i32
    return %arg0, %c0_i32, %c0_i32_0 : i32, i32, i32
  }
  func.func @transform_2(%arg0: i32) -> (i32, i32, i32) {
    %c0_i32 = arith.constant 0 : i32
    %c0_i32_0 = arith.constant 0 : i32
    %c0_i32_1 = arith.constant 0 : i32
    return %arg0, %c0_i32, %c0_i32_0 : i32, i32, i32
  }
}

</mosaic_0001>

<bundles_post_ra>
// kernel: lap_loss.1
= control target key start
LH: loop header
LB: loop body
LE: loop exit
PB: predicated region body
PF: predicated region fallthrough
CT: control target
= control target key end

     0   :  { %7 = vsyncpa [#allocation3], 0  ;;  %s14453_s0 = inlined_call_operand.hbm [shape: f32[6,64,64], index: 0, kind: input, shape index: {}]   ;;  %s14454_s1 = inlined_call_operand.hbm [shape: f32[6,64,64], index: 1, kind: input, shape index: {}]   ;;  %s14455_s2 = inlined_call_operand.vmem [shape: f32[2,1,1], index: 2, kind: output, shape index: {}]  }
   0x1   :  { %9 = vsyncpa [#allocation3 + $0x1], 0 }
   0x2   :  { %10 = vsyncpa [#allocation5], 0 }
   0x3   :  { %12 = vsyncpa [#allocation5 + $0x1], 0  ;;  %s8950_s9 = smov 0   ;;  %s8952_s10 = smov 0  }
   0x4   :  { %s8954_s11 = smov 0   ;;  %s8956_s12 = smov 0  }
   0x5 LB: > { %s8969_s13 = sadd.s32 4294967295, %s8916_s12   ;;  %s8972_s14 = sadd.s32 1, %s8916_s12   ;;  %s8916_s12 = sphi %s8956_s12, %s15348_s12   ;;  %s8912_s11 = sphi %s8954_s11, %s15347_s11   ;;  %s8908_s10 = sphi %s8952_s10, %s15346_s10   ;;  %s8904_s9 = sphi %s8950_s9, %s15345_s9  }
   0x6   : > { %s22_s15 = ssub.s32 %s8916_s12, %s8972_s14  ;;  %s25_s16 = sadd.s32 1, %s8912_s11 }
   0x7   : > { %p23_p0 = scmp.eq.s32.totalorder %s22_s15, 0  ;;  %p32_p1 = scmp.ne.s32.totalorder %s8912_s11, %s8908_s10 }
   0x8   : > { %p33_p2 = scmp.eq.s32.totalorder %s8916_s12, 0  ;;  %p38_p3 = scmp.ne.s32.totalorder %s8908_s10, %s8904_s9 }
   0x9   : > { %s8982_s17 = scalar_select %p23_p0, %s8912_s11, %s25_s16  }
   0xa   : > { %p34_p4 = por %p33_p2, %p32_p1  ;;  %p39_p5 = scmp.eq.s32.totalorder %s8969_s13, 0 }
   0xb   : > { %p8770_p6 = scmp.lt.s32.totalorder %s8916_s12, 2  ;;  %s8991_s19 = sand.u32 1, %s8912_s11  }
   0xc   : > { %p8986_p7 = por %p39_p5, %p38_p3  ;;  %s8744_s20 = smul.u32 192, %s8991_s19 }
   0xd   : > { %s8225_s21 = smul.u32 3072, %s8916_s12  ;;  %p8995_p8 = pnand %p8770_p6, %p34_p4 }
   0xe   : > { %s14615_s18 = scalar_select %p8986_p7, 1, 0 }
   0xf   : > { %s9004_s25 = scalar_lea.hbm %s14453_s0, %s8225_s21  ;;  %s118_s26 = scalar_lea.vmem [#allocation2], %s8744_s20 }
  0x10   : > { %s126_s27 = sshll.u32 %s118_s26, 4  ;;  %s115_s28 = scalar_lea.sflag [#allocation3], %s8991_s19  ;;  %s9008_s27 = int_to_ptr.vmem [resolvable:$true] %s126_s27 }
  0x11   : > { %s8818_s29 = scalar_lea.hbm %s9004_s25, 3072  ;;  %p8820_p11 = pneg %p8995_p8 }
  0x12   : > { %p8819_p10 = scmp.ne.s32.totalorder %s9004_s25, %s8818_s29  ;;  %s8823_s4 = scalar_lea.hbm %s14453_s0, 6144 }
  0x13   : > { %p8824_p0 = scmp.lt.u32.totalorder %s9004_s25, %s14453_s0  ;;  %p8825_p1 = scmp.lt.u32.totalorder %s8823_s4, %s8818_s29 }
  0x14   : > { %p8821_p12 = pnand %p8820_p11, %p8819_p10  ;;  %p8827_p3 = scmp.lt.u32.totalorder %s8818_s29, %s9004_s25 }
  0x15   : > { %p8826_p2 = por %p8825_p1, %p8824_p0 }
  0x16   : > { %p8822_p13 = pneg %p8821_p12 }
  0x17   : > { %p8828_p4 = por %p8827_p3, %p8826_p2 }
  0x19   : > { %p8829_p5 = pnand %p8828_p4, %p8822_p13 }
  0x1b   : > { %8832 = shalt.err (!%p8829_p5)
}
  0x1c   : > { %s8833_s7 = scalar_lea.vmem %s9008_s27, 3072  ;;  %s8918_s8 = smov [#allocation2]  }
  0x1d   : > { %p8834_p6 = scmp.ne.s32.totalorder %s9008_s27, %s8833_s7  ;;  %s8838_s9 = sshll.u32 %s8918_s8, 4  ;;  %s8839_s9 = int_to_ptr.vmem [resolvable:$false] %s8838_s9 }
  0x1e   : > { %s8840_s15 = scalar_lea.vmem %s8839_s9, 6144  ;;  %p8841_p9 = scmp.lt.s32.totalorder %s9008_s27, %s8839_s9 }
  0x1f   : > { %p8836_p10 = pnand %p8834_p6, %p8820_p11  ;;  %p8842_p0 = scmp.lt.s32.totalorder %s8840_s15, %s8833_s7 }
  0x21   : > { %p8837_p12 = pneg %p8836_p10  ;;  %p8843_p1 = por %p8842_p0, %p8841_p9 }
  0x23   : > { %p8844_p2 = pnand %p8843_p1, %p8837_p12 }
  0x25   : > { %8847 = shalt.err (!%p8844_p2)
}
  0x26   : > { %s8919_s16 = smov 128   ;;  %s8920_s23 = smov 8  }
  0x27   : > { %8766 = dma.hbm_to_vmem [thread:$0]  (!%p8995_p8), %s9004_s25, 3072, %s9008_s27, %s115_s28, %s8919_s16, %s8919_s16, %s8920_s23  }
  0x28   : > { %p156_p9 = scmp.lt.s32.totalorder %s8916_s12, 3  ;;  %s9048_s29 = scalar_lea.hbm %s14454_s1, %s8225_s21 }
  0x29   : > { %p14617_p13 = scmp.ge.s32.totalorder %s8916_s12, 1  ;;  %s140_s3 = scalar_lea.vmem [#allocation4], %s8744_s20 }
  0x2a   : > { %s148_s4 = sshll.u32 %s140_s3, 4  ;;  %s137_s25 = scalar_lea.sflag [#allocation5], %s8991_s19  ;;  %s9058_s4 = int_to_ptr.vmem [resolvable:$true] %s148_s4 }
  0x2b   : > { %p9052_p3 = pnand %p14617_p13, %p156_p9  ;;  %s8848_s27 = scalar_lea.hbm %s9048_s29, 3072 }
  0x2c   : > { %p8849_p4 = scmp.ne.s32.totalorder %s9048_s29, %s8848_s27  ;;  %s8853_s28 = scalar_lea.hbm %s14454_s1, 6144 }
  0x2d   : > { %p8854_p10 = scmp.lt.u32.totalorder %s9048_s29, %s14454_s1  ;;  %p8855_p12 = scmp.lt.u32.totalorder %s8853_s28, %s8848_s27 }
  0x2e   : > { %p8851_p5 = pnand %p8849_p4, %p8820_p11  ;;  %p8857_p1 = scmp.lt.u32.totalorder %s8848_s27, %s9048_s29 }
  0x2f   : > { %p8856_p0 = por %p8855_p12, %p8854_p10 }
  0x30   : > { %p8852_p6 = pneg %p8851_p5 }
  0x31   : > { %p8858_p2 = por %p8857_p1, %p8856_p0 }
  0x33   : > { %p8859_p9 = pnand %p8858_p2, %p8852_p6 }
  0x35   : > { %8862 = shalt.err (!%p8859_p9)
}
  0x36   : > { %s8863_s20 = scalar_lea.vmem %s9058_s4, 3072  ;;  %s8921_s7 = smov [#allocation4]  }
  0x37   : > { %p8864_p13 = scmp.ne.s32.totalorder %s9058_s4, %s8863_s20  ;;  %s8868_s8 = sshll.u32 %s8921_s7, 4  ;;  %s8869_s8 = int_to_ptr.vmem [resolvable:$false] %s8868_s8 }
  0x38   : > { %s8870_s9 = scalar_lea.vmem %s8869_s8, 6144  ;;  %p8871_p7 = scmp.lt.s32.totalorder %s9058_s4, %s8869_s8 }
  0x39   : > { %p8866_p4 = pnand %p8864_p13, %p8820_p11  ;;  %p8872_p10 = scmp.lt.s32.totalorder %s8870_s9, %s8863_s20 }
  0x3b   : > { %p8867_p5 = pneg %p8866_p4  ;;  %p8873_p12 = por %p8872_p10, %p8871_p7 }
  0x3d   : > { %p8874_p0 = pnand %p8873_p12, %p8867_p5 }
  0x3f   : > { %8877 = shalt.err (!%p8874_p0)
}
  0x40   : > { %8769 = dma.hbm_to_vmem [thread:$0]  (!%p8995_p8), %s9048_s29, 3072, %s9058_s4, %s137_s25, %s8919_s16, %s8919_s16, %s8920_s23  }
  0x41   : > { %160 = sbr.rel (%p9052_p3) target bundleno = 4442 (0x115a), region = 28 }
  0x48   : > { %s162_s15 = sand.u32 1, %s8908_s10   ;;  %p14619_p7 = scmp.ne.s32.totalorder %s14615_s18, 0 }
  0x49   : > { %s8746_s24 = smul.u32 192, %s162_s15  ;;  %s163_s26 = scalar_lea.sflag [#allocation3], %s162_s15 }
  0x4b   : > { %s9092_s3 = scalar_lea.vmem [#allocation2], %s8746_s24 }
  0x4c   : > { %8895 = dma.done.wait (%p14619_p7), %s163_s26, 3072  }
  0x4d   : > { %8897 = vsyncadd (%p14619_p7), %s163_s26, 4294964224  ;;  %s172_s19 = scalar_lea.sflag [#allocation5], %s162_s15  ;;  %s9098_s22 = scalar_lea.vmem [#allocation4], %s8746_s24 }
  0x4e   : > { %8899 = dma.done.wait (%p14619_p7), %s172_s19, 3072  }
  0x4f   : > { %8901 = vsyncadd (%p14619_p7), %s172_s19, 4294964224  ;;  %v205_v0 = vld [vmem:[%s9092_s3 + $0x8] sm:$0xff]  ;;  %v206_v1 = vld [vmem:[%s9092_s3 + $0x10] sm:$0xff]  ;;  %vm14511_vm0 = vcmask 1041408   ;;  %vm14510_vm1 = vcmask 1040384   ;;  %s8922_s18 = smov 1  }
  0x50   : > { %v229_v2 = vld [vmem:[%s9098_s22 + $0x8] sm:$0xff]  ;;  %v230_v3 = vld [vmem:[%s9098_s22 + $0x10] sm:$0xff]  ;;  %v204_v5 = vld [vmem:[%s9092_s3] sm:$0xff]  ;;  %s8923_s16 = smov 2   ;;  %s8924_s23 = smov 3   ;;  %vm14506_vm2 = vcmask 1042432  }
  0x51   : > { %v9108_v4 = vsub.f32 %v205_v0, %v229_v2  ;;  %v228_v6 = vld [vmem:[%s9098_s22] sm:$0xff]  ;;  %v9112_v7 = vsub.f32 %v206_v1, %v230_v3  ;;  %v207_v17 = vld [vmem:[%s9092_s3 + $0x18] sm:$0xff]  ;;  %s8925_s29 = smov 4   ;;  %v209_v27 = vld [vmem:[%s9092_s3 + $0x28] sm:$0xff]  ;;  %vm735_vm3 = vcmask 7168   ;;  %vm14521_vm4 = vcmask 15360  }
  0x52   : > { %v9114_v8 = vsub.f32 %v204_v5, %v228_v6  ;;  %v231_v18 = vld [vmem:[%s9098_s22 + $0x18] sm:$0xff]  ;;  %v208_v20 = vld [vmem:[%s9092_s3 + $0x20] sm:$0xff]  ;;  %v233_v28 = vld [vmem:[%s9098_s22 + $0x28] sm:$0xff]  ;;  %vm14522_vm5 = vcmask 539648   ;;  %vm819_vm6 = vcmask 547840   ;;  %s8926_s30 = smov 127  }
  0x53   : > { %14620 = vst [vmem:[#allocation8_spill] sm:$0xff] %v9108_v4  ;;  %14621 = vst [vmem:[#allocation9_spill] sm:$0xff] %v9112_v7  ;;  %v308_v9 = vrot.slane %v9108_v4, 6  ;;  %v310_v10 = vrot.slane %v9112_v7, 6  ;;  %v9145_v19 = vsub.f32 %v207_v17, %v231_v18  ;;  %v232_v21 = vld [vmem:[%s9098_s22 + $0x20] sm:$0xff]  ;;  %v9177_v29 = vsub.f32 %v209_v27, %v233_v28  ;;  %v210_v30 = vld [vmem:[%s9092_s3 + $0x30] sm:$0xff] }
  0x54   : > { %14622 = vst [vmem:[#allocation10_spill] sm:$0xff] %v9114_v8  ;;  %v307_v11 = vrot.slane %v9114_v8, 6  ;;  %v279_v12 = vrot.slane %v9114_v8, 7  ;;  %v9154_v23 = vsub.f32 %v208_v20, %v232_v21  ;;  %v234_v31 = vld [vmem:[%s9098_s22 + $0x30] sm:$0xff]  ;;  %v211_v37 = vld [vmem:[%s9092_s3 + $0x38] sm:$0xff]  ;;  %v212_v45 = vld [vmem:[%s9092_s3 + $0x40] sm:$0xff] }
  0x55   : > { %v9121_v13 = vsel %vm14511_vm0, %v308_v9, %v310_v10  ;;  %14623 = vst [vmem:[#allocation11_spill] sm:$0xff] %v9145_v19  ;;  %v312_v22 = vrot.slane %v9145_v19, 6  ;;  %14625 = vst [vmem:[#allocation13_spill] sm:$0xff] %v9177_v29  ;;  %v316_v32 = vrot.slane %v9177_v29, 6  ;;  %v9186_v33 = vsub.f32 %v210_v30, %v234_v31  ;;  %v235_v38 = vld [vmem:[%s9098_s22 + $0x38] sm:$0xff]  ;;  %v236_v46 = vld [vmem:[%s9098_s22 + $0x40] sm:$0xff] }
  0x56   : > { %v9124_v14 = vsel %vm14511_vm0, %v307_v11, %v308_v9  ;;  %415 = vrot.lane.b32.xlu1 %v9121_v13, %s8922_s18  ;;  %v392_v15 = vsel %vm14510_vm1, %v9114_v8, %v279_v12  ;;  %14624 = vst [vmem:[#allocation12_spill] sm:$0xff] %v9154_v23  ;;  %v314_v25 = vrot.slane %v9154_v23, 6  ;;  %v9209_v39 = vsub.f32 %v211_v37, %v235_v38  ;;  %v213_v50 = vld [vmem:[%s9092_s3 + $0x48] sm:$0xff]  ;;  %v214_v55 = vld [vmem:[%s9092_s3 + $0x50] sm:$0xff]  ;;  %v215_v63 = vld [vmem:[%s9092_s3 + $0x58] sm:$0xff]  ;;  %s8927_s4 = smov 126  }
  0x57   : > { %413 = vrot.lane.b32.xlu0 %v9124_v14, %s8922_s18  ;;  %v9137_v16 = vsel %vm14511_vm0, %v392_v15, %v307_v11  ;;  %v9161_v24 = vsel %vm14511_vm0, %v310_v10, %v312_v22  ;;  %14626 = vst [vmem:[#allocation14_spill] sm:$0xff] %v9186_v33  ;;  %v318_v35 = vrot.slane %v9186_v33, 6  ;;  %v9235_v48 = vsub.f32 %v212_v45, %v236_v46  ;;  %v237_v51 = vld [vmem:[%s9098_s22 + $0x48] sm:$0xff]  ;;  %v238_v56 = vld [vmem:[%s9098_s22 + $0x50] sm:$0xff]  ;;  %v239_v0 = vld [vmem:[%s9098_s22 + $0x58] sm:$0xff]  ;;  %s8928_s25 = smov 125  }
  0x58   : > { %v9169_v26 = vsel %vm14511_vm0, %v312_v22, %v314_v25  ;;  %v9193_v34 = vsel %vm14511_vm0, %v314_v25, %v316_v32  ;;  %14627 = vst [vmem:[#allocation15_spill] sm:$0xff] %v9209_v39  ;;  %v320_v40 = vrot.slane %v9209_v39, 6  ;;  %v379_v41 = vrot.slane %v9209_v39, 5  ;;  %v216_v2 = vld [vmem:[%s9092_s3 + $0x60] sm:$0xff]  ;;  %v217_v12 = vld [vmem:[%s9092_s3 + $0x68] sm:$0xff]  ;;  %v218_v18 = vld [vmem:[%s9092_s3 + $0x70] sm:$0xff] }
  0x59   : > { %v9201_v36 = vsel %vm14511_vm0, %v316_v32, %v318_v35  ;;  %v385_v43 = vrot.slane %v9209_v39, 4  ;;  %14628 = vst [vmem:[#allocation16_spill] sm:$0xff] %v9235_v48  ;;  %v280_v49 = vrot.slane %v9235_v48, 7  ;;  %v322_v52 = vrot.slane %v9235_v48, 6  ;;  %v240_v3 = vld [vmem:[%s9098_s22 + $0x60] sm:$0xff]  ;;  %v241_v15 = vld [vmem:[%s9098_s22 + $0x68] sm:$0xff] }
  0x5a   : > { %496 = vrot.lane.b32.xlu1 %v9121_v13, %s8923_s16  ;;  %v9222_v42 = vsel %vm14511_vm0, %v318_v35, %v320_v40  ;;  %v398_v44 = vsel %vm14511_vm0, %v320_v40, %v379_v41  ;;  %v9249_v53 = vsub.f32 %v213_v50, %v237_v51  ;;  %v9263_v59 = vsub.f32 %v214_v55, %v238_v56  ;;  %v242_v20 = vld [vmem:[%s9098_s22 + $0x70] sm:$0xff]  ;;  %v219_v30 = vld [vmem:[%s9092_s3 + $0x78] sm:$0xff]  ;;  %v220_v51 = vld [vmem:[%s9092_s3 + $0x80] sm:$0xff]  ;;  %s8929_s27 = smov 124   ;;  %p201_p8 = scmp.lt.s32.totalorder %s8969_s13, 1 }
  0x5b   : > { %494 = vrot.lane.b32.xlu0 %v9124_v14, %s8923_s16  ;;  %v9233_v47 = vsel %vm14506_vm2, %v398_v44, %v385_v43  ;;  %v393_v54 = vsel %vm14510_vm1, %v9235_v48, %v280_v49  ;;  %v9290_v1 = vsub.f32 %v215_v63, %v239_v0  ;;  %v9299_v6 = vsub.f32 %v216_v2, %v240_v3  ;;  %v243_v31 = vld [vmem:[%s9098_s22 + $0x78] sm:$0xff]  ;;  %v221_v2 = vld [vmem:[%s9092_s3 + $0x88] sm:$0xff]  ;;  %v250_v29 = vld [vmem:[%s9098_s22 + $0xb0] sm:$0xff] }
  0x5c   : > { %14629 = vst [vmem:[#allocation17_spill] sm:$0xff] %v9249_v53  ;;  %v9260_v57 = vsel %vm14511_vm0, %v393_v54, %v322_v52  ;;  %v323_v58 = vrot.slane %v9249_v53, 6  ;;  %14630 = vst [vmem:[#allocation18_spill] sm:$0xff] %v9263_v59  ;;  %v325_v61 = vrot.slane %v9263_v59, 6  ;;  %v9322_v17 = vsub.f32 %v217_v12, %v241_v15  ;;  %v245_v3 = vld [vmem:[%s9098_s22 + $0x88] sm:$0xff]  ;;  %s15350_s13 = smov (!%p201_p8, %s8969_s13), 1 }
  0x5d   : > { %14632 = vst [vmem:[#allocation20_spill] sm:$0xff] %v9290_v1  ;;  %v327_v5 = vrot.slane %v9290_v1, 6  ;;  %14633 = vst [vmem:[#allocation21_spill] sm:$0xff] %v9299_v6  ;;  %v329_v10 = vrot.slane %v9299_v6, 6  ;;  %v9331_v22 = vsub.f32 %v218_v18, %v242_v20  ;;  %v9354_v32 = vsub.f32 %v219_v30, %v243_v31  ;;  %v222_v20 = vld [vmem:[%s9092_s3 + $0x90] sm:$0xff]  ;;  %v225_v53 = vld [vmem:[%s9092_s3 + $0xa8] sm:$0xff] }
  0x5e   : > { %575 = vrot.lane.b32.xlu1 %v9124_v14, %s8924_s23  ;;  %v9270_v60 = vsel %vm14511_vm0, %v322_v52, %v323_v58  ;;  %v9278_v62 = vsel %vm14511_vm0, %v323_v58, %v325_v61  ;;  %14636 = vst [vmem:[#allocation24_spill] sm:$0xff] %v9322_v17  ;;  %v331_v21 = vrot.slane %v9322_v17, 6  ;;  %v244_v52 = vld [vmem:[%s9098_s22 + $0x80] sm:$0xff]  ;;  %vm1384_vm7 = vcmask 1046528  }
  0x5f   : > { %411 = vrot.lane.b32.xlu0 %v9137_v16, %s8922_s18  ;;  %14631 = vst [vmem:[#allocation19_spill] sm:$0xff] %v9278_v62  ;;  %v9306_v9 = vsel %vm14511_vm0, %v325_v61, %v327_v5  ;;  %v9314_v11 = vsel %vm14511_vm0, %v327_v5, %v329_v10  ;;  %14637 = vst [vmem:[#allocation25_spill] sm:$0xff] %v9331_v22  ;;  %v333_v27 = vrot.slane %v9331_v22, 6  ;;  %v335_v38 = vrot.slane %v9354_v32, 6 }
  0x60   : > { %14634 = vst [vmem:[#allocation22_spill] sm:$0xff] %v9306_v9  ;;  %14635 = vst [vmem:[#allocation23_spill] sm:$0xff] %v9314_v11  ;;  %v9338_v25 = vsel %vm14511_vm0, %v329_v10, %v331_v21  ;;  %v380_v43 = vrot.slane %v9354_v32, 5  ;;  %v386_v45 = vrot.slane %v9354_v32, 4  ;;  %v9396_v58 = vsub.f32 %v220_v51, %v244_v52 }
  0x61   : > { %14638 = vst [vmem:[#allocation26_spill] sm:$0xff] %v9338_v25  ;;  %v9346_v28 = vsel %vm14511_vm0, %v331_v21, %v333_v27  ;;  %14640 = vst [vmem:[#allocation28_spill] sm:$0xff] %v9354_v32  ;;  %v9375_v44 = vsel %vm14511_vm0, %v333_v27, %v335_v38  ;;  %v9414_v10 = vsub.f32 %v221_v2, %v245_v3  ;;  %v246_v21 = vld [vmem:[%s9098_s22 + $0x90] sm:$0xff]  ;;  %v248_v32 = vld [vmem:[%s9098_s22 + $0xa0] sm:$0xff]  ;;  %vm1538_vm8 = vcmask 1045504  }
  0x62   : > { %492 = vrot.lane.b32.xlu1 %v9137_v16, %s8923_s16  ;;  %14639 = vst [vmem:[#allocation27_spill] sm:$0xff] %v9346_v28  ;;  %14641 = vst [vmem:[#allocation29_spill] sm:$0xff] %v9375_v44  ;;  %v399_v50 = vsel %vm14511_vm0, %v335_v38, %v380_v43  ;;  %v281_v0 = vrot.slane %v9396_v58, 7  ;;  %v337_v5 = vrot.slane %v9396_v58, 6  ;;  %v9432_v31 = vsub.f32 %v222_v20, %v246_v21  ;;  %v223_v20 = vld [vmem:[%s9092_s3 + $0x98] sm:$0xff] }
  0x63   : > { %573 = vrot.lane.b32.xlu0 %v9137_v16, %s8924_s23  ;;  %v9390_v54 = vsel %vm14506_vm2, %v399_v50, %v386_v45  ;;  %14643 = vst [vmem:[#allocation31_spill] sm:$0xff] %v9396_v58  ;;  %14644 = vst [vmem:[#allocation32_spill] sm:$0xff] %v9414_v10  ;;  %v338_v30 = vrot.slane %v9414_v10, 6  ;;  %v247_v21 = vld [vmem:[%s9098_s22 + $0x98] sm:$0xff]  ;;  %vm14579_vm9 = vcmask 1044480   ;;  %vm14512_vm10 = vcmask 1043456  }
  0x64   : > { %14642 = vst [vmem:[#allocation30_spill] sm:$0xff] %v9390_v54  ;;  %v394_v18 = vsel %vm14510_vm1, %v9396_v58, %v281_v0  ;;  %14646 = vst [vmem:[#allocation34_spill] sm:$0xff] %v9432_v31  ;;  %v340_v50 = vrot.slane %v9432_v31, 6  ;;  %v224_v58 = vld [vmem:[%s9092_s3 + $0xa0] sm:$0xff] }
  0x65   : > { %v9429_v27 = vsel %vm14511_vm0, %v394_v18, %v337_v5  ;;  %v9443_v45 = vsel %vm14511_vm0, %v337_v5, %v338_v30  ;;  %v9488_v17 = vsub.f32 %v224_v58, %v248_v32 }
  0x66   : > { %654 = vrot.lane.b32.xlu1 %v9137_v16, %s8925_s29  ;;  %14645 = vst [vmem:[#allocation33_spill] sm:$0xff] %v9429_v27  ;;  %14647 = vst [vmem:[#allocation35_spill] sm:$0xff] %v9443_v45  ;;  %v9455_v0 = vsel %vm14511_vm0, %v338_v30, %v340_v50  ;;  %v9475_v30 = vsub.f32 %v223_v20, %v247_v21 }
  0x67   : > { %577 = vrot.lane.b32.xlu0 %v9121_v13, %s8924_s23  ;;  %14648 = vst [vmem:[#allocation36_spill] sm:$0xff] %v9455_v0  ;;  %14650 = vst [vmem:[#allocation38_spill] sm:$0xff] %v9488_v17  ;;  %v344_v1 = vrot.slane %v9488_v17, 6  ;;  %v249_v17 = vld [vmem:[%s9098_s22 + $0xa8] sm:$0xff] }
  0x68   : > { %14649 = vst [vmem:[#allocation37_spill] sm:$0xff] %v9475_v30  ;;  %v342_v22 = vrot.slane %v9475_v30, 6  ;;  %v9523_v48 = vsub.f32 %v225_v53, %v249_v17 }
  0x6a   : > { %417 = vrot.lane.b32.xlu1 %v9161_v24, %s8922_s18  ;;  %v9499_v6 = vsel %vm14511_vm0, %v340_v50, %v342_v22  ;;  %v9511_v58 = vsel %vm14511_vm0, %v342_v22, %v344_v1  ;;  %14653 = vst [vmem:[#allocation41_spill] sm:$0xff] %v9523_v48  ;;  %v226_v22 = vld [vmem:[%s9092_s3 + $0xb0] sm:$0xff]  ;;  %v346_v23 = vrot.slane %v9523_v48, 6 }
  0x6b   : > { %656 = vrot.lane.b32.xlu0 %v9124_v14, %s8925_s29  ;;  %14651 = vst [vmem:[#allocation39_spill] sm:$0xff] %v9499_v6  ;;  %14652 = vst [vmem:[#allocation40_spill] sm:$0xff] %v9511_v58  ;;  %v9536_v19 = vsub.f32 %v226_v22, %v250_v29 }
  0x6c   : > { %v9547_v7 = vsel %vm14511_vm0, %v344_v1, %v346_v23  ;;  %v227_v1 = vld [vmem:[%s9092_s3 + $0xb8] sm:$0xff] }
  0x6d   : > { %14654 = vst [vmem:[#allocation42_spill] sm:$0xff] %v9536_v19  ;;  %14655 = vst [vmem:[#allocation43_spill] sm:$0xff] %v9547_v7  ;;  %v348_v4 = vrot.slane %v9536_v19, 6 }
  0x6e   : > { %419 = vrot.lane.b32.xlu1 %v9169_v26, %s8922_s18 }
  0x6f   : > { %658 = vrot.lane.b32.xlu0 %v9121_v13, %s8925_s29  ;;  %v9559_v29 = vsel %vm14511_vm0, %v346_v23, %v348_v4 }
  0x70   : > { %14656 = vst [vmem:[#allocation44_spill] sm:$0xff] %v9559_v29 }
  0x72   : > { %500 = vrot.lane.b32.xlu1 %v9169_v26, %s8923_s16 }
  0x73   : > { %498 = vrot.lane.b32.xlu0 %v9161_v24, %s8923_s16 }
  0x76   : > { %581 = vrot.lane.b32.xlu1 %v9169_v26, %s8924_s23 }
  0x77   : > { %579 = vrot.lane.b32.xlu0 %v9161_v24, %s8924_s23 }
  0x7a   : > { %421 = vrot.lane.b32.xlu1 %v9193_v34, %s8922_s18 }
  0x7b   : > { %660 = vrot.lane.b32.xlu0 %v9161_v24, %s8925_s29 }
  0x7e   : > { %423 = vrot.lane.b32.xlu1 %v9201_v36, %s8922_s18 }
  0x7f   : > { %662 = vrot.lane.b32.xlu0 %v9169_v26, %s8925_s29 }
  0x82   : > { %504 = vrot.lane.b32.xlu1 %v9201_v36, %s8923_s16 }
  0x83   : > { %502 = vrot.lane.b32.xlu0 %v9193_v34, %s8923_s16 }
  0x86   : > { %585 = vrot.lane.b32.xlu1 %v9201_v36, %s8924_s23 }
  0x87   : > { %583 = vrot.lane.b32.xlu0 %v9193_v34, %s8924_s23 }
  0x8a   : > { %425 = vrot.lane.b32.xlu1 %v9222_v42, %s8922_s18 }
  0x8b   : > { %664 = vrot.lane.b32.xlu0 %v9193_v34, %s8925_s29 }
  0x8e   : > { %427 = vrot.lane.b32.xlu1 %v9233_v47, %s8922_s18 }
  0x8f   : > { %666 = vrot.lane.b32.xlu0 %v9201_v36, %s8925_s29 }
  0x92   : > { %508 = vrot.lane.b32.xlu1 %v9233_v47, %s8923_s16 }
  0x93   : > { %506 = vrot.lane.b32.xlu0 %v9222_v42, %s8923_s16 }
  0x96   : > { %589 = vrot.lane.b32.xlu1 %v9233_v47, %s8924_s23 }
  0x97   : > { %587 = vrot.lane.b32.xlu0 %v9222_v42, %s8924_s23 }
  0x9a   : > { %429 = vrot.lane.b32.xlu1 %v9260_v57, %s8922_s18 }
  0x9b   : > { %668 = vrot.lane.b32.xlu0 %v9222_v42, %s8925_s29 }
  0x9e   : > { %670 = vrot.lane.b32.xlu1 %v9233_v47, %s8925_s29 }
  0x9f   : > { %431 = vrot.lane.b32.xlu0 %v9270_v60, %s8922_s18 }
  0xa2   : > { %510 = vrot.lane.b32.xlu1 %v9260_v57, %s8923_s16 }
  0xa3   : > { %433 = vrot.lane.b32.xlu0 %v9278_v62, %s8922_s18 }
  0xa6   : > { %514 = vrot.lane.b32.xlu1 %v9278_v62, %s8923_s16 }
  0xa7   : > { %512 = vrot.lane.b32.xlu0 %v9270_v60, %s8923_s16 }
  0xaa   : > { %593 = vrot.lane.b32.xlu1 %v9270_v60, %s8924_s23 }
  0xab   : > { %591 = vrot.lane.b32.xlu0 %v9260_v57, %s8924_s23 }
  0xae   : > { %672 = vrot.lane.b32.xlu1 %v9260_v57, %s8925_s29 }
  0xaf   : > { %595 = vrot.lane.b32.xlu0 %v9278_v62, %s8924_s23 }
  0xb2   : > { %435 = vrot.lane.b32.xlu1 %v9306_v9, %s8922_s18 }
  0xb3   : > { %674 = vrot.lane.b32.xlu0 %v9270_v60, %s8925_s29 }
  0xb6   : > { %437 = vrot.lane.b32.xlu1 %v9314_v11, %s8922_s18 }
  0xb7   : > { %676 = vrot.lane.b32.xlu0 %v9278_v62, %s8925_s29 }
  0xba   : > { %518 = vrot.lane.b32.xlu1 %v9314_v11, %s8923_s16 }
  0xbb   : > { %516 = vrot.lane.b32.xlu0 %v9306_v9, %s8923_s16 }
  0xbe   : > { %599 = vrot.lane.b32.xlu1 %v9314_v11, %s8924_s23 }
  0xbf   : > { %597 = vrot.lane.b32.xlu0 %v9306_v9, %s8924_s23 }
  0xc2   : > { %439 = vrot.lane.b32.xlu1 %v9338_v25, %s8922_s18 }
  0xc3   : > { %678 = vrot.lane.b32.xlu0 %v9306_v9, %s8925_s29 }
  0xc6   : > { %441 = vrot.lane.b32.xlu1 %v9346_v28, %s8922_s18 }
  0xc7   : > { %680 = vrot.lane.b32.xlu0 %v9314_v11, %s8925_s29 }
  0xc8   : > { %v9356_v35 = vpop.permute.xlu1 %415 }
  0xc9   : > { %v9358_v37 = vpop.permute.xlu0 %413 }
  0xca   : > { %522 = vrot.lane.b32.xlu1 %v9346_v28, %s8923_s16 }
  0xcb   : > { %520 = vrot.lane.b32.xlu0 %v9338_v25, %s8923_s16 }
  0xcc   : > { %v9365_v40 = vpop.permute.xlu1 %496 }
  0xcd   : > { %v9367_v41 = vpop.permute.xlu0 %494 }
  0xce   : > { %603 = vrot.lane.b32.xlu1 %v9346_v28, %s8924_s23 }
  0xcf   : > { %601 = vrot.lane.b32.xlu0 %v9338_v25, %s8924_s23 }
  0xd0   : > { %v9378_v46 = vpop.permute.xlu1 %575 }
  0xd1   : > { %v9380_v49 = vpop.permute.xlu0 %411 }
  0xd2   : > { %443 = vrot.lane.b32.xlu1 %v9375_v44, %s8922_s18 }
  0xd3   : > { %682 = vrot.lane.b32.xlu0 %v9338_v25, %s8925_s29 }
  0xd4   : > { %v9392_v55 = vpop.permute.xlu1 %492 }
  0xd5   : > { %v9394_v56 = vpop.permute.xlu0 %573 }
  0xd6   : > { %445 = vrot.lane.b32.xlu1 %v9390_v54, %s8922_s18 }
  0xd7   : > { %684 = vrot.lane.b32.xlu0 %v9346_v28, %s8925_s29 }
  0xd8   : > { %v9402_v61 = vpop.permute.xlu1 %654 }
  0xd9   : > { %v9404_v63 = vpop.permute.xlu0 %577 }
  0xda   : > { %526 = vrot.lane.b32.xlu1 %v9390_v54, %s8923_s16 }
  0xdb   : > { %524 = vrot.lane.b32.xlu0 %v9375_v44, %s8923_s16 }
  0xdc   : > { %v9416_v12 = vpop.permute.xlu1 %417 }
  0xdd   : > { %v9418_v15 = vpop.permute.xlu0 %656 }
  0xde   : > { %607 = vrot.lane.b32.xlu1 %v9390_v54, %s8924_s23 }
  0xdf   : > { %605 = vrot.lane.b32.xlu0 %v9375_v44, %s8924_s23 }
  0xe0   : > { %v9434_v38 = vpop.permute.xlu1 %419 }
  0xe1   : > { %v9436_v43 = vpop.permute.xlu0 %658 }
  0xe2   : > { %447 = vrot.lane.b32.xlu1 %v9429_v27, %s8922_s18 }
  0xe3   : > { %686 = vrot.lane.b32.xlu0 %v9375_v44, %s8925_s29 }
  0xe4   : > { %v9446_v51 = vpop.permute.xlu1 %500 }
  0xe5   : > { %v9448_v52 = vpop.permute.xlu0 %498 }
  0xe6   : > { %688 = vrot.lane.b32.xlu1 %v9390_v54, %s8925_s29 }
  0xe7   : > { %449 = vrot.lane.b32.xlu0 %v9443_v45, %s8922_s18 }
  0xe8   : > { %v9457_v2 = vpop.permute.xlu1 %581 }
  0xe9   : > { %v9459_v3 = vpop.permute.xlu0 %579 }
  0xea   : > { %528 = vrot.lane.b32.xlu1 %v9429_v27, %s8923_s16 }
  0xeb   : > { %451 = vrot.lane.b32.xlu0 %v9455_v0, %s8922_s18 }
  0xec   : > { %v9465_v5 = vpop.permute.xlu1 %421 }
  0xed   : > { %v9467_v18 = vpop.permute.xlu0 %660 }
  0xee   : > { %532 = vrot.lane.b32.xlu1 %v9455_v0, %s8923_s16 }
  0xef   : > { %530 = vrot.lane.b32.xlu0 %v9443_v45, %s8923_s16 }
  0xf0   : > { %v9477_v31 = vpop.permute.xlu1 %423 }
  0xf1   : > { %v9479_v10 = vpop.permute.xlu0 %662 }
  0xf2   : > { %611 = vrot.lane.b32.xlu1 %v9443_v45, %s8924_s23 }
  0xf3   : > { %609 = vrot.lane.b32.xlu0 %v9429_v27, %s8924_s23 }
  0xf4   : > { %v9490_v20 = vpop.permute.xlu1 %504 }
  0xf5   : > { %v9492_v21 = vpop.permute.xlu0 %502 }
  0xf6   : > { %690 = vrot.lane.b32.xlu1 %v9429_v27, %s8925_s29 }
  0xf7   : > { %613 = vrot.lane.b32.xlu0 %v9455_v0, %s8924_s23 }
  0xf8   : > { %v9502_v30 = vpop.permute.xlu1 %585 }
  0xf9   : > { %v9504_v32 = vpop.permute.xlu0 %583 }
  0xfa   : > { %453 = vrot.lane.b32.xlu1 %v9499_v6, %s8922_s18 }
  0xfb   : > { %692 = vrot.lane.b32.xlu0 %v9443_v45, %s8925_s29  ;;  %v251_v45 = vld [vmem:[%s9098_s22 + $0xb8] sm:$0xff] }
  0xfc   : > { %v9513_v59 = vpop.permute.xlu1 %425  ;;  %v9571_v19 = vsub.f32 %v227_v1, %v251_v45 }
  0xfd   : > { %v9515_v50 = vpop.permute.xlu0 %664 }
  0xfe   : > { %455 = vrot.lane.b32.xlu1 %v9511_v58, %s8922_s18  ;;  %14657 = vst [vmem:[#allocation45_spill] sm:$0xff] %v9571_v19  ;;  %v350_v23 = vrot.slane %v9571_v19, 6  ;;  %v387_v1 = vrot.slane %v9571_v19, 4 }
  0xff   : > { %694 = vrot.lane.b32.xlu0 %v9455_v0, %s8925_s29 }
 0x100   : > { %v9525_v39 = vpop.permute.xlu1 %427  ;;  %v9592_v45 = vsel %vm14511_vm0, %v348_v4, %v350_v23 }
 0x101   : > { %v9527_v33 = vpop.permute.xlu0 %666  ;;  %14658 = vst [vmem:[#allocation46_spill] sm:$0xff] %v9592_v45 }
 0x102   : > { %536 = vrot.lane.b32.xlu1 %v9511_v58, %s8923_s16 }
 0x103   : > { %534 = vrot.lane.b32.xlu0 %v9499_v6, %s8923_s16 }
 0x104   : > { %v9538_v53 = vpop.permute.xlu1 %508 }
 0x105   : > { %v9540_v17 = vpop.permute.xlu0 %506 }
 0x106   : > { %617 = vrot.lane.b32.xlu1 %v9511_v58, %s8924_s23 }
 0x107   : > { %615 = vrot.lane.b32.xlu0 %v9499_v6, %s8924_s23 }
 0x108   : > { %v9550_v8 = vpop.permute.xlu1 %589 }
 0x109   : > { %v9552_v48 = vpop.permute.xlu0 %587 }
 0x10a   : > { %457 = vrot.lane.b32.xlu1 %v9547_v7, %s8922_s18 }
 0x10b   : > { %696 = vrot.lane.b32.xlu0 %v9499_v6, %s8925_s29 }
 0x10c   : > { %v9561_v22 = vpop.permute.xlu1 %429 }
 0x10d   : > { %v9563_v0 = vpop.permute.xlu0 %668 }
 0x10e   : > { %459 = vrot.lane.b32.xlu1 %v9559_v29, %s8922_s18 }
 0x10f   : > { %698 = vrot.lane.b32.xlu0 %v9511_v58, %s8925_s29  ;;  %v381_v58 = vrot.slane %v9571_v19, 5  ;;  %v736_v19 = vsel %vm735_vm3, %v9137_v16, %v9380_v49 }
 0x110   : > { %v9573_v27 = vpop.permute.xlu1 %670 }
 0x111   : > { %v9575_v6 = vpop.permute.xlu0 %431  ;;  %v400_v11 = vsel %vm14511_vm0, %v350_v23, %v381_v58 }
 0x112   : > { %540 = vrot.lane.b32.xlu1 %v9559_v29, %s8923_s16  ;;  %v9605_v9 = vsel %vm14506_vm2, %v400_v11, %v387_v1 }
 0x113   : > { %538 = vrot.lane.b32.xlu0 %v9547_v7, %s8923_s16  ;;  %14659 = vst [vmem:[#allocation47_spill] sm:$0xff] %v9605_v9 }
 0x114   : > { %v9582_v54 = vpop.permute.xlu1 %510 }
 0x115   : > { %v9584_v44 = vpop.permute.xlu0 %433 }
 0x116   : > { %621 = vrot.lane.b32.xlu1 %v9559_v29, %s8924_s23 }
 0x117   : > { %619 = vrot.lane.b32.xlu0 %v9547_v7, %s8924_s23 }
 0x118   : > { %v9595_v28 = vpop.permute.xlu1 %514 }
 0x119   : > { %v9597_v25 = vpop.permute.xlu0 %512 }
 0x11a   : > { %461 = vrot.lane.b32.xlu1 %v9592_v45, %s8922_s18 }
 0x11b   : > { %700 = vrot.lane.b32.xlu0 %v9547_v7, %s8925_s29 }
 0x11c   : > { %v9607_v62 = vpop.permute.xlu1 %593 }
 0x11d   : > { %v9609_v4 = vpop.permute.xlu0 %591 }
 0x11e   : > { %463 = vrot.lane.b32.xlu1 %v9605_v9, %s8922_s18 }
 0x11f   : > { %702 = vrot.lane.b32.xlu0 %v9559_v29, %s8925_s29 }
 0x120   : > { %v9615_v58 = vpop.permute.xlu1 %672 }
 0x121   : > { %v9617_v23 = vpop.permute.xlu0 %595 }
 0x122   : > { %14660 = vst [vmem:[#allocation48_spill] sm:$0xff] %v9617_v23  ;;  %544 = vrot.lane.b32.xlu1 %v9605_v9, %s8923_s16  ;;  %v737_v23 = vsel %vm735_vm3, %v9124_v14, %v9358_v37 }
 0x123   : > { %542 = vrot.lane.b32.xlu0 %v9592_v45, %s8923_s16  ;;  %v765_v16 = vsel %vm14521_vm4, %v737_v23, %v9367_v41  ;;  %v738_v41 = vsel %vm735_vm3, %v9121_v13, %v9356_v35 }
 0x124   : > { %v9623_v11 = vpop.permute.xlu1 %435  ;;  %v793_v49 = vsel %vm14522_vm5, %v765_v16, %v9378_v46  ;;  %v766_v46 = vsel %vm14521_vm4, %v738_v41, %v9365_v40 }
 0x125   : > { %14661 = vst [vmem:[#allocation49_spill] sm:$0xff] %v9623_v11  ;;  %v9625_v1 = vpop.permute.xlu0 %674  ;;  %v764_v11 = vsel %vm14521_vm4, %v736_v19, %v9392_v55  ;;  %v9663_v37 = vsel %vm819_vm6, %v793_v49, %v9418_v15 }
 0x126   : > { %625 = vrot.lane.b32.xlu1 %v9605_v9, %s8924_s23  ;;  %v792_v19 = vsel %vm14522_vm5, %v764_v11, %v9394_v56  ;;  %14663 = vst [vmem:[#allocation51_spill] sm:$0xff] %v9663_v37  ;;  %v794_v56 = vsel %vm14522_vm5, %v766_v46, %v9404_v63  ;;  %v739_v63 = vsel %vm735_vm3, %v9161_v24, %v9416_v12 }
 0x127   : > { %623 = vrot.lane.b32.xlu0 %v9592_v45, %s8924_s23  ;;  %v9659_v14 = vsel %vm819_vm6, %v792_v19, %v9402_v61  ;;  %v9682_v13 = vsel %vm819_vm6, %v794_v56, %v9436_v43  ;;  %v767_v43 = vsel %vm14521_vm4, %v739_v63, %v9448_v52  ;;  %v740_v24 = vsel %vm735_vm3, %v9169_v26, %v9434_v38 }
 0x128   : > { %v9634_v29 = vpop.permute.xlu1 %437  ;;  %14664 = vst [vmem:[#allocation52_spill] sm:$0xff] %v9682_v13  ;;  %v795_v23 = vsel %vm14522_vm5, %v767_v43, %v9459_v3  ;;  %v768_v12 = vsel %vm14521_vm4, %v740_v24, %v9446_v51  ;;  %v741_v46 = vsel %vm735_vm3, %v9193_v34, %v9465_v5  ;;  %v742_v34 = vsel %vm735_vm3, %v9201_v36, %v9477_v31 }
 0x129   : > { %14662 = vst [vmem:[#allocation50_spill] sm:$0xff] %v9634_v29  ;;  %v9636_v7 = vpop.permute.xlu0 %676  ;;  %v9709_v49 = vsel %vm819_vm6, %v795_v23, %v9467_v18  ;;  %v796_v52 = vsel %vm14522_vm5, %v768_v12, %v9457_v2  ;;  %v769_v56 = vsel %vm14521_vm4, %v741_v46, %v9492_v21  ;;  %v770_v5 = vsel %vm14521_vm4, %v742_v34, %v9490_v20 }
 0x12a   : > { %706 = vrot.lane.b32.xlu1 %v9605_v9, %s8925_s29  ;;  %14665 = vst [vmem:[#allocation53_spill] sm:$0xff] %v9709_v49  ;;  %v9728_v26 = vsel %vm819_vm6, %v796_v52, %v9479_v10  ;;  %v797_v63 = vsel %vm14522_vm5, %v769_v56, %v9504_v32  ;;  %v798_v21 = vsel %vm14522_vm5, %v770_v5, %v9502_v30 }
 0x12b   : > { %704 = vrot.lane.b32.xlu0 %v9592_v45, %s8925_s29  ;;  %v9771_v24 = vsel %vm819_vm6, %v797_v63, %v9515_v50  ;;  %v9790_v12 = vsel %vm819_vm6, %v798_v21, %v9527_v33  ;;  %v743_v20 = vsel %vm735_vm3, %v9222_v42, %v9513_v59  ;;  %v744_v42 = vsel %vm735_vm3, %v9233_v47, %v9525_v39 }
 0x12c   : > { %v9653_v55 = vpop.permute.xlu1 %518  ;;  %14666 = vst [vmem:[#allocation54_spill] sm:$0xff] %v9771_v24  ;;  %v771_v52 = vsel %vm14521_vm4, %v743_v20, %v9540_v17  ;;  %v746_v21 = vsel %vm735_vm3, %v9270_v60, %v9575_v6  ;;  %v14497_v45 = vrot.slane %v9682_v13, 1 }
 0x12d   : > { %v9655_v29 = vpop.permute.xlu0 %516  ;;  %v799_v46 = vsel %vm14522_vm5, %v771_v52, %v9552_v48  ;;  %v772_v48 = vsel %vm14521_vm4, %v744_v42, %v9538_v53  ;;  %v745_v53 = vsel %vm735_vm3, %v9260_v57, %v9561_v22  ;;  %v774_v52 = vsel %vm14521_vm4, %v746_v21, %v9597_v25  ;;  %v14671_v25 = vld [vmem:[#allocation19_spill] sm:$0xff] }
 0x12e   : > { %876 = vrot.lane.b32.xlu1 %v9663_v37, %s8926_s30  ;;  %v9825_v34 = vsel %vm819_vm6, %v799_v46, %v9563_v0  ;;  %v800_v59 = vsel %vm14522_vm5, %v772_v48, %v9550_v8  ;;  %v773_v20 = vsel %vm14521_vm4, %v745_v53, %v9582_v54  ;;  %v802_v46 = vsel %vm14522_vm5, %v774_v52, %v9607_v62 }
 0x12f   : > { %874 = vrot.lane.b32.xlu0 %v9659_v14, %s8926_s30  ;;  %14667 = vst [vmem:[#allocation55_spill] sm:$0xff] %v9825_v34  ;;  %v9844_v5 = vsel %vm819_vm6, %v800_v59, %v9573_v27  ;;  %v801_v57 = vsel %vm14522_vm5, %v773_v20, %v9609_v4  ;;  %v9890_v54 = vsel %vm819_vm6, %v802_v46, %v9625_v1  ;;  %v14672_v4 = vld [vmem:[#allocation48_spill] sm:$0xff]  ;;  %v1869_v52 = vrot.slane %v9663_v37, 1  ;;  %v14675_v46 = vld [vmem:[#allocation49_spill] sm:$0xff] }
 0x130   : > { %v9676_v61 = vpop.permute.xlu1 %599  ;;  %14668 = vst [vmem:[#allocation56_spill] sm:$0xff] %v9844_v5  ;;  %v9886_v6 = vsel %vm819_vm6, %v801_v57, %v9615_v58  ;;  %14670 = vst [vmem:[#allocation58_spill] sm:$0xff] %v9890_v54  ;;  %v747_v42 = vsel %vm735_vm3, %v14671_v25, %v9584_v44  ;;  %v14676_v57 = vld [vmem:[#allocation22_spill] sm:$0xff] }
 0x131   : > { %v9678_v15 = vpop.permute.xlu0 %597  ;;  %14669 = vst [vmem:[#allocation57_spill] sm:$0xff] %v9886_v6  ;;  %v775_v62 = vsel %vm14521_vm4, %v747_v42, %v9595_v28  ;;  %v748_v25 = vsel %vm735_vm3, %v14676_v57, %v14675_v46 }
 0x132   : > { %982 = vrot.lane.b32.xlu1 %v9659_v14, %s8927_s4  ;;  %v803_v58 = vsel %vm14522_vm5, %v775_v62, %v14672_v4  ;;  %v776_v42 = vsel %vm14521_vm4, %v748_v25, %v9655_v29  ;;  %v1868_v62 = vrot.slane %v9659_v14, 1 }
 0x133   : > { %878 = vrot.lane.b32.xlu0 %v9682_v13, %s8926_s30  ;;  %v9909_v59 = vsel %vm819_vm6, %v803_v58, %v9636_v7  ;;  %v804_v4 = vsel %vm14522_vm5, %v776_v42, %v9678_v15 }
 0x134   : > { %v9688_v35 = vpop.permute.xlu1 %439  ;;  %v1870_v57 = vsel %vm1384_vm7, %v1868_v62, %v1869_v52 }
 0x135   : > { %v9690_v40 = vpop.permute.xlu0 %678 }
 0x136   : > { %986 = vrot.lane.b32.xlu1 %v9682_v13, %s8927_s4  ;;  %v9954_v46 = vsel %vm819_vm6, %v804_v4, %v9690_v40  ;;  %v1968_v40 = vrot.slane %v9663_v37, 2  ;;  %v1967_v4 = vrot.slane %v9659_v14, 2 }
 0x137   : > { %984 = vrot.lane.b32.xlu0 %v9663_v37, %s8927_s4  ;;  %14678 = vst [vmem:[#allocation22_spill] sm:$0xff] %v9954_v46 }
 0x138   : > { %v9703_v11 = vpop.permute.xlu1 %441 }
 0x139   : > { %v9705_v16 = vpop.permute.xlu0 %680 }
 0x13a   : > { %1090 = vrot.lane.b32.xlu1 %v9659_v14, %s8928_s25 }
 0x13b   : > { %880 = vrot.lane.b32.xlu0 %v9709_v49, %s8926_s30 }
 0x13c   : > { %v9722_v3 = vpop.permute.xlu1 %522 }
 0x13d   : > { %v9724_v18 = vpop.permute.xlu0 %520 }
 0x13e   : > { %882 = vrot.lane.b32.xlu1 %v9728_v26, %s8926_s30 }
 0x13f   : > { %1092 = vrot.lane.b32.xlu0 %v9663_v37, %s8928_s25 }
 0x140   : > { %v9734_v38 = vpop.permute.xlu1 %603 }
 0x141   : > { %v9736_v51 = vpop.permute.xlu0 %601 }
 0x142   : > { %988 = vrot.lane.b32.xlu1 %v9709_v49, %s8927_s4 }
 0x143   : > { %1094 = vrot.lane.b32.xlu0 %v9682_v13, %s8928_s25 }
 0x144   : > { %v9742_v2 = vpop.permute.xlu1 %443 }
 0x145   : > { %v9744_v10 = vpop.permute.xlu0 %682 }
 0x146   : > { %1200 = vrot.lane.b32.xlu1 %v9663_v37, %s8929_s27 }
 0x147   : > { %1198 = vrot.lane.b32.xlu0 %v9659_v14, %s8929_s27 }
 0x148   : > { %v9750_v19 = vpop.permute.xlu1 %445 }
 0x149   : > { %v9752_v41 = vpop.permute.xlu0 %684 }
 0x14a   : > { %1202 = vrot.lane.b32.xlu1 %v9682_v13, %s8929_s27 }
 0x14b   : > { %990 = vrot.lane.b32.xlu0 %v9728_v26, %s8927_s4 }
 0x14c   : > { %v9765_v43 = vpop.permute.xlu1 %526 }
 0x14d   : > { %v9767_v23 = vpop.permute.xlu0 %524 }
 0x14e   : > { %1096 = vrot.lane.b32.xlu1 %v9709_v49, %s8928_s25 }
 0x14f   : > { %884 = vrot.lane.b32.xlu0 %v9771_v24, %s8926_s30 }
 0x150   : > { %v9784_v32 = vpop.permute.xlu1 %607 }
 0x151   : > { %v9786_v50 = vpop.permute.xlu0 %605 }
 0x152   : > { %1098 = vrot.lane.b32.xlu1 %v9728_v26, %s8928_s25 }
 0x153   : > { %886 = vrot.lane.b32.xlu0 %v9790_v12, %s8926_s30 }
 0x154   : > { %v9796_v36 = vpop.permute.xlu1 %447 }
 0x155   : > { %v9798_v31 = vpop.permute.xlu0 %686 }
 0x156   : > { %1204 = vrot.lane.b32.xlu1 %v9709_v49, %s8929_s27 }
 0x157   : > { %992 = vrot.lane.b32.xlu0 %v9771_v24, %s8927_s4 }
 0x158   : > { %v9804_v30 = vpop.permute.xlu1 %688 }
 0x159   : > { %v9806_v33 = vpop.permute.xlu0 %449 }
 0x15a   : > { %1206 = vrot.lane.b32.xlu1 %v9728_v26, %s8929_s27 }
 0x15b   : > { %994 = vrot.lane.b32.xlu0 %v9790_v12, %s8927_s4 }
 0x15c   : > { %v9819_v56 = vpop.permute.xlu1 %528 }
 0x15d   : > { %v9821_v63 = vpop.permute.xlu0 %451 }
 0x15e   : > { %1100 = vrot.lane.b32.xlu1 %v9771_v24, %s8928_s25 }
 0x15f   : > { %888 = vrot.lane.b32.xlu0 %v9825_v34, %s8926_s30 }
 0x160   : > { %v9838_v17 = vpop.permute.xlu1 %532 }
 0x161   : > { %v9840_v0 = vpop.permute.xlu0 %530 }
 0x162   : > { %1102 = vrot.lane.b32.xlu1 %v9790_v12, %s8928_s25 }
 0x163   : > { %890 = vrot.lane.b32.xlu0 %v9844_v5, %s8926_s30 }
 0x164   : > { %v9850_v39 = vpop.permute.xlu1 %611 }
 0x165   : > { %v9852_v47 = vpop.permute.xlu0 %609 }
 0x166   : > { %1208 = vrot.lane.b32.xlu1 %v9771_v24, %s8929_s27 }
 0x167   : > { %996 = vrot.lane.b32.xlu0 %v9825_v34, %s8927_s4 }
 0x168   : > { %v9858_v8 = vpop.permute.xlu1 %690 }
 0x169   : > { %v9860_v27 = vpop.permute.xlu0 %613 }
 0x16a   : > { %1210 = vrot.lane.b32.xlu1 %v9790_v12, %s8929_s27 }
 0x16b   : > { %998 = vrot.lane.b32.xlu0 %v9844_v5, %s8927_s4 }
 0x16c   : > { %v9880_v22 = vpop.permute.xlu1 %453 }
 0x16d   : > { %v9882_v60 = vpop.permute.xlu0 %692 }
 0x16e   : > { %894 = vrot.lane.b32.xlu1 %v9890_v54, %s8926_s30 }
 0x16f   : > { %892 = vrot.lane.b32.xlu0 %v9886_v6, %s8926_s30 }
 0x170   : > { %v9903_v48 = vpop.permute.xlu1 %455 }
 0x171   : > { %v9905_v1 = vpop.permute.xlu0 %694 }
 0x172   : > { %896 = vrot.lane.b32.xlu1 %v9909_v59, %s8926_s30 }
 0x173   : > { %1104 = vrot.lane.b32.xlu0 %v9825_v34, %s8928_s25 }
 0x174   : > { %v9915_v44 = vpop.permute.xlu1 %536 }
 0x175   : > { %v9917_v28 = vpop.permute.xlu0 %534 }
 0x176   : > { %1000 = vrot.lane.b32.xlu1 %v9886_v6, %s8927_s4 }
 0x177   : > { %1106 = vrot.lane.b32.xlu0 %v9844_v5, %s8928_s25 }
 0x178   : > { %v9923_v53 = vpop.permute.xlu1 %617 }
 0x179   : > { %14673 = vst [vmem:[#allocation19_spill] sm:$0xff] %v9923_v53  ;;  %v9925_v7 = vpop.permute.xlu0 %615  ;;  %v14680_v53 = vld [vmem:[#allocation23_spill] sm:$0xff] }
 0x17a   : > { %1212 = vrot.lane.b32.xlu1 %v9825_v34, %s8929_s27 }
 0x17b   : > { %1002 = vrot.lane.b32.xlu0 %v9890_v54, %s8927_s4 }
 0x17c   : > { %v9931_v21 = vpop.permute.xlu1 %457 }
 0x17d   : > { %14674 = vst [vmem:[#allocation48_spill] sm:$0xff] %v9931_v21  ;;  %v9933_v20 = vpop.permute.xlu0 %696  ;;  %v14679_v21 = vld [vmem:[#allocation50_spill] sm:$0xff] }
 0x17e   : > { %1214 = vrot.lane.b32.xlu1 %v9844_v5, %s8929_s27  ;;  %v749_v29 = vsel %vm735_vm3, %v14680_v53, %v14679_v21  ;;  %v1943_v53 = vadd.f32 %v1870_v57, %v9659_v14  ;;  %v2067_v57 = vrot.slane %v9663_v37, 3 }
 0x17f   : > { %1004 = vrot.lane.b32.xlu0 %v9909_v59, %s8927_s4  ;;  %v777_v15 = vsel %vm14521_vm4, %v749_v29, %v9653_v55  ;;  %v1872_v55 = vsel %vm1384_vm7, %v1869_v52, %v14497_v45  ;;  %v1970_v29 = vrot.slane %v9682_v13, 2  ;;  %v2066_v45 = vrot.slane %v9659_v14, 3 }
 0x180   : > { %v9948_v58 = vpop.permute.xlu1 %459  ;;  %v805_v25 = vsel %vm14522_vm5, %v777_v15, %v9676_v61  ;;  %v1969_v61 = vsel %vm1538_vm8, %v1967_v4, %v1968_v40  ;;  %v1944_v52 = vadd.f32 %v1872_v55, %v9663_v37 }
 0x181   : > { %14677 = vst [vmem:[#allocation49_spill] sm:$0xff] %v9948_v58  ;;  %v9950_v9 = vpop.permute.xlu0 %698  ;;  %v9977_v21 = vsel %vm819_vm6, %v805_v25, %v9705_v16  ;;  %v2042_v25 = vadd.f32 %v1969_v61, %v1943_v53  ;;  %v2068_v4 = vsel %vm14579_vm9, %v2066_v45, %v2067_v57  ;;  %v2069_v58 = vrot.slane %v9682_v13, 3 }
 0x182   : > { %1108 = vrot.lane.b32.xlu1 %v9886_v6, %s8928_s25 }
 0x183   : > { %898 = vrot.lane.b32.xlu0 %v9954_v46, %s8926_s30  ;;  %v2141_v55 = vadd.f32 %v2068_v4, %v2042_v25 }
 0x184   : > { %v9970_v42 = vpop.permute.xlu1 %540 }
 0x185   : > { %14681 = vst [vmem:[#allocation50_spill] sm:$0xff] %v9970_v42  ;;  %v9972_v62 = vpop.permute.xlu0 %538  ;;  %v2166_v42 = vrot.slane %v9663_v37, 4  ;;  %v2168_v37 = vrot.slane %v9682_v13, 4 }
 0x186   : > { %14682 = vst [vmem:[#allocation23_spill] sm:$0xff] %v9972_v62  ;;  %900 = vrot.lane.b32.xlu1 %v9977_v21, %s8926_s30  ;;  %v2165_v62 = vrot.slane %v9659_v14, 4 }
 0x187   : > { %1110 = vrot.lane.b32.xlu0 %v9890_v54, %s8928_s25 }
 0x188   : > { %v9990_v16 = vpop.permute.xlu1 %621  ;;  %v2167_v45 = vsel %vm14512_vm10, %v2165_v62, %v2166_v42 }
 0x189   : > { %14683 = vst [vmem:[#allocation59_spill] sm:$0xff] %v9990_v16  ;;  %v9992_v15 = vpop.permute.xlu0 %619  ;;  %v1971_v16 = vsel %vm1538_vm8, %v1968_v40, %v1970_v29  ;;  %v2070_v40 = vsel %vm14579_vm9, %v2067_v57, %v2069_v58  ;;  %v10020_v25 = vadd.f32 %v2167_v45, %v2141_v55  ;;  %v2169_v57 = vsel %vm14512_vm10, %v2166_v42, %v2168_v37 }
 0x18a   : > { %14684 = vst [vmem:[#allocation60_spill] sm:$0xff] %v9992_v15  ;;  %1006 = vrot.lane.b32.xlu1 %v9954_v46, %s8927_s4  ;;  %v2043_v61 = vadd.f32 %v1971_v16, %v1944_v52  ;;  %v14689_v52 = vld [vmem:[#allocation26_spill] sm:$0xff] }
 0x18b   : > { %1112 = vrot.lane.b32.xlu0 %v9909_v59, %s8928_s25  ;;  %v750_v4 = vsel %vm735_vm3, %v14689_v52, %v9688_v35  ;;  %v10039_v35 = vmul.f32 0.023647603, %v10020_v25 }
 0x18c   : > { %v10004_v15 = vpop.permute.xlu1 %461  ;;  %v2142_v16 = vadd.f32 %v2070_v40, %v2043_v61  ;;  %v778_v62 = vsel %vm14521_vm4, %v750_v4, %v9724_v18  ;;  %v1873_v18 = vrot.slane %v9709_v49, 1 }
 0x18d   : > { %14685 = vst [vmem:[#allocation61_spill] sm:$0xff] %v10004_v15  ;;  %v10006_v53 = vpop.permute.xlu0 %700  ;;  %v806_v55 = vsel %vm14522_vm5, %v778_v62, %v9736_v51  ;;  %v14696_v62 = vld [vmem:[#allocation27_spill] sm:$0xff] }
 0x18e   : > { %14686 = vst [vmem:[#allocation62_spill] sm:$0xff] %v10006_v53  ;;  %1218 = vrot.lane.b32.xlu1 %v9890_v54, %s8929_s27  ;;  %v10041_v40 = vadd.f32 %v2169_v57, %v2142_v16  ;;  %v10045_v52 = vsel %vm819_vm6, %v806_v55, %v9744_v10  ;;  %v14695_v16 = vrot.slane %v9682_v13, 1  ;;  %v751_v57 = vsel %vm735_vm3, %v14696_v62, %v9703_v11 }
 0x18f   : > { %1216 = vrot.lane.b32.xlu0 %v9886_v6, %s8929_s27  ;;  %14692 = vst [vmem:[#allocation66_spill] sm:$0xff] %v10045_v52  ;;  %v779_v55 = vsel %vm14521_vm4, %v751_v57, %v9722_v3 }
 0x190   : > { %v10016_v15 = vpop.permute.xlu1 %463  ;;  %v10057_v4 = vmul.f32 0.023647603, %v10041_v40  ;;  %v1874_v10 = vsel %vm1384_vm7, %v14695_v16, %v1873_v18 }
 0x191   : > { %14687 = vst [vmem:[#allocation63_spill] sm:$0xff] %v10016_v15  ;;  %v10018_v53 = vpop.permute.xlu0 %702  ;;  %v1945_v11 = vadd.f32 %v1874_v10, %v9682_v13  ;;  %v2456_v10 = vmul.f32 0.030364122, %v10020_v25 }
 0x192   : > { %14688 = vst [vmem:[#allocation64_spill] sm:$0xff] %v10018_v53  ;;  %1220 = vrot.lane.b32.xlu1 %v9909_v59, %s8929_s27 }
 0x193   : > { %1008 = vrot.lane.b32.xlu0 %v9977_v21, %s8927_s4 }
 0x194   : > { %v10034_v45 = vpop.permute.xlu1 %544 }
 0x195   : > { %14690 = vst [vmem:[#allocation26_spill] sm:$0xff] %v10034_v45  ;;  %v10036_v61 = vpop.permute.xlu0 %542  ;;  %v807_v45 = vsel %vm14522_vm5, %v779_v55, %v9734_v38  ;;  %v2071_v38 = vrot.slane %v9709_v49, 3 }
 0x196   : > { %14691 = vst [vmem:[#allocation65_spill] sm:$0xff] %v10036_v61  ;;  %902 = vrot.lane.b32.xlu1 %v10045_v52, %s8926_s30 }
 0x197   : > { %2360 = vrot.lane.b32.xlu0 %v10039_v35, %s8926_s30 }
 0x198   : > { %v10052_v51 = vpop.permute.xlu1 %625 }
 0x199   : > { %14693 = vst [vmem:[#allocation67_spill] sm:$0xff] %v10052_v51  ;;  %v10054_v42 = vpop.permute.xlu0 %623  ;;  %v1972_v51 = vrot.slane %v9709_v49, 2 }
 0x19a   : > { %14694 = vst [vmem:[#allocation68_spill] sm:$0xff] %v10054_v42  ;;  %2362 = vrot.lane.b32.xlu1 %v10057_v4, %s8926_s30  ;;  %v10082_v42 = vsel %vm819_vm6, %v807_v45, %v9752_v41  ;;  %v14699_v41 = vrot.slane %v9728_v26, 1 }
 0x19b   : > { %1114 = vrot.lane.b32.xlu0 %v9954_v46, %s8928_s25  ;;  %v1973_v3 = vsel %vm1538_vm8, %v1970_v29, %v1972_v51  ;;  %v14503_v29 = vrot.slane %v9728_v26, 2 }
 0x19c   : > { %v10074_v15 = vpop.permute.xlu1 %706  ;;  %v2044_v62 = vadd.f32 %v1973_v3, %v1945_v11  ;;  %v1876_v45 = vsel %vm1384_vm7, %v1873_v18, %v14699_v41  ;;  %v2457_v3 = vmul.f32 0.030364122, %v10041_v40  ;;  %v2923_v41 = vlaneseq }
 0x19d   : > { %14697 = vst [vmem:[#allocation27_spill] sm:$0xff] %v10074_v15  ;;  %v10076_v16 = vpop.permute.xlu0 %704  ;;  %v2072_v15 = vsel %vm14579_vm9, %v2069_v58, %v2071_v38  ;;  %v1946_v61 = vadd.f32 %v1876_v45, %v9709_v49  ;;  %v1975_v58 = vsel %vm1538_vm8, %v1972_v51, %v14503_v29  ;;  %v14509_v51 = vrot.slane %v9728_v26, 4 }
 0x19e   : > { %14698 = vst [vmem:[#allocation69_spill] sm:$0xff] %v10076_v16  ;;  %1116 = vrot.lane.b32.xlu1 %v9977_v21, %s8928_s25  ;;  %v2170_v16 = vrot.slane %v9709_v49, 4  ;;  %v2143_v18 = vadd.f32 %v2072_v15, %v2044_v62  ;;  %v10117_v45 = vand.u32 127, %v2923_v41 }
 0x19f   : > { %904 = vrot.lane.b32.xlu0 %v10082_v42, %s8926_s30 }
 0x1a0   : > { %v10090_v57 = vpop.permute.xlu1 %876  ;;  %14701 = vst [vmem:[#allocation71_spill] sm:$0xff] %v10117_v45  ;;  %v2171_v49 = vsel %vm14512_vm10, %v2168_v37, %v2170_v16 }
 0x1a1   : > { %v10092_v55 = vpop.permute.xlu0 %874  ;;  %v10124_v62 = vadd.f32 %v2171_v49, %v2143_v18 }
 0x1a2   : > { %1010 = vrot.lane.b32.xlu1 %v10045_v52, %s8927_s4 }
 0x1a3   : > { %2504 = vrot.lane.b32.xlu0 %v2456_v10, %s8927_s4  ;;  %v14504_v10 = vrot.slane %v9728_v26, 3  ;;  %v10152_v29 = vmul.f32 0.023647603, %v10124_v62 }
 0x1a4   : > { %v10105_v53 = vpop.permute.xlu1 %982 }
 0x1a5   : > { %v10107_v11 = vpop.permute.xlu0 %878  ;;  %v2074_v37 = vsel %vm14579_vm9, %v2071_v38, %v14504_v10  ;;  %v14704_v38 = vld [vmem:[#allocation29_spill] sm:$0xff] }
 0x1a6   : > { %14700 = vst [vmem:[#allocation70_spill] sm:$0xff] %v10107_v11  ;;  %2506 = vrot.lane.b32.xlu1 %v2457_v3, %s8927_s4  ;;  %v2045_v11 = vadd.f32 %v1975_v58, %v1946_v61  ;;  %v10126_v3 = vshrl.u32 %v2923_v41, 7 }
 0x1a7   : > { %1222 = vrot.lane.b32.xlu0 %v9954_v46, %s8929_s27  ;;  %v10129_v46 = vmul.u32 2, %v10117_v45 }
 0x1a8   : > { %v10120_v13 = vpop.permute.xlu1 %986  ;;  %14702 = vst [vmem:[#allocation72_spill] sm:$0xff] %v10126_v3  ;;  %v10140_v49 = vadd.s32 8, %v10126_v3  ;;  %v2144_v18 = vadd.f32 %v2074_v37, %v2045_v11  ;;  %v752_v11 = vsel %vm735_vm3, %v14704_v38, %v9742_v2  ;;  %v14705_v37 = vmov 0 }
 0x1a9   : > { %v10122_v15 = vpop.permute.xlu0 %984  ;;  %vm2935_vm11 = vcmp.eq.s32.totalorder %v10126_v3, %v10129_v46  ;;  %v10145_v61 = vadd.s32 1, %v10129_v46  ;;  %v780_v10 = vsel %vm14521_vm4, %v752_v11, %v9767_v23  ;;  %v10177_v2 = vadd.s32 16, %v10126_v3 }
 0x1aa   : > { %1224 = vrot.lane.b32.xlu1 %v9977_v21, %s8929_s27  ;;  %14703 = vst [vmem:[#allocation73_spill] sm:$0xff] %v10140_v49  ;;  %vm2936_vm12 = vcmp.eq.s32.totalorder %v10140_v49, %v10129_v46  ;;  %v10180_v38 = vadd.s32 24, %v10126_v3  ;;  %v808_v23 = vsel %vm14522_vm5, %v780_v10, %v9786_v50  ;;  %v2928_v10 = vadd.s32 32, %v10126_v3 }
 0x1ab   : > { %1012 = vrot.lane.b32.xlu0 %v10082_v42, %s8927_s4  ;;  %vm2944_vm13 = vcmp.eq.s32.totalorder %v10126_v3, %v10145_v61  ;;  %vm2945_vm14 = vcmp.eq.s32.totalorder %v10140_v49, %v10145_v61  ;;  %v2173_v49 = vsel %vm14512_vm10, %v2170_v16, %v14509_v51  ;;  %14708 = vst [vmem:[#allocation74_spill] sm:$0xff] %v10177_v2  ;;  %v14513_v51 = vmov 0.5|0.5  }
 0x1ac   : > { %v10147_v41 = vpop.permute.xlu1 %1090  ;;  %vm10163_vm15 = vmor %vm2935_vm11, %vm2944_vm13  ;;  %14709 = vst [vmem:[#allocation75_spill] sm:$0xff] %v10180_v38  ;;  %v10184_v11 = vadd.f32 %v2173_v49, %v2144_v18  ;;  %vm2938_vm13 = vcmp.eq.s32.totalorder %v10180_v38, %v10129_v46  ;;  %v10209_v50 = vsel %vm819_vm6, %v808_v23, %v9798_v31  ;;  %v2929_v49 = vadd.s32 40, %v10126_v3 }
 0x1ad   : > { %v10149_v58 = vpop.permute.xlu0 %880  ;;  %v14706_v37 = vsel %vm10163_vm15, 4294967295, %v14705_v37  ;;  %vm2953_vm2 = vmor %vm2936_vm12, %vm2945_vm14  ;;  %vm2937_vm12 = vcmp.eq.s32.totalorder %v10177_v2, %v10129_v46  ;;  %vm2947_vm14 = vcmp.eq.s32.totalorder %v10180_v38, %v10145_v61  ;;  %v14714_v31 = vmov 0 }
 0x1ae   : > { %14707 = vst [vmem:[#allocation29_spill] sm:$0xff] %v14706_v37  ;;  %2600 = vrot.lane.b32.xlu1 %v10039_v35, %s8928_s25  ;;  %vm10188_vm11 = vmpackc.low %vm2953_vm2, %vm10163_vm15  ;;  %v14710_v35 = vmov 0  ;;  %vm2946_vm2 = vcmp.eq.s32.totalorder %v10177_v2, %v10145_v61  ;;  %v10221_v18 = vmul.f32 0.023647603, %v10184_v11  ;;  %v14718_v37 = vmov 0.5|0.5  }
 0x1af   : > { %2364 = vrot.lane.b32.xlu0 %v10152_v29, %s8926_s30  ;;  %v14711_v35 = vsel %vm10188_vm11, 4294967295, %v14710_v35  ;;  %8636 = vmatprep.subr.msk.bf16.mxu0 %vm10188_vm11, %v14513_v51  ;;  %vm2954_vm1 = vmor %vm2937_vm12, %vm2946_vm2  ;;  %vm2939_vm12 = vcmp.eq.s32.totalorder %v2928_v10, %v10129_v46  ;;  %vm2948_vm2 = vcmp.eq.s32.totalorder %v2928_v10, %v10145_v61  ;;  %v1877_v2 = vrot.slane %v9771_v24, 1 }
 0x1b0   : > { %14712 = vst [vmem:[#allocation76_spill] sm:$0xff] %v14711_v35  ;;  %v10192_v45 = vpop.permute.xlu1 %882  ;;  %8638 = vmatpush3.bf16.msk.msra.mxu0 %vm10188_vm11, %v14513_v51  ;;  %vm2955_vm0 = vmor %vm2938_vm13, %vm2947_vm14  ;;  %vm2940_vm13 = vcmp.eq.s32.totalorder %v2929_v49, %v10129_v46  ;;  %vm2949_vm14 = vcmp.eq.s32.totalorder %v2929_v49, %v10145_v61  ;;  %v14719_v35 = vld [vmem:[#allocation30_spill] sm:$0xff] }
 0x1b1   : > { %14713 = vst [vmem:[#allocation77_spill] sm:$0xff] %v10192_v45  ;;  %v10194_v16 = vpop.permute.xlu0 %1092  ;;  %vm10223_vm10 = vmpackc.low %vm2955_vm0, %vm2954_vm1  ;;  %v753_v38 = vsel %vm735_vm3, %v14719_v35, %v9750_v19  ;;  %v2930_v19 = vadd.s32 48, %v10126_v3  ;;  %v2931_v35 = vadd.s32 56, %v10126_v3 }
 0x1b2   : > { %1118 = vrot.lane.b32.xlu1 %v10045_v52, %s8928_s25  ;;  %v14715_v31 = vsel %vm10223_vm10, 4294967295, %v14714_v31  ;;  %8640 = vmatprep.subr.msk.bf16.mxu0 %vm10223_vm10, %v14718_v37  ;;  %vm10245_vm0 = vmor %vm2939_vm12, %vm2948_vm2 }
 0x1b3   : > { %906 = vrot.lane.b32.xlu0 %v10209_v50, %s8926_s30  ;;  %14716 = vst [vmem:[#allocation78_spill] sm:$0xff] %v14715_v31  ;;  %vm2957_vm1 = vmor %vm2940_vm13, %vm2949_vm14  ;;  %vm2941_vm2 = vcmp.eq.s32.totalorder %v2930_v19, %v10129_v46  ;;  %vm2942_vm13 = vcmp.eq.s32.totalorder %v2931_v35, %v10129_v46  ;;  %vm2950_vm14 = vcmp.eq.s32.totalorder %v2930_v19, %v10145_v61  ;;  %v1976_v46 = vrot.slane %v9771_v24, 2 }
 0x1b4   : > { %v10227_v23 = vpop.permute.xlu1 %988  ;;  %8642 = vmatpush3.bf16.msk.msra.mxu0 %vm10223_vm10, %v14718_v37  ;;  %vm8643_vm12 = vmpackc.low %vm2957_vm1, %vm10245_vm0 }
 0x1b5   : > { %14717 = vst [vmem:[#allocation79_spill] sm:$0xff] %v10227_v23  ;;  %v10229_v51 = vpop.permute.xlu0 %1094  ;;  %v781_v23 = vsel %vm14521_vm4, %v753_v38, %v9765_v43  ;;  %8644 = vmatprep.subr.msk.bf16.mxu0 %vm8643_vm12, %v14718_v37  ;;  %vm2951_vm4 = vcmp.eq.s32.totalorder %v2931_v35, %v10145_v61  ;;  %vm2958_vm0 = vmor %vm2941_vm2, %vm2950_vm14  ;;  %v10288_v38 = vmul.f32 0.011170336, %v10020_v25  ;;  %v14527_v35 = vrot.slane %v9790_v12, 1 }
 0x1b6   : > { %2602 = vrot.lane.b32.xlu1 %v10057_v4, %s8928_s25  ;;  %v809_v10 = vsel %vm14522_vm5, %v781_v23, %v9784_v32  ;;  %v14722_v4 = vrot.slane %v9728_v26, 1  ;;  %vm2959_vm1 = vmor %vm2942_vm13, %vm2951_vm4  ;;  %v2458_v23 = vmul.f32 0.030364122, %v10124_v62  ;;  %vm14732_vm4 = vcmask 1043456  }
 0x1b7   : > { %2366 = vrot.lane.b32.xlu0 %v10221_v18, %s8926_s30  ;;  %v10272_v32 = vsel %vm819_vm6, %v809_v10, %v9804_v30  ;;  %vm8647_vm5 = vmpackc.low %vm2959_vm1, %vm2958_vm0  ;;  %14724 = vst [vmem:[#allocation80_spill] sm:$0xff] %v10288_v38  ;;  %v14725_v10 = vrot.slane %v9728_v26, 2  ;;  %vm14740_vm13 = vcmask 539648  }
 0x1b8   : > { %v10261_v49 = vpop.permute.xlu1 %1200  ;;  %v1878_v45 = vsel %vm1384_vm7, %v14722_v4, %v1877_v2  ;;  %8646 = vmatpush3.bf16.msk.msra.mxu0 %vm8643_vm12, %v14718_v37  ;;  %v2075_v4 = vrot.slane %v9771_v24, 3  ;;  %vm14739_vm2 = vmmov %vm14732_vm4 }
 0x1b9   : > { %v10263_v43 = vpop.permute.xlu0 %1198  ;;  %v1947_v19 = vadd.f32 %v1878_v45, %v9728_v26  ;;  %8648 = vmatprep.subr.msk.bf16.mxu0 %vm8647_vm5, %v14718_v37  ;;  %v1977_v25 = vsel %vm1538_vm8, %v14725_v10, %v1976_v46  ;;  %vm14741_vm14 = vmmov %vm14740_vm13 }
 0x1ba   : > { %1120 = vrot.lane.b32.xlu1 %v10082_v42, %s8928_s25  ;;  %vm14746_vm1 = vmmov %vm14740_vm13 }
 0x1bb   : > { %908 = vrot.lane.b32.xlu0 %v10272_v32, %s8926_s30  ;;  %v2046_v3 = vadd.f32 %v1977_v25, %v1947_v19  ;;  %v2459_v25 = vmul.f32 0.030364122, %v10184_v11 }
 0x1bc   : > { %v10283_v61 = vpop.permute.xlu1 %1202  ;;  %8650 = vmatpush3.bf16.msk.msra.mxu0 %vm8647_vm5, %v14718_v37  ;;  %v1880_v37 = vsel %vm1384_vm7, %v1877_v2, %v14527_v35  ;;  %v10323_v2 = vmul.f32 0.011170336, %v10041_v40  ;;  %v14533_v40 = vrot.slane %v9790_v12, 3  ;;  %vm14737_vm5 = vcmask 15360  }
 0x1bd   : > { %v10285_v30 = vpop.permute.xlu0 %990  ;;  %vm14738_vm12 = vmmov %vm14737_vm5 }
 0x1be   : > { %14723 = vst [vmem:[#allocation30_spill] sm:$0xff] %v10285_v30  ;;  %2720 = vrot.lane.b32.xlu1 %v10288_v38, %s8929_s27  ;;  %v2174_v30 = vrot.slane %v9771_v24, 4  ;;  %vm14745_vm0 = vmmov %vm14737_vm5 }
 0x1bf   : > { %2508 = vrot.lane.b32.xlu0 %v2458_v23, %s8927_s4  ;;  %v14728_v23 = vrot.slane %v9728_v26, 3 }
 0x1c0   : > { %v10302_v31 = vpop.permute.xlu1 %1096 }
 0x1c1   : > { %14726 = vst [vmem:[#allocation81_spill] sm:$0xff] %v10302_v31  ;;  %v10304_v45 = vpop.permute.xlu0 %884  ;;  %v2076_v10 = vsel %vm14579_vm9, %v14728_v23, %v2075_v4  ;;  %v14731_v23 = vrot.slane %v9728_v26, 4 }
 0x1c2   : > { %14727 = vst [vmem:[#allocation82_spill] sm:$0xff] %v10304_v45  ;;  %1226 = vrot.lane.b32.xlu1 %v10045_v52, %s8929_s27  ;;  %v2145_v35 = vadd.f32 %v2076_v10, %v2046_v3  ;;  %v1948_v52 = vadd.f32 %v1880_v37, %v9771_v24 }
 0x1c3   : > { %1014 = vrot.lane.b32.xlu0 %v10209_v50, %s8927_s4  ;;  %v2175_v31 = vsel %vm14732_vm4, %v14731_v23, %v2174_v30  ;;  %vm14759_vm4 = vmmov %vm14739_vm2 }
 0x1c4   : > { %v10318_v45 = vpop.permute.xlu1 %1098  ;;  %v10341_v37 = vadd.f32 %v2175_v31, %v2145_v35  ;;  %v14735_v35 = vld [vmem:[#allocation33_spill] sm:$0xff] }
 0x1c5   : > { %14729 = vst [vmem:[#allocation83_spill] sm:$0xff] %v10318_v45  ;;  %v10320_v19 = vpop.permute.xlu0 %886  ;;  %v14733_v45 = vrot.slane %v9790_v12, 2 }
 0x1c6   : > { %14730 = vst [vmem:[#allocation84_spill] sm:$0xff] %v10320_v19  ;;  %2722 = vrot.lane.b32.xlu1 %v10323_v2, %s8929_s27  ;;  %v10356_v31 = vmul.f32 0.023647603, %v10341_v37 }
 0x1c7   : > { %2510 = vrot.lane.b32.xlu0 %v2459_v25, %s8927_s4  ;;  %v1979_v19 = vsel %vm1538_vm8, %v1976_v46, %v14733_v45  ;;  %v2078_v25 = vsel %vm14579_vm9, %v2075_v4, %v14533_v40  ;;  %v14532_v46 = vrot.slane %v9790_v12, 4 }
 0x1c8   : > { %v10337_v38 = vpop.permute.xlu1 %1204  ;;  %v2047_v10 = vadd.f32 %v1979_v19, %v1948_v52  ;;  %v754_v19 = vsel %vm735_vm3, %v14735_v35, %v9796_v36 }
 0x1c9   : > { %v10339_v3 = vpop.permute.xlu0 %992  ;;  %v782_v4 = vsel %vm14737_vm5, %v754_v19, %v9819_v56  ;;  %v2177_v36 = vsel %vm14739_vm2, %v2174_v30, %v14532_v46  ;;  %v2079_v46 = vrot.slane %v9825_v34, 3  ;;  %vm14765_vm5 = vmmov %vm14745_vm0 }
 0x1ca   : > { %14734 = vst [vmem:[#allocation85_spill] sm:$0xff] %v10339_v3  ;;  %1228 = vrot.lane.b32.xlu1 %v10082_v42, %s8929_s27  ;;  %v2146_v52 = vadd.f32 %v2078_v25, %v2047_v10  ;;  %v14736_v3 = vld [vmem:[#allocation35_spill] sm:$0xff] }
 0x1cb   : > { %1016 = vrot.lane.b32.xlu0 %v10272_v32, %s8927_s4  ;;  %v755_v24 = vsel %vm735_vm3, %v14736_v3, %v9806_v33  ;;  %v810_v33 = vsel %vm14741_vm14, %v782_v4, %v9852_v47  ;;  %vm14776_vm14 = vmmov %vm14746_vm1 }
 0x1cc   : > { %v10351_v45 = vpop.permute.xlu1 %1206  ;;  %v783_v10 = vsel %vm14738_vm12, %v755_v24, %v9840_v0  ;;  %v10383_v35 = vadd.f32 %v2177_v36, %v2146_v52  ;;  %v10387_v56 = vsel %vm819_vm6, %v810_v33, %v9858_v8  ;;  %v14744_v8 = vld [vmem:[#allocation36_spill] sm:$0xff]  ;;  %vm14766_vm12 = vmmov %vm14739_vm2 }
 0x1cd   : > { %v10353_v23 = vpop.permute.xlu0 %994  ;;  %v811_v25 = vsel %vm14740_vm13, %v783_v10, %v9850_v39  ;;  %v756_v30 = vsel %vm735_vm3, %v14744_v8, %v9821_v63  ;;  %v1881_v63 = vrot.slane %v9825_v34, 1  ;;  %vm14767_vm2 = vmmov %vm14746_vm1 }
 0x1ce   : > { %2604 = vrot.lane.b32.xlu1 %v10152_v29, %s8928_s25  ;;  %v10391_v24 = vsel %vm819_vm6, %v811_v25, %v9882_v60  ;;  %v10402_v47 = vmul.f32 0.023647603, %v10383_v35  ;;  %v784_v60 = vsel %vm14745_vm0, %v756_v30, %v9838_v17  ;;  %v14749_v25 = vrot.slane %v9790_v12, 1  ;;  %vm14774_vm13 = vmmov %vm14745_vm0 }
 0x1cf   : > { %2368 = vrot.lane.b32.xlu0 %v10356_v31, %s8926_s30  ;;  %v812_v52 = vsel %vm14746_vm1, %v784_v60, %v9860_v27  ;;  %v2460_v27 = vmul.f32 0.030364122, %v10341_v37  ;;  %v10445_v30 = vmul.f32 0.011170336, %v10124_v62  ;;  %vm14792_vm0 = vmmov %vm14759_vm4 }
 0x1d0   : > { %v10379_v29 = vpop.permute.xlu1 %1100  ;;  %v10421_v10 = vsel %vm819_vm6, %v812_v52, %v9905_v1  ;;  %v1882_v33 = vsel %vm1384_vm7, %v14749_v25, %v1881_v63  ;;  %v1980_v1 = vrot.slane %v9825_v34, 2  ;;  %v1883_v52 = vrot.slane %v9844_v5, 1  ;;  %vm14800_vm1 = vmmov %vm14792_vm0 }
 0x1d1   : > { %v10381_v3 = vpop.permute.xlu0 %888  ;;  %v1949_v60 = vadd.f32 %v1882_v33, %v9790_v12 }
 0x1d2   : > { %14742 = vst [vmem:[#allocation33_spill] sm:$0xff] %v10381_v3  ;;  %912 = vrot.lane.b32.xlu1 %v10391_v24, %s8926_s30  ;;  %v1884_v33 = vsel %vm1384_vm7, %v1881_v63, %v1883_v52  ;;  %v10476_v63 = vmul.f32 0.011170336, %v10184_v11 }
 0x1d3   : > { %910 = vrot.lane.b32.xlu0 %v10387_v56, %s8926_s30 }
 0x1d4   : > { %v10397_v0 = vpop.permute.xlu1 %1102 }
 0x1d5   : > { %v10399_v39 = vpop.permute.xlu0 %890 }
 0x1d6   : > { %14743 = vst [vmem:[#allocation35_spill] sm:$0xff] %v10399_v39  ;;  %2370 = vrot.lane.b32.xlu1 %v10402_v47, %s8926_s30  ;;  %v1982_v39 = vrot.slane %v9844_v5, 2 }
 0x1d7   : > { %1122 = vrot.lane.b32.xlu0 %v10209_v50, %s8928_s25 }
 0x1d8   : > { %v10415_v19 = vpop.permute.xlu1 %1208 }
 0x1d9   : > { %v10417_v4 = vpop.permute.xlu0 %996 }
 0x1da   : > { %14747 = vst [vmem:[#allocation36_spill] sm:$0xff] %v10417_v4  ;;  %914 = vrot.lane.b32.xlu1 %v10421_v10, %s8926_s30 }
 0x1db   : > { %2606 = vrot.lane.b32.xlu0 %v10221_v18, %s8928_s25 }
 0x1dc   : > { %v10428_v17 = vpop.permute.xlu1 %1210 }
 0x1dd   : > { %v10430_v36 = vpop.permute.xlu0 %998 }
 0x1de   : > { %14748 = vst [vmem:[#allocation86_spill] sm:$0xff] %v10430_v36  ;;  %2512 = vrot.lane.b32.xlu1 %v2460_v27, %s8927_s4  ;;  %v14752_v27 = vrot.slane %v9790_v12, 2 }
 0x1df   : > { %1124 = vrot.lane.b32.xlu0 %v10272_v32, %s8928_s25 }
 0x1e0   : > { %v10440_v8 = vpop.permute.xlu1 %894  ;;  %v1981_v25 = vsel %vm1538_vm8, %v14752_v27, %v1980_v1  ;;  %v2178_v27 = vrot.slane %v9825_v34, 4 }
 0x1e1   : > { %14750 = vst [vmem:[#allocation87_spill] sm:$0xff] %v10440_v8  ;;  %v10442_v18 = vpop.permute.xlu0 %892  ;;  %v14755_v8 = vrot.slane %v9790_v12, 3 }
 0x1e2   : > { %14751 = vst [vmem:[#allocation88_spill] sm:$0xff] %v10442_v18  ;;  %1018 = vrot.lane.b32.xlu1 %v10387_v56, %s8927_s4  ;;  %v2048_v18 = vadd.f32 %v1981_v25, %v1949_v60  ;;  %v2461_v60 = vmul.f32 0.030364122, %v10383_v35  ;;  %v1950_v25 = vadd.f32 %v1884_v33, %v9825_v34 }
 0x1e3   : > { %2724 = vrot.lane.b32.xlu0 %v10445_v30, %s8929_s27  ;;  %v2080_v36 = vsel %vm14579_vm9, %v14755_v8, %v2079_v46  ;;  %v14758_v8 = vrot.slane %v9790_v12, 4 }
 0x1e4   : > { %v10457_v40 = vpop.permute.xlu1 %896  ;;  %v2147_v52 = vadd.f32 %v2080_v36, %v2048_v18 }
 0x1e5   : > { %14753 = vst [vmem:[#allocation89_spill] sm:$0xff] %v10457_v40  ;;  %v10459_v62 = vpop.permute.xlu0 %1104  ;;  %v2179_v4 = vsel %vm14759_vm4, %v14758_v8, %v2178_v27  ;;  %vm14802_vm4 = vmmov %vm14765_vm5 }
 0x1e6   : > { %14754 = vst [vmem:[#allocation90_spill] sm:$0xff] %v10459_v62  ;;  %1230 = vrot.lane.b32.xlu1 %v10209_v50, %s8929_s27  ;;  %v10492_v36 = vadd.f32 %v2179_v4, %v2147_v52 }
 0x1e7   : > { %1020 = vrot.lane.b32.xlu0 %v10391_v24, %s8927_s4 }
 0x1e8   : > { %v10471_v40 = vpop.permute.xlu1 %1000  ;;  %v10505_v8 = vmul.f32 0.023647603, %v10492_v36 }
 0x1e9   : > { %14756 = vst [vmem:[#allocation91_spill] sm:$0xff] %v10471_v40  ;;  %v10473_v62 = vpop.permute.xlu0 %1106  ;;  %v1983_v40 = vsel %vm1538_vm8, %v1980_v1, %v1982_v39 }
 0x1ea   : > { %14757 = vst [vmem:[#allocation92_spill] sm:$0xff] %v10473_v62  ;;  %2726 = vrot.lane.b32.xlu1 %v10476_v63, %s8929_s27  ;;  %v2081_v62 = vrot.slane %v9844_v5, 3  ;;  %v2049_v18 = vadd.f32 %v1983_v40, %v1950_v25  ;;  %v14764_v40 = vld [vmem:[#allocation39_spill] sm:$0xff] }
 0x1eb   : > { %2514 = vrot.lane.b32.xlu0 %v2461_v60, %s8927_s4  ;;  %v2180_v60 = vrot.slane %v9844_v5, 4  ;;  %v757_v52 = vsel %vm735_vm3, %v14764_v40, %v9880_v22 }
 0x1ec   : > { %v10488_v11 = vpop.permute.xlu1 %1212  ;;  %v2082_v33 = vsel %vm14579_vm9, %v2079_v46, %v2081_v62  ;;  %v785_v46 = vsel %vm14765_vm5, %v757_v52, %v9917_v28  ;;  %vm14804_vm5 = vmmov %vm14767_vm2 }
 0x1ed   : > { %14760 = vst [vmem:[#allocation93_spill] sm:$0xff] %v10488_v11  ;;  %v10490_v3 = vpop.permute.xlu0 %1002  ;;  %v2148_v4 = vadd.f32 %v2082_v33, %v2049_v18  ;;  %v2181_v62 = vsel %vm14766_vm12, %v2178_v27, %v2180_v60  ;;  %v813_v25 = vsel %vm14767_vm2, %v785_v46, %v9925_v7  ;;  %v14773_v27 = vld [vmem:[#allocation40_spill] sm:$0xff]  ;;  %vm14813_vm12 = vmmov %vm14802_vm4 }
 0x1ee   : > { %14761 = vst [vmem:[#allocation94_spill] sm:$0xff] %v10490_v3  ;;  %1232 = vrot.lane.b32.xlu1 %v10272_v32, %s8929_s27  ;;  %v10527_v22 = vsel %vm819_vm6, %v813_v25, %v9933_v20  ;;  %v758_v60 = vsel %vm735_vm3, %v14773_v27, %v9903_v48  ;;  %v1886_v48 = vrot.slane %v9890_v54, 1 }
 0x1ef   : > { %1022 = vrot.lane.b32.xlu0 %v10421_v10, %s8927_s4  ;;  %v10523_v33 = vadd.f32 %v2181_v62, %v2148_v4  ;;  %14770 = vst [vmem:[#allocation98_spill] sm:$0xff] %v10527_v22  ;;  %v786_v20 = vsel %vm14774_vm13, %v758_v60, %v9915_v44  ;;  %v14775_v4 = vld [vmem:[#allocation19_spill] sm:$0xff]  ;;  %v1885_v44 = vrot.slane %v9886_v6, 1  ;;  %v2462_v60 = vmul.f32 0.030364122, %v10492_v36  ;;  %vm14820_vm13 = vmmov %vm14792_vm0 }
 0x1f0   : > { %v10500_v39 = vpop.permute.xlu1 %1214  ;;  %v814_v40 = vsel %vm14776_vm14, %v786_v20, %v14775_v4  ;;  %v14782_v4 = vld [vmem:[#allocation51_spill] sm:$0xff]  ;;  %vm14831_vm14 = vmmov %vm14792_vm0 }
 0x1f1   : > { %14762 = vst [vmem:[#allocation95_spill] sm:$0xff] %v10500_v39  ;;  %v10502_v1 = vpop.permute.xlu0 %1004  ;;  %v10538_v7 = vmul.f32 0.023647603, %v10523_v33  ;;  %v10557_v62 = vsel %vm819_vm6, %v814_v40, %v9950_v9  ;;  %v1887_v20 = vsel %vm1384_vm7, %v1885_v44, %v1886_v48  ;;  %v10575_v9 = vmul.f32 0.011170336, %v10341_v37 }
 0x1f2   : > { %14763 = vst [vmem:[#allocation96_spill] sm:$0xff] %v10502_v1  ;;  %2608 = vrot.lane.b32.xlu1 %v10356_v31, %s8928_s25  ;;  %v956_v40 = vadd.f32 %v10090_v57, %v14782_v4  ;;  %v1951_v44 = vadd.f32 %v1887_v20, %v9886_v6  ;;  %v2084_v57 = vrot.slane %v9890_v54, 3 }
 0x1f3   : > { %2372 = vrot.lane.b32.xlu0 %v10505_v8, %s8926_s30  ;;  %14781 = vst [vmem:[#allocation103_spill] sm:$0xff] %v10575_v9 }
 0x1f4   : > { %v10519_v1 = vpop.permute.xlu1 %1108 }
 0x1f5   : > { %14768 = vst [vmem:[#allocation39_spill] sm:$0xff] %v10519_v1  ;;  %v10521_v18 = vpop.permute.xlu0 %898 }
 0x1f6   : > { %14769 = vst [vmem:[#allocation97_spill] sm:$0xff] %v10521_v18  ;;  %1126 = vrot.lane.b32.xlu1 %v10387_v56, %s8928_s25 }
 0x1f7   : > { %916 = vrot.lane.b32.xlu0 %v10527_v22, %s8926_s30 }
 0x1f8   : > { %v10533_v28 = vpop.permute.xlu1 %900 }
 0x1f9   : > { %14771 = vst [vmem:[#allocation99_spill] sm:$0xff] %v10533_v28  ;;  %v10535_v31 = vpop.permute.xlu0 %1110  ;;  %v955_v28 = vadd.f32 %v10092_v55, %v9659_v14 }
 0x1fa   : > { %14772 = vst [vmem:[#allocation100_spill] sm:$0xff] %v10535_v31  ;;  %2374 = vrot.lane.b32.xlu1 %v10538_v7, %s8926_s30 }
 0x1fb   : > { %1128 = vrot.lane.b32.xlu0 %v10391_v24, %s8928_s25  ;;  %v1063_v37 = vadd.f32 %v10105_v53, %v955_v28 }
 0x1fc   : > { %v10551_v52 = vpop.permute.xlu1 %1006 }
 0x1fd   : > { %14777 = vst [vmem:[#allocation40_spill] sm:$0xff] %v10551_v52  ;;  %v10553_v46 = vpop.permute.xlu0 %1112  ;;  %v1171_v55 = vadd.f32 %v10147_v41, %v1063_v37  ;;  %v14788_v37 = vld [vmem:[#allocation70_spill] sm:$0xff]  ;;  %v2182_v41 = vrot.slane %v9886_v6, 4 }
 0x1fe   : > { %14778 = vst [vmem:[#allocation19_spill] sm:$0xff] %v10553_v46  ;;  %918 = vrot.lane.b32.xlu1 %v10557_v62, %s8926_s30  ;;  %v1984_v46 = vrot.slane %v9886_v6, 2 }
 0x1ff   : > { %2610 = vrot.lane.b32.xlu0 %v10402_v47, %s8928_s25  ;;  %v1985_v47 = vrot.slane %v9890_v54, 2 }
 0x200   : > { %v10565_v25 = vpop.permute.xlu1 %1218 }
 0x201   : > { %14779 = vst [vmem:[#allocation101_spill] sm:$0xff] %v10565_v25  ;;  %v10567_v27 = vpop.permute.xlu0 %1216  ;;  %v1986_v14 = vsel %vm1538_vm8, %v1984_v46, %v1985_v47  ;;  %v1279_v46 = vadd.f32 %v10263_v43, %v1171_v55  ;;  %v10624_v55 = vmul.f32 0.011170336, %v10383_v35  ;;  %v14791_v35 = vrot.slane %v9909_v59, 2 }
 0x202   : > { %14780 = vst [vmem:[#allocation102_spill] sm:$0xff] %v10567_v27  ;;  %2516 = vrot.lane.b32.xlu1 %v2462_v60, %s8927_s4  ;;  %v1064_v27 = vadd.f32 %v10122_v15, %v956_v40  ;;  %v2050_v53 = vadd.f32 %v1986_v14, %v1951_v44  ;;  %v14786_v15 = vrot.slane %v9909_v59, 1  ;;  %v2083_v40 = vrot.slane %v9886_v6, 3  ;;  %v14787_v44 = vld [vmem:[#allocation52_spill] sm:$0xff]  ;;  %v14806_v6 = vld [vmem:[#allocation62_spill] sm:$0xff] }
 0x203   : > { %1130 = vrot.lane.b32.xlu0 %v10421_v10, %s8928_s25  ;;  %v957_v14 = vadd.f32 %v14788_v37, %v14787_v44  ;;  %14790 = vst [vmem:[#allocation70_spill] sm:$0xff] %v10624_v55  ;;  %v1988_v44 = vsel %vm1538_vm8, %v1985_v47, %v14791_v35 }
 0x204   : > { %v10582_v52 = vpop.permute.xlu1 %1220  ;;  %v1172_v20 = vadd.f32 %v10194_v16, %v1064_v27  ;;  %v1889_v28 = vsel %vm1384_vm7, %v1886_v48, %v14786_v15  ;;  %v2085_v16 = vsel %vm14579_vm9, %v2083_v40, %v2084_v57  ;;  %v2183_v27 = vrot.slane %v9890_v54, 4 }
 0x205   : > { %14783 = vst [vmem:[#allocation51_spill] sm:$0xff] %v10582_v52  ;;  %v10584_v18 = vpop.permute.xlu0 %1008  ;;  %v1952_v48 = vadd.f32 %v1889_v28, %v9890_v54  ;;  %v2149_v15 = vadd.f32 %v2085_v16, %v2050_v53  ;;  %v10632_v52 = vmul.f32 0.023647603, %v1279_v46 }
 0x206   : > { %14784 = vst [vmem:[#allocation104_spill] sm:$0xff] %v10584_v18  ;;  %1024 = vrot.lane.b32.xlu1 %v10527_v22, %s8927_s4  ;;  %v1280_v18 = vadd.f32 %v10261_v49, %v1172_v20  ;;  %v2463_v20 = vmul.f32 0.030364122, %v10523_v33  ;;  %v2184_v53 = vsel %vm14792_vm0, %v2182_v41, %v2183_v27 }
 0x207   : > { %2728 = vrot.lane.b32.xlu0 %v10575_v9, %s8929_s27  ;;  %v2051_v16 = vadd.f32 %v1988_v44, %v1952_v48  ;;  %v1484_v48 = vmul.f32 0.030364122, %v1279_v46  ;;  %v14828_v9 = vld [vmem:[#allocation79_spill] sm:$0xff] }
 0x208   : > { %v10599_v4 = vpop.permute.xlu1 %902  ;;  %v10630_v28 = vmul.f32 0.023647603, %v1280_v18  ;;  %v1485_v41 = vmul.f32 0.030364122, %v1280_v18 }
 0x209   : > { %14785 = vst [vmem:[#allocation105_spill] sm:$0xff] %v10599_v4  ;;  %v10601_v60 = vpop.permute.xlu0 %2360  ;;  %v1065_v4 = vadd.f32 %v10120_v13, %v957_v14  ;;  %v10646_v14 = vadd.f32 %v2184_v53, %v2149_v15  ;;  %v14798_v53 = vld [vmem:[#allocation43_spill] sm:$0xff]  ;;  %v1539_v1 = vrot.slane %v1484_v48, 2 }
 0x20a   : > { %1236 = vrot.lane.b32.xlu1 %v10391_v24, %s8929_s27  ;;  %v1386_v25 = vrot.slane %v10630_v28, 1 }
 0x20b   : > { %1234 = vrot.lane.b32.xlu0 %v10387_v56, %s8929_s27  ;;  %v1173_v37 = vadd.f32 %v10229_v51, %v1065_v4  ;;  %v14795_v51 = vrot.slane %v9909_v59, 3  ;;  %v10664_v44 = vmul.f32 0.023647603, %v10646_v14 }
 0x20c   : > { %v10619_v49 = vpop.permute.xlu1 %2362 }
 0x20d   : > { %v10621_v43 = vpop.permute.xlu0 %1114  ;;  %v1281_v31 = vadd.f32 %v10283_v61, %v1173_v37  ;;  %v2087_v47 = vsel %vm14579_vm9, %v2084_v57, %v14795_v51  ;;  %v14797_v61 = vld [vmem:[#allocation48_spill] sm:$0xff]  ;;  %v14799_v57 = vrot.slane %v9909_v59, 4  ;;  %v14801_v51 = vld [vmem:[#allocation23_spill] sm:$0xff] }
 0x20e   : > { %14789 = vst [vmem:[#allocation52_spill] sm:$0xff] %v10621_v43  ;;  %2730 = vrot.lane.b32.xlu1 %v10624_v55, %s8929_s27  ;;  %v2150_v4 = vadd.f32 %v2087_v47, %v2051_v16  ;;  %v759_v37 = vsel %vm735_vm3, %v14798_v53, %v14797_v61  ;;  %v14803_v61 = vld [vmem:[#allocation60_spill] sm:$0xff]  ;;  %v1540_v53 = vrot.slane %v1485_v41, 2  ;;  %v14807_v41 = vld [vmem:[#allocation22_spill] sm:$0xff] }
 0x20f   : > { %2518 = vrot.lane.b32.xlu0 %v2463_v20, %s8927_s4  ;;  %v1385_v20 = vrot.slane %v10632_v52, 1  ;;  %v2186_v16 = vsel %vm14800_vm1, %v2183_v27, %v14799_v57  ;;  %v787_v47 = vsel %vm14802_vm4, %v759_v37, %v14801_v51  ;;  %v1890_v48 = vrot.slane %v14807_v41, 1 }
 0x210   : > { %v10642_v40 = vpop.permute.xlu1 %1116  ;;  %v1640_v37 = vrot.slane %v10630_v28, 3  ;;  %vm2864_vm1 = vcmask 523264  }
 0x211   : > { %14793 = vst [vmem:[#allocation106_spill] sm:$0xff] %v10642_v40  ;;  %v10644_v13 = vpop.permute.xlu0 %904  ;;  %v1387_v43 = vsel %vm1384_vm7, %v1385_v20, %v1386_v25  ;;  %v10681_v40 = vadd.f32 %v2186_v16, %v2150_v4  ;;  %v815_v20 = vsel %vm14804_vm5, %v787_v47, %v14803_v61  ;;  %v1541_v16 = vsel %vm1538_vm8, %v1539_v1, %v1540_v53  ;;  %v14810_v61 = vld [vmem:[#allocation49_spill] sm:$0xff]  ;;  %v14815_v1 = vld [vmem:[#allocation59_spill] sm:$0xff]  ;;  %vm14844_vm5 = vmmov %vm14792_vm0 }
 0x212   : > { %14794 = vst [vmem:[#allocation107_spill] sm:$0xff] %v10644_v13  ;;  %1238 = vrot.lane.b32.xlu1 %v10421_v10, %s8929_s27  ;;  %v10670_v13 = vmul.f32 0.023647603, %v1281_v31  ;;  %v10691_v54 = vsel %vm819_vm6, %v815_v20, %v14806_v6  ;;  %v1639_v6 = vrot.slane %v10632_v52, 3 }
 0x213   : > { %1026 = vrot.lane.b32.xlu0 %v10557_v62, %s8927_s4  ;;  %v10701_v4 = vmul.f32 0.023647603, %v10681_v40 }
 0x214   : > { %v10659_v15 = vpop.permute.xlu1 %1010  ;;  %v14814_v28 = vrot.slane %v10670_v13, 1 }
 0x215   : > { %14796 = vst [vmem:[#allocation108_spill] sm:$0xff] %v10659_v15  ;;  %v10661_v35 = vpop.permute.xlu0 %2504  ;;  %v1306_v15 = vmul.f32 0.011170336, %v1279_v46  ;;  %v10698_v46 = vmul.f32 0.011170336, %v1280_v18  ;;  %v14811_v18 = vld [vmem:[#allocation44_spill] sm:$0xff] }
 0x216   : > { %2612 = vrot.lane.b32.xlu1 %v10505_v8, %s8928_s25  ;;  %v760_v20 = vsel %vm735_vm3, %v14811_v18, %v14810_v61  ;;  %v1389_v52 = vsel %vm1384_vm7, %v1386_v25, %v14814_v28  ;;  %v1641_v25 = vsel %vm14579_vm9, %v1639_v6, %v1640_v37  ;;  %v2464_v6 = vmul.f32 0.030364122, %v10646_v14 }
 0x217   : > { %2376 = vrot.lane.b32.xlu0 %v10664_v44, %s8926_s30  ;;  %v1460_v27 = vadd.f32 %v1387_v43, %v1306_v15  ;;  %v10706_v43 = vmul.f32 0.030364122, %v1281_v31 }
 0x218   : > { %v10685_v3 = vpop.permute.xlu1 %2506 }
 0x219   : > { %v10687_v8 = vpop.permute.xlu0 %1222  ;;  %v1614_v57 = vadd.f32 %v1541_v16, %v1460_v27  ;;  %v1770_v16 = vrot.slane %v10698_v46, 4  ;;  %v14538_v61 = vrot.slane %v10706_v43, 2 }
 0x21a   : > { %14805 = vst [vmem:[#allocation48_spill] sm:$0xff] %v10687_v8  ;;  %1132 = vrot.lane.b32.xlu1 %v10527_v22, %s8928_s25  ;;  %v14812_v8 = vld [vmem:[#allocation50_spill] sm:$0xff] }
 0x21b   : > { %920 = vrot.lane.b32.xlu0 %v10691_v54, %s8926_s30  ;;  %v788_v55 = vsel %vm14813_vm12, %v760_v20, %v14812_v8  ;;  %v1769_v8 = vrot.slane %v1306_v15, 4  ;;  %v1714_v39 = vadd.f32 %v1641_v25, %v1614_v57  ;;  %v10745_v15 = vmul.f32 0.011170336, %v10492_v36  ;;  %vm14846_vm12 = vmmov %vm14767_vm2 }
 0x21c   : > { %v10709_v51 = vpop.permute.xlu1 %1224  ;;  %v2088_v57 = vrot.slane %v14807_v41, 3 }
 0x21d   : > { %14808 = vst [vmem:[#allocation43_spill] sm:$0xff] %v10709_v51  ;;  %v10711_v47 = vpop.permute.xlu0 %1012  ;;  %v14816_v51 = vrot.slane %v9909_v59, 1  ;;  %14819 = vst [vmem:[#allocation62_spill] sm:$0xff] %v10745_v15 }
 0x21e   : > { %14809 = vst [vmem:[#allocation23_spill] sm:$0xff] %v10711_v47  ;;  %2614 = vrot.lane.b32.xlu1 %v10538_v7, %s8928_s25  ;;  %v816_v47 = vsel %vm14767_vm2, %v788_v55, %v14815_v1  ;;  %v14817_v7 = vld [vmem:[#allocation64_spill] sm:$0xff]  ;;  %v1461_v55 = vadd.f32 %v1389_v52, %v10698_v46  ;;  %v1989_v1 = vrot.slane %v14807_v41, 2  ;;  %v1771_v46 = vsel %vm14820_vm13, %v1769_v8, %v1770_v16  ;;  %vm14857_vm2 = vmmov %vm14802_vm4 }
 0x21f   : > { %2378 = vrot.lane.b32.xlu0 %v10701_v4, %s8926_s30  ;;  %v1891_v27 = vsel %vm1384_vm7, %v14816_v51, %v1890_v48  ;;  %v10737_v28 = vsel %vm819_vm6, %v816_v47, %v14817_v7  ;;  %v10750_v47 = vmul.f32 0.011170336, %v1281_v31  ;;  %v1543_v52 = vsel %vm1538_vm8, %v1540_v53, %v14538_v61  ;;  %v14824_v53 = vld [vmem:[#allocation53_spill] sm:$0xff]  ;;  %vm14860_vm13 = vmmov %vm14846_vm12 }
 0x220   : > { %v2601_v18 = vpop.permute.xlu1 %2600  ;;  %14818 = vst [vmem:[#allocation60_spill] sm:$0xff] %v10737_v28  ;;  %v1953_v51 = vadd.f32 %v1891_v27, %v9909_v59  ;;  %v1844_v7 = vadd.f32 %v1771_v46, %v1714_v39  ;;  %v1615_v5 = vadd.f32 %v1543_v52, %v1461_v55  ;;  %v14823_v31 = vrot.slane %v9909_v59, 2 }
 0x221   : > { %v10733_v20 = vpop.permute.xlu0 %2364  ;;  %v958_v61 = vadd.f32 %v10149_v58, %v14824_v53  ;;  %v14825_v39 = vrot.slane %v10670_v13, 3  ;;  %v10787_v58 = vmul.f32 0.011170336, %v10523_v33 }
 0x222   : > { %1134 = vrot.lane.b32.xlu1 %v10557_v62, %s8928_s25  ;;  %v1990_v8 = vsel %vm1538_vm8, %v14823_v31, %v1989_v1  ;;  %v14827_v31 = vrot.slane %v9977_v21, 1 }
 0x223   : > { %922 = vrot.lane.b32.xlu0 %v10737_v28, %s8926_s30  ;;  %v1643_v55 = vsel %vm14579_vm9, %v1640_v37, %v14825_v39  ;;  %v2052_v27 = vadd.f32 %v1990_v8, %v1953_v51  ;;  %v1066_v34 = vadd.f32 %v14828_v9, %v958_v61  ;;  %v2465_v37 = vmul.f32 0.030364122, %v10681_v40  ;;  %v14830_v61 = vld [vmem:[#allocation81_spill] sm:$0xff] }
 0x224   : > { %v10757_v25 = vpop.permute.xlu1 %1118  ;;  %v1893_v11 = vsel %vm1384_vm7, %v1890_v48, %v14827_v31  ;;  %v2187_v48 = vrot.slane %v14807_v41, 4  ;;  %v14545_v9 = vrot.slane %v9977_v21, 2 }
 0x225   : > { %14821 = vst [vmem:[#allocation49_spill] sm:$0xff] %v10757_v25  ;;  %v10759_v36 = vpop.permute.xlu0 %906  ;;  %v1174_v8 = vadd.f32 %v14830_v61, %v1066_v34 }
 0x226   : > { %14822 = vst [vmem:[#allocation44_spill] sm:$0xff] %v10759_v36  ;;  %2732 = vrot.lane.b32.xlu1 %v10745_v15, %s8929_s27  ;;  %v14544_v36 = vrot.slane %v10750_v47, 4  ;;  %v1715_v15 = vadd.f32 %v1643_v55, %v1615_v5  ;;  %v14829_v5 = vrot.slane %v9909_v59, 3 }
 0x227   : > { %2520 = vrot.lane.b32.xlu0 %v2464_v6, %s8927_s4  ;;  %v14826_v6 = vld [vmem:[#allocation80_spill] sm:$0xff]  ;;  %v10807_v31 = vadd.f32 %v10337_v38, %v1174_v8  ;;  %v14836_v8 = vld [vmem:[#allocation30_spill] sm:$0xff] }
 0x228   : > { %v2603_v46 = vpop.permute.xlu1 %2602  ;;  %v2288_v25 = vadd.f32 %v14826_v6, %v1844_v7  ;;  %v2089_v7 = vsel %vm14579_vm9, %v14829_v5, %v2088_v57  ;;  %v1773_v53 = vsel %vm14831_vm14, %v1770_v16, %v14544_v36  ;;  %v14834_v16 = vrot.slane %v9909_v59, 4  ;;  %v14856_v36 = vld [vmem:[#allocation26_spill] sm:$0xff]  ;;  %vm14882_vm14 = vmmov %vm14792_vm0 }
 0x229   : > { %v10775_v52 = vpop.permute.xlu0 %2366  ;;  %v2151_v55 = vadd.f32 %v2089_v7, %v2052_v27 }
 0x22a   : > { %1240 = vrot.lane.b32.xlu1 %v10527_v22, %s8929_s27  ;;  %v2432_v51 = vadd.f32 %v10601_v60, %v2288_v25  ;;  %v1954_v60 = vadd.f32 %v1893_v11, %v14807_v41  ;;  %v1845_v25 = vadd.f32 %v1773_v53, %v1715_v15  ;;  %v2188_v5 = vsel %vm14792_vm0, %v14834_v16, %v2187_v48  ;;  %v14880_v41 = vld [vmem:[#allocation85_spill] sm:$0xff] }
 0x22b   : > { %1028 = vrot.lane.b32.xlu0 %v10691_v54, %s8927_s4  ;;  %v1992_v11 = vsel %vm1538_vm8, %v1989_v1, %v14545_v9  ;;  %v14543_v15 = vrot.slane %v9977_v21, 3  ;;  %v10823_v7 = vadd.f32 %v2188_v5, %v2151_v55  ;;  %v14542_v1 = vrot.slane %v9977_v21, 4  ;;  %v14837_v55 = vld [vmem:[#allocation83_spill] sm:$0xff] }
 0x22c   : > { %v10800_v33 = vpop.permute.xlu1 %1120  ;;  %v2576_v6 = vadd.f32 %v10661_v35, %v2432_v51  ;;  %v14835_v35 = vld [vmem:[#allocation77_spill] sm:$0xff] }
 0x22d   : > { %14832 = vst [vmem:[#allocation50_spill] sm:$0xff] %v10800_v33  ;;  %v10802_v39 = vpop.permute.xlu0 %908  ;;  %v959_v38 = vadd.f32 %v14835_v35, %v9728_v26  ;;  %v10846_v16 = vmul.f32 0.023647603, %v10823_v7  ;;  %v14841_v35 = vld [vmem:[#allocation46_spill] sm:$0xff] }
 0x22e   : > { %14833 = vst [vmem:[#allocation59_spill] sm:$0xff] %v10802_v39  ;;  %2734 = vrot.lane.b32.xlu1 %v10787_v58, %s8929_s27  ;;  %v2672_v34 = vadd.f32 %v2601_v18, %v2576_v6  ;;  %v2053_v18 = vadd.f32 %v1992_v11, %v1954_v60  ;;  %v10828_v6 = vmul.f32 0.023647603, %v10807_v31  ;;  %v14840_v11 = vld [vmem:[#allocation61_spill] sm:$0xff] }
 0x22f   : > { %2522 = vrot.lane.b32.xlu0 %v2465_v37, %s8927_s4  ;;  %v2289_v37 = vadd.f32 %v10323_v2, %v1845_v25  ;;  %v1067_v53 = vadd.f32 %v14836_v8, %v959_v38  ;;  %v2091_v2 = vsel %vm14579_vm9, %v2088_v57, %v14543_v15  ;;  %v761_v38 = vsel %vm735_vm3, %v14841_v35, %v14840_v11  ;;  %v14847_v35 = vld [vmem:[#allocation69_spill] sm:$0xff] }
 0x230   : > { %v2721_v27 = vpop.permute.xlu1 %2720  ;;  %v2152_v5 = vadd.f32 %v2091_v2, %v2053_v18  ;;  %v1390_v57 = vrot.slane %v10828_v6, 1  ;;  %v14845_v2 = vld [vmem:[#allocation68_spill] sm:$0xff] }
 0x231   : > { %v10821_v51 = vpop.permute.xlu0 %2508  ;;  %v2792_v61 = vadd.f32 %v2721_v27, %v2672_v34  ;;  %v2433_v26 = vadd.f32 %v10619_v49, %v2289_v37  ;;  %v1175_v60 = vadd.f32 %v14837_v55, %v1067_v53  ;;  %v14842_v37 = vld [vmem:[#allocation65_spill] sm:$0xff]  ;;  %v10869_v55 = vmul.f32 0.030364122, %v10807_v31 }
 0x232   : > { %1242 = vrot.lane.b32.xlu1 %v10557_v62, %s8929_s27  ;;  %v789_v18 = vsel %vm14802_vm4, %v761_v38, %v14842_v37  ;;  %vm14883_vm4 = vmmov %vm14792_vm0 }
 0x233   : > { %1030 = vrot.lane.b32.xlu0 %v10737_v28, %s8927_s4  ;;  %8384 = vmatprep.mubr.msk.f32.mxu0 %vm2864_vm1, %v2792_v61  ;;  %v2577_v49 = vadd.f32 %v10685_v3, %v2433_v26  ;;  %v10854_v27 = vadd.f32 %v10351_v45, %v1175_v60  ;;  %v14843_v3 = vld [vmem:[#allocation10_spill] sm:$0xff]  ;;  %v2190_v26 = vsel %vm14844_vm5, %v2187_v48, %v14542_v1  ;;  %v14849_v48 = vrot.slane %v10670_v13, 1  ;;  %vm14894_vm5 = vmmov %vm14792_vm0 }
 0x234   : > { %v10841_v25 = vpop.permute.xlu1 %1226  ;;  %v2816_v53 = vsub.f32 %v14843_v3, %v2792_v61  ;;  %v817_v45 = vsel %vm14846_vm12, %v789_v18, %v14845_v2  ;;  %v10873_v11 = vadd.f32 %v2190_v26, %v2152_v5  ;;  %v14850_v5 = vld [vmem:[#allocation66_spill] sm:$0xff]  ;;  %v14851_v3 = vld [vmem:[#allocation8_spill] sm:$0xff]  ;;  %vm14900_vm12 = vmmov %vm14792_vm0 }
 0x235   : > { %14838 = vst [vmem:[#allocation64_spill] sm:$0xff] %v10841_v25  ;;  %v10843_v34 = vpop.permute.xlu0 %1014  ;;  %v2673_v8 = vadd.f32 %v2603_v46, %v2577_v49  ;;  %v10877_v46 = vsel %vm819_vm6, %v817_v45, %v14847_v35  ;;  %v10880_v49 = vmul.f32 0.023647603, %v10854_v27  ;;  %v1391_v38 = vsel %vm1384_vm7, %v14849_v48, %v1390_v57  ;;  %v14854_v35 = vld [vmem:[#allocation63_spill] sm:$0xff] }
 0x236   : > { %14839 = vst [vmem:[#allocation53_spill] sm:$0xff] %v10843_v34  ;;  %2616 = vrot.lane.b32.xlu1 %v10664_v44, %s8928_s25  ;;  %14848 = vst [vmem:[#allocation80_spill] sm:$0xff] %v10877_v46  ;;  %v1894_v37 = vrot.slane %v14850_v5, 1  ;;  %v2840_v18 = vand.u32 2147483647, %v2816_v53  ;;  %v14855_v48 = vld [vmem:[#allocation47_spill] sm:$0xff]  ;;  %v1462_v15 = vadd.f32 %v1391_v38, %v10750_v47 }
 0x237   : > { %2380 = vrot.lane.b32.xlu0 %v10846_v16, %s8926_s30  ;;  %v762_v1 = vsel %vm735_vm3, %v14855_v48, %v14854_v35  ;;  %v14859_v48 = vld [vmem:[#allocation67_spill] sm:$0xff]  ;;  %v14869_v34 = vrot.slane %v10082_v42, 1 }
 0x238   : > { %v2723_v44 = vpop.permute.xlu1 %2722 }
 0x239   : > { %v10871_v60 = vpop.permute.xlu0 %2510  ;;  %v2793_v61 = vadd.f32 %v2723_v44, %v2673_v8  ;;  %v1544_v8 = vrot.slane %v10869_v55, 2  ;;  %v10898_v44 = vmul.f32 0.023647603, %v10873_v11  ;;  %v14858_v55 = vrot.slane %v9977_v21, 1 }
 0x23a   : > { %1136 = vrot.lane.b32.xlu1 %v10691_v54, %s8928_s25 }
 0x23b   : > { %924 = vrot.lane.b32.xlu0 %v10877_v46, %s8926_s30  ;;  %v2817_v26 = vsub.f32 %v14851_v3, %v2793_v61  ;;  %8385 = vmatmul.mubr.msk.f32.vlgmr.msra.gmra.mrb[0].mxu0 %vm2864_vm1, %v2793_v61  ;;  %v790_v3 = vsel %vm14857_vm2, %v762_v1, %v14856_v36  ;;  %v1895_v9 = vsel %vm1384_vm7, %v14858_v55, %v1894_v37  ;;  %v2865_v36 = vsel %vm2864_vm1, %v2840_v18, 0.0  ;;  %vm14905_vm2 = vmmov %vm14792_vm0 }
 0x23c   : > { %v10893_v2 = vpop.permute.xlu1 %1228  ;;  %v818_v38 = vsel %vm14860_vm13, %v790_v3, %v14859_v48  ;;  %v10924_v61 = vmul.f32 0.030364122, %v10854_v27  ;;  %vm14922_vm13 = vmmov %vm14792_vm0 }
 0x23d   : > { %14852 = vst [vmem:[#allocation79_spill] sm:$0xff] %v10893_v2  ;;  %v10895_v45 = vpop.permute.xlu0 %1016  ;;  %v2841_v53 = vand.u32 2147483647, %v2817_v26  ;;  %v10918_v26 = vmul.f32 0.011170336, %v10807_v31  ;;  %v14862_v31 = vld [vmem:[#allocation27_spill] sm:$0xff] }
 0x23e   : > { %14853 = vst [vmem:[#allocation81_spill] sm:$0xff] %v10895_v45  ;;  %2618 = vrot.lane.b32.xlu1 %v10701_v4, %s8928_s25  ;;  %v1644_v4 = vrot.slane %v10828_v6, 3  ;;  %v14861_v45 = vrot.slane %v10706_v43, 2  ;;  %v10937_v18 = vsel %vm819_vm6, %v818_v38, %v14862_v31  ;;  %v14864_v6 = vrot.slane %v10880_v49, 1  ;;  %vm14872_vm6 = vmmov %vm14792_vm0 }
 0x23f   : > { %2382 = vrot.lane.b32.xlu0 %v10898_v44, %s8926_s30  ;;  %v2866_v1 = vsel %vm2864_vm1, %v2841_v53, 0.0  ;;  %14863 = vst [vmem:[#allocation77_spill] sm:$0xff] %v10937_v18  ;;  %v1993_v43 = vrot.slane %v14850_v5, 2  ;;  %v1955_v38 = vadd.f32 %v1895_v9, %v9977_v21 }
 0x240   : > { %v1545_v55 = vsel %vm1538_vm8, %v14861_v45, %v1544_v8  ;;  %v10929_v35 = vadd.f32 %v2866_v1, %v2865_v36  ;;  %v10931_v39 = vpop.permute.xlu1 %2604  ;;  %v1393_v48 = vsel %vm1384_vm7, %v1390_v57, %v14864_v6  ;;  %v10948_v45 = vmul.f32 0.011170336, %v10646_v14 }
 0x241   : > { %v10933_v3 = vpop.permute.xlu0 %2368  ;;  %v1616_v53 = vadd.f32 %v1545_v55, %v1462_v15  ;;  %v2466_v36 = vmul.f32 0.030364122, %v10823_v7  ;;  %v1774_v15 = vrot.slane %v10918_v26, 4  ;;  %v14866_v57 = vrot.slane %v10670_v13, 3 }
 0x242   : > { %1138 = vrot.lane.b32.xlu1 %v10737_v28, %s8928_s25  ;;  %14865 = vst [vmem:[#allocation30_spill] sm:$0xff] %v10948_v45  ;;  %v1897_v14 = vsel %vm1384_vm7, %v1894_v37, %v14869_v34  ;;  %v1463_v33 = vadd.f32 %v1393_v48, %v10918_v26  ;;  %v14870_v13 = vrot.slane %v9977_v21, 2  ;;  %v10975_v34 = vmul.f32 0.011170336, %v10854_v27 }
 0x243   : > { %926 = vrot.lane.b32.xlu0 %v10937_v18, %s8926_s30  ;;  %v1645_v55 = vsel %vm14579_vm9, %v14866_v57, %v1644_v4  ;;  %v2092_v57 = vrot.slane %v14850_v5, 3  ;;  %v14871_v26 = vrot.slane %v10750_v47, 4  ;;  %v14873_v48 = vrot.slane %v10924_v61, 2 }
 0x244   : > { %v10957_v31 = vpop.permute.xlu1 %912  ;;  %v1716_v2 = vadd.f32 %v1645_v55, %v1616_v53  ;;  %v1994_v9 = vsel %vm1538_vm8, %v14870_v13, %v1993_v43  ;;  %v10993_v47 = vmul.f32 0.011170336, %v10681_v40  ;;  %v2467_v27 = vmul.f32 0.030364122, %v10873_v11 }
 0x245   : > { %14867 = vst [vmem:[#allocation83_spill] sm:$0xff] %v10957_v31  ;;  %v10959_v6 = vpop.permute.xlu0 %910  ;;  %v2054_v1 = vadd.f32 %v1994_v9, %v1955_v38  ;;  %v1995_v31 = vrot.slane %v10082_v42, 2  ;;  %v1775_v53 = vsel %vm14872_vm6, %v14871_v26, %v1774_v15  ;;  %v14875_v9 = vrot.slane %v9977_v21, 3  ;;  %vm14926_vm6 = vmmov %vm14792_vm0 }
 0x246   : > { %14868 = vst [vmem:[#allocation61_spill] sm:$0xff] %v10959_v6  ;;  %2736 = vrot.lane.b32.xlu1 %v10948_v45, %s8929_s27  ;;  %v1956_v6 = vadd.f32 %v1897_v14, %v14850_v5  ;;  %v1846_v14 = vadd.f32 %v1775_v53, %v1716_v2  ;;  %v2094_v2 = vrot.slane %v10082_v42, 3  ;;  %v14876_v53 = vld [vmem:[#allocation54_spill] sm:$0xff]  ;;  %v14549_v40 = vrot.slane %v10975_v34, 4 }
 0x247   : > { %2524 = vrot.lane.b32.xlu0 %v2466_v36, %s8927_s4  ;;  %v1547_v36 = vsel %vm1538_vm8, %v1544_v8, %v14873_v48  ;;  %v2093_v8 = vsel %vm14579_vm9, %v14875_v9, %v2092_v57  ;;  %v2191_v48 = vrot.slane %v14850_v5, 4 }
 0x248   : > { %v10984_v55 = vpop.permute.xlu1 %2370  ;;  %v1617_v13 = vadd.f32 %v1547_v36, %v1463_v33  ;;  %v2153_v26 = vadd.f32 %v2093_v8, %v2054_v1  ;;  %v1996_v33 = vsel %vm1538_vm8, %v1993_v43, %v1995_v31  ;;  %v14877_v36 = vld [vmem:[#allocation82_spill] sm:$0xff]  ;;  %v2290_v8 = vadd.f32 %v10445_v30, %v1846_v14 }
 0x249   : > { %v10986_v38 = vpop.permute.xlu0 %1122  ;;  %v960_v37 = vadd.f32 %v14877_v36, %v14876_v53  ;;  %v2055_v9 = vadd.f32 %v1996_v33, %v1956_v6  ;;  %v14881_v36 = vrot.slane %v9977_v21, 4  ;;  %v2095_v6 = vsel %vm14579_vm9, %v2092_v57, %v2094_v2 }
 0x24a   : > { %14874 = vst [vmem:[#allocation46_spill] sm:$0xff] %v10986_v38  ;;  %1244 = vrot.lane.b32.xlu1 %v10691_v54, %s8929_s27  ;;  %v14878_v38 = vrot.slane %v10880_v49, 3  ;;  %v2434_v53 = vadd.f32 %v10733_v20, %v2290_v8  ;;  %v14551_v30 = vrot.slane %v10082_v42, 4  ;;  %v1898_v33 = vrot.slane %v10209_v50, 1 }
 0x24b   : > { %1032 = vrot.lane.b32.xlu0 %v10877_v46, %s8927_s4  ;;  %v1068_v43 = vadd.f32 %v14880_v41, %v960_v37  ;;  %v1777_v41 = vsel %vm14792_vm0, %v1774_v15, %v14549_v40  ;;  %v2154_v14 = vadd.f32 %v2095_v6, %v2055_v9 }
 0x24c   : > { %v1647_v25 = vsel %vm14579_vm9, %v1644_v4, %v14878_v38  ;;  %v11010_v45 = vpop.permute.xlu1 %914  ;;  %v2192_v4 = vsel %vm14882_vm14, %v14881_v36, %v2191_v48  ;;  %v2194_v15 = vsel %vm14883_vm4, %v2191_v48, %v14551_v30  ;;  %v14886_v36 = vld [vmem:[#allocation9_spill] sm:$0xff]  ;;  %vm14935_vm14 = vmmov %vm14792_vm0 }
 0x24d   : > { %14879 = vst [vmem:[#allocation65_spill] sm:$0xff] %v11010_v45  ;;  %v2607_v1 = vpop.permute.xlu0 %2606  ;;  %v1717_v5 = vadd.f32 %v1647_v25, %v1617_v13  ;;  %v1176_v25 = vadd.f32 %v10379_v29, %v1068_v43  ;;  %v11033_v20 = vadd.f32 %v2192_v4, %v2153_v26  ;;  %v14885_v43 = vld [vmem:[#allocation84_spill] sm:$0xff]  ;;  %vm14950_vm4 = vmmov %vm14792_vm0 }
 0x24e   : > { %2738 = vrot.lane.b32.xlu1 %v10993_v47, %s8929_s27 }
 0x24f   : > { %2526 = vrot.lane.b32.xlu0 %v2467_v27, %s8927_s4  ;;  %v1847_v13 = vadd.f32 %v1777_v41, %v1717_v5  ;;  %v2578_v27 = vadd.f32 %v10821_v51, %v2434_v53  ;;  %v11037_v57 = vadd.f32 %v10415_v19, %v1176_v25  ;;  %v11050_v51 = vmul.f32 0.023647603, %v11033_v20 }
 0x250   : > { %v11029_v37 = vpop.permute.xlu1 %2512  ;;  %v11052_v19 = vadd.f32 %v2194_v15, %v2154_v14 }
 0x251   : > { %v11031_v38 = vpop.permute.xlu0 %1124  ;;  %v2674_v29 = vadd.f32 %v10931_v39, %v2578_v27  ;;  %v2291_v9 = vadd.f32 %v10476_v63, %v1847_v13  ;;  %v961_v39 = vadd.f32 %v14885_v43, %v9790_v12  ;;  %v11059_v53 = vmul.f32 0.023647603, %v11037_v57 }
 0x252   : > { %1246 = vrot.lane.b32.xlu1 %v10737_v28, %s8929_s27  ;;  %v1900_v63 = vrot.slane %v10272_v32, 1  ;;  %v11075_v41 = vmul.f32 0.023647603, %v11052_v19 }
 0x253   : > { %1034 = vrot.lane.b32.xlu0 %v10937_v18, %s8927_s4  ;;  %v2435_v48 = vadd.f32 %v10775_v52, %v2291_v9  ;;  %v1069_v6 = vadd.f32 %v10353_v23, %v961_v39  ;;  %v1997_v23 = vrot.slane %v10209_v50, 2  ;;  %v14554_v40 = vrot.slane %v11059_v53, 3 }
 0x254   : > { %v11047_v26 = vpop.permute.xlu1 %1018 }
 0x255   : > { %14884 = vst [vmem:[#allocation10_spill] sm:$0xff] %v11047_v26  ;;  %v2725_v5 = vpop.permute.xlu0 %2724  ;;  %v2579_v52 = vadd.f32 %v10871_v60, %v2435_v48  ;;  %v1177_v27 = vadd.f32 %v10397_v0, %v1069_v6  ;;  %v11091_v60 = vmul.f32 0.030364122, %v11037_v57  ;;  %v1901_v48 = vsel %vm1384_vm7, %v1898_v33, %v1900_v63  ;;  %v14890_v63 = vld [vmem:[#allocation11_spill] sm:$0xff] }
 0x256   : > { %v2794_v8 = vadd.f32 %v2725_v5, %v2674_v29  ;;  %2620 = vrot.lane.b32.xlu1 %v10846_v16, %s8928_s25  ;;  %v14888_v16 = vrot.slane %v10082_v42, 1  ;;  %v14550_v29 = vrot.slane %v11059_v53, 1  ;;  %v14916_v26 = vrot.slane %v11059_v53, 3 }
 0x257   : > { %2384 = vrot.lane.b32.xlu0 %v11050_v51, %s8926_s30  ;;  %v2675_v15 = vadd.f32 %v2607_v1, %v2579_v52  ;;  %v11094_v0 = vadd.f32 %v10428_v17, %v1177_v27  ;;  %v14889_v1 = vrot.slane %v10880_v49, 1  ;;  %v1998_v17 = vsel %vm1538_vm8, %v1995_v31, %v1997_v23 }
 0x258   : > { %v2818_v4 = vsub.f32 %v14886_v36, %v2794_v8  ;;  %8387 = vmatprep.mubr.msk.f32.mxu0 %vm2864_vm1, %v2794_v8  ;;  %v11070_v12 = vpop.permute.xlu1 %1230  ;;  %v1899_v14 = vsel %vm1384_vm7, %v14888_v16, %v1898_v33  ;;  %v1999_v33 = vrot.slane %v10272_v32, 2  ;;  %v11117_v16 = vmul.f32 0.011170336, %v10823_v7 }
 0x259   : > { %v11072_v25 = vpop.permute.xlu0 %1020  ;;  %v1957_v9 = vadd.f32 %v1899_v14, %v10082_v42  ;;  %v1958_v52 = vadd.f32 %v1901_v48, %v10209_v50  ;;  %v2469_v7 = vmul.f32 0.030364122, %v11052_v19  ;;  %v2195_v48 = vrot.slane %v10209_v50, 4 }
 0x25a   : > { %14887 = vst [vmem:[#allocation68_spill] sm:$0xff] %v11072_v25  ;;  %v2842_v13 = vand.u32 2147483647, %v2818_v4  ;;  %2386 = vrot.lane.b32.xlu1 %v11075_v41, %s8926_s30  ;;  %v1395_v4 = vsel %vm1384_vm7, %v14889_v1, %v14550_v29  ;;  %v2098_v1 = vrot.slane %v10272_v32, 3 }
 0x25b   : > { %1140 = vrot.lane.b32.xlu0 %v10877_v46, %s8928_s25  ;;  %v2056_v14 = vadd.f32 %v1998_v17, %v1957_v9 }
 0x25c   : > { %v2868_v5 = vsel %vm2864_vm1, %v2842_v13, 0.0  ;;  %v2727_v43 = vpop.permute.xlu1 %2726  ;;  %v11122_v13 = vmul.f32 0.023647603, %v11094_v0 }
 0x25d   : > { %v2869_v8 = vadd.f32 %v2868_v5, %v10929_v35  ;;  %v11097_v39 = vpop.permute.xlu0 %2514  ;;  %v2795_v36 = vadd.f32 %v2727_v43, %v2675_v15  ;;  %v2096_v35 = vrot.slane %v10209_v50, 3  ;;  %v2468_v15 = vmul.f32 0.030364122, %v11033_v20 }
 0x25e   : > { %1142 = vrot.lane.b32.xlu1 %v10937_v18, %s8928_s25  ;;  %v1464_v5 = vadd.f32 %v1395_v4, %v10975_v34  ;;  %v11141_v4 = vmul.f32 0.011170336, %v11037_v57 }
 0x25f   : > { %2622 = vrot.lane.b32.xlu0 %v10898_v44, %s8928_s25  ;;  %v2819_v6 = vsub.f32 %v14890_v63, %v2795_v36  ;;  %8388 = vmatmul.mubr.msk.f32.gmra.mrb[2].mxu0 %vm2864_vm1, %v2795_v36  ;;  %v14552_v44 = vrot.slane %v11091_v60, 2  ;;  %v2097_v9 = vsel %vm14579_vm9, %v2094_v2, %v2096_v35  ;;  %v2000_v36 = vsel %vm1538_vm8, %v1997_v23, %v1999_v33 }
 0x260   : > { %v11124_v31 = vpop.permute.xlu1 %1232  ;;  %v2155_v63 = vadd.f32 %v2097_v9, %v2056_v14  ;;  %v14892_v2 = vrot.slane %v10924_v61, 2  ;;  %v1903_v14 = vrot.slane %v10391_v24, 1  ;;  %v11165_v61 = vmul.f32 0.011170336, %v10873_v11 }
 0x261   : > { %v11126_v27 = vpop.permute.xlu0 %1022  ;;  %v2843_v43 = vand.u32 2147483647, %v2819_v6  ;;  %v2057_v6 = vadd.f32 %v2000_v36, %v1958_v52  ;;  %v11159_v52 = vmul.f32 0.030364122, %v11094_v0  ;;  %v1902_v36 = vrot.slane %v10387_v56, 1 }
 0x262   : > { %14891 = vst [vmem:[#allocation69_spill] sm:$0xff] %v11126_v27  ;;  %2740 = vrot.lane.b32.xlu1 %v11117_v16, %s8929_s27  ;;  %v1549_v29 = vsel %vm1538_vm8, %v14892_v2, %v14552_v44  ;;  %v14896_v2 = vrot.slane %v11059_v53, 1  ;;  %v14918_v53 = vld [vmem:[#allocation56_spill] sm:$0xff] }
 0x263   : > { %2528 = vrot.lane.b32.xlu0 %v2468_v15, %s8927_s4  ;;  %v2870_v17 = vsel %vm2864_vm1, %v2843_v43, 0.0  ;;  %v14553_v15 = vrot.slane %v11122_v13, 1  ;;  %v1618_v30 = vadd.f32 %v1549_v29, %v1464_v5  ;;  %v2099_v29 = vsel %vm14579_vm9, %v2096_v35, %v2098_v1 }
 0x264   : > { %v11151_v23 = vadd.f32 %v2870_v17, %v2869_v8  ;;  %v11153_v33 = vpop.permute.xlu1 %2608  ;;  %v14893_v8 = vrot.slane %v10082_v42, 4  ;;  %v2197_v5 = vrot.slane %v10272_v32, 4  ;;  %v14895_v17 = vrot.slane %v10880_v49, 3 }
 0x265   : > { %v11155_v57 = vpop.permute.xlu0 %2372  ;;  %v2156_v1 = vadd.f32 %v2099_v29, %v2057_v6  ;;  %v1904_v44 = vsel %vm1384_vm7, %v1902_v36, %v1903_v14  ;;  %v2002_v29 = vrot.slane %v10391_v24, 2  ;;  %v14901_v36 = vld [vmem:[#allocation55_spill] sm:$0xff]  ;;  %v14904_v49 = vrot.slane %v10975_v34, 4  ;;  %v14908_v34 = vld [vmem:[#allocation36_spill] sm:$0xff] }
 0x266   : > { %2530 = vrot.lane.b32.xlu1 %v2469_v7, %s8927_s4  ;;  %v2196_v43 = vsel %vm14894_vm5, %v14893_v8, %v2195_v48  ;;  %v1649_v11 = vsel %vm14579_vm9, %v14895_v17, %v14554_v40  ;;  %v11198_v17 = vmul.f32 0.011170336, %v11033_v20  ;;  %v14903_v40 = vrot.slane %v11141_v4, 4  ;;  %vm14956_vm5 = vmmov %vm14792_vm0 }
 0x267   : > { %1248 = vrot.lane.b32.xlu0 %v10877_v46, %s8929_s27  ;;  %v11170_v9 = vadd.f32 %v2196_v43, %v2155_v63  ;;  %v1397_v63 = vsel %vm1384_vm7, %v14896_v2, %v14553_v15  ;;  %v1718_v43 = vadd.f32 %v1649_v11, %v1618_v30  ;;  %v2198_v30 = vsel %vm14900_vm12, %v2195_v48, %v2197_v5  ;;  %v14902_v11 = vld [vmem:[#allocation33_spill] sm:$0xff]  ;;  %vm14972_vm12 = vmmov %vm14792_vm0 }
 0x268   : > { %v11186_v8 = vpop.permute.xlu1 %1126  ;;  %14899 = vst [vmem:[#allocation47_spill] sm:$0xff] %v11198_v17  ;;  %v1465_v2 = vadd.f32 %v1397_v63, %v11141_v4  ;;  %v962_v15 = vadd.f32 %v14902_v11, %v14901_v36  ;;  %v1779_v7 = vsel %vm14905_vm2, %v14904_v49, %v14903_v40  ;;  %v11217_v63 = vadd.f32 %v2198_v30, %v2156_v1  ;;  %v14911_v30 = vld [vmem:[#allocation90_spill] sm:$0xff]  ;;  %v14913_v49 = vld [vmem:[#allocation103_spill] sm:$0xff]  ;;  %vm14977_vm2 = vmmov %vm14792_vm0 }
 0x269   : > { %14897 = vst [vmem:[#allocation8_spill] sm:$0xff] %v11186_v8  ;;  %v11188_v35 = vpop.permute.xlu0 %916  ;;  %v11202_v6 = vmul.f32 0.023647603, %v11170_v9  ;;  %v1959_v27 = vadd.f32 %v1904_v44, %v10387_v56  ;;  %v1848_v48 = vadd.f32 %v1779_v7, %v1718_v43  ;;  %v2001_v5 = vrot.slane %v10387_v56, 2 }
 0x26a   : > { %14898 = vst [vmem:[#allocation63_spill] sm:$0xff] %v11188_v35  ;;  %1250 = vrot.lane.b32.xlu1 %v10937_v18, %s8929_s27  ;;  %v2101_v8 = vrot.slane %v10391_v24, 3  ;;  %v14907_v36 = vrot.slane %v10421_v10, 1  ;;  %v1070_v45 = vadd.f32 %v14908_v34, %v962_v15  ;;  %v11227_v40 = vmul.f32 0.011170336, %v11094_v0 }
 0x26b   : > { %2742 = vrot.lane.b32.xlu0 %v11165_v61, %s8929_s27  ;;  %v14909_v1 = vrot.slane %v11159_v52, 2  ;;  %v14910_v44 = vrot.slane %v11091_v60, 2  ;;  %v2003_v15 = vsel %vm1538_vm8, %v2001_v5, %v2002_v29  ;;  %v2100_v0 = vrot.slane %v10387_v56, 3 }
 0x26c   : > { %v11213_v20 = vpop.permute.xlu1 %2374  ;;  %v1906_v11 = vsel %vm1384_vm7, %v1903_v14, %v14907_v36  ;;  %v1178_v36 = vadd.f32 %v14911_v30, %v1070_v45  ;;  %v2200_v43 = vrot.slane %v10391_v24, 4  ;;  %v14914_v30 = vld [vmem:[#allocation93_spill] sm:$0xff]  ;;  %v2470_v45 = vmul.f32 0.030364122, %v11170_v9 }
 0x26d   : > { %v11215_v35 = vpop.permute.xlu0 %1128  ;;  %v1551_v7 = vsel %vm1538_vm8, %v14910_v44, %v14909_v1  ;;  %v11248_v1 = vmul.f32 0.023647603, %v11217_v63  ;;  %v1960_v44 = vadd.f32 %v1906_v11, %v10391_v24  ;;  %v2102_v5 = vsel %vm14579_vm9, %v2100_v0, %v2101_v8 }
 0x26e   : > { %14906 = vst [vmem:[#allocation26_spill] sm:$0xff] %v11215_v35  ;;  %2624 = vrot.lane.b32.xlu1 %v11050_v51, %s8928_s25  ;;  %v1619_v14 = vadd.f32 %v1551_v7, %v1465_v2  ;;  %v2058_v51 = vadd.f32 %v2003_v15, %v1959_v27  ;;  %v2292_v2 = vadd.f32 %v14913_v49, %v1848_v48  ;;  %v2199_v7 = vrot.slane %v10387_v56, 4 }
 0x26f   : > { %2388 = vrot.lane.b32.xlu0 %v11202_v6, %s8926_s30  ;;  %v14915_v35 = vrot.slane %v11122_v13, 3  ;;  %v14917_v15 = vrot.slane %v10421_v10, 2 }
 0x270   : > { %v11243_v34 = vpop.permute.xlu1 %918  ;;  %v2436_v11 = vadd.f32 %v10933_v3, %v2292_v2  ;;  %v2157_v25 = vadd.f32 %v2102_v5, %v2058_v51 }
 0x271   : > { %14912 = vst [vmem:[#allocation67_spill] sm:$0xff] %v11243_v34  ;;  %v11245_v60 = vpop.permute.xlu0 %2610  ;;  %v11257_v34 = vadd.f32 %v14914_v30, %v1178_v36  ;;  %v1651_v27 = vsel %vm14579_vm9, %v14916_v26, %v14915_v35  ;;  %v2005_v0 = vsel %vm1538_vm8, %v2002_v29, %v14917_v15  ;;  %v1907_v36 = vrot.slane %v10527_v22, 1  ;;  %v14919_v30 = vld [vmem:[#allocation35_spill] sm:$0xff] }
 0x272   : > { %2626 = vrot.lane.b32.xlu1 %v11075_v41, %s8928_s25  ;;  %v1719_v49 = vadd.f32 %v1651_v27, %v1619_v14  ;;  %v963_v26 = vadd.f32 %v14919_v30, %v14918_v53  ;;  %v2059_v48 = vadd.f32 %v2005_v0, %v1960_v44  ;;  %v2580_v3 = vadd.f32 %v11029_v37, %v2436_v11  ;;  %v14923_v27 = vld [vmem:[#allocation86_spill] sm:$0xff]  ;;  %v14929_v0 = vld [vmem:[#allocation92_spill] sm:$0xff] }
 0x273   : > { %2390 = vrot.lane.b32.xlu0 %v11248_v1, %s8926_s30  ;;  %v11283_v14 = vmul.f32 0.011170336, %v11052_v19  ;;  %v2201_v29 = vsel %vm14922_vm13, %v2199_v7, %v2200_v43  ;;  %v11289_v53 = vmul.f32 0.023647603, %v11257_v34  ;;  %v14924_v30 = vrot.slane %v11227_v40, 4  ;;  %vm14981_vm13 = vmmov %vm14792_vm0 }
 0x274   : > { %v11276_v35 = vpop.permute.xlu1 %2516  ;;  %v1071_v15 = vadd.f32 %v14923_v27, %v963_v26  ;;  %v14927_v37 = vrot.slane %v10421_v10, 3  ;;  %v2676_v5 = vadd.f32 %v11153_v33, %v2580_v3  ;;  %v14928_v7 = vrot.slane %v10421_v10, 1  ;;  %v14931_v3 = vld [vmem:[#allocation95_spill] sm:$0xff] }
 0x275   : > { %v11278_v41 = vpop.permute.xlu0 %1130  ;;  %14921 = vst [vmem:[#allocation54_spill] sm:$0xff] %v11283_v14  ;;  %v1398_v33 = vrot.slane %v11289_v53, 1 }
 0x276   : > { %14920 = vst [vmem:[#allocation27_spill] sm:$0xff] %v11278_v41  ;;  %v14925_v41 = vrot.slane %v11141_v4, 4  ;;  %2744 = vrot.lane.b32.xlu1 %v11198_v17, %s8929_s27  ;;  %v2104_v19 = vsel %vm14579_vm9, %v2101_v8, %v14927_v37  ;;  %v1908_v11 = vsel %vm1384_vm7, %v14928_v7, %v1907_v36  ;;  %v14555_v4 = vrot.slane %v10557_v62, 1  ;;  %v14932_v37 = vld [vmem:[#allocation70_spill] sm:$0xff] }
 0x277   : > { %2532 = vrot.lane.b32.xlu0 %v2470_v45, %s8927_s4  ;;  %v1179_v26 = vadd.f32 %v14929_v0, %v1071_v15  ;;  %v2471_v45 = vmul.f32 0.030364122, %v11217_v63  ;;  %v2158_v2 = vadd.f32 %v2104_v19, %v2059_v48  ;;  %v1961_v15 = vadd.f32 %v1908_v11, %v10421_v10 }
 0x278   : > { %v1781_v51 = vsel %vm14926_vm6, %v14925_v41, %v14924_v30  ;;  %v11308_v41 = vpop.permute.xlu1 %1024  ;;  %v11311_v30 = vadd.f32 %v2201_v29, %v2157_v25  ;;  %v14933_v25 = vld [vmem:[#allocation12_spill] sm:$0xff]  ;;  %v14934_v48 = vrot.slane %v10421_v10, 4  ;;  %v11332_v0 = vmul.f32 0.030364122, %v11257_v34  ;;  %vm14991_vm6 = vmmov %vm14792_vm0 }
 0x279   : > { %v1849_v44 = vadd.f32 %v1781_v51, %v1719_v49  ;;  %14930 = vst [vmem:[#allocation82_spill] sm:$0xff] %v11308_v41  ;;  %v2729_v27 = vpop.permute.xlu0 %2728  ;;  %v2006_v49 = vrot.slane %v10527_v22, 2  ;;  %v11316_v51 = vadd.f32 %v14931_v3, %v1179_v26  ;;  %v14937_v3 = vrot.slane %v10421_v10, 2 }
 0x27a   : > { %v2796_v8 = vadd.f32 %v2729_v27, %v2676_v5  ;;  %2746 = vrot.lane.b32.xlu1 %v11283_v14, %s8929_s27  ;;  %v2203_v19 = vsel %vm14935_vm14, %v2200_v43, %v14934_v48  ;;  %v1910_v5 = vsel %vm1384_vm7, %v1907_v36, %v14555_v4  ;;  %v14938_v48 = vrot.slane %v11122_v13, 1  ;;  %vm14995_vm14 = vmmov %vm14792_vm0 }
 0x27b   : > { %2534 = vrot.lane.b32.xlu0 %v2471_v45, %s8927_s4  ;;  %v2293_v7 = vadd.f32 %v14932_v37, %v1849_v44  ;;  %v11339_v44 = vmul.f32 0.023647603, %v11311_v30  ;;  %v11341_v27 = vadd.f32 %v2203_v19, %v2158_v2  ;;  %v2105_v45 = vrot.slane %v10527_v22, 3 }
 0x27c   : > { %v2820_v29 = vsub.f32 %v14933_v25, %v2796_v8  ;;  %8390 = vmatprep.mubr.msk.f32.mxu0 %vm2864_vm1, %v2796_v8  ;;  %v11334_v26 = vpop.permute.xlu1 %1236  ;;  %v2007_v36 = vsel %vm1538_vm8, %v14937_v3, %v2006_v49  ;;  %v11350_v25 = vmul.f32 0.023647603, %v11316_v51  ;;  %v1399_v4 = vsel %vm1384_vm7, %v14938_v48, %v1398_v33 }
 0x27d   : > { %v11336_v11 = vpop.permute.xlu0 %1234  ;;  %v2437_v43 = vadd.f32 %v10984_v55, %v2293_v7  ;;  %v2060_v55 = vadd.f32 %v2007_v36, %v1961_v15  ;;  %v1962_v2 = vadd.f32 %v1910_v5, %v10527_v22  ;;  %v2204_v19 = vrot.slane %v10527_v22, 4 }
 0x27e   : > { %14936 = vst [vmem:[#allocation85_spill] sm:$0xff] %v11336_v11  ;;  %v2844_v8 = vand.u32 2147483647, %v2820_v29  ;;  %2628 = vrot.lane.b32.xlu1 %v11202_v6, %s8928_s25  ;;  %v11368_v6 = vmul.f32 0.023647603, %v11341_v27  ;;  %v14939_v15 = vrot.slane %v10421_v10, 3 }
 0x27f   : > { %2392 = vrot.lane.b32.xlu0 %v11339_v44, %s8926_s30  ;;  %v2581_v7 = vadd.f32 %v11097_v39, %v2437_v43  ;;  %v1466_v39 = vadd.f32 %v1399_v4, %v11227_v40  ;;  %v11393_v22 = vmul.f32 0.011170336, %v11257_v34  ;;  %v1492_v14 = vmul.f32 0.030364122, %v11316_v51 }
 0x280   : > { %v2872_v29 = vsel %vm2864_vm1, %v2844_v8, 0.0  ;;  %v2731_v48 = vpop.permute.xlu1 %2730  ;;  %v2106_v5 = vsel %vm14579_vm9, %v14939_v15, %v2105_v45  ;;  %v14940_v8 = vrot.slane %v10557_v62, 2  ;;  %v11385_v15 = vmul.f32 0.011170336, %v11170_v9 }
 0x281   : > { %v2873_v37 = vadd.f32 %v2872_v29, %v11151_v23  ;;  %v11365_v41 = vpop.permute.xlu0 %2518  ;;  %v2677_v43 = vadd.f32 %v11245_v60, %v2581_v7  ;;  %v1400_v29 = vrot.slane %v11350_v25, 1  ;;  %v2159_v4 = vadd.f32 %v2106_v5, %v2060_v55 }
 0x282   : > { %v2009_v36 = vsel %vm1538_vm8, %v2006_v49, %v14940_v8  ;;  %2630 = vrot.lane.b32.xlu1 %v11248_v1, %s8928_s25  ;;  %v2472_v7 = vmul.f32 0.030364122, %v11311_v30  ;;  %v14941_v49 = vrot.slane %v10421_v10, 4  ;;  %v1911_v23 = vrot.slane %v10691_v54, 1 }
 0x283   : > { %2394 = vrot.lane.b32.xlu0 %v11368_v6, %s8926_s30  ;;  %v2061_v3 = vadd.f32 %v2009_v36, %v1962_v2  ;;  %v2797_v60 = vadd.f32 %v2731_v48, %v2677_v43  ;;  %v1652_v1 = vrot.slane %v11289_v53, 3  ;;  %v14942_v9 = vrot.slane %v11332_v0, 2  ;;  %v14945_v36 = vld [vmem:[#allocation13_spill] sm:$0xff] }
 0x284   : > { %v2205_v8 = vsel %vm14792_vm0, %v14941_v49, %v2204_v19  ;;  %v14943_v55 = vrot.slane %v11159_v52, 2  ;;  %v11402_v48 = vpop.permute.xlu1 %1238  ;;  %v14946_v34 = vrot.slane %v10557_v62, 3  ;;  %v14559_v17 = vrot.slane %v10557_v62, 4 }
 0x285   : > { %v11404_v5 = vpop.permute.xlu0 %1026  ;;  %v2821_v49 = vsub.f32 %v14945_v36, %v2797_v60  ;;  %8391 = vmatmul.mubr.msk.f32.gmra.mrb[4].mxu0 %vm2864_vm1, %v2797_v60  ;;  %v1401_v11 = vsel %vm1384_vm7, %v1398_v33, %v1400_v29  ;;  %v11417_v52 = vmul.f32 0.011170336, %v11217_v63  ;;  %v1554_v36 = vrot.slane %v1492_v14, 2 }
 0x286   : > { %v1553_v2 = vsel %vm1538_vm8, %v14943_v55, %v14942_v9  ;;  %14944 = vst [vmem:[#allocation84_spill] sm:$0xff] %v11404_v5  ;;  %v2108_v53 = vsel %vm14579_vm9, %v2105_v45, %v14946_v34  ;;  %2748 = vrot.lane.b32.xlu1 %v11385_v15, %s8929_s27  ;;  %v2473_v55 = vmul.f32 0.030364122, %v11341_v27  ;;  %v14561_v45 = vrot.slane %v10737_v28, 1 }
 0x287   : > { %v1620_v43 = vadd.f32 %v1553_v2, %v1466_v39  ;;  %2536 = vrot.lane.b32.xlu0 %v2472_v7, %s8927_s4  ;;  %14947 = vst [vmem:[#allocation9_spill] sm:$0xff] %v11417_v52  ;;  %v11419_v39 = vadd.f32 %v2205_v8, %v2159_v4  ;;  %v2160_v9 = vadd.f32 %v2108_v53, %v2061_v3  ;;  %v2845_v60 = vand.u32 2147483647, %v2821_v49 }
 0x288   : > { %v1782_v2 = vrot.slane %v11393_v22, 4  ;;  %v14948_v33 = vrot.slane %v11122_v13, 3  ;;  %v11427_v34 = vpop.permute.xlu1 %2612  ;;  %v14949_v63 = vrot.slane %v10557_v62, 1  ;;  %v1467_v8 = vadd.f32 %v1401_v11, %v11393_v22  ;;  %v14951_v11 = vld [vmem:[#allocation58_spill] sm:$0xff] }
 0x289   : > { %v11429_v7 = vpop.permute.xlu0 %2376  ;;  %v2874_v49 = vsel %vm2864_vm1, %v2845_v60, 0.0  ;;  %v2207_v14 = vsel %vm14950_vm4, %v2204_v19, %v14559_v17  ;;  %v11445_v53 = vmul.f32 0.023647603, %v11419_v39  ;;  %v2010_v22 = vrot.slane %v10691_v54, 2  ;;  %vm15001_vm4 = vmmov %vm14792_vm0 }
 0x28a   : > { %v1653_v29 = vsel %vm14579_vm9, %v14948_v33, %v1652_v1  ;;  %v1912_v3 = vsel %vm1384_vm7, %v14949_v63, %v1911_v23  ;;  %v11439_v13 = vadd.f32 %v2874_v49, %v2873_v37  ;;  %2750 = vrot.lane.b32.xlu1 %v11417_v52, %s8929_s27  ;;  %v11447_v33 = vadd.f32 %v2207_v14, %v2160_v9  ;;  %v14954_v63 = vld [vmem:[#allocation88_spill] sm:$0xff] }
 0x28b   : > { %v1720_v4 = vadd.f32 %v1653_v29, %v1620_v43  ;;  %2538 = vrot.lane.b32.xlu0 %v2473_v55, %s8927_s4  ;;  %v14952_v43 = vld [vmem:[#allocation87_spill] sm:$0xff]  ;;  %v14953_v29 = vld [vmem:[#allocation57_spill] sm:$0xff]  ;;  %v1963_v37 = vadd.f32 %v1912_v3, %v10557_v62  ;;  %v1914_v49 = vsel %vm1384_vm7, %v1911_v23, %v14561_v45  ;;  %v1654_v55 = vrot.slane %v11350_v25, 3 }
 0x28c   : > { %v965_v60 = vadd.f32 %v14952_v43, %v14951_v11  ;;  %v964_v19 = vadd.f32 %v14954_v63, %v14953_v29  ;;  %v1738_v17 = vmul.f32 0.011170336, %v11316_v51  ;;  %v14955_v9 = vrot.slane %v11227_v40, 4  ;;  %v11466_v43 = vpop.permute.xlu1 %1132  ;;  %v14961_v25 = vld [vmem:[#allocation91_spill] sm:$0xff]  ;;  %v14962_v51 = vld [vmem:[#allocation94_spill] sm:$0xff] }
 0x28d   : > { %v14957_v52 = vrot.slane %v11332_v0, 2  ;;  %14958 = vst [vmem:[#allocation11_spill] sm:$0xff] %v11466_v43  ;;  %v11468_v29 = vpop.permute.xlu0 %920  ;;  %v11471_v23 = vmul.f32 0.011170336, %v11311_v30  ;;  %v14963_v40 = vrot.slane %v10557_v62, 2 }
 0x28e   : > { %v1783_v14 = vsel %vm14956_vm5, %v14955_v9, %v1782_v2  ;;  %14959 = vst [vmem:[#allocation55_spill] sm:$0xff] %v11468_v29  ;;  %v1072_v45 = vadd.f32 %v14961_v25, %v964_v19  ;;  %v1073_v5 = vadd.f32 %v14962_v51, %v965_v60  ;;  %2632 = vrot.lane.b32.xlu1 %v11339_v44, %s8928_s25  ;;  %v1784_v60 = vrot.slane %v1738_v17, 4  ;;  %v14964_v19 = vld [vmem:[#allocation39_spill] sm:$0xff]  ;;  %v14965_v9 = vld [vmem:[#allocation100_spill] sm:$0xff]  ;;  %vm15024_vm5 = vmmov %vm14792_vm0 }
 0x28f   : > { %v1555_v11 = vsel %vm1538_vm8, %v14957_v52, %v1554_v36  ;;  %v1850_v3 = vadd.f32 %v1783_v14, %v1720_v4  ;;  %14960 = vst [vmem:[#allocation33_spill] sm:$0xff] %v11471_v23  ;;  %2396 = vrot.lane.b32.xlu0 %v11445_v53, %s8926_s30  ;;  %v2011_v0 = vsel %vm1538_vm8, %v14963_v40, %v2010_v22  ;;  %v2109_v52 = vrot.slane %v10691_v54, 3  ;;  %v14966_v40 = vld [vmem:[#allocation62_spill] sm:$0xff] }
 0x290   : > { %v1621_v63 = vadd.f32 %v1555_v11, %v1467_v8  ;;  %v11484_v36 = vmul.f32 0.023647603, %v11447_v33  ;;  %v2062_v30 = vadd.f32 %v2011_v0, %v1963_v37  ;;  %v1964_v4 = vadd.f32 %v1914_v49, %v10691_v54  ;;  %v11491_v25 = vpop.permute.xlu1 %2614  ;;  %v14968_v0 = vld [vmem:[#allocation101_spill] sm:$0xff] }
 0x291   : > { %v14562_v8 = vrot.slane %v10737_v28, 2  ;;  %v1180_v44 = vadd.f32 %v14964_v19, %v1072_v45  ;;  %v1181_v14 = vadd.f32 %v14965_v9, %v1073_v5  ;;  %v1655_v11 = vsel %vm14579_vm9, %v1652_v1, %v1654_v55  ;;  %v11493_v51 = vpop.permute.xlu0 %2378  ;;  %v14969_v45 = vld [vmem:[#allocation102_spill] sm:$0xff] }
 0x292   : > { %v2294_v29 = vadd.f32 %v14966_v40, %v1850_v3  ;;  %v1721_v43 = vadd.f32 %v1655_v11, %v1621_v63  ;;  %v2474_v37 = vmul.f32 0.030364122, %v11419_v39  ;;  %v11498_v49 = vmul.f32 0.011170336, %v11341_v27  ;;  %2634 = vrot.lane.b32.xlu1 %v11368_v6, %s8928_s25  ;;  %v14971_v6 = vld [vmem:[#allocation89_spill] sm:$0xff] }
 0x293   : > { %v11501_v17 = vadd.f32 %v14968_v0, %v1181_v14  ;;  %v11504_v19 = vadd.f32 %v14969_v45, %v1180_v44  ;;  %2398 = vrot.lane.b32.xlu0 %v11484_v36, %s8926_s30  ;;  %v14970_v1 = vrot.slane %v10557_v62, 3  ;;  %v2208_v55 = vrot.slane %v10691_v54, 4 }
 0x294   : > { %14967 = vst [vmem:[#allocation36_spill] sm:$0xff] %v11498_v49  ;;  %v2438_v27 = vadd.f32 %v11155_v57, %v2294_v29  ;;  %v2013_v63 = vsel %vm1538_vm8, %v2010_v22, %v14562_v8  ;;  %v14565_v44 = vrot.slane %v10737_v28, 3  ;;  %v966_v9 = vadd.f32 %v14971_v6, %v9909_v59  ;;  %v11522_v11 = vpop.permute.xlu1 %1134 }
 0x295   : > { %v2110_v5 = vsel %vm14579_vm9, %v14970_v1, %v2109_v52  ;;  %v1785_v14 = vsel %vm14972_vm12, %v1782_v2, %v1784_v60  ;;  %v11524_v40 = vpop.permute.xlu0 %922  ;;  %v2063_v0 = vadd.f32 %v2013_v63, %v1964_v4  ;;  %v1915_v45 = vrot.slane %v10877_v46, 1  ;;  %v14975_v1 = vld [vmem:[#allocation96_spill] sm:$0xff]  ;;  %v14978_v63 = vld [vmem:[#allocation19_spill] sm:$0xff]  ;;  %vm15028_vm12 = vmmov %vm14792_vm0 }
 0x296   : > { %v2161_v3 = vadd.f32 %v2110_v5, %v2062_v30  ;;  %14973 = vst [vmem:[#allocation90_spill] sm:$0xff] %v11524_v40  ;;  %v1851_v57 = vadd.f32 %v1785_v14, %v1721_v43  ;;  %v2582_v29 = vadd.f32 %v11276_v35, %v2438_v27  ;;  %v11530_v22 = vmul.f32 0.011170336, %v11419_v39  ;;  %2752 = vrot.lane.b32.xlu1 %v11471_v23, %s8929_s27 }
 0x297   : > { %v1074_v5 = vadd.f32 %v14975_v1, %v966_v9  ;;  %v11534_v59 = vmul.f32 0.023647603, %v11501_v17  ;;  %v11537_v2 = vmul.f32 0.023647603, %v11504_v19  ;;  %2540 = vrot.lane.b32.xlu0 %v2474_v37, %s8927_s4  ;;  %v2475_v35 = vmul.f32 0.030364122, %v11447_v33 }
 0x298   : > { %14974 = vst [vmem:[#allocation103_spill] sm:$0xff] %v11530_v22  ;;  %v1917_v43 = vrot.slane %v10937_v18, 1  ;;  %v2678_v39 = vadd.f32 %v11427_v34, %v2582_v29  ;;  %v14976_v4 = vrot.slane %v10557_v62, 4  ;;  %v2112_v27 = vsel %vm14579_vm9, %v2109_v52, %v14565_v44  ;;  %v2733_v9 = vpop.permute.xlu1 %2732 }
 0x299   : > { %v1182_v6 = vadd.f32 %v14978_v63, %v1074_v5  ;;  %v11552_v14 = vpop.permute.xlu0 %2520  ;;  %v2162_v1 = vadd.f32 %v2112_v27, %v2063_v0  ;;  %v14979_v8 = vrot.slane %v10737_v28, 1  ;;  %v2295_v29 = vadd.f32 %v10787_v58, %v1851_v57 }
 0x29a   : > { %v2209_v60 = vsel %vm14977_vm2, %v14976_v4, %v2208_v55  ;;  %v2798_v30 = vadd.f32 %v2733_v9, %v2678_v39  ;;  %v14980_v4 = vrot.slane %v10737_v28, 4  ;;  %v11564_v52 = vmul.f32 0.011170336, %v11447_v33  ;;  %2754 = vrot.lane.b32.xlu1 %v11498_v49, %s8929_s27  ;;  %vm15030_vm2 = vmmov %vm14792_vm0 }
 0x29b   : > { %v11554_v37 = vadd.f32 %v2209_v60, %v2161_v3  ;;  %v1916_v34 = vsel %vm1384_vm7, %v14979_v8, %v1915_v45  ;;  %v14564_v5 = vrot.slane %v11534_v59, 1  ;;  %v1402_v3 = vrot.slane %v11537_v2, 1  ;;  %v14983_v60 = vld [vmem:[#allocation51_spill] sm:$0xff]  ;;  %2542 = vrot.lane.b32.xlu0 %v2475_v35, %s8927_s4 }
 0x29c   : > { %v2211_v23 = vsel %vm14981_vm13, %v2208_v55, %v14980_v4  ;;  %14982 = vst [vmem:[#allocation93_spill] sm:$0xff] %v11564_v52  ;;  %v11569_v0 = vadd.f32 %v14983_v60, %v1182_v6  ;;  %v2014_v58 = vrot.slane %v10877_v46, 2  ;;  %v2439_v8 = vadd.f32 %v11213_v20, %v2295_v29  ;;  %v14984_v55 = vld [vmem:[#allocation14_spill] sm:$0xff]  ;;  %8393 = vmatprep.mubr.msk.f32.mxu0 %vm2864_vm1, %v2798_v30  ;;  %v11584_v6 = vpop.permute.xlu1 %1240  ;;  %vm15040_vm13 = vmmov %vm14792_vm0 }
 0x29d   : > { %v2822_v57 = vsub.f32 %v14984_v55, %v2798_v30  ;;  %v1965_v33 = vadd.f32 %v1916_v34, %v10737_v28  ;;  %v1918_v39 = vsel %vm1384_vm7, %v1915_v45, %v1917_v43  ;;  %v11581_v27 = vmul.f32 0.030364122, %v11501_v17  ;;  %v11586_v35 = vpop.permute.xlu0 %1028 }
 0x29e   : > { %v1493_v63 = vmul.f32 0.030364122, %v11504_v19  ;;  %v11589_v9 = vmul.f32 0.023647603, %v11554_v37  ;;  %v11591_v20 = vadd.f32 %v2211_v23, %v2162_v1  ;;  %v2583_v30 = vadd.f32 %v11365_v41, %v2439_v8  ;;  %2636 = vrot.lane.b32.xlu1 %v11445_v53, %s8928_s25 }
 0x29f   : > { %v2846_v29 = vand.u32 2147483647, %v2822_v57  ;;  %v2113_v34 = vrot.slane %v10877_v46, 3  ;;  %v2016_v45 = vrot.slane %v10937_v18, 2  ;;  %v1404_v43 = vsel %vm1384_vm7, %v1402_v3, %v14564_v5 }
 0x2a0   : > { %v11600_v4 = vmul.f32 0.023647603, %v11569_v0  ;;  %2400 = vrot.lane.b32.xlu0 %v11589_v9, %s8926_s30  ;;  %v14985_v41 = vrot.slane %v10737_v28, 2  ;;  %v1966_v1 = vadd.f32 %v1918_v39, %v10877_v46  ;;  %v1314_v60 = vmul.f32 0.011170336, %v11504_v19  ;;  %v2735_v44 = vpop.permute.xlu1 %2734 }
 0x2a1   : > { %v2679_v8 = vadd.f32 %v11491_v25, %v2583_v30  ;;  %v2876_v3 = vsel %vm2864_vm1, %v2846_v29, 0.0  ;;  %v1557_v57 = vrot.slane %v11581_v27, 2  ;;  %v1556_v5 = vrot.slane %v1493_v63, 2  ;;  %v11615_v49 = vpop.permute.xlu0 %2522 }
 0x2a2   : > { %v2015_v23 = vsel %vm1538_vm8, %v14985_v41, %v2014_v58  ;;  %v2877_v53 = vadd.f32 %v2876_v3, %v11439_v13  ;;  %v11618_v40 = vmul.f32 0.023647603, %v11591_v20  ;;  %v1468_v41 = vadd.f32 %v1404_v43, %v1314_v60  ;;  %2638 = vrot.lane.b32.xlu1 %v11484_v36, %s8928_s25 }
 0x2a3   : > { %v2064_v55 = vadd.f32 %v2015_v23, %v1965_v33  ;;  %v2799_v39 = vadd.f32 %v2735_v44, %v2679_v8  ;;  %v2017_v19 = vsel %vm1538_vm8, %v2014_v58, %v2016_v45  ;;  %v2115_v25 = vrot.slane %v10937_v18, 3  ;;  %v14987_v58 = vld [vmem:[#allocation15_spill] sm:$0xff] }
 0x2a4   : > { %v14567_v30 = vrot.slane %v11600_v4, 1  ;;  %2402 = vrot.lane.b32.xlu0 %v11618_v40, %s8926_s30  ;;  %v14986_v13 = vrot.slane %v10737_v28, 3  ;;  %v2212_v27 = vrot.slane %v10877_v46, 4  ;;  %v2065_v63 = vadd.f32 %v2017_v19, %v1966_v1  ;;  %v11643_v1 = vpop.permute.xlu1 %1242 }
 0x2a5   : > { %v11632_v44 = vmul.f32 0.011170336, %v11501_v17  ;;  %v2823_v29 = vsub.f32 %v14987_v58, %v2799_v39  ;;  %8394 = vmatmul.mubr.msk.f32.gmra.mrb[6].mxu0 %vm2864_vm1, %v2799_v39  ;;  %v2476_v45 = vmul.f32 0.030364122, %v11554_v37  ;;  %v1657_v43 = vrot.slane %v11534_v59, 3  ;;  %v11645_v17 = vpop.permute.xlu0 %1030 }
 0x2a6   : > { %v2114_v33 = vsel %vm14579_vm9, %v14986_v13, %v2113_v34  ;;  %v1656_v23 = vrot.slane %v11537_v2, 3  ;;  %v11640_v8 = vmul.f32 0.030364122, %v11569_v0  ;;  %v1558_v3 = vsel %vm1538_vm8, %v1556_v5, %v1557_v57  ;;  %14988 = vst [vmem:[#allocation56_spill] sm:$0xff] %v11645_v17  ;;  %2756 = vrot.lane.b32.xlu1 %v11530_v22, %s8929_s27 }
 0x2a7   : > { %v2163_v36 = vadd.f32 %v2114_v33, %v2064_v55  ;;  %v1622_v19 = vadd.f32 %v1558_v3, %v1468_v41  ;;  %v2847_v13 = vand.u32 2147483647, %v2823_v29  ;;  %v2477_v39 = vmul.f32 0.030364122, %v11591_v20 }
 0x2a8   : > { %v2116_v58 = vsel %vm14579_vm9, %v2113_v34, %v2115_v25  ;;  %v14989_v55 = vrot.slane %v11534_v59, 1  ;;  %2544 = vrot.lane.b32.xlu0 %v2476_v45, %s8927_s4  ;;  %v14990_v5 = vrot.slane %v10737_v28, 4  ;;  %v2214_v29 = vrot.slane %v10937_v18, 4 }
 0x2a9   : > { %v2164_v33 = vadd.f32 %v2116_v58, %v2065_v63  ;;  %v1787_v34 = vrot.slane %v11632_v44, 4  ;;  %v1786_v25 = vrot.slane %v1314_v60, 4  ;;  %v2878_v3 = vsel %vm2864_vm1, %v2847_v13, 0.0  ;;  %v11671_v63 = vpop.permute.xlu0 %2380  ;;  %v14994_v60 = vld [vmem:[#allocation40_spill] sm:$0xff] }
 0x2aa   : > { %v1406_v2 = vsel %vm1384_vm7, %v14989_v55, %v14567_v30  ;;  %v2213_v41 = vsel %vm14991_vm6, %v14990_v5, %v2212_v27  ;;  %v14992_v55 = vld [vmem:[#allocation22_spill] sm:$0xff]  ;;  %v14993_v30 = vld [vmem:[#allocation97_spill] sm:$0xff]  ;;  %v1559_v22 = vrot.slane %v11640_v8, 2  ;;  %v1658_v45 = vsel %vm14579_vm9, %v1656_v23, %v1657_v43  ;;  %v2617_v5 = vpop.permute.xlu1 %2616  ;;  %2758 = vrot.lane.b32.xlu1 %v11564_v52, %s8929_s27  ;;  %v15018_v8 = vld [vmem:[#allocation79_spill] sm:$0xff] }
 0x2ab   : > { %v11663_v59 = vadd.f32 %v2213_v41, %v2163_v36  ;;  %v967_v46 = vadd.f32 %v14993_v30, %v14992_v55  ;;  %v11669_v17 = vadd.f32 %v2878_v3, %v2877_v53  ;;  %v1722_v58 = vadd.f32 %v1658_v45, %v1622_v19  ;;  %vm15045_vm6 = vmmov %vm14792_vm0 }
 0x2ac   : > { %v1469_v18 = vadd.f32 %v1406_v2, %v11632_v44  ;;  %2546 = vrot.lane.b32.xlu0 %v2477_v39, %s8927_s4  ;;  %v2215_v30 = vsel %vm14995_vm14, %v2212_v27, %v2214_v29  ;;  %v1788_v36 = vsel %vm14792_vm0, %v1786_v25, %v1787_v34  ;;  %v11686_v19 = vmul.f32 0.011170336, %v11569_v0  ;;  %v14997_v25 = vld [vmem:[#allocation48_spill] sm:$0xff]  ;;  %vm15050_vm14 = vmmov %vm14792_vm0 }
 0x2ad   : > { %v1075_v28 = vadd.f32 %v14994_v60, %v967_v46  ;;  %v11681_v53 = vmul.f32 0.023647603, %v11663_v59  ;;  %v11683_v23 = vadd.f32 %v2215_v30, %v2164_v33  ;;  %v14573_v44 = vrot.slane %v11600_v4, 3  ;;  %v14996_v46 = vld [vmem:[#allocation52_spill] sm:$0xff]  ;;  %v11695_v27 = vpop.permute.xlu0 %924 }
 0x2ae   : > { %v1560_v39 = vsel %vm1538_vm8, %v1557_v57, %v1559_v22  ;;  %v11693_v2 = vpop.permute.xlu1 %1136  ;;  %v1852_v41 = vadd.f32 %v1788_v36, %v1722_v58  ;;  %2640 = vrot.lane.b32.xlu1 %v11589_v9, %s8928_s25  ;;  %v14999_v58 = vld [vmem:[#allocation30_spill] sm:$0xff]  ;;  %v15000_v36 = vld [vmem:[#allocation104_spill] sm:$0xff] }
 0x2af   : > { %v1183_v13 = vadd.f32 %v14996_v46, %v1075_v28  ;;  %v1623_v29 = vadd.f32 %v1560_v39, %v1469_v18  ;;  %v14572_v28 = vrot.slane %v11686_v19, 4  ;;  %v1660_v0 = vsel %vm14579_vm9, %v1657_v43, %v14573_v44  ;;  %v14998_v18 = vld [vmem:[#allocation99_spill] sm:$0xff] }
 0x2b0   : > { %2404 = vrot.lane.b32.xlu0 %v11681_v53, %s8926_s30  ;;  %v2335_v55 = vmul.f32 0.023647603, %v11683_v23  ;;  %v968_v45 = vadd.f32 %v14998_v18, %v9977_v21  ;;  %v2296_v60 = vadd.f32 %v14999_v58, %v1852_v41  ;;  %v11727_v41 = vmul.f32 0.011170336, %v11554_v37 }
 0x2b1   : > { %v1291_v33 = vadd.f32 %v14997_v25, %v1183_v13  ;;  %v11706_v3 = vpop.permute.xlu0 %2382  ;;  %v1723_v9 = vadd.f32 %v1660_v0, %v1623_v29  ;;  %v1790_v13 = vsel %vm15001_vm4, %v1787_v34, %v14572_v28  ;;  %v2478_v29 = vmul.f32 0.030364122, %v11663_v59  ;;  %v15004_v34 = vld [vmem:[#allocation66_spill] sm:$0xff]  ;;  %vm15057_vm4 = vmmov %vm14792_vm0 }
 0x2b2   : > { %v2619_v57 = vpop.permute.xlu1 %2618  ;;  %2642 = vrot.lane.b32.xlu1 %v11618_v40, %s8928_s25  ;;  %v1076_v43 = vadd.f32 %v15000_v36, %v968_v45  ;;  %v2440_v46 = vadd.f32 %v11429_v7, %v2296_v60  ;;  %15002 = vst [vmem:[#allocation35_spill] sm:$0xff] %v11727_v41  ;;  %v15003_v40 = vld [vmem:[#allocation106_spill] sm:$0xff]  ;;  %v15005_v45 = vld [vmem:[#allocation105_spill] sm:$0xff]  ;;  %v15006_v60 = vld [vmem:[#allocation43_spill] sm:$0xff] }
 0x2b3   : > { %v11712_v30 = vmul.f32 0.023647603, %v1291_v33  ;;  %v1853_v0 = vadd.f32 %v1790_v13, %v1723_v9  ;;  %v969_v58 = vadd.f32 %v15005_v45, %v15004_v34  ;;  %v11741_v28 = vmul.f32 0.030364122, %v1291_v33  ;;  %v15008_v13 = vld [vmem:[#allocation108_spill] sm:$0xff] }
 0x2b4   : > { %2406 = vrot.lane.b32.xlu0 %v2335_v55, %s8926_s30  ;;  %v1184_v25 = vadd.f32 %v15003_v40, %v1076_v43  ;;  %v2584_v18 = vadd.f32 %v11552_v14, %v2440_v46  ;;  %v11746_v14 = vmul.f32 0.011170336, %v11591_v20  ;;  %v2479_v46 = vmul.f32 0.030364122, %v11683_v23  ;;  %v15010_v20 = vld [vmem:[#allocation49_spill] sm:$0xff] }
 0x2b5   : > { %v11724_v21 = vpop.permute.xlu0 %926  ;;  %v1407_v7 = vrot.slane %v11712_v30, 1  ;;  %v1077_v40 = vadd.f32 %v15008_v13, %v969_v58  ;;  %v15009_v34 = vrot.slane %v11600_v4, 1  ;;  %v15011_v58 = vld [vmem:[#allocation16_spill] sm:$0xff] }
 0x2b6   : > { %v11722_v39 = vpop.permute.xlu1 %1138  ;;  %2760 = vrot.lane.b32.xlu1 %v11727_v41, %s8929_s27  ;;  %v11739_v37 = vadd.f32 %v15006_v60, %v1184_v25  ;;  %v2680_v36 = vadd.f32 %v2617_v5, %v2584_v18  ;;  %15007 = vst [vmem:[#allocation86_spill] sm:$0xff] %v11746_v14 }
 0x2b7   : > { %v1408_v25 = vsel %vm1384_vm7, %v15009_v34, %v1407_v7  ;;  %v1185_v18 = vadd.f32 %v15010_v20, %v1077_v40  ;;  %v11776_v20 = vmul.f32 0.011170336, %v1291_v33  ;;  %v1661_v33 = vrot.slane %v11712_v30, 3  ;;  %v15019_v30 = vld [vmem:[#allocation17_spill] sm:$0xff] }
 0x2b8   : > { %2548 = vrot.lane.b32.xlu0 %v2478_v29, %s8927_s4  ;;  %v2297_v29 = vadd.f32 %v10993_v47, %v1853_v0  ;;  %v11758_v5 = vmul.f32 0.023647603, %v11739_v37  ;;  %v15012_v47 = vld [vmem:[#allocation107_spill] sm:$0xff] }
 0x2b9   : > { %v11743_v9 = vpop.permute.xlu0 %2524  ;;  %v970_v0 = vadd.f32 %v15012_v47, %v10082_v42  ;;  %v11782_v42 = vmul.f32 0.011170336, %v11683_v23 }
 0x2ba   : > { %v2737_v43 = vpop.permute.xlu1 %2736  ;;  %2762 = vrot.lane.b32.xlu1 %v11746_v14, %s8929_s27  ;;  %v2441_v45 = vadd.f32 %v11493_v51, %v2297_v29  ;;  %v1470_v51 = vadd.f32 %v1408_v25, %v11686_v19 }
 0x2bb   : > { %v2800_v44 = vadd.f32 %v2737_v43, %v2680_v36  ;;  %v1561_v36 = vrot.slane %v11741_v28, 2  ;;  %15014 = vst [vmem:[#allocation92_spill] sm:$0xff] %v11782_v42  ;;  %v1409_v28 = vrot.slane %v11758_v5, 1 }
 0x2bc   : > { %2550 = vrot.lane.b32.xlu0 %v2479_v46, %s8927_s4  ;;  %v15013_v46 = vld [vmem:[#allocation64_spill] sm:$0xff]  ;;  %v2585_v40 = vadd.f32 %v11615_v49, %v2441_v45 }
 0x2bd   : > { %v2824_v60 = vsub.f32 %v15011_v58, %v2800_v44  ;;  %8396 = vmatprep.mubr.msk.f32.mxu0 %vm2864_vm1, %v2800_v44  ;;  %v11769_v13 = vpop.permute.xlu0 %1032  ;;  %v11772_v34 = vadd.f32 %v15013_v46, %v1185_v18  ;;  %v11785_v44 = vmul.f32 0.011170336, %v11663_v59  ;;  %v15016_v18 = vld [vmem:[#allocation23_spill] sm:$0xff] }
 0x2be   : > { %v11767_v43 = vpop.permute.xlu1 %1244  ;;  %2646 = vrot.lane.b32.xlu1 %v2335_v55, %s8928_s25  ;;  %v1078_v49 = vadd.f32 %v15016_v18, %v970_v0  ;;  %v2681_v45 = vadd.f32 %v2619_v57, %v2585_v40  ;;  %v1497_v55 = vmul.f32 0.030364122, %v11739_v37 }
 0x2bf   : > { %v2848_v29 = vand.u32 2147483647, %v2824_v60  ;;  %15015 = vst [vmem:[#allocation95_spill] sm:$0xff] %v11785_v44  ;;  %v15017_v60 = vld [vmem:[#allocation50_spill] sm:$0xff]  ;;  %v11800_v0 = vmul.f32 0.023647603, %v11772_v34 }
 0x2c0   : > { %2644 = vrot.lane.b32.xlu0 %v11681_v53, %s8928_s25  ;;  %v1562_v53 = vsel %vm1538_vm8, %v1559_v22, %v1561_v36  ;;  %v1186_v47 = vadd.f32 %v15017_v60, %v1078_v49  ;;  %v1563_v18 = vrot.slane %v1497_v55, 2  ;;  %v15022_v55 = vld [vmem:[#allocation53_spill] sm:$0xff] }
 0x2c1   : > { %v2880_v25 = vsel %vm2864_vm1, %v2848_v29, 0.0  ;;  %v11796_v59 = vpop.permute.xlu0 %2526  ;;  %v1624_v57 = vadd.f32 %v1562_v53, %v1470_v51  ;;  %v1791_v29 = vrot.slane %v11776_v20, 4  ;;  %v15020_v51 = vrot.slane %v11600_v4, 3  ;;  %v15021_v53 = vld [vmem:[#allocation44_spill] sm:$0xff] }
 0x2c2   : > { %v2881_v23 = vadd.f32 %v2880_v25, %v11669_v17  ;;  %v2739_v58 = vpop.permute.xlu1 %2738  ;;  %2766 = vrot.lane.b32.xlu1 %v11782_v42, %s8929_s27  ;;  %v1294_v22 = vadd.f32 %v15018_v8, %v1186_v47  ;;  %v1410_v17 = vsel %vm1384_vm7, %v1407_v7, %v1409_v28  ;;  %v1411_v7 = vrot.slane %v11800_v0, 1 }
 0x2c3   : > { %v2801_v46 = vadd.f32 %v2739_v58, %v2681_v45  ;;  %v1662_v49 = vsel %vm14579_vm9, %v15020_v51, %v1661_v33  ;;  %v971_v58 = vadd.f32 %v15021_v53, %v10209_v50  ;;  %v1498_v8 = vmul.f32 0.030364122, %v11772_v34 }
 0x2c4   : > { %2764 = vrot.lane.b32.xlu0 %v11785_v44, %s8929_s27  ;;  %v1724_v60 = vadd.f32 %v1662_v49, %v1624_v57  ;;  %v11824_v4 = vmul.f32 0.023647603, %v1294_v22  ;;  %v1318_v42 = vmul.f32 0.011170336, %v11739_v37  ;;  %v1663_v44 = vrot.slane %v11758_v5, 3 }
 0x2c5   : > { %v2825_v40 = vsub.f32 %v15019_v30, %v2801_v46  ;;  %8397 = vmatmul.mubr.msk.f32.gmra.mrb[8].mxu0 %vm2864_vm1, %v2801_v46  ;;  %v11816_v25 = vpop.permute.xlu0 %1034  ;;  %v1471_v46 = vadd.f32 %v1410_v17, %v11776_v20  ;;  %v1079_v30 = vadd.f32 %v15022_v55, %v971_v58  ;;  %v15023_v50 = vrot.slane %v11686_v19, 4  ;;  %v15025_v17 = vld [vmem:[#allocation46_spill] sm:$0xff] }
 0x2c6   : > { %v11814_v45 = vpop.permute.xlu1 %1246  ;;  %v1564_v55 = vsel %vm1538_vm8, %v1561_v36, %v1563_v18  ;;  %v1565_v37 = vrot.slane %v1498_v8, 2  ;;  %v1413_v5 = vrot.slane %v11824_v4, 1  ;;  %v1793_v41 = vrot.slane %v1318_v42, 4 }
 0x2c7   : > { %v2849_v47 = vand.u32 2147483647, %v2825_v40  ;;  %v1792_v53 = vsel %vm15024_vm5, %v15023_v50, %v1791_v29  ;;  %v1187_v49 = vadd.f32 %v15025_v17, %v1079_v30  ;;  %v1625_v14 = vadd.f32 %v1564_v55, %v1471_v46 }
 0x2c8   : > { %v1854_v58 = vadd.f32 %v1792_v53, %v1724_v60  ;;  %v11847_v52 = vmul.f32 0.030364122, %v1294_v22  ;;  %v1664_v36 = vsel %vm14579_vm9, %v1661_v33, %v1663_v44  ;;  %v11854_v8 = vmul.f32 0.011170336, %v11772_v34  ;;  %v15027_v34 = vld [vmem:[#allocation81_spill] sm:$0xff] }
 0x2c9   : > { %v2882_v51 = vsel %vm2864_vm1, %v2849_v47, 0.0  ;;  %v11834_v20 = vpop.permute.xlu0 %2384  ;;  %v1412_v47 = vsel %vm1384_vm7, %v1409_v28, %v1411_v7  ;;  %v11841_v19 = vadd.f32 %v11070_v12, %v1187_v49  ;;  %v15026_v28 = vld [vmem:[#allocation59_spill] sm:$0xff]  ;;  %v1665_v12 = vrot.slane %v11800_v0, 3 }
 0x2ca   : > { %v11832_v57 = vadd.f32 %v2882_v51, %v2881_v23  ;;  %v2621_v40 = vpop.permute.xlu1 %2620  ;;  %v1472_v50 = vadd.f32 %v1412_v47, %v1318_v42  ;;  %v2298_v60 = vadd.f32 %v11117_v16, %v1854_v58  ;;  %v972_v46 = vadd.f32 %v15026_v28, %v10272_v32 }
 0x2cb   : > { %v1725_v30 = vadd.f32 %v1664_v36, %v1625_v14  ;;  %v11858_v53 = vmul.f32 0.023647603, %v11841_v19  ;;  %v1566_v17 = vsel %vm1538_vm8, %v1563_v18, %v1565_v37  ;;  %v1414_v16 = vsel %vm1384_vm7, %v1411_v7, %v1413_v5 }
 0x2cc   : > { %v2442_v42 = vadd.f32 %v11671_v63, %v2298_v60  ;;  %v1626_v49 = vadd.f32 %v1566_v17, %v1472_v50  ;;  %v1567_v32 = vrot.slane %v11847_v52, 2  ;;  %v1080_v55 = vadd.f32 %v15027_v34, %v972_v46 }
 0x2cd   : > { %v11845_v51 = vpop.permute.xlu0 %1140  ;;  %v1794_v0 = vsel %vm15028_vm12, %v1791_v29, %v1793_v41  ;;  %v1795_v47 = vrot.slane %v11854_v8, 4  ;;  %v1666_v63 = vsel %vm14579_vm9, %v1663_v44, %v1665_v12  ;;  %v1473_v18 = vadd.f32 %v1414_v16, %v11854_v8 }
 0x2ce   : > { %v11843_v23 = vpop.permute.xlu1 %2386  ;;  %v2586_v14 = vadd.f32 %v11743_v9, %v2442_v42  ;;  %v1855_v36 = vadd.f32 %v1794_v0, %v1725_v30  ;;  %v11872_v7 = vmul.f32 0.011170336, %v1294_v22  ;;  %v1188_v50 = vadd.f32 %v11031_v38, %v1080_v55  ;;  %v15029_v30 = vld [vmem:[#allocation83_spill] sm:$0xff]  ;;  %v15032_v55 = vld [vmem:[#allocation18_spill] sm:$0xff] }
 0x2cf   : > { %v1415_v60 = vrot.slane %v11858_v53, 1  ;;  %v1667_v28 = vrot.slane %v11824_v4, 3  ;;  %v1726_v46 = vadd.f32 %v1666_v63, %v1626_v49  ;;  %v11880_v9 = vmul.f32 0.030364122, %v11841_v19  ;;  %v15031_v49 = vld [vmem:[#allocation61_spill] sm:$0xff] }
 0x2d0   : > { %v2682_v52 = vadd.f32 %v2621_v40, %v2586_v14  ;;  %v1296_v44 = vadd.f32 %v11124_v31, %v1188_v50  ;;  %v1568_v8 = vsel %vm1538_vm8, %v1565_v37, %v1567_v32  ;;  %v974_v38 = vadd.f32 %v15029_v30, %v10391_v24  ;;  %v15033_v37 = vld [vmem:[#allocation68_spill] sm:$0xff] }
 0x2d1   : > { %v2623_v58 = vpop.permute.xlu0 %2622  ;;  %v2299_v42 = vadd.f32 %v11165_v61, %v1855_v36  ;;  %v1796_v40 = vsel %vm15030_vm2, %v1793_v41, %v1795_v47  ;;  %v1627_v4 = vadd.f32 %v1568_v8, %v1473_v18  ;;  %v1797_v16 = vrot.slane %v11872_v7, 4  ;;  %v15035_v8 = vld [vmem:[#allocation26_spill] sm:$0xff] }
 0x2d2   : > { %v11863_v33 = vpop.permute.xlu1 %1142  ;;  %v973_v34 = vadd.f32 %v15031_v49, %v10387_v56  ;;  %v1416_v31 = vsel %vm1384_vm7, %v1413_v5, %v1415_v60  ;;  %v1082_v24 = vadd.f32 %v15033_v37, %v974_v38  ;;  %v1856_v14 = vadd.f32 %v1796_v40, %v1726_v46  ;;  %v15034_v56 = vld [vmem:[#allocation10_spill] sm:$0xff] }
 0x2d3   : > { %v2443_v61 = vadd.f32 %v11706_v3, %v2299_v42  ;;  %v1668_v41 = vsel %vm14579_vm9, %v1665_v12, %v1667_v28  ;;  %v1569_v50 = vrot.slane %v11880_v9, 2  ;;  %v1474_v3 = vadd.f32 %v1416_v31, %v11872_v7  ;;  %v15036_v12 = vld [vmem:[#allocation65_spill] sm:$0xff]  ;;  %v15037_v42 = vld [vmem:[#allocation8_spill] sm:$0xff] }
 0x2d4   : > { %v1081_v18 = vadd.f32 %v15034_v56, %v973_v34  ;;  %v1190_v5 = vadd.f32 %v15035_v8, %v1082_v24  ;;  %v1727_v30 = vadd.f32 %v1668_v41, %v1627_v4  ;;  %v975_v46 = vadd.f32 %v15036_v12, %v10421_v10  ;;  %v15039_v31 = vld [vmem:[#allocation85_spill] sm:$0xff]  ;;  %v15043_v12 = vld [vmem:[#allocation20_spill] sm:$0xff] }
 0x2d5   : > { %v11877_v17 = vpop.permute.xlu0 %2528  ;;  %v11913_v38 = vmul.f32 0.011170336, %v11841_v19  ;;  %v1669_v49 = vrot.slane %v11858_v53, 3  ;;  %v1570_v24 = vsel %vm1538_vm8, %v1567_v32, %v1569_v50  ;;  %v1798_v41 = vsel %vm15040_vm13, %v1795_v47, %v1797_v16  ;;  %vm15072_vm13 = vmmov %vm14792_vm0 }
 0x2d6   : > { %v2741_v29 = vpop.permute.xlu1 %2740  ;;  %v1189_v40 = vadd.f32 %v15037_v42, %v1081_v18  ;;  %v11919_v34 = vadd.f32 %v11334_v26, %v1190_v5  ;;  %v1628_v26 = vadd.f32 %v1570_v24, %v1474_v3  ;;  %v15041_v18 = vld [vmem:[#allocation27_spill] sm:$0xff] }
 0x2d7   : > { %v2802_v22 = vadd.f32 %v2741_v29, %v2682_v52  ;;  %v11905_v52 = vmul.f32 0.023647603, %v1296_v44  ;;  %v15042_v5 = vld [vmem:[#allocation47_spill] sm:$0xff] }
 0x2d8   : > { %v1297_v37 = vadd.f32 %v15039_v31, %v1189_v40  ;;  %v11932_v8 = vmul.f32 0.023647603, %v11919_v34  ;;  %v1670_v40 = vsel %vm14579_vm9, %v1667_v28, %v1669_v49 }
 0x2d9   : > { %v2826_v0 = vsub.f32 %v15032_v55, %v2802_v22  ;;  %8399 = vmatprep.mubr.msk.f32.mxu0 %vm2864_vm1, %v2802_v22  ;;  %v11901_v63 = vpop.permute.xlu0 %1248  ;;  %v2587_v22 = vadd.f32 %v11796_v59, %v2443_v61  ;;  %v1417_v10 = vrot.slane %v11905_v52, 1  ;;  %v1501_v61 = vmul.f32 0.030364122, %v1296_v44 }
 0x2da   : > { %v11899_v36 = vpop.permute.xlu1 %2530  ;;  %v11939_v47 = vmul.f32 0.023647603, %v1297_v37 }
 0x2db   : > { %v2850_v29 = vand.u32 2147483647, %v2826_v0  ;;  %v2683_v55 = vadd.f32 %v2623_v58, %v2587_v22  ;;  %v15038_v0 = vld [vmem:[#allocation69_spill] sm:$0xff]  ;;  %v1799_v58 = vrot.slane %v11913_v38, 4  ;;  %v2300_v22 = vadd.f32 %v15042_v5, %v1856_v14  ;;  %v15046_v5 = vld [vmem:[#allocation98_spill] sm:$0xff] }
 0x2dc   : > { %v1083_v19 = vadd.f32 %v15038_v0, %v975_v46 }
 0x2dd   : > { %v2884_v9 = vsel %vm2864_vm1, %v2850_v29, 0.0  ;;  %v2743_v7 = vpop.permute.xlu0 %2742  ;;  %v1857_v29 = vadd.f32 %v1798_v41, %v1727_v30  ;;  %v1418_v30 = vsel %vm1384_vm7, %v1415_v60, %v1417_v10  ;;  %v2444_v0 = vadd.f32 %v11834_v20, %v2300_v22  ;;  %v15047_v22 = vld [vmem:[#allocation63_spill] sm:$0xff] }
 0x2de   : > { %v2885_v59 = vadd.f32 %v2884_v9, %v11832_v57  ;;  %v11922_v4 = vpop.permute.xlu1 %1250  ;;  %v2803_v56 = vadd.f32 %v2743_v7, %v2683_v55  ;;  %v1191_v57 = vadd.f32 %v15041_v18, %v1083_v19  ;;  %v1571_v9 = vrot.slane %v1501_v61, 2  ;;  %v15044_v19 = vld [vmem:[#allocation54_spill] sm:$0xff] }
 0x2df   : > { %v1728_v55 = vadd.f32 %v1670_v40, %v1628_v26  ;;  %v1739_v7 = vmul.f32 0.011170336, %v1296_v44  ;;  %v2301_v31 = vadd.f32 %v15044_v19, %v1857_v29  ;;  %v1800_v24 = vsel %vm15045_vm6, %v1797_v16, %v1799_v58  ;;  %vm15074_vm6 = vmmov %vm14792_vm0 }
 0x2e0   : > { %v2827_v46 = vsub.f32 %v15043_v12, %v2803_v56  ;;  %8400 = vmatmul.mubr.msk.f32.gmra.mrb[10].mxu0 %vm2864_vm1, %v2803_v56  ;;  %v11942_v3 = vadd.f32 %v11402_v48, %v1191_v57  ;;  %v1671_v41 = vrot.slane %v11905_v52, 3  ;;  %v1420_v48 = vrot.slane %v11932_v8, 1 }
 0x2e1   : > { %v11937_v42 = vpop.permute.xlu0 %2388  ;;  %v1475_v53 = vadd.f32 %v1418_v30, %v11913_v38  ;;  %v1419_v10 = vrot.slane %v11939_v47, 1  ;;  %v2588_v20 = vadd.f32 %v11877_v17, %v2444_v0  ;;  %v1858_v16 = vadd.f32 %v1800_v24, %v1728_v55  ;;  %v15048_v55 = vld [vmem:[#allocation82_spill] sm:$0xff]  ;;  %v15049_v24 = vld [vmem:[#allocation21_spill] sm:$0xff] }
 0x2e2   : > { %v2625_v32 = vpop.permute.xlu1 %2624  ;;  %v2851_v14 = vand.u32 2147483647, %v2827_v46  ;;  %v11959_v44 = vmul.f32 0.023647603, %v11942_v3  ;;  %v1572_v52 = vsel %vm1538_vm8, %v1569_v50, %v1571_v9  ;;  %v1503_v26 = vmul.f32 0.030364122, %v11919_v34 }
 0x2e3   : > { %v1502_v18 = vmul.f32 0.030364122, %v1297_v37  ;;  %v2445_v57 = vadd.f32 %v11843_v23, %v2301_v31  ;;  %v2684_v29 = vadd.f32 %v2625_v32, %v2588_v20  ;;  %v1801_v38 = vrot.slane %v1739_v7, 4 }
 0x2e4   : > { %v2886_v28 = vsel %vm2864_vm1, %v2851_v14, 0.0  ;;  %v976_v12 = vadd.f32 %v15047_v22, %v15046_v5  ;;  %v1629_v46 = vadd.f32 %v1572_v52, %v1475_v53  ;;  %v1672_v40 = vsel %vm14579_vm9, %v1669_v49, %v1671_v41  ;;  %v15051_v52 = vld [vmem:[#allocation11_spill] sm:$0xff]  ;;  %v15053_v22 = vld [vmem:[#allocation24_spill] sm:$0xff] }
 0x2e5   : > { %v11955_v60 = vpop.permute.xlu0 %2390  ;;  %v2887_v61 = vadd.f32 %v2886_v28, %v2885_v59  ;;  %v1421_v17 = vsel %vm1384_vm7, %v1419_v10, %v1420_v48  ;;  %v1422_v59 = vrot.slane %v11959_v44, 1  ;;  %v2589_v50 = vadd.f32 %v11899_v36, %v2445_v57 }
 0x2e6   : > { %v2627_v56 = vpop.permute.xlu1 %2626  ;;  %v1084_v0 = vadd.f32 %v15048_v55, %v976_v12  ;;  %v1322_v23 = vmul.f32 0.011170336, %v1297_v37  ;;  %v11973_v32 = vmul.f32 0.030364122, %v11942_v3  ;;  %v2302_v7 = vadd.f32 %v11385_v15, %v1858_v16  ;;  %v15052_v16 = vld [vmem:[#allocation67_spill] sm:$0xff] }
 0x2e7   : > { %v1574_v19 = vrot.slane %v1503_v26, 2  ;;  %v1573_v31 = vrot.slane %v1502_v18, 2  ;;  %v2685_v49 = vadd.f32 %v2627_v56, %v2589_v50  ;;  %v11979_v28 = vmul.f32 0.011170336, %v11919_v34  ;;  %v15054_v50 = vld [vmem:[#allocation84_spill] sm:$0xff] }
 0x2e8   : > { %v1476_v36 = vadd.f32 %v1421_v17, %v1322_v23  ;;  %v1729_v53 = vadd.f32 %v1672_v40, %v1629_v46  ;;  %v1802_v10 = vsel %vm15050_vm14, %v1799_v58, %v1801_v38  ;;  %v1192_v57 = vadd.f32 %v15051_v52, %v1084_v0  ;;  %vm15078_vm14 = vmmov %vm14792_vm0 }
 0x2e9   : > { %v2533_v14 = vpop.permute.xlu0 %2532  ;;  %v1423_v56 = vsel %vm1384_vm7, %v1420_v48, %v1422_v59  ;;  %v977_v26 = vadd.f32 %v15052_v16, %v10557_v62  ;;  %v1674_v34 = vrot.slane %v11932_v8, 3  ;;  %v1673_v18 = vrot.slane %v11939_v47, 3 }
 0x2ea   : > { %v2745_v30 = vpop.permute.xlu1 %2744  ;;  %v1576_v5 = vrot.slane %v11973_v32, 2  ;;  %v11992_v58 = vadd.f32 %v11584_v6, %v1192_v57  ;;  %v1575_v48 = vsel %vm1538_vm8, %v1573_v31, %v1574_v19  ;;  %v1859_v46 = vadd.f32 %v1802_v10, %v1729_v53  ;;  %v15055_v57 = vld [vmem:[#allocation9_spill] sm:$0xff] }
 0x2eb   : > { %v2804_v9 = vadd.f32 %v2745_v30, %v2684_v29  ;;  %v1630_v30 = vadd.f32 %v1575_v48, %v1476_v36  ;;  %v1477_v47 = vadd.f32 %v1423_v56, %v11979_v28  ;;  %v1804_v17 = vrot.slane %v11979_v28, 4 }
 0x2ec   : > { %v1803_v6 = vrot.slane %v1322_v23, 4  ;;  %v12004_v0 = vmul.f32 0.011170336, %v11942_v3  ;;  %v1675_v31 = vsel %vm14579_vm9, %v1673_v18, %v1674_v34  ;;  %v2446_v23 = vadd.f32 %v11937_v42, %v2302_v7 }
 0x2ed   : > { %v2828_v41 = vsub.f32 %v15049_v24, %v2804_v9  ;;  %8402 = vmatprep.mubr.msk.f32.mxu0 %vm2864_vm1, %v2804_v9  ;;  %v2535_v20 = vpop.permute.xlu0 %2534  ;;  %v1085_v9 = vadd.f32 %v15054_v50, %v977_v26  ;;  %v1730_v3 = vadd.f32 %v1675_v31, %v1630_v30  ;;  %v15056_v26 = vld [vmem:[#allocation55_spill] sm:$0xff]  ;;  %v12033_v18 = vmul.f32 0.030364122, %v11992_v58  ;;  %v15062_v31 = vld [vmem:[#allocation33_spill] sm:$0xff] }
 0x2ee   : > { %v2747_v37 = vpop.permute.xlu1 %2746 }
 0x2ef   : > { %v2852_v29 = vand.u32 2147483647, %v2828_v41  ;;  %v2805_v15 = vadd.f32 %v2747_v37, %v2685_v49  ;;  %v1676_v49 = vrot.slane %v11959_v44, 3  ;;  %v1193_v24 = vadd.f32 %v11522_v11, %v1085_v9  ;;  %v15060_v9 = vld [vmem:[#allocation60_spill] sm:$0xff] }
 0x2f0   : > { %v12013_v41 = vmul.f32 0.023647603, %v11992_v58  ;;  %v1806_v11 = vrot.slane %v12004_v0, 4 }
 0x2f1   : > { %v2888_v38 = vsel %vm2864_vm1, %v2852_v29, 0.0  ;;  %v2829_v12 = vsub.f32 %v15053_v22, %v2805_v15  ;;  %8403 = vmatmul.mubr.msk.f32.gmra.mrb[12].mxu0 %vm2864_vm1, %v2805_v15  ;;  %v11998_v8 = vpop.permute.xlu0 %2392  ;;  %v12020_v52 = vadd.f32 %v11643_v1, %v1193_v24  ;;  %v2590_v29 = vadd.f32 %v2533_v14, %v2446_v23 }
 0x2f2   : > { %v2889_v40 = vadd.f32 %v2888_v38, %v2887_v61  ;;  %v2629_v62 = vpop.permute.xlu1 %2628  ;;  %v1577_v61 = vsel %vm1538_vm8, %v1574_v19, %v1576_v5  ;;  %v2303_v19 = vadd.f32 %v15055_v57, %v1859_v46  ;;  %v1805_v15 = vsel %vm14792_vm0, %v1803_v6, %v1804_v17  ;;  %v15059_v6 = vld [vmem:[#allocation72_spill] sm:$0xff] }
 0x2f3   : > { %v2853_v55 = vand.u32 2147483647, %v2829_v12  ;;  %v1631_v10 = vadd.f32 %v1577_v61, %v1477_v47  ;;  %v1424_v42 = vrot.slane %v12013_v41, 1  ;;  %v2686_v56 = vadd.f32 %v2629_v62, %v2590_v29 }
 0x2f4   : > { %v2447_v7 = vadd.f32 %v11955_v60, %v2303_v19  ;;  %v1677_v16 = vsel %vm14579_vm9, %v1674_v34, %v1676_v49  ;;  %v978_v1 = vadd.f32 %v15056_v26, %v10691_v54  ;;  %v1860_v14 = vadd.f32 %v1805_v15, %v1730_v3  ;;  %v15058_v54 = vld [vmem:[#allocation25_spill] sm:$0xff]  ;;  %v15063_v19 = vld [vmem:[#allocation71_spill] sm:$0xff] }
 0x2f5   : > { %v2890_v28 = vsel %vm2864_vm1, %v2853_v55, 0.0  ;;  %v12017_v37 = vpop.permute.xlu0 %2394  ;;  %v1731_v38 = vadd.f32 %v1677_v16, %v1631_v10  ;;  %v12036_v48 = vmul.f32 0.023647603, %v12020_v52  ;;  %v1807_v34 = vsel %vm15057_vm4, %v1804_v17, %v1806_v11  ;;  %v15066_v16 = vld [vmem:[#allocation28_spill] sm:$0xff]  ;;  %vm15083_vm4 = vmmov %vm14792_vm0 }
 0x2f6   : > { %v2891_v36 = vadd.f32 %v2890_v28, %v2889_v40  ;;  %v2631_v53 = vpop.permute.xlu1 %2630  ;;  %v2591_v46 = vadd.f32 %v2535_v20, %v2447_v7  ;;  %v1086_v40 = vadd.f32 %v11586_v35, %v978_v1  ;;  %v1425_v47 = vsel %vm1384_vm7, %v1422_v59, %v1424_v42  ;;  %v15061_v20 = vld [vmem:[#allocation90_spill] sm:$0xff] }
 0x2f7   : > { %v3225_v50 = vmul.u32 2, %v15059_v6  ;;  %v979_v55 = vadd.f32 %v15061_v20, %v15060_v9  ;;  %v1578_v35 = vrot.slane %v12033_v18, 2  ;;  %v2304_v61 = vadd.f32 %v15062_v31, %v1860_v14  ;;  %v15069_v9 = vld [vmem:[#allocation36_spill] sm:$0xff] }
 0x2f8   : > { %v2687_v62 = vadd.f32 %v2631_v53, %v2591_v46  ;;  %v1861_v24 = vadd.f32 %v1807_v34, %v1731_v38  ;;  %v1426_v28 = vrot.slane %v12036_v48, 1  ;;  %v1194_v3 = vadd.f32 %v11693_v2, %v1086_v40 }
 0x2f9   : > { %v2537_v12 = vpop.permute.xlu0 %2536  ;;  %v12055_v59 = vmul.f32 0.030364122, %v12020_v52  ;;  %v1478_v57 = vadd.f32 %v1425_v47, %v12004_v0  ;;  %vm12059_vm5 = vcmp.eq.s32.totalorder %v15063_v19, %v3225_v50  ;;  %v3233_v15 = vadd.s32 1, %v3225_v50 }
 0x2fa   : > { %v2749_v22 = vpop.permute.xlu1 %2748  ;;  %v12064_v7 = vadd.f32 %v11767_v43, %v1194_v3  ;;  %v12070_v26 = vmul.f32 0.011170336, %v11992_v58  ;;  %v1678_v1 = vrot.slane %v12013_v41, 3  ;;  %v1427_v58 = vsel %vm1384_vm7, %v1424_v42, %v1426_v28 }
 0x2fb   : > { %v2806_v60 = vadd.f32 %v2749_v22, %v2686_v56  ;;  %vm3237_vm12 = vcmp.eq.s32.totalorder %v15063_v19, %v3233_v15  ;;  %v15067_v22 = vld [vmem:[#allocation56_spill] sm:$0xff]  ;;  %v1580_v41 = vrot.slane %v12055_v59, 2  ;;  %v14580_v40 = vmov 0.0  }
 0x2fc   : > { %v1087_v43 = vadd.f32 %v15067_v22, %v979_v55  ;;  %vm3241_vm2 = vmor %vm12059_vm5, %vm3237_vm12  ;;  %v12091_v32 = vmul.f32 0.023647603, %v12064_v7  ;;  %v1808_v42 = vrot.slane %v12070_v26, 4  ;;  %v1479_v6 = vadd.f32 %v1427_v58, %v12070_v26 }
 0x2fd   : > { %v2830_v30 = vsub.f32 %v15058_v54, %v2806_v60  ;;  %8405 = vmatprep.mubr.msk.f32.mxu0 %vm2864_vm1, %v2806_v60  ;;  %v2539_v23 = vpop.permute.xlu0 %2538  ;;  %v1579_v60 = vsel %vm1538_vm8, %v1576_v5, %v1578_v35  ;;  %v12087_v34 = vsel %vm3241_vm2, 0.5, %v14580_v40  ;;  %v2448_v5 = vadd.f32 %v11998_v8, %v2304_v61  ;;  %vm15084_vm5 = vmmov %vm14792_vm0 }
 0x2fe   : > { %v2751_v17 = vpop.permute.xlu1 %2750  ;;  %15068 = vst [vmem:[#allocation70_spill] sm:$0xff] %v12087_v34  ;;  %8436 = vmatprep.mubr.msk.f32.mxu1 %vm2864_vm1, %v12087_v34  ;;  %v2305_v20 = vadd.f32 %v15069_v9, %v1861_v24  ;;  %v1679_v8 = vsel %vm14579_vm9, %v1676_v49, %v1678_v1  ;;  %v12109_v31 = vmul.f32 0.011170336, %v12020_v52  ;;  %v1680_v61 = vrot.slane %v12036_v48, 3  ;;  %v15071_v24 = vld [vmem:[#allocation77_spill] sm:$0xff] }
 0x2ff   : > { %v2854_v53 = vand.u32 2147483647, %v2830_v30  ;;  %v2807_v10 = vadd.f32 %v2751_v17, %v2687_v62  ;;  %v1195_v62 = vadd.f32 %v11722_v39, %v1087_v43  ;;  %v2592_v55 = vadd.f32 %v2537_v12, %v2448_v5  ;;  %v15070_v12 = vld [vmem:[#allocation80_spill] sm:$0xff] }
 0x300   : > { %v1428_v3 = vrot.slane %v12091_v32, 1  ;;  %v980_v44 = vadd.f32 %v11695_v27, %v15070_v12  ;;  %v981_v49 = vadd.f32 %v11724_v21, %v15071_v24  ;;  %v1809_v52 = vsel %vm15072_vm13, %v1806_v11, %v1808_v42 }
 0x301   : > { %v2892_v56 = vsel %vm2864_vm1, %v2854_v53, 0.0  ;;  %v2831_v2 = vsub.f32 %v15066_v16, %v2807_v10  ;;  %8406 = vmatmul.mubr.msk.f32.gmra.mrb[14].mxu0 %vm2864_vm1, %v2807_v10  ;;  %v12073_v38 = vpop.permute.xlu0 %2396  ;;  %v12102_v39 = vadd.f32 %v11814_v45, %v1195_v62  ;;  %v2449_v53 = vadd.f32 %v12017_v37, %v2305_v20  ;;  %v15076_v20 = vld [vmem:[#allocation32_spill] sm:$0xff] }
 0x302   : > { %v2893_v18 = vadd.f32 %v2892_v56, %v2891_v36  ;;  %v2633_v14 = vpop.permute.xlu1 %2632  ;;  %v1632_v36 = vadd.f32 %v1579_v60, %v1478_v57  ;;  %v1581_v45 = vsel %vm1538_vm8, %v1578_v35, %v1580_v41  ;;  %v12125_v37 = vmul.f32 0.030364122, %v12064_v7 }
 0x303   : > { %v2855_v46 = vand.u32 2147483647, %v2831_v2  ;;  %v2688_v10 = vadd.f32 %v2633_v14, %v2592_v55  ;;  %v1633_v57 = vadd.f32 %v1581_v45, %v1479_v6  ;;  %v12128_v56 = vmul.f32 0.023647603, %v12102_v39 }
 0x304   : > { %v1732_v17 = vadd.f32 %v1679_v8, %v1632_v36  ;;  %v2593_v35 = vadd.f32 %v2539_v23, %v2449_v53  ;;  %v1810_v27 = vrot.slane %v12109_v31, 4  ;;  %v1088_v2 = vadd.f32 %v11769_v13, %v980_v44 }
 0x305   : > { %v2894_v54 = vsel %vm2864_vm1, %v2855_v46, 0.0  ;;  %v12099_v50 = vpop.permute.xlu0 %2398  ;;  %v1089_v21 = vadd.f32 %v11816_v25, %v981_v49  ;;  %v1681_v11 = vsel %vm14579_vm9, %v1678_v1, %v1680_v61  ;;  %v1429_v23 = vsel %vm1384_vm7, %v1426_v28, %v1428_v3 }
 0x306   : > { %v2895_v30 = vadd.f32 %v2894_v54, %v2893_v18  ;;  %v2635_v47 = vpop.permute.xlu1 %2634  ;;  %v1862_v0 = vadd.f32 %v1809_v52, %v1732_v17  ;;  %v15073_v18 = vld [vmem:[#allocation31_spill] sm:$0xff]  ;;  %v1196_v22 = vadd.f32 %v11845_v51, %v1088_v2  ;;  %v1733_v43 = vadd.f32 %v1681_v11, %v1633_v57 }
 0x307   : > { %v2689_v26 = vadd.f32 %v2635_v47, %v2593_v35  ;;  %v1197_v13 = vadd.f32 %v11863_v33, %v1089_v21  ;;  %v1582_v60 = vrot.slane %v12125_v37, 2  ;;  %v1430_v58 = vrot.slane %v12128_v56, 1  ;;  %v15075_v47 = vld [vmem:[#allocation103_spill] sm:$0xff]  ;;  %v15077_v35 = vld [vmem:[#allocation93_spill] sm:$0xff] }
 0x308   : > { %v1304_v62 = vadd.f32 %v11901_v63, %v1196_v22  ;;  %v1811_v51 = vsel %vm15074_vm6, %v1808_v42, %v1810_v27  ;;  %v1480_v33 = vadd.f32 %v1429_v23, %v12109_v31  ;;  %v12154_v54 = vmul.f32 0.030364122, %v12102_v39 }
 0x309   : > { %v2541_v15 = vpop.permute.xlu0 %2540  ;;  %v12147_v5 = vadd.f32 %v11922_v4, %v1197_v13  ;;  %v2306_v6 = vadd.f32 %v15075_v47, %v1862_v0  ;;  %v12161_v4 = vmul.f32 0.011170336, %v12064_v7  ;;  %v1863_v8 = vadd.f32 %v1811_v51, %v1733_v43 }
 0x30a   : > { %v2753_v29 = vpop.permute.xlu1 %2752  ;;  %v1682_v45 = vrot.slane %v12091_v32, 3  ;;  %v1583_v44 = vsel %vm1538_vm8, %v1580_v41, %v1582_v60  ;;  %v1431_v24 = vsel %vm1384_vm7, %v1428_v3, %v1430_v58  ;;  %v12170_v49 = vmul.f32 0.023647603, %v1304_v62 }
 0x30b   : > { %v2808_v16 = vadd.f32 %v2753_v29, %v2688_v10  ;;  %v12173_v7 = vmul.f32 0.023647603, %v12147_v5  ;;  %v1634_v52 = vadd.f32 %v1583_v44, %v1480_v33  ;;  %v2450_v57 = vadd.f32 %v12073_v38, %v2306_v6 }
 0x30c   : > { %v1481_v41 = vadd.f32 %v1431_v24, %v12161_v4  ;;  %v1812_v3 = vrot.slane %v12161_v4, 4  ;;  %v1683_v21 = vsel %vm14579_vm9, %v1680_v61, %v1682_v45  ;;  %v12187_v38 = vmul.f32 0.011170336, %v12102_v39  ;;  %v15080_v4 = vld [vmem:[#allocation35_spill] sm:$0xff] }
 0x30d   : > { %v2832_v14 = vsub.f32 %v15073_v18, %v2808_v16  ;;  %8408 = vmatprep.mubr.msk.f32.mxu0 %vm2864_vm1, %v2808_v16  ;;  %v2543_v46 = vpop.permute.xlu0 %2542  ;;  %v2307_v16 = vadd.f32 %v15077_v35, %v1863_v8  ;;  %v2594_v2 = vadd.f32 %v2541_v15, %v2450_v57  ;;  %v1432_v0 = vrot.slane %v12170_v49, 1 }
 0x30e   : > { %v2755_v25 = vpop.permute.xlu1 %2754  ;;  %v8386_v28 = vpop.f32.mrb[0].mxu0  ;;  %v1734_v11 = vadd.f32 %v1683_v21, %v1634_v52  ;;  %v1684_v18 = vrot.slane %v12128_v56, 3  ;;  %v1509_v15 = vmul.f32 0.030364122, %v1304_v62  ;;  %v1510_v48 = vmul.f32 0.030364122, %v12147_v5 }
 0x30f   : > { %v2856_v1 = vand.u32 2147483647, %v2832_v14  ;;  %v2809_v36 = vadd.f32 %v2755_v25, %v2689_v26  ;;  %v3106_v63 = vpop.f32.mrb[1].mxu0  ;;  %v1434_v26 = vrot.slane %v12173_v7, 1  ;;  %v2451_v14 = vadd.f32 %v12099_v50, %v2307_v16 }
 0x310   : > { %v8651_v17 = vpack.c.bf16 %v8386_v28, %v3106_v63  ;;  %v1813_v25 = vsel %vm15078_vm14, %v1810_v27, %v1812_v3  ;;  %v1433_v50 = vsel %vm1384_vm7, %v1430_v58, %v1432_v0  ;;  %v1685_v33 = vsel %vm14579_vm9, %v1682_v45, %v1684_v18  ;;  %v15081_v45 = vld [vmem:[#allocation37_spill] sm:$0xff] }
 0x311   : > { %v2896_v9 = vsel %vm2864_vm1, %v2856_v1, 0.0  ;;  %v2833_v55 = vsub.f32 %v15076_v20, %v2809_v36  ;;  %8409 = vmatmul.mubr.msk.f32.gmra.mrb[16].mxu0 %vm2864_vm1, %v2809_v36  ;;  %v2595_v39 = vadd.f32 %v2543_v46, %v2451_v14  ;;  %v1814_v36 = vrot.slane %v12187_v38, 4 }
 0x312   : > { %v2897_v42 = vadd.f32 %v2896_v9, %v2895_v30  ;;  %v2637_v53 = vpop.permute.xlu1 %2636  ;;  %v12163_v10 = vpop.permute.xlu0 %2400  ;;  %8652 = vmatprep.subr.bf16.mxu1 %v8651_v17  ;;  %v1584_v30 = vrot.slane %v12154_v54, 2  ;;  %v1864_v56 = vadd.f32 %v1813_v25, %v1734_v11  ;;  %v1435_v51 = vsel %vm1384_vm7, %v1432_v0, %v1434_v26  ;;  %v15079_v54 = vld [vmem:[#allocation34_spill] sm:$0xff] }
 0x313   : > { %v2857_v12 = vand.u32 2147483647, %v2833_v55  ;;  %8654 = vmatpush3.bf16.msra.mxu1 %v8651_v17  ;;  %v2690_v23 = vadd.f32 %v2637_v53, %v2594_v2  ;;  %v1586_v46 = vrot.slane %v1509_v15, 2  ;;  %v1588_v31 = vrot.slane %v1510_v48, 2  ;;  %v15082_v26 = vld [vmem:[#allocation86_spill] sm:$0xff] }
 0x314   : > { %v1585_v22 = vsel %vm1538_vm8, %v1582_v60, %v1584_v30  ;;  %v1329_v60 = vmul.f32 0.011170336, %v1304_v62  ;;  %v1482_v63 = vadd.f32 %v1433_v50, %v12187_v38  ;;  %v2308_v8 = vadd.f32 %v15080_v4, %v1864_v56 }
 0x315   : > { %v2898_v32 = vsel %vm2864_vm1, %v2857_v12, 0.0  ;;  %v1635_v13 = vadd.f32 %v1585_v22, %v1481_v41  ;;  %v1815_v62 = vsel %vm14792_vm0, %v1812_v3, %v1814_v36  ;;  %v1740_v17 = vmul.f32 0.011170336, %v12147_v5 }
 0x316   : > { %v2899_v29 = vadd.f32 %v2898_v32, %v2897_v42  ;;  %v2639_v59 = vpop.permute.xlu1 %2638  ;;  %v12179_v37 = vpop.permute.xlu0 %2402  ;;  %v1483_v58 = vadd.f32 %v1435_v51, %v1329_v60  ;;  %v1686_v42 = vrot.slane %v12170_v49, 3  ;;  %v1688_v44 = vrot.slane %v12173_v7, 3  ;;  %v15085_v51 = vld [vmem:[#allocation38_spill] sm:$0xff] }
 0x317   : > { %v2691_v28 = vadd.f32 %v2639_v59, %v2595_v39  ;;  %v1735_v6 = vadd.f32 %v1685_v33, %v1635_v13  ;;  %v1587_v57 = vsel %vm1538_vm8, %v1584_v30, %v1586_v46  ;;  %v1589_v59 = vsel %vm1538_vm8, %v1586_v46, %v1588_v31  ;;  %v15086_v33 = vld [vmem:[#allocation95_spill] sm:$0xff] }
 0x318   : > { %v1636_v49 = vadd.f32 %v1587_v57, %v1482_v63  ;;  %v1637_v35 = vadd.f32 %v1589_v59, %v1483_v58  ;;  %v1816_v5 = vrot.slane %v1329_v60, 4  ;;  %v2452_v16 = vadd.f32 %v12163_v10, %v2308_v8 }
 0x319   : > { %v1865_v41 = vadd.f32 %v1815_v62, %v1735_v6  ;;  %v1818_v21 = vrot.slane %v1740_v17, 4  ;;  %v1687_v7 = vsel %vm14579_vm9, %v1684_v18, %v1686_v42  ;;  %v1689_v0 = vsel %vm14579_vm9, %v1686_v42, %v1688_v44 }
 0x31a   : > { %v2757_v61 = vpop.permute.xlu1 %2756  ;;  %v2545_v43 = vpop.permute.xlu0 %2544  ;;  %v1737_v22 = vadd.f32 %v1689_v0, %v1637_v35  ;;  %v1817_v10 = vsel %vm15083_vm4, %v1814_v36, %v1816_v5 }
 0x31b   : > { %v2810_v1 = vadd.f32 %v2757_v61, %v2690_v23  ;;  %v2309_v11 = vadd.f32 %v15082_v26, %v1865_v41  ;;  %v2596_v14 = vadd.f32 %v2545_v43, %v2452_v16  ;;  %v1736_v23 = vadd.f32 %v1687_v7, %v1636_v49  ;;  %v15089_v41 = vld [vmem:[#allocation45_spill] sm:$0xff]  ;;  %v15090_v49 = vld [vmem:[#allocation42_spill] sm:$0xff] }
 0x31c   : > { %v1819_v13 = vsel %vm15084_vm5, %v1816_v5, %v1818_v21  ;;  %v15092_v26 = vld [vmem:[#allocation73_spill] sm:$0xff] }
 0x31d   : > { %v2834_v47 = vsub.f32 %v15079_v54, %v2810_v1  ;;  %8411 = vmatprep.mubr.msk.f32.mxu0 %vm2864_vm1, %v2810_v1  ;;  %v2453_v15 = vadd.f32 %v12179_v37, %v2309_v11  ;;  %v1866_v18 = vadd.f32 %v1817_v10, %v1736_v23  ;;  %v1867_v1 = vadd.f32 %v1819_v13, %v1737_v22  ;;  %v15087_v54 = vld [vmem:[#allocation92_spill] sm:$0xff] }
 0x31e   : > { %v2759_v27 = vpop.permute.xlu1 %2758  ;;  %v2547_v9 = vpop.permute.xlu0 %2546  ;;  %v3226_v11 = vmul.u32 2, %v15092_v26 }
 0x31f   : > { %v2858_v20 = vand.u32 2147483647, %v2834_v47  ;;  %v2811_v55 = vadd.f32 %v2759_v27, %v2691_v28  ;;  %v2597_v25 = vadd.f32 %v2547_v9, %v2453_v15  ;;  %v2310_v37 = vadd.f32 %v15086_v33, %v1866_v18  ;;  %v15088_v9 = vld [vmem:[#allocation41_spill] sm:$0xff]  ;;  %v15094_v15 = vld [vmem:[#allocation75_spill] sm:$0xff] }
 0x320   : > { %v2311_v47 = vadd.f32 %v15087_v54, %v1867_v1  ;;  %v3234_v22 = vadd.s32 1, %v3226_v11  ;;  %vm3230_vm12 = vcmp.eq.s32.totalorder %v15063_v19, %v3226_v11 }
 0x321   : > { %v2900_v53 = vsel %vm2864_vm1, %v2858_v20, 0.0  ;;  %v2835_v12 = vsub.f32 %v15081_v45, %v2811_v55  ;;  %8412 = vmatmul.mubr.msk.f32.gmra.mrb[18].mxu0 %vm2864_vm1, %v2811_v55 }
 0x322   : > { %v2901_v24 = vadd.f32 %v2900_v53, %v2899_v29  ;;  %v2641_v52 = vpop.permute.xlu1 %2640  ;;  %v2405_v32 = vpop.permute.xlu0 %2404  ;;  %vm3238_vm2 = vcmp.eq.s32.totalorder %v15063_v19, %v3234_v22 }
 0x323   : > { %v2859_v3 = vand.u32 2147483647, %v2835_v12  ;;  %v2692_v48 = vadd.f32 %v2641_v52, %v2596_v14  ;;  %v2454_v31 = vadd.f32 %v2405_v32, %v2310_v37  ;;  %v15093_v14 = vld [vmem:[#allocation74_spill] sm:$0xff]  ;;  %vm3242_vm14 = vmor %vm3230_vm12, %vm3238_vm2 }
 0x324   : > { %v3227_v23 = vmul.u32 2, %v15093_v14  ;;  %v12249_v18 = vsel %vm3242_vm14, 0.5, %v14580_v40 }
 0x325   : > { %v2902_v2 = vsel %vm2864_vm1, %v2859_v3, 0.0  ;;  %15095 = vst [vmem:[#allocation13_spill] sm:$0xff] %v12249_v18 }
 0x326   : > { %v2903_v38 = vadd.f32 %v2902_v2, %v2901_v24  ;;  %v2643_v29 = vpop.permute.xlu1 %2642  ;;  %v2407_v30 = vpop.permute.xlu0 %2406  ;;  %v3235_v10 = vadd.s32 1, %v3227_v23  ;;  %vm3231_vm13 = vcmp.eq.s32.totalorder %v15063_v19, %v3227_v23 }
 0x327   : > { %v2693_v50 = vadd.f32 %v2643_v29, %v2597_v25  ;;  %v2455_v6 = vadd.f32 %v2407_v30, %v2311_v47 }
 0x328   : > { %vm3239_vm6 = vcmp.eq.s32.totalorder %v15063_v19, %v3235_v10 }
 0x329   : > { %vm3243_vm0 = vmor %vm3231_vm13, %vm3239_vm6  ;;  %vm15107_vm6 = vcmask 1042432  }
 0x32a   : > { %v2761_v61 = vpop.permute.xlu1 %2760  ;;  %v2549_v39 = vpop.permute.xlu0 %2548  ;;  %v3247_v1 = vsel %vm3243_vm0, 0.5, %v14580_v40 }
 0x32b   : > { %v2812_v56 = vadd.f32 %v2761_v61, %v2692_v48  ;;  %v2598_v4 = vadd.f32 %v2549_v39, %v2454_v31  ;;  %v3228_v48 = vmul.u32 2, %v15094_v15 }
 0x32d   : > { %v2836_v60 = vsub.f32 %v15085_v51, %v2812_v56  ;;  %8414 = vmatprep.mubr.msk.f32.mxu0 %vm2864_vm1, %v2812_v56  ;;  %v3236_v13 = vadd.s32 1, %v3228_v48  ;;  %vm3232_vm4 = vcmp.eq.s32.totalorder %v15063_v19, %v3228_v48 }
 0x32e   : > { %v2763_v43 = vpop.permute.xlu1 %2762  ;;  %v2551_v28 = vpop.permute.xlu0 %2550 }
 0x32f   : > { %v2860_v36 = vand.u32 2147483647, %v2836_v60  ;;  %v2813_v46 = vadd.f32 %v2763_v43, %v2693_v50  ;;  %v2599_v62 = vadd.f32 %v2551_v28, %v2455_v6  ;;  %vm3240_vm5 = vcmp.eq.s32.totalorder %v15063_v19, %v3236_v13 }
 0x330   : > { %vm3244_vm9 = vmor %vm3232_vm4, %vm3240_vm5 }
 0x331   : > { %v2904_v27 = vsel %vm2864_vm1, %v2860_v36, 0.0  ;;  %v2837_v20 = vsub.f32 %v15088_v9, %v2813_v46  ;;  %8415 = vmatmul.mubr.msk.f32.gmra.mrb[20].mxu0 %vm2864_vm1, %v2813_v46  ;;  %v3248_v56 = vsel %vm3244_vm9, 0.5, %v14580_v40  ;;  %vm15099_vm9 = vcmask 1041408  }
 0x332   : > { %v2905_v55 = vadd.f32 %v2904_v27, %v2903_v38  ;;  %v2647_v63 = vpop.permute.xlu1 %2646  ;;  %v2645_v58 = vpop.permute.xlu0 %2644 }
 0x333   : > { %v2861_v8 = vand.u32 2147483647, %v2837_v20  ;;  %v8389_v42 = vpop.f32.mrb[2].mxu0  ;;  %v2695_v53 = vadd.f32 %v2647_v63, %v2599_v62  ;;  %v2694_v45 = vadd.f32 %v2645_v58, %v2598_v4 }
 0x334   : > { %v3116_v12 = vpop.f32.mrb[3].mxu0 }
 0x335   : > { %v2906_v17 = vsel %vm2864_vm1, %v2861_v8, 0.0  ;;  %v8655_v24 = vpack.c.bf16 %v8389_v42, %v3116_v12 }
 0x336   : > { %v2907_v44 = vadd.f32 %v2906_v17, %v2905_v55  ;;  %v2767_v52 = vpop.permute.xlu1 %2766  ;;  %v2765_v57 = vpop.permute.xlu0 %2764  ;;  %v15096_v17 = vmov 0.5|0.5  }
 0x337   : > { %v2815_v32 = vadd.f32 %v2767_v52, %v2695_v53  ;;  %v2814_v59 = vadd.f32 %v2765_v57, %v2694_v45  ;;  %8656 = vmatprep.subr.bf16.mxu1 %v8655_v24 }
 0x338   : > { %8658 = vmatpush3.bf16.msra.mxu1 %v8655_v24 }
 0x339   : > { %v2839_v3 = vsub.f32 %v15089_v41, %v2815_v32  ;;  %v2838_v35 = vsub.f32 %v15090_v49, %v2814_v59  ;;  %8417 = vmatprep.mubr.msk.f32.mxu0 %vm2864_vm1, %v2814_v59 }
 0x33a   : > { %8418 = vmatmul.mubr.msk.f32.gmra.mrb[22].mxu0 %vm2864_vm1, %v2815_v32 }
 0x33b   : > { %v2863_v5 = vand.u32 2147483647, %v2839_v3  ;;  %v2862_v16 = vand.u32 2147483647, %v2838_v35 }
 0x33d   : > { %v2908_v2 = vsel %vm2864_vm1, %v2862_v16, 0.0  ;;  %v2910_v38 = vsel %vm2864_vm1, %v2863_v5, 0.0 }
 0x33e   : > { %v2909_v21 = vadd.f32 %v2908_v2, %v2907_v44 }
 0x340   : > { %v12237_v7 = vadd.f32 %v2910_v38, %v2909_v21 }
 0x342   : > { %15091 = vst [vmem:[#allocation12_spill] sm:$0xff] %v12237_v7 }
 0x358   : > { %v8392_v29 = vpop.f32.mrb[4].mxu0 }
 0x359   : > { %v3126_v0 = vpop.f32.mrb[5].mxu0 }
 0x35a   : > { %v8659_v30 = vpack.c.bf16 %v8392_v29, %v3126_v0 }
 0x35c   : > { %8660 = vmatprep.subr.bf16.mxu1 %v8659_v30 }
 0x35d   : > { %8662 = vmatpush3.bf16.msra.mxu1 %v8659_v30 }
 0x378   : > { %v8395_v61 = vpop.f32.mrb[6].mxu0 }
 0x379   : > { %v3136_v39 = vpop.f32.mrb[7].mxu0 }
 0x37a   : > { %v8663_v25 = vpack.c.bf16 %v8395_v61, %v3136_v39 }
 0x37c   : > { %8664 = vmatprep.subr.bf16.mxu1 %v8663_v25 }
 0x37d   : > { %8666 = vmatpush3.bf16.msra.mxu1 %v8663_v25 }
 0x380   : > { %8437 = vmatmul.mubr.msk.f32.vlgmr.msra.gmra.mrb[0].mxu1 %vm2864_vm1, %v12249_v18 }
 0x381   : > { %8439 = vmatprep.mubr.msk.f32.mxu1 %vm2864_vm1, %v3247_v1 }
 0x384   : > { %8440 = vmatmul.mubr.msk.f32.gmra.mrb[2].mxu1 %vm2864_vm1, %v3248_v56 }
 0x385   : > { %8458 = vmatprep.mubr.msk.f32.mxu1 %vm2864_vm1, %v12087_v34 }
 0x398   : > { %v8398_v19 = vpop.f32.mrb[8].mxu0 }
 0x399   : > { %v3146_v50 = vpop.f32.mrb[9].mxu0 }
 0x39a   : > { %v8667_v51 = vpack.c.bf16 %v8398_v19, %v3146_v50 }
 0x39c   : > { %8668 = vmatprep.subr.bf16.mxu1 %v8667_v51 }
 0x39d   : > { %8670 = vmatpush3.bf16.msra.mxu1 %v8667_v51 }
 0x3b3   : > { %v8401_v60 = vpop.f32.mrb[10].mxu0 }
 0x3b4   : > { %v3156_v43 = vpop.f32.mrb[11].mxu0 }
 0x3b5   : > { %v8671_v28 = vpack.c.bf16 %v8401_v60, %v3156_v43 }
 0x3b7   : > { %8672 = vmatprep.subr.bf16.mxu1 %v8671_v28 }
 0x3b8   : > { %8674 = vmatpush3.bf16.msra.mxu1 %v8671_v28 }
 0x3c4   : > { %v8404_v33 = vpop.f32.mrb[12].mxu0 }
 0x3c5   : > { %v3166_v37 = vpop.f32.mrb[13].mxu0 }
 0x3c6   : > { %v8675_v54 = vpack.c.bf16 %v8404_v33, %v3166_v37 }
 0x3c8   : > { %8676 = vmatprep.subr.bf16.mxu1 %v8675_v54 }
 0x3c9   : > { %8678 = vmatpush3.bf16.msra.mxu1 %v8675_v54 }
 0x3d4   : > { %v8407_v47 = vpop.f32.mrb[14].mxu0 }
 0x3d5   : > { %v3176_v36 = vpop.f32.mrb[15].mxu0 }
 0x3d6   : > { %v8679_v46 = vpack.c.bf16 %v8407_v47, %v3176_v36 }
 0x3d8   : > { %8680 = vmatprep.subr.bf16.mxu1 %v8679_v46 }
 0x3d9   : > { %8682 = vmatpush3.bf16.msra.mxu1 %v8679_v46 }
 0x3dc   : > { %8459 = vmatmul.mubr.msk.f32.vlgmr.msra.gmra.mrb[4].mxu1 %vm2864_vm1, %v12249_v18 }
 0x3dd   : > { %8461 = vmatprep.mubr.msk.f32.mxu1 %vm2864_vm1, %v3247_v1 }
 0x3e0   : > { %8462 = vmatmul.mubr.msk.f32.gmra.mrb[6].mxu1 %vm2864_vm1, %v3248_v56 }
 0x3e1   : > { %8480 = vmatprep.mubr.msk.f32.mxu1 %vm2864_vm1, %v12087_v34 }
 0x3e4   : > { %v8410_v31 = vpop.f32.mrb[16].mxu0 }
 0x3e5   : > { %v3186_v6 = vpop.f32.mrb[17].mxu0 }
 0x3e6   : > { %v8683_v27 = vpack.c.bf16 %v8410_v31, %v3186_v6 }
 0x3e8   : > { %8684 = vmatprep.subr.bf16.mxu1 %v8683_v27 }
 0x3e9   : > { %8686 = vmatpush3.bf16.msra.mxu1 %v8683_v27 }
 0x3f4   : > { %v8413_v9 = vpop.f32.mrb[18].mxu0 }
 0x3f5   : > { %v3196_v20 = vpop.f32.mrb[19].mxu0 }
 0x3f6   : > { %v8687_v55 = vpack.c.bf16 %v8413_v9, %v3196_v20 }
 0x3f8   : > { %8688 = vmatprep.subr.bf16.mxu1 %v8687_v55 }
 0x3f9   : > { %8690 = vmatpush3.bf16.msra.mxu1 %v8687_v55 }
 0x404   : > { %v8416_v63 = vpop.f32.mrb[20].mxu0 }
 0x405   : > { %v3206_v58 = vpop.f32.mrb[21].mxu0 }
 0x406   : > { %v8691_v4 = vpack.c.bf16 %v8416_v63, %v3206_v58 }
 0x408   : > { %8692 = vmatprep.subr.bf16.mxu1 %v8691_v4 }
 0x409   : > { %8694 = vmatpush3.bf16.msra.mxu1 %v8691_v4 }
 0x40d   : > { %v8419_v8 = vpop.f32.mrb[22].mxu0 }
 0x40e   : > { %v3216_v62 = vpop.f32.mrb[23].mxu0 }
 0x40f   : > { %v8695_v42 = vpack.c.bf16 %v8419_v8, %v3216_v62 }
 0x411   : > { %8696 = vmatprep.subr.bf16.mxu1 %v8695_v42 }
 0x412   : > { %8698 = vmatpush3.bf16.msra.mxu1 %v8695_v42 }
 0x413   : > { %8700 = vmatprep.subr.msk.bf16.mxu1 %vm10188_vm11, %v15096_v17 }
 0x415   : > { %8481 = vmatmul.mubr.msk.f32.vlgmr.msra.gmra.mrb[8].mxu1 %vm2864_vm1, %v12249_v18 }
 0x416   : > { %8483 = vmatprep.mubr.msk.f32.mxu1 %vm2864_vm1, %v3247_v1  ;;  %8702 = vmatpush3.bf16.msk.msra.mxu1 %vm10188_vm11, %v15096_v17 }
 0x417   : > { %8704 = vmatprep.subr.msk.bf16.mxu1 %vm10223_vm10, %v15096_v17 }
 0x419   : > { %8484 = vmatmul.mubr.msk.f32.gmra.mrb[10].mxu1 %vm2864_vm1, %v3248_v56  ;;  %vm15103_vm1 = vmmov %vm15099_vm9 }
 0x41a   : > { %8706 = vmatpush3.bf16.msk.msra.mxu1 %vm10223_vm10, %v15096_v17  ;;  %vm15102_vm10 = vcmask 1040384   ;;  %vm15104_vm12 = vmmov %vm15103_vm1 }
 0x41b   : > { %8732 = vmatprep.subr.msk.bf16.mxu1 %vm10188_vm11, %v15096_v17  ;;  %vm15105_vm2 = vmmov %vm15103_vm1 }
 0x41c   : > { %vm15106_vm13 = vmmov %vm15103_vm1 }
 0x41d   : > { %vm15110_vm14 = vmmov %vm15102_vm10 }
 0x41e   : > { %vm15111_vm0 = vmmov %vm15103_vm1 }
 0x41f   : > { %vm15114_vm4 = vmmov %vm15111_vm0 }
 0x420   : > { %vm15115_vm5 = vmmov %vm15111_vm0 }
 0x453   : > { %v12284_v12 = vpop.f32.mrb[0].mxu1 }
 0x454   : > { %v3535_v44 = vrot.slane %v12284_v12, 6  ;;  %v12287_v24 = vpop.f32.mrb[1].mxu1 }
 0x455   : > { %v3534_v52 = vrot.slane %v12287_v24, 6  ;;  %v3519_v57 = vrot.slane %v12287_v24, 7 }
 0x457   : > { %v12292_v32 = vsel %vm15099_vm9, %v3534_v52, %v3535_v44  ;;  %v12294_v59 = vpop.f32.mrb[2].mxu1  ;;  %v3582_v35 = vsel %vm15102_vm10, %v12287_v24, %v3519_v57  ;;  %vm15116_vm9 = vmmov %vm15111_vm0 }
 0x458   : > { %15100 = vst [vmem:[#allocation58_spill] sm:$0xff] %v12294_v59  ;;  %3647 = vrot.lane.b32.xlu0 %v12292_v32, %s8923_s16  ;;  %3602 = vrot.lane.b32.xlu1 %v12292_v32, %s8922_s18  ;;  %v3539_v41 = vrot.slane %v12294_v59, 6  ;;  %v12301_v3 = vpop.f32.mrb[3].mxu1  ;;  %v12317_v2 = vsel %vm15105_vm2, %v3582_v35, %v3534_v52  ;;  %v3570_v21 = vrot.slane %v12294_v59, 5  ;;  %v3576_v38 = vrot.slane %v12294_v59, 4  ;;  %vm15117_vm10 = vmmov %vm15111_vm0 }
 0x459   : > { %15101 = vst [vmem:[#allocation87_spill] sm:$0xff] %v12301_v3  ;;  %v3537_v49 = vrot.slane %v12301_v3, 6  ;;  %vm15123_vm2 = vmmov %vm15110_vm14 }
 0x45a   : > { %v3588_v29 = vsel %vm15106_vm13, %v3539_v41, %v3570_v21  ;;  %vm15125_vm13 = vmmov %vm15111_vm0 }
 0x45b   : > { %v12307_v5 = vsel %vm15103_vm1, %v3535_v44, %v3537_v49  ;;  %v12310_v16 = vsel %vm15104_vm12, %v3537_v49, %v3539_v41  ;;  %v12339_v0 = vsel %vm15107_vm6, %v3588_v29, %v3576_v38  ;;  %vm15118_vm1 = vmmov %vm15107_vm6 }
 0x45c   : > { %3737 = vrot.lane.b32.xlu0 %v12292_v32, %s8925_s29  ;;  %3692 = vrot.lane.b32.xlu1 %v12292_v32, %s8924_s23  ;;  %vm15122_vm12 = vmmov %vm15111_vm0 }
 0x45d   : > { %vm15126_vm6 = vmmov %vm15111_vm0 }
 0x460   : > { %3645 = vrot.lane.b32.xlu1 %v12317_v2, %s8923_s16  ;;  %3600 = vrot.lane.b32.xlu0 %v12317_v2, %s8922_s18 }
 0x464   : > { %3735 = vrot.lane.b32.xlu1 %v12317_v2, %s8925_s29  ;;  %3690 = vrot.lane.b32.xlu0 %v12317_v2, %s8924_s23 }
 0x468   : > { %3649 = vrot.lane.b32.xlu1 %v12307_v5, %s8923_s16  ;;  %3604 = vrot.lane.b32.xlu0 %v12307_v5, %s8922_s18 }
 0x46c   : > { %3606 = vrot.lane.b32.xlu1 %v12310_v16, %s8922_s18  ;;  %3694 = vrot.lane.b32.xlu0 %v12307_v5, %s8924_s23 }
 0x470   : > { %3608 = vrot.lane.b32.xlu1 %v12339_v0, %s8922_s18  ;;  %3739 = vrot.lane.b32.xlu0 %v12307_v5, %s8925_s29 }
 0x474   : > { %3653 = vrot.lane.b32.xlu1 %v12339_v0, %s8923_s16  ;;  %3651 = vrot.lane.b32.xlu0 %v12310_v16, %s8923_s16 }
 0x478   : > { %3698 = vrot.lane.b32.xlu1 %v12339_v0, %s8924_s23  ;;  %3696 = vrot.lane.b32.xlu0 %v12310_v16, %s8924_s23 }
 0x47c   : > { %3743 = vrot.lane.b32.xlu1 %v12339_v0, %s8925_s29  ;;  %3741 = vrot.lane.b32.xlu0 %v12310_v16, %s8925_s29 }
 0x4af   : > { %v12357_v30 = vpop.f32.mrb[4].mxu1 }
 0x4b0   : > { %15108 = vst [vmem:[#allocation57_spill] sm:$0xff] %v12357_v30  ;;  %v3542_v26 = vrot.slane %v12357_v30, 6  ;;  %v12360_v11 = vpop.f32.mrb[5].mxu1 }
 0x4b1   : > { %15109 = vst [vmem:[#allocation88_spill] sm:$0xff] %v12360_v11  ;;  %v3520_v14 = vrot.slane %v12360_v11, 7  ;;  %v3541_v23 = vrot.slane %v12360_v11, 6 }
 0x4b3   : > { %v3583_v22 = vsel %vm15110_vm14, %v12360_v11, %v3520_v14  ;;  %v12367_v15 = vsel %vm15111_vm0, %v3541_v23, %v3542_v26  ;;  %v12369_v48 = vpop.f32.mrb[6].mxu1  ;;  %vm15127_vm14 = vmmov %vm15111_vm0 }
 0x4b4   : > { %15112 = vst [vmem:[#allocation91_spill] sm:$0xff] %v12369_v48  ;;  %3702 = vrot.lane.b32.xlu1 %v12367_v15, %s8924_s23  ;;  %3612 = vrot.lane.b32.xlu0 %v12367_v15, %s8922_s18  ;;  %v3546_v10 = vrot.slane %v12369_v48, 6  ;;  %v12376_v13 = vpop.f32.mrb[7].mxu1  ;;  %v12379_v61 = vsel %vm15114_vm4, %v3583_v22, %v3541_v23  ;;  %v3571_v56 = vrot.slane %v12369_v48, 5  ;;  %v3577_v19 = vrot.slane %v12369_v48, 4  ;;  %vm15128_vm4 = vmmov %vm15118_vm1 }
 0x4b5   : > { %15113 = vst [vmem:[#allocation94_spill] sm:$0xff] %v12376_v13  ;;  %v3544_v39 = vrot.slane %v12376_v13, 6 }
 0x4b6   : > { %v3589_v50 = vsel %vm15117_vm10, %v3546_v10, %v3571_v56  ;;  %vm3826_vm10 = vcmask 285696  }
 0x4b7   : > { %v12383_v25 = vsel %vm15115_vm5, %v3542_v26, %v3544_v39  ;;  %v12386_v1 = vsel %vm15116_vm9, %v3544_v39, %v3546_v10  ;;  %v12412_v51 = vsel %vm15118_vm1, %v3589_v50, %v3577_v19  ;;  %vm3810_vm5 = vcmask 277504  }
 0x4b8   : > { %3657 = vrot.lane.b32.xlu0 %v12367_v15, %s8923_s16  ;;  %3610 = vrot.lane.b32.xlu1 %v12379_v61, %s8922_s18  ;;  %vm15129_vm9 = vcmask 15360  }
 0x4b9   : > { %vm15130_vm1 = vmmov %vm15129_vm9 }
 0x4bc   : > { %3747 = vrot.lane.b32.xlu0 %v12367_v15, %s8925_s29  ;;  %3655 = vrot.lane.b32.xlu1 %v12379_v61, %s8923_s16 }
 0x4c0   : > { %3700 = vrot.lane.b32.xlu0 %v12379_v61, %s8924_s23  ;;  %3745 = vrot.lane.b32.xlu1 %v12379_v61, %s8925_s29 }
 0x4c4   : > { %3659 = vrot.lane.b32.xlu1 %v12383_v25, %s8923_s16  ;;  %3614 = vrot.lane.b32.xlu0 %v12383_v25, %s8922_s18 }
 0x4c8   : > { %3616 = vrot.lane.b32.xlu1 %v12386_v1, %s8922_s18  ;;  %3704 = vrot.lane.b32.xlu0 %v12383_v25, %s8924_s23 }
 0x4ca   : > { %v3603_v54 = vpop.permute.xlu1 %3602  ;;  %v3648_v47 = vpop.permute.xlu0 %3647 }
 0x4cb   : > { %v3781_v29 = vsel %vm735_vm3, %v12292_v32, %v3603_v54 }
 0x4cc   : > { %3618 = vrot.lane.b32.xlu1 %v12412_v51, %s8922_s18  ;;  %3749 = vrot.lane.b32.xlu0 %v12383_v25, %s8925_s29  ;;  %v3796_v26 = vsel %vm15129_vm9, %v3781_v29, %v3648_v47  ;;  %vm15137_vm9 = vmmov %vm15130_vm1 }
 0x4ce   : > { %v3693_v58 = vpop.permute.xlu1 %3692  ;;  %v3738_v4 = vpop.permute.xlu0 %3737 }
 0x4cf   : > { %v3812_v22 = vsel %vm3810_vm5, %v3796_v26, %v3693_v58 }
 0x4d0   : > { %3663 = vrot.lane.b32.xlu1 %v12412_v51, %s8923_s16  ;;  %3661 = vrot.lane.b32.xlu0 %v12386_v1, %s8923_s16  ;;  %v12508_v32 = vsel %vm3826_vm10, %v3812_v22, %v3738_v4 }
 0x4d1   : > { %v4443_v26 = vrot.slane %v12508_v32, 2 }
 0x4d2   : > { %v3646_v8 = vpop.permute.xlu1 %3645  ;;  %v3601_v62 = vpop.permute.xlu0 %3600 }
 0x4d3   : > { %v3780_v10 = vsel %vm735_vm3, %v12317_v2, %v3601_v62 }
 0x4d4   : > { %3708 = vrot.lane.b32.xlu1 %v12412_v51, %s8924_s23  ;;  %3706 = vrot.lane.b32.xlu0 %v12386_v1, %s8924_s23  ;;  %v3795_v19 = vsel %vm15130_vm1, %v3780_v10, %v3646_v8 }
 0x4d6   : > { %v3736_v45 = vpop.permute.xlu1 %3735  ;;  %v3691_v44 = vpop.permute.xlu0 %3690 }
 0x4d7   : > { %v3811_v50 = vsel %vm3810_vm5, %v3795_v19, %v3691_v44  ;;  %v4392_v44 = vrot.slane %v12508_v32, 1 }
 0x4d8   : > { %3753 = vrot.lane.b32.xlu1 %v12412_v51, %s8925_s29  ;;  %3751 = vrot.lane.b32.xlu0 %v12386_v1, %s8925_s29  ;;  %v12523_v2 = vsel %vm3826_vm10, %v3811_v50, %v3736_v45 }
 0x4d9   : > { %v4391_v58 = vrot.slane %v12523_v2, 1  ;;  %v4544_v50 = vrot.slane %v12523_v2, 4 }
 0x4da   : > { %v3650_v41 = vpop.permute.xlu1 %3649  ;;  %v3605_v49 = vpop.permute.xlu0 %3604 }
 0x4de   : > { %v3607_v21 = vpop.permute.xlu1 %3606  ;;  %v3695_v38 = vpop.permute.xlu0 %3694 }
 0x4e2   : > { %v3609_v14 = vpop.permute.xlu1 %3608  ;;  %v3740_v23 = vpop.permute.xlu0 %3739 }
 0x4e3   : > { %v3784_v4 = vsel %vm735_vm3, %v12339_v0, %v3609_v14 }
 0x4e6   : > { %v3654_v39 = vpop.permute.xlu1 %3653  ;;  %v3652_v56 = vpop.permute.xlu0 %3651 }
 0x4e8   : > { %v12430_v60 = vpop.f32.mrb[8].mxu1 }
 0x4e9   : > { %15119 = vst [vmem:[#allocation39_spill] sm:$0xff] %v12430_v60  ;;  %v3549_v43 = vrot.slane %v12430_v60, 6  ;;  %v12433_v28 = vpop.f32.mrb[9].mxu1 }
 0x4ea   : > { %15120 = vst [vmem:[#allocation100_spill] sm:$0xff] %v12433_v28  ;;  %v3521_v33 = vrot.slane %v12433_v28, 7  ;;  %v3548_v37 = vrot.slane %v12433_v28, 6 }
 0x4ec   : > { %v12437_v36 = vpop.f32.mrb[10].mxu1  ;;  %v12440_v46 = vsel %vm15122_vm12, %v3548_v37, %v3549_v43  ;;  %v3584_v31 = vsel %vm15123_vm2, %v12433_v28, %v3521_v33  ;;  %v3697_v33 = vpop.permute.xlu0 %3696  ;;  %vm15131_vm12 = vmmov %vm15130_vm1 }
 0x4ed   : > { %15121 = vst [vmem:[#allocation62_spill] sm:$0xff] %v12437_v36  ;;  %v3553_v6 = vrot.slane %v12437_v36, 6  ;;  %3712 = vrot.lane.b32.xlu1 %v12440_v46, %s8924_s23  ;;  %3622 = vrot.lane.b32.xlu0 %v12440_v46, %s8922_s18  ;;  %v12449_v27 = vpop.f32.mrb[11].mxu1  ;;  %v12453_v20 = vsel %vm15125_vm13, %v3584_v31, %v3548_v37  ;;  %v3572_v42 = vrot.slane %v12437_v36, 5  ;;  %v3578_v52 = vrot.slane %v12437_v36, 4  ;;  %vm15132_vm2 = vmmov %vm15130_vm1 }
 0x4ee   : > { %15124 = vst [vmem:[#allocation101_spill] sm:$0xff] %v12449_v27  ;;  %v3551_v9 = vrot.slane %v12449_v27, 6  ;;  %v3782_v37 = vsel %vm735_vm3, %v12307_v5, %v3605_v49  ;;  %v3783_v5 = vsel %vm735_vm3, %v12310_v16, %v3607_v21  ;;  %v3799_v8 = vsel %vm15132_vm2, %v3784_v4, %v3654_v39  ;;  %vm15133_vm13 = vmmov %vm15130_vm1 }
 0x4ef   : > { %v3590_v57 = vsel %vm15111_vm0, %v3553_v6, %v3572_v42  ;;  %v3797_v54 = vsel %vm15131_vm12, %v3782_v37, %v3650_v41  ;;  %v3798_v62 = vsel %vm15133_vm13, %v3783_v5, %v3652_v56  ;;  %v4393_v41 = vsel %vm1384_vm7, %v4391_v58, %v4392_v44 }
 0x4f0   : > { %v12456_v55 = vsel %vm15126_vm6, %v3549_v43, %v3551_v9  ;;  %v12459_v63 = vsel %vm15127_vm14, %v3551_v9, %v3553_v6  ;;  %v12485_v35 = vsel %vm15128_vm4, %v3590_v57, %v3578_v52  ;;  %v3699_v43 = vpop.permute.xlu1 %3698  ;;  %v3742_v31 = vpop.permute.xlu0 %3741  ;;  %v3813_v6 = vsel %vm3810_vm5, %v3797_v54, %v3695_v38  ;;  %vm15136_vm4 = vmmov %vm15130_vm1 }
 0x4f1   : > { %3667 = vrot.lane.b32.xlu0 %v12440_v46, %s8923_s16  ;;  %3620 = vrot.lane.b32.xlu1 %v12453_v20, %s8922_s18  ;;  %v12538_v9 = vsel %vm3826_vm10, %v3813_v6, %v3740_v23  ;;  %v3815_v52 = vsel %vm3810_vm5, %v3799_v8, %v3699_v43  ;;  %v3814_v16 = vsel %vm3810_vm5, %v3798_v62, %v3697_v33  ;;  %v4442_v21 = vrot.slane %v12523_v2, 2  ;;  %vm15141_vm13 = vmmov %vm15136_vm4 }
 0x4f2   : > { %v12558_v57 = vsel %vm3826_vm10, %v3814_v16, %v3742_v31  ;;  %v4430_v29 = vadd.f32 %v4393_v41, %v12523_v2  ;;  %v4493_v23 = vrot.slane %v12523_v2, 3  ;;  %v4494_v39 = vrot.slane %v12508_v32, 3 }
 0x4f3   : > { %v4444_v14 = vsel %vm1538_vm8, %v4442_v21, %v4443_v26  ;;  %vm15134_vm6 = vcmask 1044480   ;;  %v4545_v33 = vrot.slane %v12508_v32, 4  ;;  %vm15135_vm14 = vcmask 1043456  }
 0x4f4   : > { %v3744_v47 = vpop.permute.xlu1 %3743  ;;  %v4481_v10 = vadd.f32 %v4444_v14, %v4430_v29  ;;  %v4495_v19 = vsel %vm15134_vm6, %v4493_v23, %v4494_v39  ;;  %v4394_v5 = vrot.slane %v12538_v9, 1  ;;  %vm4895_vm0 = vcmask 261120   ;;  %vm15138_vm1 = vmmov %vm15134_vm6 }
 0x4f5   : > { %3757 = vrot.lane.b32.xlu0 %v12440_v46, %s8925_s29  ;;  %3665 = vrot.lane.b32.xlu1 %v12453_v20, %s8923_s16  ;;  %v12555_v0 = vsel %vm3826_vm10, %v3815_v52, %v3744_v47  ;;  %v4546_v54 = vsel %vm15135_vm14, %v4544_v50, %v4545_v33  ;;  %v4445_v29 = vrot.slane %v12538_v9, 2  ;;  %vm15139_vm12 = vmmov %vm15135_vm14 }
 0x4f6   : > { %v4532_v43 = vadd.f32 %v4495_v19, %v4481_v10  ;;  %8520 = vmatprep.mubr.msk.f32.mxu0 %vm4895_vm0, %v12087_v34  ;;  %v4395_v41 = vsel %vm1384_vm7, %v4392_v44, %v4394_v5  ;;  %v4496_v10 = vrot.slane %v12538_v9, 3  ;;  %vm15140_vm2 = vmmov %vm15138_vm1 }
 0x4f7   : > { %v4446_v44 = vsel %vm1538_vm8, %v4443_v26, %v4445_v29  ;;  %vm15142_vm6 = vmmov %vm15139_vm12 }
 0x4f8   : > { %v4583_v31 = vadd.f32 %v4546_v54, %v4532_v43  ;;  %v4497_v26 = vsel %vm15138_vm1, %v4494_v39, %v4496_v10  ;;  %vm15143_vm14 = vmmov %vm15138_vm1 }
 0x4f9   : > { %3710 = vrot.lane.b32.xlu0 %v12453_v20, %s8924_s23  ;;  %3755 = vrot.lane.b32.xlu1 %v12453_v20, %s8925_s29  ;;  %vm15145_vm1 = vmmov %vm15136_vm4 }
 0x4fa   : > { %v4619_v58 = vmul.f32 0.023647603, %v4583_v31  ;;  %v12600_v62 = vmul.f32 0.011170336, %v4583_v31  ;;  %v4691_v52 = vmul.f32 0.030364122, %v4583_v31 }
 0x4fd   : > { %3669 = vrot.lane.b32.xlu1 %v12456_v55, %s8923_s16  ;;  %3624 = vrot.lane.b32.xlu0 %v12456_v55, %s8922_s18 }
 0x501   : > { %3626 = vrot.lane.b32.xlu1 %v12459_v63, %s8922_s18  ;;  %3714 = vrot.lane.b32.xlu0 %v12456_v55, %s8924_s23 }
 0x505   : > { %3628 = vrot.lane.b32.xlu1 %v12485_v35, %s8922_s18  ;;  %3759 = vrot.lane.b32.xlu0 %v12456_v55, %s8925_s29 }
 0x509   : > { %3673 = vrot.lane.b32.xlu1 %v12485_v35, %s8923_s16  ;;  %3671 = vrot.lane.b32.xlu0 %v12459_v63, %s8923_s16 }
 0x50d   : > { %3718 = vrot.lane.b32.xlu1 %v12485_v35, %s8924_s23  ;;  %3716 = vrot.lane.b32.xlu0 %v12459_v63, %s8924_s23 }
 0x511   : > { %3763 = vrot.lane.b32.xlu1 %v12485_v35, %s8925_s29  ;;  %3761 = vrot.lane.b32.xlu0 %v12459_v63, %s8925_s29 }
 0x515   : > { %3919 = vrot.lane.b32.xlu0 %v12508_v32, %s8927_s4  ;;  %3859 = vrot.lane.b32.xlu1 %v12508_v32, %s8926_s30 }
 0x519   : > { %3979 = vrot.lane.b32.xlu0 %v12508_v32, %s8928_s25  ;;  %4039 = vrot.lane.b32.xlu1 %v12508_v32, %s8929_s27 }
 0x51d   : > { %3917 = vrot.lane.b32.xlu1 %v12523_v2, %s8927_s4  ;;  %3857 = vrot.lane.b32.xlu0 %v12523_v2, %s8926_s30 }
 0x521   : > { %3977 = vrot.lane.b32.xlu1 %v12523_v2, %s8928_s25  ;;  %4037 = vrot.lane.b32.xlu0 %v12523_v2, %s8929_s27 }
 0x525   : > { %3921 = vrot.lane.b32.xlu1 %v12538_v9, %s8927_s4  ;;  %3861 = vrot.lane.b32.xlu0 %v12538_v9, %s8926_s30 }
 0x526   : > { %v3703_v42 = vpop.permute.xlu1 %3702  ;;  %v3613_v45 = vpop.permute.xlu0 %3612 }
 0x527   : > { %v3786_v8 = vsel %vm735_vm3, %v12367_v15, %v3613_v45  ;;  %v4431_v15 = vadd.f32 %v4395_v41, %v12508_v32  ;;  %v4498_v41 = vrot.slane %v12558_v57, 3 }
 0x529   : > { %3865 = vrot.lane.b32.xlu1 %v12555_v0, %s8926_s30  ;;  %3863 = vrot.lane.b32.xlu0 %v12558_v57, %s8926_s30  ;;  %v4482_v50 = vadd.f32 %v4446_v44, %v4431_v15 }
 0x52a   : > { %v3611_v49 = vpop.permute.xlu1 %3610  ;;  %v3658_v38 = vpop.permute.xlu0 %3657 }
 0x52b   : > { %v3801_v16 = vsel %vm15136_vm4, %v3786_v8, %v3658_v38  ;;  %v4396_v38 = vrot.slane %v12558_v57, 1  ;;  %v4533_v8 = vadd.f32 %v4497_v26, %v4482_v50  ;;  %v4500_v50 = vrot.slane %v12555_v0, 3 }
 0x52c   : > { %v3817_v14 = vsel %vm3810_vm5, %v3801_v16, %v3703_v42  ;;  %v3785_v42 = vsel %vm735_vm3, %v12379_v61, %v3611_v49  ;;  %v4547_v61 = vrot.slane %v12538_v9, 4  ;;  %v4447_v49 = vrot.slane %v12558_v57, 2 }
 0x52d   : > { %3923 = vrot.lane.b32.xlu1 %v12558_v57, %s8927_s4  ;;  %3981 = vrot.lane.b32.xlu0 %v12538_v9, %s8928_s25  ;;  %v4397_v54 = vsel %vm1384_vm7, %v4394_v5, %v4396_v38 }
 0x52e   : > { %v3656_v22 = vpop.permute.xlu1 %3655  ;;  %v3748_v56 = vpop.permute.xlu0 %3747  ;;  %v4548_v39 = vsel %vm15139_vm12, %v4545_v33, %v4547_v61  ;;  %v4448_v16 = vsel %vm1538_vm8, %v4445_v29, %v4447_v49  ;;  %v4499_v33 = vsel %vm15140_vm2, %v4496_v10, %v4498_v41  ;;  %v4549_v29 = vrot.slane %v12558_v57, 4  ;;  %vm15146_vm12 = vmmov %vm15145_vm1 }
 0x52f   : > { %v12613_v45 = vsel %vm3826_vm10, %v3817_v14, %v3748_v56  ;;  %v4398_v56 = vrot.slane %v12555_v0, 1  ;;  %v3800_v43 = vsel %vm15137_vm9, %v3785_v42, %v3656_v22  ;;  %v4432_v22 = vadd.f32 %v4397_v54, %v12538_v9  ;;  %vm15144_vm9 = vmmov %vm15142_vm6 }
 0x530   : > { %v4449_v14 = vrot.slane %v12555_v0, 2  ;;  %vm15148_vm2 = vmmov %vm15145_vm1 }
 0x531   : > { %4041 = vrot.lane.b32.xlu1 %v12538_v9, %s8929_s27  ;;  %3925 = vrot.lane.b32.xlu0 %v12555_v0, %s8927_s4  ;;  %v4483_v44 = vadd.f32 %v4448_v16, %v4432_v22  ;;  %v4501_v22 = vsel %vm15143_vm14, %v4498_v41, %v4500_v50  ;;  %vm15153_vm14 = vmmov %vm15145_vm1 }
 0x532   : > { %v3746_v37 = vpop.permute.xlu1 %3745  ;;  %v3701_v47 = vpop.permute.xlu0 %3700  ;;  %v4450_v42 = vsel %vm1538_vm8, %v4447_v49, %v4449_v14  ;;  %v4550_v49 = vsel %vm15142_vm6, %v4547_v61, %v4549_v29  ;;  %vm15151_vm6 = vmmov %vm15145_vm1 }
 0x533   : > { %v3816_v31 = vsel %vm3810_vm5, %v3800_v43, %v3701_v47  ;;  %v4399_v47 = vsel %vm1384_vm7, %v4396_v38, %v4398_v56 }
 0x534   : > { %v12637_v5 = vsel %vm3826_vm10, %v3816_v31, %v3746_v37  ;;  %v12648_v37 = vadd.f32 %v4548_v39, %v4533_v8  ;;  %v4433_v38 = vadd.f32 %v4399_v47, %v12558_v57  ;;  %v4534_v31 = vadd.f32 %v4499_v33, %v4483_v44 }
 0x535   : > { %4043 = vrot.lane.b32.xlu1 %v12558_v57, %s8929_s27  ;;  %3983 = vrot.lane.b32.xlu0 %v12558_v57, %s8928_s25  ;;  %v4551_v47 = vrot.slane %v12555_v0, 4 }
 0x536   : > { %v12591_v6 = vpop.permute.xlu1 %3659  ;;  %v3615_v4 = vpop.permute.xlu0 %3614  ;;  %v4620_v54 = vmul.f32 0.023647603, %v12648_v37  ;;  %v4484_v26 = vadd.f32 %v4450_v42, %v4433_v38  ;;  %v12671_v39 = vadd.f32 %v4550_v49, %v4534_v31 }
 0x537   : > { %v3787_v56 = vsel %vm735_vm3, %v12383_v25, %v3615_v4  ;;  %v4692_v4 = vmul.f32 0.030364122, %v12648_v37 }
 0x538   : > { %v3802_v10 = vsel %vm15141_vm13, %v3787_v56, %v12591_v6  ;;  %v4535_v16 = vadd.f32 %v4501_v22, %v4484_v26  ;;  %v12685_v33 = vmul.f32 0.023647603, %v12671_v39  ;;  %vm15149_vm13 = vmmov %vm15145_vm1  ;;  %v12916_v27 = vmul.f32 0.011170336, %v12671_v39 }
 0x539   : > { %4045 = vrot.lane.b32.xlu1 %v12555_v0, %s8929_s27  ;;  %3985 = vrot.lane.b32.xlu0 %v12555_v0, %s8928_s25 }
 0x53a   : > { %v12604_v21 = vpop.permute.xlu1 %3616  ;;  %v3705_v23 = vpop.permute.xlu0 %3704 }
 0x53b   : > { %v3818_v25 = vsel %vm3810_vm5, %v3802_v10, %v3705_v23  ;;  %v4552_v23 = vsel %vm15144_vm9, %v4549_v29, %v4551_v47 }
 0x53d   : > { %4763 = vrot.lane.b32.xlu1 %v4619_v58, %s8928_s25  ;;  %4643 = vrot.lane.b32.xlu0 %v4619_v58, %s8926_s30 }
 0x53e   : > { %v3619_v19 = vpop.permute.xlu1 %3618  ;;  %v3750_v58 = vpop.permute.xlu0 %3749 }
 0x53f   : > { %v12674_v14 = vsel %vm3826_vm10, %v3818_v25, %v3750_v58  ;;  %v3789_v44 = vsel %vm735_vm3, %v12412_v51, %v3619_v19  ;;  %v12687_v58 = vadd.f32 %v4552_v23, %v4535_v16  ;;  %v3788_v19 = vsel %vm735_vm3, %v12386_v1, %v12604_v21 }
 0x541   : > { %4823 = vrot.lane.b32.xlu1 %v12600_v62, %s8929_s27  ;;  %4715 = vrot.lane.b32.xlu0 %v4691_v52, %s8927_s4  ;;  %v12702_v56 = vmul.f32 0.023647603, %v12687_v58 }
 0x542   : > { %v3664_v52 = vpop.permute.xlu1 %3663  ;;  %v3662_v15 = vpop.permute.xlu0 %3661 }
 0x543   : > { %v3804_v61 = vsel %vm15136_vm4, %v3789_v44, %v3664_v52  ;;  %v3803_v52 = vsel %vm15145_vm1, %v3788_v19, %v3662_v15  ;;  %v4693_v15 = vmul.f32 0.030364122, %v12671_v39  ;;  %vm15157_vm4 = vmmov %vm15144_vm9  ;;  %v15161_v39 = vrot.slane %v12674_v14, 3 }
 0x544   : > { %vm15158_vm9 = vmmov %vm15157_vm4 }
 0x545   : > { %3929 = vrot.lane.b32.xlu0 %v12613_v45, %s8927_s4  ;;  %3869 = vrot.lane.b32.xlu1 %v12613_v45, %s8926_s30 }
 0x546   : > { %v3709_v43 = vpop.permute.xlu1 %3708  ;;  %v3707_v8 = vpop.permute.xlu0 %3706 }
 0x547   : > { %v3820_v41 = vsel %vm3810_vm5, %v3804_v61, %v3709_v43  ;;  %v3819_v29 = vsel %vm3810_vm5, %v3803_v52, %v3707_v8 }
 0x549   : > { %3989 = vrot.lane.b32.xlu0 %v12613_v45, %s8928_s25  ;;  %4049 = vrot.lane.b32.xlu1 %v12613_v45, %s8929_s27 }
 0x54a   : > { %v3754_v6 = vpop.permute.xlu1 %3753  ;;  %v3752_v38 = vpop.permute.xlu0 %3751 }
 0x54b   : > { %v12690_v51 = vsel %vm3826_vm10, %v3820_v41, %v3754_v6  ;;  %v12705_v43 = vsel %vm3826_vm10, %v3819_v29, %v3752_v38 }
 0x54d   : > { %3927 = vrot.lane.b32.xlu1 %v12637_v5, %s8927_s4  ;;  %3867 = vrot.lane.b32.xlu0 %v12637_v5, %s8926_s30 }
 0x551   : > { %3987 = vrot.lane.b32.xlu1 %v12637_v5, %s8928_s25  ;;  %4047 = vrot.lane.b32.xlu0 %v12637_v5, %s8929_s27 }
 0x555   : > { %4765 = vrot.lane.b32.xlu1 %v4620_v54, %s8928_s25  ;;  %4645 = vrot.lane.b32.xlu0 %v4620_v54, %s8926_s30 }
 0x559   : > { %4717 = vrot.lane.b32.xlu0 %v4692_v4, %s8927_s4  ;;  %3871 = vrot.lane.b32.xlu1 %v12674_v14, %s8926_s30 }
 0x55d   : > { %4647 = vrot.lane.b32.xlu0 %v12685_v33, %s8926_s30  ;;  %3875 = vrot.lane.b32.xlu1 %v12690_v51, %s8926_s30 }
 0x55f   : > { %v3713_v42 = vpop.permute.xlu1 %3712  ;;  %v3623_v50 = vpop.permute.xlu0 %3622 }
 0x560   : > { %v3791_v26 = vsel %vm735_vm3, %v12440_v46, %v3623_v50 }
 0x561   : > { %4649 = vrot.lane.b32.xlu0 %v12702_v56, %s8926_s30  ;;  %3933 = vrot.lane.b32.xlu1 %v12705_v43, %s8927_s4 }
 0x563   : > { %v3621_v1 = vpop.permute.xlu1 %3620  ;;  %v3668_v21 = vpop.permute.xlu0 %3667 }
 0x564   : > { %v3806_v49 = vsel %vm15146_vm12, %v3791_v26, %v3668_v21  ;;  %v3790_v46 = vsel %vm735_vm3, %v12453_v20, %v3621_v1 }
 0x565   : > { %4719 = vrot.lane.b32.xlu0 %v4693_v15, %s8927_s4  ;;  %4051 = vrot.lane.b32.xlu1 %v12674_v14, %s8929_s27  ;;  %v3822_v22 = vsel %vm3810_vm5, %v3806_v49, %v3713_v42 }
 0x567   : > { %v3666_v54 = vpop.permute.xlu1 %3665  ;;  %v3758_v31 = vpop.permute.xlu0 %3757 }
 0x568   : > { %v12728_v4 = vsel %vm3826_vm10, %v3822_v22, %v3758_v31  ;;  %v3805_v6 = vsel %vm15148_vm2, %v3790_v46, %v3666_v54  ;;  %vm15164_vm2 = vmmov %vm15157_vm4 }
 0x569   : > { %3931 = vrot.lane.b32.xlu0 %v12674_v14, %s8927_s4  ;;  %4053 = vrot.lane.b32.xlu1 %v12705_v43, %s8929_s27  ;;  %15147 = vst [vmem:[#allocation102_spill] sm:$0xff] %v12728_v4 }
 0x56b   : > { %v3756_v8 = vpop.permute.xlu1 %3755  ;;  %v3711_v10 = vpop.permute.xlu0 %3710 }
 0x56c   : > { %v3821_v61 = vsel %vm3810_vm5, %v3805_v6, %v3711_v10  ;;  %v4400_v6 = vrot.slane %v12637_v5, 1 }
 0x56d   : > { %4055 = vrot.lane.b32.xlu1 %v12690_v51, %s8929_s27  ;;  %3873 = vrot.lane.b32.xlu0 %v12705_v43, %s8926_s30  ;;  %v12743_v38 = vsel %vm3826_vm10, %v3821_v61, %v3756_v8  ;;  %v4401_v61 = vrot.slane %v12613_v45, 1 }
 0x56f   : > { %v3670_v47 = vpop.permute.xlu1 %3669  ;;  %v3625_v25 = vpop.permute.xlu0 %3624 }
 0x570   : > { %v3792_v20 = vsel %vm735_vm3, %v12456_v55, %v3625_v25 }
 0x571   : > { %3991 = vrot.lane.b32.xlu0 %v12674_v14, %s8928_s25  ;;  %3879 = vrot.lane.b32.xlu1 %v12728_v4, %s8926_s30  ;;  %v3807_v29 = vsel %vm15149_vm13, %v3792_v20, %v3670_v47  ;;  %vm15167_vm13 = vmmov %vm15164_vm2 }
 0x573   : > { %v3627_v16 = vpop.permute.xlu1 %3626  ;;  %v3715_v44 = vpop.permute.xlu0 %3714 }
 0x574   : > { %v3823_v42 = vsel %vm3810_vm5, %v3807_v29, %v3715_v44  ;;  %v3793_v10 = vsel %vm735_vm3, %v12459_v63, %v3627_v16  ;;  %v4451_v29 = vrot.slane %v12637_v5, 2 }
 0x575   : > { %3935 = vrot.lane.b32.xlu0 %v12690_v51, %s8927_s4  ;;  %4059 = vrot.lane.b32.xlu1 %v12728_v4, %s8929_s27 }
 0x577   : > { %v3629_v23 = vpop.permute.xlu1 %3628  ;;  %v3760_v41 = vpop.permute.xlu0 %3759 }
 0x578   : > { %v12758_v21 = vsel %vm3826_vm10, %v3823_v42, %v3760_v41  ;;  %v3794_v55 = vsel %vm735_vm3, %v12485_v35, %v3629_v23 }
 0x579   : > { %3993 = vrot.lane.b32.xlu0 %v12705_v43, %s8928_s25  ;;  %3937 = vrot.lane.b32.xlu1 %v12743_v38, %s8927_s4  ;;  %15150 = vst [vmem:[#allocation89_spill] sm:$0xff] %v12758_v21 }
 0x57b   : > { %v3674_v19 = vpop.permute.xlu1 %3673  ;;  %v3672_v52 = vpop.permute.xlu0 %3671 }
 0x57c   : > { %v3809_v15 = vsel %vm15151_vm6, %v3794_v55, %v3674_v19  ;;  %v3808_v35 = vsel %vm15153_vm14, %v3793_v10, %v3672_v52  ;;  %v4402_v19 = vsel %vm1384_vm7, %v4400_v6, %v4401_v61 }
 0x57d   : > { %3995 = vrot.lane.b32.xlu0 %v12690_v51, %s8928_s25  ;;  %3997 = vrot.lane.b32.xlu1 %v12743_v38, %s8928_s25  ;;  %v4434_v42 = vadd.f32 %v4402_v19, %v12637_v5 }
 0x57f   : > { %v3719_v50 = vpop.permute.xlu1 %3718  ;;  %v3717_v1 = vpop.permute.xlu0 %3716 }
 0x580   : > { %v3825_v54 = vsel %vm3810_vm5, %v3809_v15, %v3719_v50  ;;  %v3824_v49 = vsel %vm3810_vm5, %v3808_v35, %v3717_v1  ;;  %v4502_v35 = vrot.slane %v12637_v5, 3  ;;  %vm15155_vm5 = vcmask 1044480  }
 0x581   : > { %3939 = vrot.lane.b32.xlu0 %v12728_v4, %s8927_s4  ;;  %3881 = vrot.lane.b32.xlu1 %v12758_v21, %s8926_s30  ;;  %vm15160_vm1 = vmmov %vm15155_vm5 }
 0x582   : > { %vm15162_vm12 = vmmov %vm15160_vm1 }
 0x583   : > { %v3764_v31 = vpop.permute.xlu1 %3763  ;;  %v3762_v26 = vpop.permute.xlu0 %3761  ;;  %vm15168_vm6 = vmmov %vm15160_vm1 }
 0x584   : > { %v12769_v8 = vsel %vm3826_vm10, %v3825_v54, %v3764_v31  ;;  %v12780_v25 = vsel %vm3826_vm10, %v3824_v49, %v3762_v26  ;;  %v14583_v31 = vrot.slane %v12674_v14, 2  ;;  %vm15156_vm10 = vmmov %vm15155_vm5 }
 0x585   : > { %15152 = vst [vmem:[#allocation96_spill] sm:$0xff] %v12769_v8  ;;  %3999 = vrot.lane.b32.xlu0 %v12728_v4, %s8928_s25  ;;  %3885 = vrot.lane.b32.xlu1 %v12769_v8, %s8926_s30  ;;  %15154 = vst [vmem:[#allocation19_spill] sm:$0xff] %v12780_v25 }
 0x586   : > { %vm15169_vm14 = vmmov %vm15160_vm1 }
 0x587   : > { %v3860_v22 = vpop.permute.xlu1 %3859  ;;  %v3920_v47 = vpop.permute.xlu0 %3919 }
 0x588   : > { %v3903_v46 = vadd.f32 %v3860_v22, %v12508_v32  ;;  %v4403_v32 = vrot.slane %v12674_v14, 1 }
 0x589   : > { %3877 = vrot.lane.b32.xlu0 %v12743_v38, %s8926_s30  ;;  %3943 = vrot.lane.b32.xlu1 %v12780_v25, %s8927_s4 }
 0x58a   : > { %v3963_v63 = vadd.f32 %v3920_v47, %v3903_v46  ;;  %v4404_v50 = vsel %vm1384_vm7, %v4401_v61, %v4403_v32  ;;  %v14582_v61 = vrot.slane %v12674_v14, 3 }
 0x58b   : > { %v4040_v16 = vpop.permute.xlu1 %4039  ;;  %v3980_v44 = vpop.permute.xlu0 %3979  ;;  %v4435_v49 = vadd.f32 %v4404_v50, %v12613_v45 }
 0x58c   : > { %v4023_v23 = vadd.f32 %v3980_v44, %v3963_v63  ;;  %v4503_v44 = vrot.slane %v12613_v45, 3 }
 0x58d   : > { %4057 = vrot.lane.b32.xlu0 %v12743_v38, %s8929_s27  ;;  %4061 = vrot.lane.b32.xlu1 %v12758_v21, %s8929_s27 }
 0x58e   : > { %v12805_v1 = vadd.f32 %v4040_v16, %v4023_v23 }
 0x58f   : > { %v3918_v41 = vpop.permute.xlu1 %3917  ;;  %v3858_v20 = vpop.permute.xlu0 %3857 }
 0x590   : > { %v3902_v52 = vadd.f32 %v3858_v20, %v12523_v2  ;;  %v4452_v2 = vrot.slane %v12613_v45, 2  ;;  %v12817_v47 = vmul.f32 0.023647603, %v12805_v1 }
 0x591   : > { %3941 = vrot.lane.b32.xlu0 %v12758_v21, %s8927_s4  ;;  %4003 = vrot.lane.b32.xlu1 %v12780_v25, %s8928_s25 }
 0x592   : > { %v3962_v15 = vadd.f32 %v3918_v41, %v3902_v52  ;;  %v4453_v10 = vsel %vm1538_vm8, %v4451_v29, %v4452_v2  ;;  %v4455_v6 = vsel %vm1538_vm8, %v4452_v2, %v14583_v31  ;;  %v4504_v41 = vsel %vm15155_vm5, %v4502_v35, %v4503_v44  ;;  %vm15170_vm5 = vmmov %vm15164_vm2 }
 0x593   : > { %v3978_v55 = vpop.permute.xlu1 %3977  ;;  %v4038_v54 = vpop.permute.xlu0 %4037  ;;  %v4485_v22 = vadd.f32 %v4453_v10, %v4434_v42  ;;  %v4486_v20 = vadd.f32 %v4455_v6, %v4435_v49  ;;  %v4553_v52 = vrot.slane %v12637_v5, 4  ;;  %v14584_v29 = vrot.slane %v12817_v47, 1 }
 0x594   : > { %v4022_v26 = vadd.f32 %v3978_v55, %v3962_v15  ;;  %v4506_v10 = vsel %vm15156_vm10, %v4503_v44, %v14582_v61  ;;  %v4405_v35 = vrot.slane %v12705_v43, 1  ;;  %v12846_v49 = vmul.f32 0.030364122, %v12805_v1  ;;  %vm15171_vm10 = vmmov %vm15164_vm2 }
 0x595   : > { %4005 = vrot.lane.b32.xlu1 %v12769_v8, %s8928_s25  ;;  %3883 = vrot.lane.b32.xlu0 %v12780_v25, %s8926_s30  ;;  %v4536_v19 = vadd.f32 %v4504_v41, %v4485_v22  ;;  %v12856_v6 = vmul.f32 0.011170336, %v12648_v37  ;;  %v4694_v31 = vmul.f32 0.030364122, %v12687_v58 }
 0x596   : > { %v4082_v46 = vadd.f32 %v4038_v54, %v4022_v26  ;;  %v14585_v54 = vrot.slane %v12674_v14, 4  ;;  %v4554_v26 = vrot.slane %v12613_v45, 4  ;;  %v4406_v37 = vsel %vm1384_vm7, %v4403_v32, %v4405_v35 }
 0x597   : > { %v3922_v63 = vpop.permute.xlu1 %3921  ;;  %v3862_v16 = vpop.permute.xlu0 %3861 }
 0x598   : > { %v12824_v23 = vmul.f32 0.023647603, %v4082_v46  ;;  %v4190_v50 = vmul.f32 0.030364122, %v4082_v46  ;;  %v3904_v2 = vadd.f32 %v3862_v16, %v12538_v9  ;;  %v4537_v9 = vadd.f32 %v4506_v10, %v4486_v20 }
 0x599   : > { %4063 = vrot.lane.b32.xlu1 %v12780_v25, %s8929_s27  ;;  %4001 = vrot.lane.b32.xlu0 %v12758_v21, %s8928_s25  ;;  %v4097_v16 = vmul.f32 0.011170336, %v4082_v46  ;;  %v4555_v44 = vsel %vm15157_vm4, %v4553_v52, %v4554_v26  ;;  %v4407_v20 = vrot.slane %v12690_v51, 1  ;;  %v4221_v52 = vrot.slane %v12846_v49, 2  ;;  %vm15172_vm4 = vmmov %vm15160_vm1 }
 0x59a   : > { %v4139_v42 = vrot.slane %v12824_v23, 1  ;;  %v4220_v41 = vrot.slane %v4190_v50, 2  ;;  %v3964_v10 = vadd.f32 %v3922_v63, %v3904_v2  ;;  %v4436_v49 = vadd.f32 %v4406_v37, %v12674_v14 }
 0x59b   : > { %v12834_v55 = vpop.permute.xlu1 %3865  ;;  %v12836_v15 = vpop.permute.xlu0 %3863 }
 0x59c   : > { %v4141_v22 = vsel %vm1384_vm7, %v4139_v42, %v14584_v29  ;;  %v12862_v42 = vadd.f32 %v4555_v44, %v4536_v19  ;;  %v4557_v29 = vsel %vm15158_vm9, %v4554_v26, %v14585_v54  ;;  %v4456_v26 = vrot.slane %v12705_v43, 2  ;;  %vm15174_vm9 = vmmov %vm15164_vm2 }
 0x59d   : > { %4065 = vrot.lane.b32.xlu1 %v12769_v8, %s8929_s27  ;;  %3945 = vrot.lane.b32.xlu0 %v12769_v8, %s8927_s4  ;;  %v4178_v46 = vadd.f32 %v4141_v22, %v4097_v16  ;;  %v12875_v19 = vadd.f32 %v4557_v29, %v4537_v9  ;;  %v4271_v44 = vrot.slane %v12824_v23, 3  ;;  %v4222_v32 = vsel %vm1538_vm8, %v4220_v41, %v4221_v52 }
 0x59e   : > { %v12882_v2 = vmul.f32 0.023647603, %v12862_v42  ;;  %v4272_v29 = vrot.slane %v12817_v47, 3  ;;  %v4507_v9 = vrot.slane %v12705_v43, 3 }
 0x59f   : > { %v12859_v40 = vpop.permute.xlu1 %3923  ;;  %v3982_v61 = vpop.permute.xlu0 %3981  ;;  %v4259_v7 = vadd.f32 %v4222_v32, %v4178_v46  ;;  %v12896_v23 = vmul.f32 0.023647603, %v12875_v19 }
 0x5a0   : > { %v4024_v50 = vadd.f32 %v3982_v61, %v3964_v10  ;;  %v12888_v61 = vmul.f32 0.011170336, %v12805_v1  ;;  %v15159_v1 = vrot.slane %v12674_v14, 2  ;;  %v4340_v10 = vrot.slane %v4097_v16, 4 }
 0x5a1   : > { %4825 = vrot.lane.b32.xlu1 %v12856_v6, %s8929_s27  ;;  %4721 = vrot.lane.b32.xlu0 %v4694_v31, %s8927_s4  ;;  %v4408_v31 = vsel %vm1384_vm7, %v4405_v35, %v4407_v20  ;;  %v4458_v20 = vrot.slane %v12690_v51, 2  ;;  %v4695_v16 = vmul.f32 0.030364122, %v12862_v42 }
 0x5a2   : > { %v4457_v35 = vsel %vm1538_vm8, %v15159_v1, %v4456_v26  ;;  %v4437_v32 = vadd.f32 %v4408_v31, %v12705_v43  ;;  %v4341_v36 = vrot.slane %v12888_v61, 4 }
 0x5a3   : > { %v4042_v22 = vpop.permute.xlu1 %4041  ;;  %v12879_v63 = vpop.permute.xlu0 %3925 }
 0x5a4   : > { %v4084_v54 = vadd.f32 %v4042_v22, %v4024_v50  ;;  %v4273_v50 = vsel %vm15160_vm1, %v4271_v44, %v4272_v29  ;;  %v4487_v22 = vadd.f32 %v4457_v35, %v4436_v49  ;;  %v4558_v44 = vrot.slane %v12705_v43, 4 }
 0x5a5   : > { %4767 = vrot.lane.b32.xlu1 %v12685_v33, %s8928_s25  ;;  %4651 = vrot.lane.b32.xlu0 %v12882_v2, %s8926_s30  ;;  %v4310_v1 = vadd.f32 %v4273_v50, %v4259_v7  ;;  %v4509_v49 = vrot.slane %v12690_v51, 3  ;;  %v4508_v7 = vsel %vm15162_vm12, %v15161_v39, %v4507_v9  ;;  %v4459_v35 = vsel %vm1538_vm8, %v4456_v26, %v4458_v20  ;;  %vm15176_vm12 = vmmov %vm15164_vm2 }
 0x5a6   : > { %v12899_v41 = vmul.f32 0.023647603, %v4084_v54  ;;  %v12901_v46 = vmul.f32 0.030364122, %v4084_v54  ;;  %v12926_v31 = vmul.f32 0.011170336, %v4084_v54  ;;  %v4342_v28 = vsel %vm15164_vm2, %v4340_v10, %v4341_v36  ;;  %vm15177_vm2 = vmmov %vm15160_vm1 }
 0x5a7   : > { %v12907_v33 = vpop.permute.xlu1 %4043  ;;  %v12909_v37 = vpop.permute.xlu0 %3983  ;;  %v4538_v54 = vadd.f32 %v4508_v7, %v4487_v22  ;;  %v4488_v48 = vadd.f32 %v4459_v35, %v4437_v32  ;;  %v4379_v30 = vadd.f32 %v4342_v28, %v4310_v1  ;;  %v4409_v26 = vrot.slane %v12743_v38, 1 }
 0x5a8   : > { %v14599_v34 = vrot.slane %v12899_v41, 1  ;;  %v14597_v39 = vrot.slane %v12899_v41, 3  ;;  %v15165_v20 = vrot.slane %v12901_v46, 2  ;;  %v4560_v10 = vrot.slane %v12690_v51, 4 }
 0x5a9   : > { %4769 = vrot.lane.b32.xlu1 %v12702_v56, %s8928_s25  ;;  %4653 = vrot.lane.b32.xlu0 %v12896_v23, %s8926_s30  ;;  %v15163_v56 = vrot.slane %v12817_v47, 1  ;;  %v14598_v32 = vrot.slane %v12926_v31, 4  ;;  %v4510_v1 = vsel %vm15168_vm6, %v4507_v9, %v4509_v49  ;;  %v4410_v7 = vrot.slane %v12728_v4, 1  ;;  %vm15180_vm6 = vmmov %vm15160_vm1 }
 0x5aa   : > { %v4224_v47 = vsel %vm1538_vm8, %v4221_v52, %v15165_v20  ;;  %v4607_v20 = vadd.f32 %v12600_v62, %v4379_v30  ;;  %v4275_v9 = vsel %vm15169_vm14, %v4272_v29, %v14597_v39  ;;  %v4412_v49 = vrot.slane %v12758_v21, 1  ;;  %vm15182_vm14 = vmmov %vm15170_vm5 }
 0x5ab   : > { %v4143_v50 = vsel %vm1384_vm7, %v15163_v56, %v14599_v34  ;;  %v12937_v18 = vpop.permute.xlu1 %4045  ;;  %v12939_v60 = vpop.permute.xlu0 %3985  ;;  %v12959_v56 = vmul.f32 0.011170336, %v12687_v58  ;;  %v4344_v30 = vsel %vm15171_vm10, %v4341_v36, %v14598_v32  ;;  %v4416_v34 = vrot.slane %v12769_v8, 1  ;;  %vm15199_vm10 = vmmov %vm15160_vm1 }
 0x5ac   : > { %v4179_v13 = vadd.f32 %v4143_v50, %v12888_v61  ;;  %v15166_v61 = vrot.slane %v12674_v14, 4 }
 0x5ad   : > { %4827 = vrot.lane.b32.xlu1 %v12916_v27, %s8929_s27  ;;  %4723 = vrot.lane.b32.xlu0 %v4695_v16, %s8927_s4  ;;  %v4696_v16 = vmul.f32 0.030364122, %v12875_v19 }
 0x5ae   : > { %v4260_v22 = vadd.f32 %v4224_v47, %v4179_v13  ;;  %v4559_v28 = vsel %vm15167_vm13, %v15166_v61, %v4558_v44  ;;  %v4539_v13 = vadd.f32 %v4510_v1, %v4488_v48  ;;  %v4411_v47 = vsel %vm1384_vm7, %v4409_v26, %v4410_v7  ;;  %vm15179_vm13 = vmmov %vm15170_vm5 }
 0x5af   : > { %v4764_v35 = vpop.permute.xlu1 %4763  ;;  %v4644_v52 = vpop.permute.xlu0 %4643  ;;  %v12962_v50 = vadd.f32 %v4559_v28, %v4538_v54  ;;  %v4561_v54 = vsel %vm15170_vm5, %v4558_v44, %v4560_v10  ;;  %v4460_v48 = vrot.slane %v12743_v38, 2  ;;  %v4438_v1 = vadd.f32 %v4411_v47, %v12743_v38  ;;  %vm15198_vm5 = vmmov %vm15160_vm1 }
 0x5b0   : > { %v4311_v58 = vadd.f32 %v4275_v9, %v4260_v22  ;;  %v4679_v61 = vadd.f32 %v4644_v52, %v4607_v20  ;;  %v12979_v28 = vadd.f32 %v4561_v54, %v4539_v13  ;;  %v4461_v22 = vrot.slane %v12728_v4, 2 }
 0x5b1   : > { %4829 = vrot.lane.b32.xlu1 %v12959_v56, %s8929_s27  ;;  %4725 = vrot.lane.b32.xlu0 %v4696_v16, %s8927_s4  ;;  %v4625_v29 = vmul.f32 0.023647603, %v12962_v50  ;;  %v4413_v44 = vsel %vm1384_vm7, %v4410_v7, %v4412_v49  ;;  %v4511_v13 = vrot.slane %v12743_v38, 3  ;;  %v4463_v20 = vrot.slane %v12758_v21, 2 }
 0x5b2   : > { %v4380_v39 = vadd.f32 %v4344_v30, %v4311_v58  ;;  %v4462_v52 = vsel %vm1538_vm8, %v4460_v48, %v4461_v22  ;;  %v4626_v7 = vmul.f32 0.023647603, %v12979_v28  ;;  %v4514_v30 = vrot.slane %v12758_v21, 3 }
 0x5b3   : > { %v4824_v62 = vpop.permute.xlu1 %4823  ;;  %v4716_v26 = vpop.permute.xlu0 %4715  ;;  %v4489_v58 = vadd.f32 %v4462_v52, %v4438_v1  ;;  %v4464_v48 = vsel %vm1538_vm8, %v4461_v22, %v4463_v20  ;;  %v4697_v1 = vmul.f32 0.030364122, %v12962_v50  ;;  %v4414_v52 = vrot.slane %v12780_v25, 1 }
 0x5b4   : > { %v4751_v16 = vadd.f32 %v4716_v26, %v4679_v61  ;;  %v12988_v36 = vadd.f32 %v12856_v6, %v4380_v39  ;;  %v4512_v6 = vrot.slane %v12728_v4, 3  ;;  %v4562_v39 = vrot.slane %v12743_v38, 4 }
 0x5b5   : > { %4771 = vrot.lane.b32.xlu1 %v12882_v2, %s8928_s25  ;;  %4655 = vrot.lane.b32.xlu0 %v4625_v29, %s8926_s30  ;;  %v4439_v2 = vadd.f32 %v4413_v44, %v12728_v4 }
 0x5b6   : > { %v4799_v10 = vadd.f32 %v4764_v35, %v4751_v16  ;;  %v4513_v54 = vsel %vm15172_vm4, %v4511_v13, %v4512_v6  ;;  %v4515_v13 = vsel %vm15160_vm1, %v4512_v6, %v4514_v30  ;;  %vm15201_vm4 = vmmov %vm15174_vm9 }
 0x5b7   : > { %v12993_v47 = vpop.permute.xlu1 %3869  ;;  %v12995_v9 = vpop.permute.xlu0 %3929  ;;  %v4540_v16 = vadd.f32 %v4513_v54, %v4489_v58  ;;  %v4490_v44 = vadd.f32 %v4464_v48, %v4439_v2  ;;  %v13034_v58 = vmul.f32 0.011170336, %v12875_v19  ;;  %v4698_v2 = vmul.f32 0.030364122, %v12979_v28 }
 0x5b8   : > { %v12999_v61 = vadd.f32 %v4824_v62, %v4799_v10  ;;  %v4563_v10 = vrot.slane %v12728_v4, 4 }
 0x5b9   : > { %4773 = vrot.lane.b32.xlu1 %v12896_v23, %s8928_s25  ;;  %4657 = vrot.lane.b32.xlu0 %v4626_v7, %s8926_s30  ;;  %v13018_v23 = vmul.f32 0.011170336, %v12862_v42  ;;  %v4565_v42 = vrot.slane %v12758_v21, 4  ;;  %15175 = vst [vmem:[#allocation14_spill] sm:$0xff] %v13034_v58  ;;  %v4541_v48 = vadd.f32 %v4515_v13, %v4490_v44  ;;  %v4467_v13 = vrot.slane %v12769_v8, 2 }
 0x5ba   : > { %8494 = vmatprep.mubr.msk.f32.mxu1 %vm4895_vm0, %v12999_v61  ;;  %v4564_v22 = vsel %vm15174_vm9, %v4562_v39, %v4563_v10  ;;  %v4465_v39 = vrot.slane %v12780_v25, 2  ;;  %vm15202_vm9 = vmmov %vm15201_vm4 }
 0x5bb   : > { %v13013_v62 = vpop.permute.xlu1 %4049  ;;  %v13015_v26 = vpop.permute.xlu0 %3989  ;;  %15173 = vst [vmem:[#allocation51_spill] sm:$0xff] %v13018_v23  ;;  %v4591_v54 = vadd.f32 %v4564_v22, %v4540_v16  ;;  %v4566_v6 = vsel %vm15176_vm12, %v4563_v10, %v4565_v42  ;;  %v4417_v22 = vsel %vm1384_vm7, %v4414_v52, %v4416_v34  ;;  %v4516_v10 = vrot.slane %v12780_v25, 3  ;;  %vm15210_vm12 = vmmov %vm15177_vm2 }
 0x5bc   : > { %v4592_v16 = vadd.f32 %v4566_v6, %v4541_v48 }
 0x5bd   : > { %4831 = vrot.lane.b32.xlu1 %v13018_v23, %s8929_s27  ;;  %4727 = vrot.lane.b32.xlu0 %v4697_v1, %s8927_s4  ;;  %v4415_v1 = vsel %vm1384_vm7, %v4412_v49, %v4414_v52  ;;  %v4627_v59 = vmul.f32 0.023647603, %v4591_v54  ;;  %v4466_v49 = vsel %vm1538_vm8, %v4463_v20, %v4465_v39  ;;  %v4517_v34 = vsel %vm15177_vm2, %v4514_v30, %v4516_v10 }
 0x5be   : > { %v4440_v44 = vadd.f32 %v4415_v1, %v12758_v21  ;;  %v4628_v23 = vmul.f32 0.023647603, %v4592_v16  ;;  %v4441_v1 = vadd.f32 %v4417_v22, %v12780_v25  ;;  %v4468_v20 = vsel %vm1538_vm8, %v4465_v39, %v4467_v13 }
 0x5bf   : > { %v13029_v35 = vpop.permute.xlu1 %3927  ;;  %v13031_v32 = vpop.permute.xlu0 %3867  ;;  %v4518_v52 = vrot.slane %v12769_v8, 3  ;;  %v4699_v22 = vmul.f32 0.030364122, %v4591_v54  ;;  %v4569_v13 = vrot.slane %v12769_v8, 4 }
 0x5c0   : > { %v4491_v48 = vadd.f32 %v4466_v49, %v4440_v44  ;;  %v13071_v44 = vmul.f32 0.011170336, %v12962_v50  ;;  %v13084_v50 = vmul.f32 0.011170336, %v12979_v28 }
 0x5c1   : > { %4833 = vrot.lane.b32.xlu1 %v13034_v58, %s8929_s27  ;;  %4729 = vrot.lane.b32.xlu0 %v4698_v2, %s8927_s4  ;;  %v4519_v39 = vsel %vm15180_vm6, %v4516_v10, %v4518_v52 }
 0x5c2   : > { %15178 = vst [vmem:[#allocation15_spill] sm:$0xff] %v13071_v44  ;;  %v4542_v49 = vadd.f32 %v4517_v34, %v4491_v48  ;;  %15181 = vst [vmem:[#allocation22_spill] sm:$0xff] %v13084_v50  ;;  %v4700_v48 = vmul.f32 0.030364122, %v4592_v16 }
 0x5c3   : > { %v13044_v11 = vpop.permute.xlu1 %3987  ;;  %v13046_v19 = vpop.permute.xlu0 %4047 }
 0x5c5   : > { %4775 = vrot.lane.b32.xlu1 %v4625_v29, %s8928_s25  ;;  %4659 = vrot.lane.b32.xlu0 %v4627_v59, %s8926_s30  ;;  %v4567_v29 = vrot.slane %v12780_v25, 4 }
 0x5c7   : > { %v13055_v2 = vpop.permute.xlu1 %4765  ;;  %v13057_v58 = vpop.permute.xlu0 %4645  ;;  %v4568_v30 = vsel %vm15179_vm13, %v4565_v42, %v4567_v29  ;;  %v4570_v42 = vsel %vm15182_vm14, %v4567_v29, %v4569_v13  ;;  %vm15224_vm13 = vmmov %vm15198_vm5 }
 0x5c8   : > { %vm15227_vm14 = vmmov %vm15198_vm5 }
 0x5c9   : > { %4777 = vrot.lane.b32.xlu1 %v4626_v7, %s8928_s25  ;;  %4661 = vrot.lane.b32.xlu0 %v4628_v23, %s8926_s30  ;;  %v4492_v7 = vadd.f32 %v4468_v20, %v4441_v1  ;;  %v4593_v1 = vadd.f32 %v4568_v30, %v4542_v49 }
 0x5cb   : > { %v13066_v6 = vpop.permute.xlu1 %3871  ;;  %v13068_v21 = vpop.permute.xlu0 %4717  ;;  %v4543_v34 = vadd.f32 %v4519_v39, %v4492_v7  ;;  %v4629_v52 = vmul.f32 0.023647603, %v4593_v1  ;;  %v13106_v39 = vmul.f32 0.011170336, %v4591_v54  ;;  %v4701_v13 = vmul.f32 0.030364122, %v4593_v1 }
 0x5cd   : > { %4835 = vrot.lane.b32.xlu1 %v13071_v44, %s8929_s27  ;;  %4731 = vrot.lane.b32.xlu0 %v4699_v22, %s8927_s4  ;;  %v4594_v22 = vadd.f32 %v4570_v42, %v4543_v34  ;;  %15183 = vst [vmem:[#allocation97_spill] sm:$0xff] %v13106_v39  ;;  %v13115_v34 = vmul.f32 0.011170336, %v4592_v16  ;;  %v13130_v16 = vmul.f32 0.011170336, %v4593_v1  ;;  %v3905_v1 = vadd.f32 %v12836_v15, %v12558_v57 }
 0x5cf   : > { %v13079_v25 = vpop.permute.xlu1 %3875  ;;  %v13081_v3 = vpop.permute.xlu0 %4647  ;;  %v4630_v7 = vmul.f32 0.023647603, %v4594_v22  ;;  %15184 = vst [vmem:[#allocation40_spill] sm:$0xff] %v13115_v34  ;;  %15188 = vst [vmem:[#allocation30_spill] sm:$0xff] %v13130_v16  ;;  %v3965_v44 = vadd.f32 %v12859_v40, %v3905_v1  ;;  %v3907_v40 = vadd.f32 %v13031_v32, %v12637_v5 }
 0x5d1   : > { %4837 = vrot.lane.b32.xlu1 %v13084_v50, %s8929_s27  ;;  %4733 = vrot.lane.b32.xlu0 %v4700_v48, %s8927_s4  ;;  %v13128_v50 = vmul.f32 0.011170336, %v4594_v22 }
 0x5d3   : > { %v13090_v10 = vpop.permute.xlu1 %3933  ;;  %v13092_v20 = vpop.permute.xlu0 %4649  ;;  %15187 = vst [vmem:[#allocation99_spill] sm:$0xff] %v13128_v50 }
 0x5d5   : > { %4779 = vrot.lane.b32.xlu1 %v4627_v59, %s8928_s25  ;;  %4663 = vrot.lane.b32.xlu0 %v4629_v52, %s8926_s30 }
 0x5d7   : > { %v13096_v28 = vpop.permute.xlu1 %4051  ;;  %v13098_v49 = vpop.permute.xlu0 %4719 }
 0x5d9   : > { %4781 = vrot.lane.b32.xlu1 %v4628_v23, %s8928_s25  ;;  %4665 = vrot.lane.b32.xlu0 %v4630_v7, %s8926_s30  ;;  %v4702_v23 = vmul.f32 0.030364122, %v4594_v22  ;;  %v3906_v22 = vadd.f32 %v12834_v55, %v12555_v0  ;;  %v3908_v55 = vadd.f32 %v12993_v47, %v12613_v45 }
 0x5db   : > { %v13102_v29 = vpop.permute.xlu1 %4053  ;;  %v13104_v30 = vpop.permute.xlu0 %3931 }
 0x5dd   : > { %4839 = vrot.lane.b32.xlu1 %v13106_v39, %s8929_s27  ;;  %4735 = vrot.lane.b32.xlu0 %v4701_v13, %s8927_s4 }
 0x5df   : > { %v13111_v59 = vpop.permute.xlu1 %4055  ;;  %v13113_v48 = vpop.permute.xlu0 %3873 }
 0x5e1   : > { %4841 = vrot.lane.b32.xlu1 %v13115_v34, %s8929_s27  ;;  %4737 = vrot.lane.b32.xlu0 %v4702_v23, %s8927_s4 }
 0x5e3   : > { %v13120_v54 = vpop.permute.xlu1 %3879  ;;  %v3992_v42 = vpop.permute.xlu0 %3991 }
 0x5e4   : > { %15185 = vst [vmem:[#allocation52_spill] sm:$0xff] %v13120_v54 }
 0x5e5   : > { %4785 = vrot.lane.b32.xlu1 %v4630_v7, %s8928_s25  ;;  %4783 = vrot.lane.b32.xlu0 %v4629_v52, %s8928_s25 }
 0x5e7   : > { %v13124_v13 = vpop.permute.xlu1 %4059  ;;  %v13126_v39 = vpop.permute.xlu0 %3935 }
 0x5e8   : > { %15186 = vst [vmem:[#allocation48_spill] sm:$0xff] %v13124_v13  ;;  %v4025_v13 = vadd.f32 %v12909_v37, %v3965_v44  ;;  %v3967_v44 = vadd.f32 %v13029_v35, %v3907_v40  ;;  %v15195_v40 = vrot.slane %v12899_v41, 1 }
 0x5e9   : > { %4845 = vrot.lane.b32.xlu1 %v13128_v50, %s8929_s27  ;;  %4843 = vrot.lane.b32.xlu0 %v13130_v16, %s8929_s27  ;;  %v3966_v50 = vadd.f32 %v12879_v63, %v3906_v22 }
 0x5ea   : > { %v4085_v0 = vadd.f32 %v12907_v33, %v4025_v13  ;;  %v4027_v5 = vadd.f32 %v13044_v11, %v3967_v44 }
 0x5eb   : > { %v13136_v23 = vpop.permute.xlu1 %3937  ;;  %v13138_v34 = vpop.permute.xlu0 %3993 }
 0x5ec   : > { %v4112_v37 = vmul.f32 0.023647603, %v4085_v0  ;;  %v4193_v32 = vmul.f32 0.030364122, %v4085_v0  ;;  %v4087_v35 = vadd.f32 %v13046_v19, %v4027_v5  ;;  %v4100_v11 = vmul.f32 0.011170336, %v4085_v0 }
 0x5ee   : > { %v4225_v44 = vrot.slane %v4193_v32, 2 }
 0x5ef   : > { %v13140_v7 = vpop.permute.xlu1 %3997  ;;  %v13142_v52 = vpop.permute.xlu0 %3995 }
 0x5f0   : > { %15189 = vst [vmem:[#allocation104_spill] sm:$0xff] %v13140_v7  ;;  %v4026_v7 = vadd.f32 %v12939_v60, %v3966_v50  ;;  %v3968_v50 = vadd.f32 %v12995_v9, %v3908_v55  ;;  %v3909_v9 = vadd.f32 %v13066_v6, %v12674_v14  ;;  %v13196_v14 = vmul.f32 0.023647603, %v4087_v35 }
 0x5f2   : > { %v4086_v57 = vadd.f32 %v12937_v18, %v4026_v7  ;;  %v4144_v18 = vrot.slane %v4112_v37, 1  ;;  %v4028_v47 = vadd.f32 %v13015_v26, %v3968_v50  ;;  %v3969_v50 = vadd.f32 %v13104_v30, %v3909_v9 }
 0x5f3   : > { %v13150_v8 = vpop.permute.xlu1 %3881  ;;  %v13152_v16 = vpop.permute.xlu0 %3939  ;;  %v4148_v9 = vrot.slane %v13196_v14, 1 }
 0x5f4   : > { %v4113_v60 = vmul.f32 0.023647603, %v4086_v57  ;;  %v4194_v45 = vmul.f32 0.030364122, %v4086_v57  ;;  %v4145_v55 = vsel %vm1384_vm7, %v15195_v40, %v4144_v18  ;;  %v4088_v26 = vadd.f32 %v13013_v62, %v4028_v47 }
 0x5f5   : > { %v4029_v6 = vadd.f32 %v3992_v42, %v3969_v50  ;;  %v4276_v40 = vrot.slane %v4112_v37, 3  ;;  %v4680_v42 = vadd.f32 %v13057_v58, %v12988_v36  ;;  %v4345_v37 = vrot.slane %v4100_v11, 4 }
 0x5f6   : > { %v4146_v13 = vrot.slane %v4113_v60, 1  ;;  %v13198_v0 = vmul.f32 0.023647603, %v4088_v26  ;;  %v3910_v50 = vadd.f32 %v13113_v48, %v12705_v43 }
 0x5f7   : > { %v13156_v54 = vpop.permute.xlu1 %3885  ;;  %v13158_v4 = vpop.permute.xlu0 %3999 }
 0x5f8   : > { %15190 = vst [vmem:[#allocation106_spill] sm:$0xff] %v13156_v54  ;;  %v3970_v48 = vadd.f32 %v13090_v10, %v3910_v50  ;;  %v15203_v10 = vsub.f32 %v12287_v24, %v12999_v61 }
 0x5fb   : > { %v13166_v15 = vpop.permute.xlu1 %3943  ;;  %v13168_v63 = vpop.permute.xlu0 %3877 }
 0x5fc   : > { %15191 = vst [vmem:[#allocation66_spill] sm:$0xff] %v13166_v15  ;;  %v4227_v15 = vrot.slane %v4194_v45, 2 }
 0x5fe   : > { %v4228_v30 = vsel %vm1538_vm8, %v4225_v44, %v4227_v15 }
 0x5ff   : > { %v13172_v22 = vpop.permute.xlu1 %4061  ;;  %v13174_v33 = vpop.permute.xlu0 %4057 }
 0x600   : > { %15192 = vst [vmem:[#allocation105_spill] sm:$0xff] %v13172_v22  ;;  %v4147_v22 = vsel %vm1384_vm7, %v4144_v18, %v4146_v13  ;;  %v4322_v18 = vmul.f32 0.011170336, %v4086_v57  ;;  %v15196_v13 = vrot.slane %v12901_v46, 2  ;;  %v4089_v57 = vadd.f32 %v13096_v28, %v4029_v6 }
 0x601   : > { %v4181_v54 = vadd.f32 %v4147_v22, %v4100_v11  ;;  %v15197_v46 = vrot.slane %v12899_v41, 3 }
 0x602   : > { %v4226_v62 = vsel %vm1538_vm8, %v15196_v13, %v4225_v44  ;;  %v4752_v44 = vadd.f32 %v13068_v21, %v4680_v42  ;;  %v13220_v13 = vmul.f32 0.030364122, %v4088_v26  ;;  %v13227_v6 = vmul.f32 0.023647603, %v4089_v57 }
 0x603   : > { %v13178_v7 = vpop.permute.xlu1 %4003  ;;  %v13180_v1 = vpop.permute.xlu0 %3941  ;;  %v4262_v22 = vadd.f32 %v4228_v30, %v4181_v54  ;;  %v4149_v54 = vrot.slane %v13198_v0, 1 }
 0x604   : > { %15193 = vst [vmem:[#allocation43_spill] sm:$0xff] %v13178_v7  ;;  %15194 = vst [vmem:[#allocation108_spill] sm:$0xff] %v13180_v1  ;;  %v4180_v7 = vadd.f32 %v4145_v55, %v12926_v31  ;;  %v4278_v1 = vrot.slane %v4113_v60, 3  ;;  %v4347_v60 = vrot.slane %v4322_v18, 4  ;;  %v4277_v55 = vsel %vm15198_vm5, %v15197_v46, %v4276_v40 }
 0x605   : > { %v4150_v41 = vsel %vm1384_vm7, %v4148_v9, %v4149_v54  ;;  %v4230_v30 = vrot.slane %v13220_v13, 2  ;;  %v15204_v13 = vmov 0.0  }
 0x606   : > { %v4261_v32 = vadd.f32 %v4226_v62, %v4180_v7  ;;  %v4279_v15 = vsel %vm15199_vm10, %v4276_v40, %v4278_v1  ;;  %v4195_v7 = vmul.f32 0.030364122, %v4087_v35  ;;  %v4101_v1 = vmul.f32 0.011170336, %v4087_v35 }
 0x607   : > { %v13192_v19 = vpop.permute.xlu1 %4005  ;;  %v13194_v5 = vpop.permute.xlu0 %3883  ;;  %v4313_v58 = vadd.f32 %v4279_v15, %v4262_v22  ;;  %v15200_v40 = vrot.slane %v12926_v31, 4  ;;  %v4348_v43 = vsel %vm15202_vm9, %v4345_v37, %v4347_v60  ;;  %v4800_v62 = vadd.f32 %v13055_v2, %v4752_v44  ;;  %vm15235_vm9 = vmmov %vm15199_vm10 }
 0x608   : > { %v4312_v36 = vadd.f32 %v4277_v55, %v4261_v32  ;;  %v4229_v18 = vrot.slane %v4195_v7, 2  ;;  %v4182_v32 = vadd.f32 %v4150_v41, %v4101_v1  ;;  %v3911_v35 = vadd.f32 %v13079_v25, %v12690_v51 }
 0x609   : > { %v4346_v21 = vsel %vm15201_vm4, %v15200_v40, %v4345_v37  ;;  %v4382_v42 = vadd.f32 %v4348_v43, %v4313_v58  ;;  %v4151_v31 = vrot.slane %v13227_v6, 1  ;;  %v4030_v55 = vadd.f32 %v13138_v34, %v3970_v48 }
 0x60a   : > { %v4381_v22 = vadd.f32 %v4346_v21, %v4312_v36  ;;  %v4883_v37 = vand.u32 2147483647, %v15203_v10  ;;  %v13243_v2 = vmul.f32 0.011170336, %v4088_v26  ;;  %v4280_v60 = vrot.slane %v13196_v14, 3 }
 0x60b   : > { %v13204_v45 = vpop.permute.xlu1 %4063  ;;  %v13206_v47 = vpop.permute.xlu0 %4001  ;;  %v13246_v7 = vmul.f32 0.030364122, %v4089_v57  ;;  %v3971_v44 = vadd.f32 %v13126_v39, %v3911_v35  ;;  %v4231_v51 = vsel %vm1538_vm8, %v4229_v18, %v4230_v30  ;;  %v4610_v34 = vadd.f32 %v12959_v56, %v4382_v42 }
 0x60c   : > { %v4609_v25 = vadd.f32 %v12916_v27, %v4381_v22  ;;  %v4263_v61 = vadd.f32 %v4231_v51, %v4182_v32  ;;  %v4281_v39 = vrot.slane %v13198_v0, 3  ;;  %v4152_v27 = vsel %vm1384_vm7, %v4149_v54, %v4151_v31 }
 0x60d   : > { %v4031_v14 = vadd.f32 %v13142_v52, %v3971_v44  ;;  %v4350_v56 = vrot.slane %v13243_v2, 4  ;;  %v4349_v36 = vrot.slane %v4101_v1, 4  ;;  %v4896_v41 = vsel %vm4895_vm0, %v4883_v37, 0.0 }
 0x60e   : > { %v4232_v53 = vrot.slane %v13246_v7, 2  ;;  %v13273_v0 = vmul.f32 0.011170336, %v4089_v57  ;;  %v4183_v1 = vadd.f32 %v4152_v27, %v13243_v2  ;;  %v15212_v27 = vld [vmem:[#allocation51_spill] sm:$0xff] }
 0x60f   : > { %v13222_v28 = vpop.permute.xlu1 %4065  ;;  %v13224_v11 = vpop.permute.xlu0 %3945  ;;  %v13283_v48 = vadd.f32 %v13111_v59, %v4031_v14 }
 0x610   : > { %v4233_v42 = vsel %vm1538_vm8, %v4230_v30, %v4232_v53  ;;  %v4352_v59 = vrot.slane %v13273_v0, 4 }
 0x611   : > { %v13297_v2 = vmul.f32 0.023647603, %v13283_v48 }
 0x613   : > { %v4826_v9 = vpop.permute.xlu1 %4825  ;;  %v4722_v46 = vpop.permute.xlu0 %4721 }
 0x614   : > { %v4860_v15 = vadd.f32 %v4826_v9, %v4800_v62  ;;  %v4283_v62 = vrot.slane %v13227_v6, 3  ;;  %v15208_v9 = vld [vmem:[#allocation52_spill] sm:$0xff] }
 0x616   : > { %v4872_v50 = vsub.f32 %v12284_v12, %v4860_v15  ;;  %8495 = vmatmul.mubr.msk.f32.vlgmr.msra.gmra.mrb[12].mxu1 %vm4895_vm0, %v4860_v15  ;;  %v4090_v12 = vadd.f32 %v13102_v29, %v4030_v55  ;;  %v3912_v29 = vadd.f32 %v13168_v63, %v12743_v38  ;;  %v4682_v63 = vadd.f32 %v13092_v20, %v4610_v34 }
 0x617   : > { %v4768_v24 = vpop.permute.xlu1 %4767  ;;  %v13254_v26 = vpop.permute.xlu0 %4651  ;;  %8734 = vmatpush3.bf16.msk.msra.mxu1 %vm10188_vm11, %v15096_v17  ;;  %v4681_v17 = vadd.f32 %v13081_v3, %v4609_v25  ;;  %vm15205_vm11 = vmmov %vm15160_vm1  ;;  %v4264_v15 = vadd.f32 %v4233_v42, %v4183_v1  ;;  %v4284_v34 = vsel %vm15210_vm12, %v4281_v39, %v4283_v62 }
 0x618   : > { %8579 = vmatprep.subr.mxu1 %v15204_v13  ;;  %v4884_v58 = vand.u32 2147483647, %v4872_v50  ;;  %v4282_v52 = vsel %vm15205_vm11, %v4280_v60, %v4281_v39  ;;  %v13280_v3 = vmul.f32 0.023647603, %v4090_v12  ;;  %vm15206_vm1 = vmmov %vm15201_vm4  ;;  %v3972_v32 = vadd.f32 %v13136_v23, %v3912_v29  ;;  %v15209_v50 = vld [vmem:[#allocation104_spill] sm:$0xff] }
 0x619   : > { %v4314_v40 = vadd.f32 %v4282_v52, %v4263_v61  ;;  %v4753_v43 = vadd.f32 %v13098_v49, %v4681_v17  ;;  %v4351_v57 = vsel %vm15206_vm1, %v4349_v36, %v4350_v56  ;;  %v15207_v49 = vld [vmem:[#allocation102_spill] sm:$0xff]  ;;  %v4754_v23 = vadd.f32 %v4722_v46, %v4682_v63  ;;  %vm15213_vm2 = vmmov %vm15206_vm1 }
 0x61a   : > { %v4897_v54 = vsel %vm4895_vm0, %v4884_v58, 0.0  ;;  %v3913_v35 = vadd.f32 %v15208_v9, %v15207_v49  ;;  %v4153_v37 = vrot.slane %v13280_v3, 1  ;;  %v13299_v44 = vmul.f32 0.030364122, %v4090_v12  ;;  %vm15225_vm6 = vmmov %vm15206_vm1 }
 0x61b   : > { %v4770_v21 = vpop.permute.xlu1 %4769  ;;  %v13277_v18 = vpop.permute.xlu0 %4653  ;;  %v4898_v38 = vadd.f32 %v4897_v54, %v4896_v41  ;;  %v4801_v22 = vadd.f32 %v4768_v24, %v4753_v43  ;;  %v4383_v55 = vadd.f32 %v4351_v57, %v4314_v40  ;;  %v4032_v51 = vadd.f32 %v15209_v50, %v3972_v32  ;;  %v15211_v24 = vld [vmem:[#allocation87_spill] sm:$0xff]  ;;  %v15215_v57 = vld [vmem:[#allocation58_spill] sm:$0xff]  ;;  %vm15229_vm5 = vmmov %vm15206_vm1 }
 0x61c   : > { %v3973_v30 = vadd.f32 %v13152_v16, %v3913_v35  ;;  %v4802_v25 = vadd.f32 %v4770_v21, %v4754_v23  ;;  %v4315_v36 = vadd.f32 %v4284_v34, %v4264_v15  ;;  %v4353_v16 = vsel %vm15213_vm2, %v4350_v56, %v4352_v59  ;;  %v15214_v21 = vld [vmem:[#allocation89_spill] sm:$0xff]  ;;  %v15220_v50 = vld [vmem:[#allocation106_spill] sm:$0xff]  ;;  %vm15233_vm4 = vmmov %vm15206_vm1 }
 0x61d   : > { %v4611_v46 = vadd.f32 %v15212_v27, %v4383_v55  ;;  %v4155_v17 = vrot.slane %v13297_v2, 1  ;;  %v4154_v39 = vsel %vm1384_vm7, %v4151_v31, %v4153_v37  ;;  %v13317_v54 = vmul.f32 0.011170336, %v4090_v12  ;;  %v15216_v31 = vld [vmem:[#allocation48_spill] sm:$0xff]  ;;  %v15221_v27 = vld [vmem:[#allocation66_spill] sm:$0xff]  ;;  %vm15237_vm11 = vmmov %vm15206_vm1 }
 0x61e   : > { %v4033_v14 = vadd.f32 %v13158_v4, %v3973_v30  ;;  %v4234_v4 = vrot.slane %v13299_v44, 2  ;;  %v4199_v40 = vmul.f32 0.030364122, %v13283_v48  ;;  %v3914_v1 = vadd.f32 %v13150_v8, %v15214_v21  ;;  %v15219_v30 = vld [vmem:[#allocation96_spill] sm:$0xff]  ;;  %vm15239_vm1 = vmmov %vm15235_vm9 }
 0x61f   : > { %v4828_v10 = vpop.permute.xlu1 %4827  ;;  %v4724_v20 = vpop.permute.xlu0 %4723  ;;  %v4285_v56 = vrot.slane %v13280_v3, 3  ;;  %v4092_v43 = vadd.f32 %v13174_v33, %v4032_v51  ;;  %v4184_v35 = vadd.f32 %v4154_v39, %v13273_v0  ;;  %v15218_v3 = vld [vmem:[#allocation19_spill] sm:$0xff]  ;;  %v4384_v55 = vadd.f32 %v4353_v16, %v4315_v36  ;;  %v15222_v16 = vld [vmem:[#allocation14_spill] sm:$0xff]  ;;  %vm15240_vm12 = vmmov %vm15239_vm1 }
 0x620   : > { %v4861_v60 = vadd.f32 %v4828_v10, %v4801_v22  ;;  %v13329_v12 = vadd.f32 %v15216_v31, %v4033_v14  ;;  %v15217_v22 = vld [vmem:[#allocation108_spill] sm:$0xff]  ;;  %v3915_v33 = vadd.f32 %v13194_v5, %v15218_v3  ;;  %v4156_v10 = vsel %vm1384_vm7, %v4153_v37, %v4155_v17 }
 0x621   : > { %v3974_v42 = vadd.f32 %v15217_v22, %v3914_v1  ;;  %v4354_v23 = vrot.slane %v13317_v54, 4  ;;  %v3916_v51 = vadd.f32 %v15220_v50, %v15219_v30  ;;  %v4683_v5 = vadd.f32 %v13254_v26, %v4611_v46  ;;  %v15223_v46 = vld [vmem:[#allocation105_spill] sm:$0xff] }
 0x622   : > { %v4873_v61 = vsub.f32 %v15211_v24, %v4861_v60  ;;  %8497 = vmatprep.mubr.msk.f32.mxu1 %vm4895_vm0, %v4861_v60  ;;  %v4236_v60 = vrot.slane %v4199_v40, 2  ;;  %v13350_v37 = vmul.f32 0.023647603, %v13329_v12  ;;  %v3975_v36 = vadd.f32 %v15221_v27, %v3915_v33 }
 0x623   : > { %v4830_v58 = vpop.permute.xlu1 %4829  ;;  %v4726_v41 = vpop.permute.xlu0 %4725  ;;  %v4034_v44 = vadd.f32 %v13206_v47, %v3974_v42  ;;  %v4185_v47 = vadd.f32 %v4156_v10, %v13317_v54  ;;  %v4755_v17 = vadd.f32 %v4724_v20, %v4683_v5  ;;  %v4287_v26 = vrot.slane %v13297_v2, 3 }
 0x624   : > { %v4885_v29 = vand.u32 2147483647, %v4873_v61  ;;  %v4862_v52 = vadd.f32 %v4830_v58, %v4802_v25  ;;  %v13345_v25 = vmul.f32 0.023647603, %v4092_v43  ;;  %v4612_v58 = vadd.f32 %v15222_v16, %v4384_v55 }
 0x625   : > { %v4286_v39 = vsel %vm15224_vm13, %v4283_v62, %v4285_v56  ;;  %v4237_v21 = vsel %vm1538_vm8, %v4234_v4, %v4236_v60  ;;  %v4158_v20 = vrot.slane %v13350_v37, 1  ;;  %v4355_v2 = vsel %vm15225_vm6, %v4352_v59, %v4354_v23  ;;  %vm15242_vm13 = vmmov %vm15213_vm2 }
 0x626   : > { %v4899_v63 = vsel %vm4895_vm0, %v4885_v29, 0.0  ;;  %v4874_v32 = vsub.f32 %v15215_v57, %v4862_v52  ;;  %8498 = vmatmul.mubr.msk.f32.gmra.mrb[14].mxu1 %vm4895_vm0, %v4862_v52  ;;  %v13360_v29 = vadd.f32 %v15223_v46, %v4034_v44  ;;  %v3976_v52 = vadd.f32 %v13224_v11, %v3916_v51 }
 0x627   : > { %v4900_v49 = vadd.f32 %v4899_v63, %v4898_v38  ;;  %v4772_v9 = vpop.permute.xlu1 %4771  ;;  %v13333_v8 = vpop.permute.xlu0 %4655  ;;  %v4235_v38 = vsel %vm1538_vm8, %v4232_v53, %v4234_v4  ;;  %v4323_v53 = vmul.f32 0.011170336, %v13283_v48  ;;  %v4157_v54 = vrot.slane %v13345_v25, 1 }
 0x628   : > { %v4886_v15 = vand.u32 2147483647, %v4874_v32  ;;  %v4265_v61 = vadd.f32 %v4235_v38, %v4184_v35  ;;  %v4684_v48 = vadd.f32 %v13277_v18, %v4612_v58  ;;  %v4803_v40 = vadd.f32 %v4772_v9, %v4755_v17  ;;  %v15226_v32 = vld [vmem:[#allocation43_spill] sm:$0xff]  ;;  %v15228_v35 = vld [vmem:[#allocation88_spill] sm:$0xff] }
 0x629   : > { %v4266_v63 = vadd.f32 %v4237_v21, %v4185_v47  ;;  %v4200_v6 = vmul.f32 0.030364122, %v4092_v43  ;;  %v4035_v62 = vadd.f32 %v15226_v32, %v3975_v36  ;;  %v4356_v42 = vrot.slane %v4323_v53, 4  ;;  %v15232_v21 = vld [vmem:[#allocation22_spill] sm:$0xff] }
 0x62a   : > { %v4901_v34 = vsel %vm4895_vm0, %v4886_v15, 0.0  ;;  %v4316_v1 = vadd.f32 %v4286_v39, %v4265_v61  ;;  %v4756_v31 = vadd.f32 %v4726_v41, %v4684_v48  ;;  %v13375_v18 = vmul.f32 0.023647603, %v13360_v29 }
 0x62b   : > { %v4902_v24 = vadd.f32 %v4901_v34, %v4900_v49  ;;  %v4774_v14 = vpop.permute.xlu1 %4773  ;;  %v13353_v7 = vpop.permute.xlu0 %4657  ;;  %v4036_v4 = vadd.f32 %v13192_v19, %v3976_v52  ;;  %v4288_v49 = vsel %vm15227_vm14, %v4285_v56, %v4287_v26  ;;  %v4201_v0 = vmul.f32 0.030364122, %v13329_v12  ;;  %v15230_v34 = vld [vmem:[#allocation57_spill] sm:$0xff] }
 0x62c   : > { %v4159_v59 = vsel %vm1384_vm7, %v4157_v54, %v4158_v20  ;;  %v4804_v9 = vadd.f32 %v4774_v14, %v4756_v31  ;;  %v4105_v33 = vmul.f32 0.011170336, %v4092_v43  ;;  %v4385_v41 = vadd.f32 %v4355_v2, %v4316_v1 }
 0x62d   : > { %v4317_v55 = vadd.f32 %v4288_v49, %v4266_v63  ;;  %v4238_v60 = vrot.slane %v4200_v6, 2  ;;  %v4095_v44 = vadd.f32 %v13204_v45, %v4035_v62  ;;  %v4160_v30 = vrot.slane %v13375_v18, 1  ;;  %v15231_v45 = vld [vmem:[#allocation15_spill] sm:$0xff] }
 0x62e   : > { %v4186_v56 = vadd.f32 %v4159_v59, %v4105_v33  ;;  %v13386_v50 = vadd.f32 %v13222_v28, %v4036_v4  ;;  %v4239_v51 = vrot.slane %v4201_v0, 2  ;;  %v4357_v5 = vsel %vm15229_vm5, %v4354_v23, %v4356_v42 }
 0x62f   : > { %v4832_v11 = vpop.permute.xlu1 %4831  ;;  %v4728_v57 = vpop.permute.xlu0 %4727  ;;  %v13393_v14 = vmul.f32 0.030364122, %v13360_v29  ;;  %v4613_v47 = vadd.f32 %v15231_v45, %v4385_v41  ;;  %v4386_v53 = vadd.f32 %v4357_v5, %v4317_v55  ;;  %v4289_v28 = vrot.slane %v13345_v25, 3 }
 0x630   : > { %v4863_v22 = vadd.f32 %v4832_v11, %v4803_v40  ;;  %v13399_v58 = vmul.f32 0.023647603, %v4095_v44  ;;  %v4240_v17 = vsel %vm1538_vm8, %v4238_v60, %v4239_v51  ;;  %v4106_v26 = vmul.f32 0.011170336, %v13329_v12 }
 0x631   : > { %v13404_v46 = vmul.f32 0.023647603, %v13386_v50  ;;  %v4267_v52 = vadd.f32 %v4240_v17, %v4186_v56  ;;  %v4161_v39 = vsel %vm1384_vm7, %v4158_v20, %v4160_v30  ;;  %v4685_v54 = vadd.f32 %v13333_v8, %v4613_v47  ;;  %v15236_v47 = vld [vmem:[#allocation97_spill] sm:$0xff] }
 0x632   : > { %v4875_v3 = vsub.f32 %v15228_v35, %v4863_v22  ;;  %8500 = vmatprep.mubr.msk.f32.mxu1 %vm4895_vm0, %v4863_v22  ;;  %v4358_v25 = vrot.slane %v4105_v33, 4  ;;  %v4241_v40 = vrot.slane %v13393_v14, 2  ;;  %v4614_v1 = vadd.f32 %v15232_v21, %v4386_v53 }
 0x633   : > { %v4834_v15 = vpop.permute.xlu1 %4833  ;;  %v4730_v10 = vpop.permute.xlu0 %4729  ;;  %v4162_v11 = vrot.slane %v13399_v58, 1  ;;  %v4757_v6 = vadd.f32 %v4728_v57, %v4685_v54  ;;  %v4187_v32 = vadd.f32 %v4161_v39, %v4106_v26  ;;  %v4164_v8 = vrot.slane %v13404_v46, 1 }
 0x634   : > { %v4887_v19 = vand.u32 2147483647, %v4875_v3  ;;  %v4864_v38 = vadd.f32 %v4834_v15, %v4804_v9  ;;  %v4203_v31 = vmul.f32 0.030364122, %v4095_v44  ;;  %v13418_v22 = vmul.f32 0.011170336, %v13360_v29 }
 0x635   : > { %v4686_v42 = vadd.f32 %v13353_v7, %v4614_v1  ;;  %v4292_v49 = vrot.slane %v13375_v18, 3  ;;  %v4204_v0 = vmul.f32 0.030364122, %v13386_v50  ;;  %v4242_v59 = vsel %vm1538_vm8, %v4239_v51, %v4241_v40 }
 0x636   : > { %v4903_v43 = vsel %vm4895_vm0, %v4887_v19, 0.0  ;;  %v4876_v61 = vsub.f32 %v15230_v34, %v4864_v38  ;;  %8501 = vmatmul.mubr.msk.f32.gmra.mrb[16].mxu1 %vm4895_vm0, %v4864_v38  ;;  %v4163_v3 = vsel %vm1384_vm7, %v4160_v30, %v4162_v11  ;;  %v4268_v41 = vadd.f32 %v4242_v59, %v4187_v32  ;;  %v15234_v38 = vld [vmem:[#allocation94_spill] sm:$0xff] }
 0x637   : > { %v4904_v27 = vadd.f32 %v4903_v43, %v4902_v24  ;;  %v4776_v36 = vpop.permute.xlu1 %4775  ;;  %v13396_v16 = vpop.permute.xlu0 %4659  ;;  %v4290_v24 = vrot.slane %v13350_v37, 3  ;;  %v4359_v37 = vrot.slane %v4106_v26, 4  ;;  %v4758_v33 = vadd.f32 %v4730_v10, %v4686_v42 }
 0x638   : > { %v4888_v23 = vand.u32 2147483647, %v4876_v61  ;;  %v4805_v4 = vadd.f32 %v4776_v36, %v4757_v6  ;;  %v4108_v29 = vmul.f32 0.011170336, %v4095_v44  ;;  %v4165_v7 = vsel %vm1384_vm7, %v4162_v11, %v4164_v8 }
 0x639   : > { %v4291_v20 = vsel %vm15199_vm10, %v4289_v28, %v4290_v24  ;;  %v4360_v57 = vsel %vm15233_vm4, %v4358_v25, %v4359_v37  ;;  %v4243_v60 = vrot.slane %v4203_v31, 2  ;;  %v4361_v18 = vrot.slane %v13418_v22, 4  ;;  %v15238_v28 = vld [vmem:[#allocation91_spill] sm:$0xff] }
 0x63a   : > { %v4905_v48 = vsel %vm4895_vm0, %v4888_v23, 0.0  ;;  %v4318_v62 = vadd.f32 %v4291_v20, %v4267_v52  ;;  %v4188_v51 = vadd.f32 %v4163_v3, %v13418_v22  ;;  %v4245_v5 = vrot.slane %v4204_v0, 2 }
 0x63b   : > { %v4906_v2 = vadd.f32 %v4905_v48, %v4904_v27  ;;  %v4778_v63 = vpop.permute.xlu1 %4777  ;;  %v13412_v12 = vpop.permute.xlu0 %4661  ;;  %v4293_v30 = vsel %vm15235_vm9, %v4290_v24, %v4292_v49  ;;  %v4189_v14 = vadd.f32 %v4165_v7, %v4108_v29  ;;  %v4294_v45 = vrot.slane %v13399_v58, 3  ;;  %v15244_v7 = vld [vmem:[#allocation30_spill] sm:$0xff] }
 0x63c   : > { %v4387_v15 = vadd.f32 %v4360_v57, %v4318_v62  ;;  %v4806_v19 = vadd.f32 %v4778_v63, %v4758_v33  ;;  %v4319_v34 = vadd.f32 %v4293_v30, %v4268_v41  ;;  %v4362_v27 = vsel %vm15237_vm11, %v4359_v37, %v4361_v18  ;;  %v15241_v37 = vld [vmem:[#allocation40_spill] sm:$0xff]  ;;  %v15246_v30 = vld [vmem:[#allocation39_spill] sm:$0xff] }
 0x63d   : > { %v4244_v17 = vsel %vm1538_vm8, %v4241_v40, %v4243_v60  ;;  %v4296_v26 = vrot.slane %v13404_v46, 3  ;;  %v4324_v52 = vmul.f32 0.011170336, %v13386_v50  ;;  %v4246_v58 = vsel %vm1538_vm8, %v4243_v60, %v4245_v5  ;;  %v15245_v60 = vld [vmem:[#allocation99_spill] sm:$0xff] }
 0x63e   : > { %v4615_v53 = vadd.f32 %v15236_v47, %v4387_v15  ;;  %v4388_v48 = vadd.f32 %v4362_v27, %v4319_v34  ;;  %v4269_v21 = vadd.f32 %v4244_v17, %v4188_v51  ;;  %v4270_v1 = vadd.f32 %v4246_v58, %v4189_v14 }
 0x63f   : > { %v4836_v9 = vpop.permute.xlu1 %4835  ;;  %v4732_v35 = vpop.permute.xlu0 %4731  ;;  %v4363_v63 = vrot.slane %v4108_v29, 4  ;;  %v4365_v20 = vrot.slane %v4324_v52, 4  ;;  %v4295_v46 = vsel %vm15239_vm1, %v4292_v49, %v4294_v45  ;;  %v4297_v50 = vsel %vm15240_vm12, %v4294_v45, %v4296_v26  ;;  %v15247_v52 = vld [vmem:[#allocation62_spill] sm:$0xff] }
 0x640   : > { %v4865_v55 = vadd.f32 %v4836_v9, %v4805_v4  ;;  %v4687_v11 = vadd.f32 %v13396_v16, %v4615_v53  ;;  %v4616_v8 = vadd.f32 %v15241_v37, %v4388_v48  ;;  %v4320_v31 = vadd.f32 %v4295_v46, %v4269_v21 }
 0x641   : > { %v4321_v22 = vadd.f32 %v4297_v50, %v4270_v1  ;;  %v4364_v16 = vsel %vm15213_vm2, %v4361_v18, %v4363_v63  ;;  %v4366_v0 = vsel %vm15242_vm13, %v4363_v63, %v4365_v20  ;;  %v15249_v50 = vld [vmem:[#allocation13_spill] sm:$0xff]  ;;  %vm15251_vm6 = vcmask 1041408  }
 0x642   : > { %v4877_v56 = vsub.f32 %v15234_v38, %v4865_v55  ;;  %8503 = vmatprep.mubr.msk.f32.mxu1 %vm4895_vm0, %v4865_v55  ;;  %v4759_v62 = vadd.f32 %v4732_v35, %v4687_v11  ;;  %v4688_v42 = vadd.f32 %v13412_v12, %v4616_v8  ;;  %v4389_v49 = vadd.f32 %v4364_v16, %v4320_v31  ;;  %v15243_v55 = vld [vmem:[#allocation100_spill] sm:$0xff]  ;;  %vm15253_vm5 = vmmov %vm15251_vm6 }
 0x643   : > { %v4838_v10 = vpop.permute.xlu1 %4837  ;;  %v4734_v43 = vpop.permute.xlu0 %4733  ;;  %v4390_v3 = vadd.f32 %v4366_v0, %v4321_v22  ;;  %vm15252_vm14 = vcmask 1042432   ;;  %vm15255_vm10 = vmmov %vm15253_vm5 }
 0x644   : > { %v4889_v44 = vand.u32 2147483647, %v4877_v56  ;;  %v4866_v61 = vadd.f32 %v4838_v10, %v4806_v19  ;;  %v4760_v9 = vadd.f32 %v4734_v43, %v4688_v42  ;;  %v4617_v12 = vadd.f32 %v15244_v7, %v4389_v49  ;;  %vm15256_vm4 = vmmov %vm15253_vm5 }
 0x645   : > { %v4618_v19 = vadd.f32 %v15245_v60, %v4390_v3  ;;  %vm15257_vm9 = vmmov %vm15252_vm14 }
 0x646   : > { %v4907_v36 = vsel %vm4895_vm0, %v4889_v44, 0.0  ;;  %v4878_v23 = vsub.f32 %v15238_v28, %v4866_v61  ;;  %8504 = vmatmul.mubr.msk.f32.gmra.mrb[18].mxu1 %vm4895_vm0, %v4866_v61  ;;  %vm15258_vm11 = vmmov %vm15256_vm4 }
 0x647   : > { %v4908_v39 = vadd.f32 %v4907_v36, %v4906_v2  ;;  %v4780_v24 = vpop.permute.xlu1 %4779  ;;  %v4664_v54 = vpop.permute.xlu0 %4663  ;;  %vm15260_vm12 = vmmov %vm15256_vm4 }
 0x648   : > { %v4890_v25 = vand.u32 2147483647, %v4878_v23  ;;  %v4807_v4 = vadd.f32 %v4780_v24, %v4759_v62  ;;  %v4689_v56 = vadd.f32 %v4664_v54, %v4617_v12  ;;  %v15248_v24 = vld [vmem:[#allocation101_spill] sm:$0xff]  ;;  %vm15261_vm2 = vmmov %vm15256_vm4 }
 0x649   : > { %vm15262_vm13 = vmmov %vm15257_vm9 }
 0x64a   : > { %v4909_v6 = vsel %vm4895_vm0, %v4890_v25, 0.0 }
 0x64b   : > { %v4910_v40 = vadd.f32 %v4909_v6, %v4908_v39  ;;  %v4782_v32 = vpop.permute.xlu1 %4781  ;;  %v4666_v2 = vpop.permute.xlu0 %4665 }
 0x64c   : > { %v4808_v41 = vadd.f32 %v4782_v32, %v4760_v9  ;;  %v4690_v51 = vadd.f32 %v4666_v2, %v4618_v19  ;;  %v15250_v2 = vld [vmem:[#allocation70_spill] sm:$0xff] }
 0x64f   : > { %v4840_v57 = vpop.permute.xlu1 %4839  ;;  %v4736_v59 = vpop.permute.xlu0 %4735 }
 0x650   : > { %v4867_v33 = vadd.f32 %v4840_v57, %v4807_v4  ;;  %v4761_v61 = vadd.f32 %v4736_v59, %v4689_v56 }
 0x652   : > { %v4879_v29 = vsub.f32 %v15243_v55, %v4867_v33  ;;  %8506 = vmatprep.mubr.msk.f32.mxu1 %vm4895_vm0, %v4867_v33 }
 0x653   : > { %v4842_v35 = vpop.permute.xlu1 %4841  ;;  %v4738_v15 = vpop.permute.xlu0 %4737 }
 0x654   : > { %v4891_v18 = vand.u32 2147483647, %v4879_v29  ;;  %v4868_v38 = vadd.f32 %v4842_v35, %v4808_v41  ;;  %v4762_v45 = vadd.f32 %v4738_v15, %v4690_v51 }
 0x656   : > { %v4911_v5 = vsel %vm4895_vm0, %v4891_v18, 0.0  ;;  %v4880_v10 = vsub.f32 %v15246_v30, %v4868_v38  ;;  %8507 = vmatmul.mubr.msk.f32.gmra.mrb[20].mxu1 %vm4895_vm0, %v4868_v38 }
 0x657   : > { %v4912_v43 = vadd.f32 %v4911_v5, %v4910_v40  ;;  %v4786_v34 = vpop.permute.xlu1 %4785  ;;  %v4784_v44 = vpop.permute.xlu0 %4783 }
 0x658   : > { %v4892_v14 = vand.u32 2147483647, %v4880_v10  ;;  %v4810_v53 = vadd.f32 %v4786_v34, %v4762_v45  ;;  %v4809_v27 = vadd.f32 %v4784_v44, %v4761_v61 }
 0x65a   : > { %v4913_v47 = vsel %vm4895_vm0, %v4892_v14, 0.0 }
 0x65b   : > { %v4914_v36 = vadd.f32 %v4913_v47, %v4912_v43  ;;  %v4846_v28 = vpop.permute.xlu1 %4845  ;;  %v4844_v23 = vpop.permute.xlu0 %4843 }
 0x65c   : > { %v4870_v17 = vadd.f32 %v4846_v28, %v4810_v53  ;;  %v4869_v26 = vadd.f32 %v4844_v23, %v4809_v27 }
 0x65e   : > { %v4882_v39 = vsub.f32 %v15247_v52, %v4870_v17  ;;  %v4881_v54 = vsub.f32 %v15248_v24, %v4869_v26  ;;  %8509 = vmatprep.mubr.msk.f32.mxu1 %vm4895_vm0, %v4869_v26 }
 0x65f   : > { %8510 = vmatmul.mubr.msk.f32.gmra.mrb[22].mxu1 %vm4895_vm0, %v4870_v17 }
 0x660   : > { %v4894_v58 = vand.u32 2147483647, %v4882_v39  ;;  %v4893_v48 = vand.u32 2147483647, %v4881_v54 }
 0x662   : > { %v4915_v25 = vsel %vm4895_vm0, %v4893_v48, 0.0  ;;  %v4917_v1 = vsel %vm4895_vm0, %v4894_v58, 0.0 }
 0x663   : > { %v4916_v21 = vadd.f32 %v4915_v25, %v4914_v36 }
 0x665   : > { %v13464_v63 = vadd.f32 %v4917_v1, %v4916_v21 }
 0x6e9   : > { %v8496_v11 = vpop.f32.mrb[12].mxu1 }
 0x6ea   : > { %v5032_v6 = vpop.f32.mrb[13].mxu1 }
 0x6eb   : > { %v8707_v20 = vpack.c.bf16 %v8496_v11, %v5032_v6 }
 0x6ed   : > { %8708 = vmatprep.subr.bf16.mxu0 %v8707_v20 }
 0x6ee   : > { %8710 = vmatpush3.bf16.msra.mxu0 %v8707_v20 }
 0x6f9   : > { %v8499_v40 = vpop.f32.mrb[14].mxu1 }
 0x6fa   : > { %v5042_v46 = vpop.f32.mrb[15].mxu1 }
 0x6fb   : > { %v8711_v32 = vpack.c.bf16 %v8499_v40, %v5042_v46 }
 0x6fd   : > { %8712 = vmatprep.subr.bf16.mxu0 %v8711_v32 }
 0x6fe   : > { %8714 = vmatpush3.bf16.msra.mxu0 %v8711_v32 }
 0x701   : > { %8521 = vmatmul.mubr.msk.f32.vlgmr.msra.gmra.mrb[24].mxu0 %vm4895_vm0, %v15249_v50 }
 0x702   : > { %8531 = vmatprep.mubr.msk.f32.mxu0 %vm4895_vm0, %v15250_v2 }
 0x709   : > { %v8502_v37 = vpop.f32.mrb[16].mxu1 }
 0x70a   : > { %v5052_v8 = vpop.f32.mrb[17].mxu1 }
 0x70b   : > { %v8715_v62 = vpack.c.bf16 %v8502_v37, %v5052_v8 }
 0x70d   : > { %8716 = vmatprep.subr.bf16.mxu0 %v8715_v62 }
 0x70e   : > { %8718 = vmatpush3.bf16.msra.mxu0 %v8715_v62 }
 0x719   : > { %v8505_v31 = vpop.f32.mrb[18].mxu1 }
 0x71a   : > { %v5062_v22 = vpop.f32.mrb[19].mxu1 }
 0x71b   : > { %v8719_v42 = vpack.c.bf16 %v8505_v31, %v5062_v22 }
 0x71d   : > { %8720 = vmatprep.subr.bf16.mxu0 %v8719_v42 }
 0x71e   : > { %8722 = vmatpush3.bf16.msra.mxu0 %v8719_v42 }
 0x721   : > { %8532 = vmatmul.mubr.msk.f32.vlgmr.msra.gmra.mrb[26].mxu0 %vm4895_vm0, %v15249_v50 }
 0x722   : > { %8542 = vmatprep.mubr.msk.f32.mxu0 %vm4895_vm0, %v15250_v2 }
 0x729   : > { %v8508_v4 = vpop.f32.mrb[20].mxu1 }
 0x72a   : > { %v5072_v16 = vpop.f32.mrb[21].mxu1 }
 0x72b   : > { %v8723_v0 = vpack.c.bf16 %v8508_v4, %v5072_v16 }
 0x72d   : > { %8724 = vmatprep.subr.bf16.mxu0 %v8723_v0 }
 0x72e   : > { %8726 = vmatpush3.bf16.msra.mxu0 %v8723_v0 }
 0x732   : > { %v8511_v57 = vpop.f32.mrb[22].mxu1 }
 0x733   : > { %v5082_v59 = vpop.f32.mrb[23].mxu1 }
 0x734   : > { %v8727_v9 = vpack.c.bf16 %v8511_v57, %v5082_v59 }
 0x736   : > { %8728 = vmatprep.subr.bf16.mxu0 %v8727_v9 }
 0x737   : > { %8730 = vmatpush3.bf16.msra.mxu0 %v8727_v9 }
 0x73a   : > { %8543 = vmatmul.mubr.msk.f32.vlgmr.msra.gmra.mrb[28].mxu0 %vm4895_vm0, %v15249_v50  ;;  %vm15254_vm0 = vcmask 1040384  }
 0x73b   : > { %vm15259_vm1 = vmmov %vm15254_vm0 }
 0x7d4   : > { %v13476_v49 = vpop.f32.mrb[24].mxu0 }
 0x7d5   : > { %v5333_v3 = vrot.slane %v13476_v49, 6  ;;  %v5350_v33 = vrot.slane %v13476_v49, 5  ;;  %v5356_v41 = vrot.slane %v13476_v49, 4  ;;  %v13481_v55 = vpop.f32.mrb[25].mxu0 }
 0x7d6   : > { %v5332_v29 = vrot.slane %v13481_v55, 6  ;;  %v5323_v12 = vrot.slane %v13481_v55, 7 }
 0x7d7   : > { %v5368_v35 = vsel %vm15251_vm6, %v5333_v3, %v5350_v33  ;;  %vm15263_vm6 = vmmov %vm15261_vm2 }
 0x7d8   : > { %v13486_v15 = vsel %vm15252_vm14, %v5368_v35, %v5356_v41  ;;  %v13489_v7 = vsel %vm15253_vm5, %v5332_v29, %v5333_v3  ;;  %v5362_v60 = vsel %vm15254_vm0, %v13481_v55, %v5323_v12  ;;  %vm15264_vm14 = vmmov %vm15254_vm0  ;;  %vm5506_vm0 = vcmask 146432  }
 0x7d9   : > { %5384 = vrot.lane.b32.xlu0 %v13486_v15, %s8922_s18  ;;  %5382 = vrot.lane.b32.xlu1 %v13489_v7, %s8922_s18  ;;  %v13511_v19 = vsel %vm15255_vm10, %v5362_v60, %v5332_v29  ;;  %vm15265_vm5 = vmmov %vm15261_vm2  ;;  %vm5516_vm10 = vcmask 154624  }
 0x7dd   : > { %5409 = vrot.lane.b32.xlu0 %v13489_v7, %s8923_s16  ;;  %5411 = vrot.lane.b32.xlu1 %v13486_v15, %s8923_s16 }
 0x7e1   : > { %5438 = vrot.lane.b32.xlu0 %v13486_v15, %s8924_s23  ;;  %5436 = vrot.lane.b32.xlu1 %v13489_v7, %s8924_s23 }
 0x7e5   : > { %5463 = vrot.lane.b32.xlu0 %v13489_v7, %s8925_s29  ;;  %5465 = vrot.lane.b32.xlu1 %v13486_v15, %s8925_s29 }
 0x7e9   : > { %5380 = vrot.lane.b32.xlu0 %v13511_v19, %s8922_s18  ;;  %5407 = vrot.lane.b32.xlu1 %v13511_v19, %s8923_s16 }
 0x7ed   : > { %5434 = vrot.lane.b32.xlu0 %v13511_v19, %s8924_s23  ;;  %5461 = vrot.lane.b32.xlu1 %v13511_v19, %s8925_s29 }
 0x7f4   : > { %v13521_v18 = vpop.f32.mrb[26].mxu0 }
 0x7f5   : > { %v5336_v38 = vrot.slane %v13521_v18, 6  ;;  %v5351_v56 = vrot.slane %v13521_v18, 5  ;;  %v5357_v51 = vrot.slane %v13521_v18, 4  ;;  %v13526_v5 = vpop.f32.mrb[27].mxu0 }
 0x7f6   : > { %v5335_v30 = vrot.slane %v13526_v5, 6  ;;  %v5324_v44 = vrot.slane %v13526_v5, 7 }
 0x7f7   : > { %v5369_v10 = vsel %vm15256_vm4, %v5336_v38, %v5351_v56  ;;  %vm15266_vm4 = vcmask 15360  }
 0x7f8   : > { %v13531_v43 = vsel %vm15257_vm9, %v5369_v10, %v5357_v51  ;;  %v13534_v34 = vsel %vm15258_vm11, %v5335_v30, %v5336_v38  ;;  %v5363_v61 = vsel %vm15259_vm1, %v13526_v5, %v5324_v44  ;;  %vm15267_vm9 = vmmov %vm15266_vm4  ;;  %vm15269_vm1 = vcmask 1044480  }
 0x7f9   : > { %5417 = vrot.lane.b32.xlu1 %v13531_v43, %s8923_s16  ;;  %5388 = vrot.lane.b32.xlu0 %v13534_v34, %s8922_s18  ;;  %v13552_v14 = vsel %vm15260_vm12, %v5363_v61, %v5335_v30  ;;  %vm15268_vm11 = vmmov %vm15266_vm4  ;;  %vm15270_vm12 = vcmask 1043456  }
 0x7fd   : > { %5442 = vrot.lane.b32.xlu1 %v13534_v34, %s8924_s23  ;;  %5390 = vrot.lane.b32.xlu0 %v13531_v43, %s8922_s18 }
 0x801   : > { %5471 = vrot.lane.b32.xlu1 %v13531_v43, %s8925_s29  ;;  %5415 = vrot.lane.b32.xlu0 %v13534_v34, %s8923_s16 }
 0x805   : > { %5444 = vrot.lane.b32.xlu0 %v13531_v43, %s8924_s23  ;;  %5386 = vrot.lane.b32.xlu1 %v13552_v14, %s8922_s18 }
 0x809   : > { %5469 = vrot.lane.b32.xlu0 %v13534_v34, %s8925_s29  ;;  %5413 = vrot.lane.b32.xlu1 %v13552_v14, %s8923_s16 }
 0x80d   : > { %5440 = vrot.lane.b32.xlu0 %v13552_v14, %s8924_s23  ;;  %v13564_v45 = vpop.f32.mrb[28].mxu0  ;;  %5467 = vrot.lane.b32.xlu1 %v13552_v14, %s8925_s29 }
 0x80e   : > { %v5339_v47 = vrot.slane %v13564_v45, 6  ;;  %v5352_v53 = vrot.slane %v13564_v45, 5  ;;  %v5358_v27 = vrot.slane %v13564_v45, 4  ;;  %v13571_v36 = vpop.f32.mrb[29].mxu0 }
 0x80f   : > { %v5338_v28 = vrot.slane %v13571_v36, 6  ;;  %v5325_v52 = vrot.slane %v13571_v36, 7 }
 0x810   : > { %v5370_v23 = vsel %vm15261_vm2, %v5339_v47, %v5352_v53  ;;  %vm15271_vm2 = vmmov %vm15269_vm1 }
 0x811   : > { %v13576_v17 = vsel %vm15262_vm13, %v5370_v23, %v5358_v27  ;;  %v13579_v26 = vsel %vm15263_vm6, %v5338_v28, %v5339_v47  ;;  %v5364_v39 = vsel %vm15264_vm14, %v13571_v36, %v5325_v52  ;;  %vm15272_vm13 = vmmov %vm15270_vm12 }
 0x812   : > { %5423 = vrot.lane.b32.xlu1 %v13576_v17, %s8923_s16  ;;  %5394 = vrot.lane.b32.xlu0 %v13579_v26, %s8922_s18  ;;  %v13597_v24 = vsel %vm15265_vm5, %v5364_v39, %v5338_v28  ;;  %vm15273_vm6 = vmmov %vm15266_vm4 }
 0x813   : > { %vm15274_vm14 = vmmov %vm15266_vm4 }
 0x814   : > { %vm15275_vm5 = vmmov %vm15266_vm4 }
 0x816   : > { %5448 = vrot.lane.b32.xlu1 %v13579_v26, %s8924_s23  ;;  %5396 = vrot.lane.b32.xlu0 %v13576_v17, %s8922_s18 }
 0x81a   : > { %5477 = vrot.lane.b32.xlu1 %v13576_v17, %s8925_s29  ;;  %5421 = vrot.lane.b32.xlu0 %v13579_v26, %s8923_s16 }
 0x81e   : > { %5450 = vrot.lane.b32.xlu0 %v13576_v17, %s8924_s23  ;;  %5392 = vrot.lane.b32.xlu1 %v13597_v24, %s8922_s18 }
 0x822   : > { %5475 = vrot.lane.b32.xlu0 %v13579_v26, %s8925_s29  ;;  %5419 = vrot.lane.b32.xlu1 %v13597_v24, %s8923_s16 }
 0x826   : > { %5446 = vrot.lane.b32.xlu0 %v13597_v24, %s8924_s23  ;;  %5473 = vrot.lane.b32.xlu1 %v13597_v24, %s8925_s29 }
 0x84b   : > { %v5383_v54 = vpop.permute.xlu1 %5382  ;;  %v5385_v58 = vpop.permute.xlu0 %5384 }
 0x84c   : > { %v5489_v11 = vsel %vm735_vm3, %v13489_v7, %v5383_v54  ;;  %v5490_v6 = vsel %vm735_vm3, %v13486_v15, %v5385_v58 }
 0x84f   : > { %v5412_v48 = vpop.permute.xlu1 %5411  ;;  %v5410_v25 = vpop.permute.xlu0 %5409 }
 0x850   : > { %v5499_v20 = vsel %vm15266_vm4, %v5490_v6, %v5412_v48  ;;  %v5498_v40 = vsel %vm15267_vm9, %v5489_v11, %v5410_v25  ;;  %vm15276_vm4 = vmmov %vm15269_vm1 }
 0x851   : > { %vm15277_vm9 = vmmov %vm15270_vm12 }
 0x853   : > { %v5437_v21 = vpop.permute.xlu1 %5436  ;;  %v5439_v1 = vpop.permute.xlu0 %5438 }
 0x854   : > { %v5508_v46 = vsel %vm5506_vm0, %v5498_v40, %v5437_v21  ;;  %v5509_v32 = vsel %vm5506_vm0, %v5499_v20, %v5439_v1 }
 0x857   : > { %v5466_v50 = vpop.permute.xlu1 %5465  ;;  %v5464_v37 = vpop.permute.xlu0 %5463 }
 0x858   : > { %v13620_v8 = vsel %vm5516_vm10, %v5509_v32, %v5466_v50  ;;  %v13623_v62 = vsel %vm5516_vm10, %v5508_v46, %v5464_v37 }
 0x859   : > { %5539 = vrot.lane.b32.xlu0 %v13620_v8, %s8926_s30  ;;  %5537 = vrot.lane.b32.xlu1 %v13623_v62, %s8926_s30  ;;  %v5844_v42 = vrot.slane %v13620_v8, 1  ;;  %v5842_v16 = vrot.slane %v13623_v62, 1  ;;  %v5869_v35 = vrot.slane %v13623_v62, 2  ;;  %v5871_v15 = vrot.slane %v13620_v8, 2 }
 0x85a   : > { %v5896_v38 = vrot.slane %v13623_v62, 3  ;;  %v5898_v10 = vrot.slane %v13620_v8, 3  ;;  %v5923_v53 = vrot.slane %v13623_v62, 4  ;;  %v5925_v52 = vrot.slane %v13620_v8, 4 }
 0x85b   : > { %v5381_v31 = vpop.permute.xlu0 %5380  ;;  %v5408_v22 = vpop.permute.xlu1 %5407  ;;  %v5845_v3 = vsel %vm1384_vm7, %v5842_v16, %v5844_v42  ;;  %v5872_v30 = vsel %vm1538_vm8, %v5869_v35, %v5871_v15 }
 0x85c   : > { %v5488_v4 = vsel %vm735_vm3, %v13511_v19, %v5381_v31  ;;  %v5863_v7 = vadd.f32 %v5845_v3, %v13623_v62  ;;  %v5899_v23 = vsel %vm15271_vm2, %v5896_v38, %v5898_v10  ;;  %v5926_v21 = vsel %vm15272_vm13, %v5923_v53, %v5925_v52  ;;  %vm15281_vm2 = vmmov %vm15275_vm5 }
 0x85d   : > { %5573 = vrot.lane.b32.xlu0 %v13623_v62, %s8927_s4  ;;  %5575 = vrot.lane.b32.xlu1 %v13620_v8, %s8927_s4  ;;  %v5497_v0 = vsel %vm15268_vm11, %v5488_v4, %v5408_v22  ;;  %vm15278_vm11 = vmmov %vm15269_vm1 }
 0x85e   : > { %v5890_v61 = vadd.f32 %v5872_v30, %v5863_v7  ;;  %vm15282_vm13 = vmmov %vm15281_vm2 }
 0x85f   : > { %v5435_v57 = vpop.permute.xlu0 %5434  ;;  %v5462_v59 = vpop.permute.xlu1 %5461 }
 0x860   : > { %v5507_v9 = vsel %vm5506_vm0, %v5497_v0, %v5435_v57  ;;  %v5917_v48 = vadd.f32 %v5899_v23, %v5890_v61 }
 0x861   : > { %v13641_v33 = vsel %vm5516_vm10, %v5507_v9, %v5462_v59  ;;  %5609 = vrot.lane.b32.xlu1 %v13623_v62, %s8928_s25 }
 0x862   : > { %5535 = vrot.lane.b32.xlu0 %v13641_v33, %s8926_s30  ;;  %v5841_v41 = vrot.slane %v13641_v33, 1  ;;  %v5868_v29 = vrot.slane %v13641_v33, 2  ;;  %v5895_v60 = vrot.slane %v13641_v33, 3  ;;  %v5922_v51 = vrot.slane %v13641_v33, 4 }
 0x863   : > { %v13677_v6 = vadd.f32 %v5926_v21, %v5917_v48 }
 0x864   : > { %v5843_v12 = vsel %vm1384_vm7, %v5841_v41, %v5842_v16  ;;  %v5870_v56 = vsel %vm1538_vm8, %v5868_v29, %v5869_v35  ;;  %v5897_v47 = vsel %vm15269_vm1, %v5895_v60, %v5896_v38  ;;  %v5924_v28 = vsel %vm15270_vm12, %v5922_v51, %v5923_v53  ;;  %vm15279_vm1 = vmmov %vm15277_vm9 }
 0x865   : > { %5611 = vrot.lane.b32.xlu1 %v13620_v8, %s8928_s25  ;;  %v5862_v19 = vadd.f32 %v5843_v12, %v13641_v33  ;;  %v5962_v32 = vmul.f32 0.023647603, %v13677_v6  ;;  %v5998_v4 = vmul.f32 0.030364122, %v13677_v6  ;;  %vm15280_vm12 = vmmov %vm15275_vm5 }
 0x866   : > { %5607 = vrot.lane.b32.xlu0 %v13641_v33, %s8928_s25 }
 0x867   : > { %v5889_v44 = vadd.f32 %v5870_v56, %v5862_v19 }
 0x869   : > { %5645 = vrot.lane.b32.xlu1 %v13623_v62, %s8929_s27  ;;  %v5916_v27 = vadd.f32 %v5897_v47, %v5889_v44 }
 0x86a   : > { %5643 = vrot.lane.b32.xlu0 %v13641_v33, %s8929_s27 }
 0x86b   : > { %v5418_v39 = vpop.permute.xlu1 %5417  ;;  %v5389_v54 = vpop.permute.xlu0 %5388  ;;  %v5943_v58 = vadd.f32 %v5924_v28, %v5916_v27 }
 0x86c   : > { %v5492_v37 = vsel %vm735_vm3, %v13534_v34, %v5389_v54 }
 0x86d   : > { %5647 = vrot.lane.b32.xlu1 %v13620_v8, %s8929_s27  ;;  %v5961_v25 = vmul.f32 0.023647603, %v5943_v58  ;;  %v5997_v20 = vmul.f32 0.030364122, %v5943_v58  ;;  %v13722_v30 = vmul.f32 0.011170336, %v5943_v58 }
 0x86f   : > { %v5443_v1 = vpop.permute.xlu1 %5442  ;;  %5973 = vrot.lane.b32.xlu0 %v5961_v25, %s8926_s30  ;;  %v5391_v11 = vpop.permute.xlu0 %5390 }
 0x870   : > { %v5493_v50 = vsel %vm735_vm3, %v13531_v43, %v5391_v11 }
 0x871   : > { %5571 = vrot.lane.b32.xlu1 %v13641_v33, %s8927_s4  ;;  %v5502_v22 = vsel %vm15273_vm6, %v5493_v50, %v5418_v39 }
 0x873   : > { %v5472_v40 = vpop.permute.xlu1 %5471  ;;  %6009 = vrot.lane.b32.xlu0 %v5997_v20, %s8927_s4  ;;  %v5416_v46 = vpop.permute.xlu0 %5415 }
 0x874   : > { %v5501_v16 = vsel %vm15274_vm14, %v5492_v37, %v5416_v46  ;;  %vm15286_vm14 = vmmov %vm15279_vm1 }
 0x875   : > { %5975 = vrot.lane.b32.xlu1 %v5962_v32, %s8926_s30  ;;  %v5511_v34 = vsel %vm5506_vm0, %v5501_v16, %v5443_v1 }
 0x877   : > { %v5387_v31 = vpop.permute.xlu1 %5386  ;;  %v5445_v42 = vpop.permute.xlu0 %5444 }
 0x878   : > { %v5512_v0 = vsel %vm5506_vm0, %v5502_v22, %v5445_v42  ;;  %v5491_v29 = vsel %vm735_vm3, %v13552_v14, %v5387_v31 }
 0x879   : > { %v13693_v57 = vsel %vm5516_vm10, %v5512_v0, %v5472_v40  ;;  %6011 = vrot.lane.b32.xlu1 %v5998_v4, %s8927_s4 }
 0x87a   : > { %5545 = vrot.lane.b32.xlu0 %v13693_v57, %s8926_s30  ;;  %v5849_v41 = vrot.slane %v13693_v57, 1  ;;  %v5876_v14 = vrot.slane %v13693_v57, 2  ;;  %v5903_v28 = vrot.slane %v13693_v57, 3  ;;  %v5930_v1 = vrot.slane %v13693_v57, 4 }
 0x87b   : > { %v5414_v43 = vpop.permute.xlu1 %5413  ;;  %v5470_v59 = vpop.permute.xlu0 %5469 }
 0x87c   : > { %v13700_v9 = vsel %vm5516_vm10, %v5511_v34, %v5470_v59  ;;  %v5500_v35 = vsel %vm15275_vm5, %v5491_v29, %v5414_v43 }
 0x87d   : > { %6035 = vrot.lane.b32.xlu1 %v5962_v32, %s8928_s25  ;;  %v5847_v3 = vrot.slane %v13700_v9, 1  ;;  %v5874_v60 = vrot.slane %v13700_v9, 2  ;;  %v5901_v44 = vrot.slane %v13700_v9, 3  ;;  %v5928_v39 = vrot.slane %v13700_v9, 4 }
 0x87e   : > { %5581 = vrot.lane.b32.xlu0 %v13693_v57, %s8927_s4 }
 0x87f   : > { %v5441_v15 = vpop.permute.xlu0 %5440  ;;  %v5468_v7 = vpop.permute.xlu1 %5467  ;;  %v5850_v12 = vsel %vm1384_vm7, %v5847_v3, %v5849_v41  ;;  %v5877_v10 = vsel %vm1538_vm8, %v5874_v60, %v5876_v14  ;;  %v5904_v52 = vsel %vm15276_vm4, %v5901_v44, %v5903_v28  ;;  %v5931_v20 = vsel %vm15277_vm9, %v5928_v39, %v5930_v1 }
 0x880   : > { %v5510_v19 = vsel %vm5506_vm0, %v5500_v35, %v5441_v15  ;;  %v5865_v38 = vadd.f32 %v5850_v12, %v13700_v9  ;;  %vm6099_vm9 = vcmask 130048  }
 0x881   : > { %v13715_v56 = vsel %vm5516_vm10, %v5510_v19, %v5468_v7  ;;  %6033 = vrot.lane.b32.xlu1 %v5961_v25, %s8928_s25 }
 0x882   : > { %5541 = vrot.lane.b32.xlu0 %v13715_v56, %s8926_s30  ;;  %v5846_v51 = vrot.slane %v13715_v56, 1  ;;  %v5873_v61 = vrot.slane %v13715_v56, 2  ;;  %v5892_v47 = vadd.f32 %v5877_v10, %v5865_v38  ;;  %v5900_v58 = vrot.slane %v13715_v56, 3 }
 0x883   : > { %v5927_v46 = vrot.slane %v13715_v56, 4 }
 0x884   : > { %v5848_v53 = vsel %vm1384_vm7, %v5846_v51, %v5847_v3  ;;  %v5395_v27 = vpop.permute.xlu0 %5394  ;;  %v5875_v54 = vsel %vm1538_vm8, %v5873_v61, %v5874_v60  ;;  %v5919_v48 = vadd.f32 %v5904_v52, %v5892_v47  ;;  %v5424_v21 = vpop.permute.xlu1 %5423  ;;  %v5902_v40 = vsel %vm15278_vm11, %v5900_v58, %v5901_v44 }
 0x885   : > { %6063 = vrot.lane.b32.xlu1 %v13722_v30, %s8929_s27  ;;  %v5864_v23 = vadd.f32 %v5848_v53, %v13715_v56  ;;  %v5929_v31 = vsel %vm15279_vm1, %v5927_v46, %v5928_v39  ;;  %v5495_v29 = vsel %vm735_vm3, %v13579_v26, %v5395_v27  ;;  %v13822_v52 = vmul.f32 0.011170336, %v13677_v6 }
 0x886   : > { %5577 = vrot.lane.b32.xlu0 %v13715_v56, %s8927_s4  ;;  %v13746_v32 = vadd.f32 %v5931_v20, %v5919_v48 }
 0x887   : > { %v5891_v25 = vadd.f32 %v5875_v54, %v5864_v23 }
 0x888   : > { %v5397_v11 = vpop.permute.xlu0 %5396  ;;  %v5449_v37 = vpop.permute.xlu1 %5448  ;;  %v13754_v22 = vmul.f32 0.023647603, %v13746_v32 }
 0x889   : > { %5543 = vrot.lane.b32.xlu1 %v13700_v9, %s8926_s30  ;;  %v5918_v50 = vadd.f32 %v5902_v40, %v5891_v25  ;;  %v5496_v43 = vsel %vm735_vm3, %v13576_v17, %v5397_v11 }
 0x88a   : > { %5613 = vrot.lane.b32.xlu0 %v13715_v56, %s8928_s25  ;;  %v5505_v3 = vsel %vm15280_vm12, %v5496_v43, %v5424_v21 }
 0x88b   : > { %v13756_v42 = vadd.f32 %v5929_v31, %v5918_v50  ;;  %v6000_v31 = vmul.f32 0.030364122, %v13746_v32 }
 0x88c   : > { %v5422_v4 = vpop.permute.xlu0 %5421  ;;  %v5478_v0 = vpop.permute.xlu1 %5477 }
 0x88d   : > { %5579 = vrot.lane.b32.xlu1 %v13700_v9, %s8927_s4  ;;  %v13763_v16 = vmul.f32 0.023647603, %v13756_v42  ;;  %v5999_v59 = vmul.f32 0.030364122, %v13756_v42  ;;  %v5504_v17 = vsel %vm15281_vm2, %v5495_v29, %v5422_v4  ;;  %vm15291_vm2 = vmmov %vm15279_vm1 }
 0x88e   : > { %5649 = vrot.lane.b32.xlu0 %v13715_v56, %s8929_s27  ;;  %v5514_v12 = vsel %vm5506_vm0, %v5504_v17, %v5449_v37  ;;  %v13861_v17 = vmul.f32 0.011170336, %v13746_v32 }
 0x890   : > { %v5451_v34 = vpop.permute.xlu0 %5450  ;;  %v5393_v35 = vpop.permute.xlu1 %5392 }
 0x891   : > { %5615 = vrot.lane.b32.xlu1 %v13700_v9, %s8928_s25  ;;  %v5515_v41 = vsel %vm5506_vm0, %v5505_v3, %v5451_v34  ;;  %v5494_v38 = vsel %vm735_vm3, %v13597_v24, %v5393_v35 }
 0x892   : > { %5979 = vrot.lane.b32.xlu0 %v13754_v22, %s8926_s30  ;;  %v13781_v15 = vsel %vm5516_vm10, %v5515_v41, %v5478_v0  ;;  %v13854_v41 = vmul.f32 0.011170336, %v13756_v42 }
 0x893   : > { %v5854_v61 = vrot.slane %v13781_v15, 1  ;;  %v5881_v28 = vrot.slane %v13781_v15, 2  ;;  %v5908_v48 = vrot.slane %v13781_v15, 3  ;;  %v5935_v40 = vrot.slane %v13781_v15, 4 }
 0x894   : > { %v5476_v7 = vpop.permute.xlu0 %5475  ;;  %v5420_v19 = vpop.permute.xlu1 %5419 }
 0x895   : > { %5617 = vrot.lane.b32.xlu1 %v13693_v57, %s8928_s25  ;;  %v13789_v60 = vsel %vm5516_vm10, %v5514_v12, %v5476_v7  ;;  %v5503_v51 = vsel %vm15282_vm13, %v5494_v38, %v5420_v19 }
 0x896   : > { %5977 = vrot.lane.b32.xlu0 %v13763_v16, %s8926_s30  ;;  %v5852_v14 = vrot.slane %v13789_v60, 1  ;;  %v5879_v53 = vrot.slane %v13789_v60, 2  ;;  %v5906_v54 = vrot.slane %v13789_v60, 3  ;;  %v5933_v6 = vrot.slane %v13789_v60, 4 }
 0x898   : > { %v5447_v26 = vpop.permute.xlu0 %5446  ;;  %v5474_v44 = vpop.permute.xlu1 %5473  ;;  %v5855_v24 = vsel %vm1384_vm7, %v5852_v14, %v5854_v61  ;;  %v5882_v39 = vsel %vm1538_vm8, %v5879_v53, %v5881_v28 }
 0x899   : > { %5651 = vrot.lane.b32.xlu1 %v13700_v9, %s8929_s27  ;;  %v5513_v10 = vsel %vm5506_vm0, %v5503_v51, %v5447_v26  ;;  %v5867_v27 = vadd.f32 %v5855_v24, %v13789_v60  ;;  %vm15283_vm0 = vmmov %vm15276_vm4 }
 0x89a   : > { %6013 = vrot.lane.b32.xlu0 %v5999_v59, %s8927_s4  ;;  %v13809_v47 = vsel %vm5516_vm10, %v5513_v10, %v5474_v44  ;;  %v5909_v21 = vsel %vm15283_vm0, %v5906_v54, %v5908_v48  ;;  %vm15284_vm10 = vmmov %vm15279_vm1 }
 0x89b   : > { %v5851_v23 = vrot.slane %v13809_v47, 1  ;;  %v5894_v58 = vadd.f32 %v5882_v39, %v5867_v27  ;;  %v5878_v1 = vrot.slane %v13809_v47, 2  ;;  %v5936_v46 = vsel %vm15284_vm10, %v5933_v6, %v5935_v40  ;;  %vm15285_vm6 = vmmov %vm15283_vm0 }
 0x89c   : > { %v5905_v37 = vrot.slane %v13809_v47, 3  ;;  %v5932_v34 = vrot.slane %v13809_v47, 4  ;;  %vm15287_vm5 = vmmov %vm15283_vm0 }
 0x89d   : > { %5653 = vrot.lane.b32.xlu1 %v13693_v57, %s8929_s27  ;;  %v5853_v25 = vsel %vm1384_vm7, %v5851_v23, %v5852_v14  ;;  %v5921_v11 = vadd.f32 %v5909_v21, %v5894_v58  ;;  %v5880_v50 = vsel %vm1538_vm8, %v5878_v1, %v5879_v53  ;;  %vm15288_vm4 = vmmov %vm15279_vm1 }
 0x89e   : > { %5551 = vrot.lane.b32.xlu0 %v13781_v15, %s8926_s30  ;;  %v5866_v20 = vadd.f32 %v5853_v25, %v13809_v47  ;;  %v5907_v43 = vsel %vm15285_vm6, %v5905_v37, %v5906_v54  ;;  %v5934_v29 = vsel %vm15286_vm14, %v5932_v34, %v5933_v6  ;;  %vm15289_vm11 = vmmov %vm15283_vm0 }
 0x89f   : > { %v5948_v4 = vadd.f32 %v5936_v46, %v5921_v11  ;;  %vm15290_vm12 = vmmov %vm15283_vm0 }
 0x8a0   : > { %v5893_v0 = vadd.f32 %v5880_v50, %v5866_v20  ;;  %vm15292_vm13 = vmmov %vm15283_vm0 }
 0x8a1   : > { %5549 = vrot.lane.b32.xlu1 %v13789_v60, %s8926_s30  ;;  %v5966_v59 = vmul.f32 0.023647603, %v5948_v4  ;;  %v6002_v35 = vmul.f32 0.030364122, %v5948_v4  ;;  %v13868_v19 = vmul.f32 0.011170336, %v5948_v4  ;;  %vm15293_vm0 = vmmov %vm15279_vm1 }
 0x8a2   : > { %5587 = vrot.lane.b32.xlu0 %v13781_v15, %s8927_s4  ;;  %v5920_v3 = vadd.f32 %v5907_v43, %v5893_v0  ;;  %vm15294_vm10 = vmmov %vm15287_vm5 }
 0x8a3   : > { %vm15295_vm6 = vmmov %vm15293_vm0 }
 0x8a4   : > { %vm15296_vm14 = vmmov %vm15287_vm5 }
 0x8a5   : > { %5585 = vrot.lane.b32.xlu1 %v13789_v60, %s8927_s4 }
 0x8a6   : > { %5623 = vrot.lane.b32.xlu0 %v13781_v15, %s8928_s25 }
 0x8a9   : > { %5621 = vrot.lane.b32.xlu1 %v13789_v60, %s8928_s25 }
 0x8aa   : > { %5657 = vrot.lane.b32.xlu0 %v13789_v60, %s8929_s27 }
 0x8ad   : > { %5659 = vrot.lane.b32.xlu1 %v13781_v15, %s8929_s27 }
 0x8ae   : > { %5547 = vrot.lane.b32.xlu0 %v13809_v47, %s8926_s30 }
 0x8b1   : > { %6065 = vrot.lane.b32.xlu1 %v13822_v52, %s8929_s27 }
 0x8b2   : > { %5583 = vrot.lane.b32.xlu0 %v13809_v47, %s8927_s4 }
 0x8b5   : > { %5655 = vrot.lane.b32.xlu1 %v13809_v47, %s8929_s27 }
 0x8b6   : > { %5619 = vrot.lane.b32.xlu0 %v13809_v47, %s8928_s25 }
 0x8b9   : > { %6037 = vrot.lane.b32.xlu1 %v13763_v16, %s8928_s25  ;;  %v5947_v16 = vadd.f32 %v5934_v29, %v5920_v3 }
 0x8ba   : > { %6015 = vrot.lane.b32.xlu0 %v6000_v31, %s8927_s4 }
 0x8bb   : > { %v5965_v7 = vmul.f32 0.023647603, %v5947_v16  ;;  %v13873_v38 = vmul.f32 0.011170336, %v5947_v16 }
 0x8bd   : > { %6039 = vrot.lane.b32.xlu1 %v13754_v22, %s8928_s25  ;;  %v6001_v22 = vmul.f32 0.030364122, %v5947_v16 }
 0x8be   : > { %5983 = vrot.lane.b32.xlu0 %v5966_v59, %s8926_s30 }
 0x8c1   : > { %6067 = vrot.lane.b32.xlu1 %v13854_v41, %s8929_s27 }
 0x8c2   : > { %6019 = vrot.lane.b32.xlu0 %v6002_v35, %s8927_s4 }
 0x8c5   : > { %6069 = vrot.lane.b32.xlu1 %v13861_v17, %s8929_s27 }
 0x8c6   : > { %5981 = vrot.lane.b32.xlu0 %v5965_v7, %s8926_s30 }
 0x8c9   : > { %6043 = vrot.lane.b32.xlu1 %v5966_v59, %s8928_s25 }
 0x8ca   : > { %6017 = vrot.lane.b32.xlu0 %v6001_v22, %s8927_s4 }
 0x8cb   : > { %v5538_v42 = vpop.permute.xlu1 %5537  ;;  %v5540_v12 = vpop.permute.xlu0 %5539 }
 0x8cc   : > { %v5563_v53 = vadd.f32 %v5538_v42, %v13623_v62  ;;  %v5564_v16 = vadd.f32 %v5540_v12, %v13620_v8 }
 0x8cd   : > { %6073 = vrot.lane.b32.xlu1 %v13868_v19, %s8929_s27 }
 0x8ce   : > { %6041 = vrot.lane.b32.xlu0 %v5965_v7, %s8928_s25 }
 0x8cf   : > { %v5576_v32 = vpop.permute.xlu1 %5575  ;;  %v5574_v26 = vpop.permute.xlu0 %5573 }
 0x8d0   : > { %v5599_v28 = vadd.f32 %v5574_v26, %v5563_v53 }
 0x8d2   : > { %6071 = vrot.lane.b32.xlu0 %v13873_v38, %s8929_s27 }
 0x8d3   : > { %v5610_v14 = vpop.permute.xlu1 %5609 }
 0x8d4   : > { %v5536_v51 = vpop.permute.xlu0 %5535  ;;  %v5635_v23 = vadd.f32 %v5610_v14, %v5599_v28 }
 0x8d5   : > { %v5562_v39 = vadd.f32 %v5536_v51, %v13641_v33  ;;  %v5600_v51 = vadd.f32 %v5576_v32, %v5564_v16 }
 0x8d7   : > { %v5612_v10 = vpop.permute.xlu1 %5611 }
 0x8d8   : > { %v5608_v44 = vpop.permute.xlu0 %5607  ;;  %v5636_v28 = vadd.f32 %v5612_v10, %v5600_v51 }
 0x8db   : > { %v5646_v61 = vpop.permute.xlu1 %5645 }
 0x8dc   : > { %v5644_v24 = vpop.permute.xlu0 %5643  ;;  %v5671_v48 = vadd.f32 %v5646_v61, %v5635_v23 }
 0x8de   : > { %v13881_v1 = vmul.f32 0.023647603, %v5671_v48  ;;  %v5731_v40 = vmul.f32 0.030364122, %v5671_v48  ;;  %v13886_v43 = vmul.f32 0.011170336, %v5671_v48 }
 0x8df   : > { %v5648_v27 = vpop.permute.xlu1 %5647 }
 0x8e0   : > { %v5704_v37 = vrot.slane %v13881_v1, 1  ;;  %v5749_v34 = vrot.slane %v5731_v40, 2  ;;  %v5776_v7 = vrot.slane %v13881_v1, 3  ;;  %v5672_v8 = vadd.f32 %v5648_v27, %v5636_v28 }
 0x8e1   : > { %v5974_v54 = vpop.permute.xlu0 %5973 }
 0x8e2   : > { %v5687_v1 = vmul.f32 0.023647603, %v5672_v8  ;;  %v5802_v51 = vmul.f32 0.011170336, %v5672_v8 }
 0x8e3   : > { %v5572_v58 = vpop.permute.xlu1 %5571 }
 0x8e4   : > { %v5598_v25 = vadd.f32 %v5572_v58, %v5562_v39 }
 0x8e5   : > { %v6010_v20 = vpop.permute.xlu0 %6009 }
 0x8e6   : > { %v5634_v21 = vadd.f32 %v5608_v44, %v5598_v25  ;;  %v5815_v44 = vrot.slane %v13886_v43, 4 }
 0x8e7   : > { %v13879_v6 = vpop.permute.xlu1 %5975 }
 0x8e8   : > { %v5670_v11 = vadd.f32 %v5644_v24, %v5634_v21 }
 0x8ea   : > { %v5685_v46 = vmul.f32 0.023647603, %v5670_v11  ;;  %v5730_v50 = vmul.f32 0.030364122, %v5670_v11  ;;  %v5679_v31 = vmul.f32 0.011170336, %v5670_v11 }
 0x8eb   : > { %v13883_v62 = vpop.permute.xlu1 %6011 }
 0x8ec   : > { %v5703_v33 = vrot.slane %v5685_v46, 1  ;;  %v5748_v4 = vrot.slane %v5730_v50, 2  ;;  %v5546_v0 = vpop.permute.xlu0 %5545  ;;  %v5775_v3 = vrot.slane %v5685_v46, 3  ;;  %v5814_v22 = vrot.slane %v5679_v31, 4 }
 0x8ed   : > { %v5706_v50 = vrot.slane %v5687_v1, 1 }
 0x8ee   : > { %v5705_v59 = vsel %vm1384_vm7, %v5703_v33, %v5704_v37  ;;  %v5750_v42 = vsel %vm1538_vm8, %v5748_v4, %v5749_v34  ;;  %v5777_v61 = vsel %vm15287_vm5, %v5775_v3, %v5776_v7  ;;  %v5816_v23 = vsel %vm15288_vm4, %v5814_v22, %v5815_v44  ;;  %vm15297_vm5 = vmmov %vm15293_vm0 }
 0x8ef   : > { %v5724_v29 = vadd.f32 %v5705_v59, %v5679_v31  ;;  %v13889_v35 = vpop.permute.xlu1 %6035  ;;  %v5732_v33 = vmul.f32 0.030364122, %v5672_v8  ;;  %vm8933_vm4 = vmmov 0  }
 0x8f0   : > { %v5582_v26 = vpop.permute.xlu0 %5581  ;;  %8562 = vmatprep.mubr.msk.f32.mxu0 %vm8933_vm4, %v15204_v13 }
 0x8f1   : > { %v5769_v14 = vadd.f32 %v5750_v42, %v5724_v29 }
 0x8f3   : > { %v5796_v24 = vadd.f32 %v5777_v61, %v5769_v14  ;;  %v6034_v53 = vpop.permute.xlu1 %6033  ;;  %v5778_v14 = vrot.slane %v5687_v1, 3 }
 0x8f4   : > { %v5542_v39 = vpop.permute.xlu0 %5541 }
 0x8f5   : > { %v5835_v58 = vadd.f32 %v5816_v23, %v5796_v24  ;;  %v5565_v29 = vadd.f32 %v5542_v39, %v13715_v56  ;;  %v5779_v56 = vsel %vm15289_vm11, %v5776_v7, %v5778_v14  ;;  %vm15298_vm11 = vcmask 1041408  }
 0x8f7   : > { %v5955_v12 = vadd.f32 %v13722_v30, %v5835_v58  ;;  %v6064_v48 = vpop.permute.xlu1 %6063  ;;  %v5707_v30 = vsel %vm1384_vm7, %v5704_v37, %v5706_v50  ;;  %v5567_v58 = vadd.f32 %v5546_v0, %v13693_v57 }
 0x8f8   : > { %v5578_v25 = vpop.permute.xlu0 %5577  ;;  %v5725_v3 = vadd.f32 %v5707_v30, %v13886_v43 }
 0x8f9   : > { %v5991_v21 = vadd.f32 %v5974_v54, %v5955_v12  ;;  %v5601_v22 = vadd.f32 %v5578_v25, %v5565_v29  ;;  %v5603_v8 = vadd.f32 %v5582_v26, %v5567_v58 }
 0x8fb   : > { %v6027_v11 = vadd.f32 %v6010_v20, %v5991_v21  ;;  %v5544_v32 = vpop.permute.xlu1 %5543  ;;  %v5751_v20 = vrot.slane %v5732_v33, 2 }
 0x8fc   : > { %v5614_v40 = vpop.permute.xlu0 %5613  ;;  %v5566_v16 = vadd.f32 %v5544_v32, %v13700_v9 }
 0x8fd   : > { %v6051_v46 = vadd.f32 %v6034_v53, %v6027_v11  ;;  %v5752_v61 = vsel %vm1538_vm8, %v5749_v34, %v5751_v20  ;;  %v5637_v28 = vadd.f32 %v5614_v40, %v5601_v22 }
 0x8fe   : > { %v5770_v37 = vadd.f32 %v5752_v61, %v5725_v3 }
 0x8ff   : > { %v13898_v31 = vadd.f32 %v6064_v48, %v6051_v46  ;;  %v5580_v10 = vpop.permute.xlu1 %5579  ;;  %v5817_v48 = vrot.slane %v5802_v51, 4 }
 0x900   : > { %v5650_v4 = vpop.permute.xlu0 %5649  ;;  %v5602_v24 = vadd.f32 %v5580_v10, %v5566_v16  ;;  %v5797_v25 = vadd.f32 %v5779_v56, %v5770_v37 }
 0x901   : > { %v6087_v27 = vsub.f32 %v13481_v55, %v13898_v31  ;;  %8549 = vmatprep.mubr.msk.f32.mxu1 %vm6099_vm9, %v13898_v31  ;;  %v5673_v12 = vadd.f32 %v5650_v4, %v5637_v28  ;;  %v5818_v32 = vsel %vm15279_vm1, %v5815_v44, %v5817_v48  ;;  %vm15299_vm1 = vcmask 1040384  }
 0x902   : > { %v5836_v46 = vadd.f32 %v5818_v32, %v5797_v25 }
 0x903   : > { %v5616_v54 = vpop.permute.xlu1 %5615  ;;  %v5688_v34 = vmul.f32 0.023647603, %v5673_v12  ;;  %v5733_v26 = vmul.f32 0.030364122, %v5673_v12  ;;  %v5681_v3 = vmul.f32 0.011170336, %v5673_v12 }
 0x904   : > { %v13905_v59 = vpop.permute.xlu0 %5979  ;;  %v5638_v23 = vadd.f32 %v5616_v54, %v5602_v24  ;;  %v5956_v30 = vadd.f32 %v13822_v52, %v5836_v46 }
 0x905   : > { %v5708_v50 = vrot.slane %v5688_v34, 1  ;;  %v5753_v61 = vrot.slane %v5733_v26, 2 }
 0x906   : > { %v5992_v51 = vadd.f32 %v13879_v6, %v5956_v30 }
 0x907   : > { %v5618_v42 = vpop.permute.xlu1 %5617 }
 0x908   : > { %v13911_v53 = vpop.permute.xlu0 %5977  ;;  %v5639_v1 = vadd.f32 %v5618_v42, %v5603_v8  ;;  %v6028_v6 = vadd.f32 %v13883_v62, %v5992_v51 }
 0x90a   : > { %v6052_v62 = vadd.f32 %v13889_v35, %v6028_v6 }
 0x90b   : > { %v5652_v43 = vpop.permute.xlu1 %5651 }
 0x90c   : > { %v5674_v9 = vadd.f32 %v5652_v43, %v5638_v23  ;;  %v13915_v39 = vpop.permute.xlu0 %6013 }
 0x90e   : > { %v13917_v21 = vmul.f32 0.023647603, %v5674_v9  ;;  %v5734_v10 = vmul.f32 0.030364122, %v5674_v9  ;;  %v5682_v37 = vmul.f32 0.011170336, %v5674_v9 }
 0x90f   : > { %v5654_v11 = vpop.permute.xlu1 %5653 }
 0x910   : > { %v5552_v40 = vpop.permute.xlu0 %5551  ;;  %v5709_v57 = vrot.slane %v13917_v21, 1  ;;  %v5675_v0 = vadd.f32 %v5654_v11, %v5639_v1  ;;  %v5754_v29 = vrot.slane %v5734_v10, 2  ;;  %v5781_v58 = vrot.slane %v13917_v21, 3 }
 0x911   : > { %v5570_v52 = vadd.f32 %v5552_v40, %v13781_v15  ;;  %v5780_v1 = vrot.slane %v5688_v34, 3  ;;  %v5820_v11 = vrot.slane %v5682_v37, 4 }
 0x912   : > { %v5690_v7 = vmul.f32 0.023647603, %v5675_v0  ;;  %v5710_v54 = vsel %vm1384_vm7, %v5708_v50, %v5709_v57  ;;  %v5735_v16 = vmul.f32 0.030364122, %v5675_v0  ;;  %v5755_v23 = vsel %vm1538_vm8, %v5753_v61, %v5754_v29 }
 0x913   : > { %v5550_v33 = vpop.permute.xlu1 %5549  ;;  %v5726_v22 = vadd.f32 %v5710_v54, %v5681_v3  ;;  %v5803_v32 = vmul.f32 0.011170336, %v5675_v0  ;;  %v5782_v15 = vsel %vm15290_vm12, %v5780_v1, %v5781_v58  ;;  %v5819_v50 = vrot.slane %v5681_v3, 4  ;;  %vm15301_vm12 = vmmov %vm15298_vm11 }
 0x914   : > { %v5588_v4 = vpop.permute.xlu0 %5587  ;;  %v5711_v20 = vrot.slane %v5690_v7, 1  ;;  %v5569_v42 = vadd.f32 %v5550_v33, %v13789_v60  ;;  %v5756_v12 = vrot.slane %v5735_v16, 2 }
 0x915   : > { %v5771_v48 = vadd.f32 %v5755_v23, %v5726_v22  ;;  %v5606_v56 = vadd.f32 %v5588_v4, %v5570_v52  ;;  %v5821_v34 = vsel %vm15291_vm2, %v5819_v50, %v5820_v11  ;;  %v5822_v0 = vrot.slane %v5803_v32, 4  ;;  %vm15302_vm2 = vmmov %vm15298_vm11 }
 0x916   : > { %v5712_v24 = vsel %vm1384_vm7, %v5709_v57, %v5711_v20  ;;  %v5757_v40 = vsel %vm1538_vm8, %v5754_v29, %v5756_v12  ;;  %v5783_v57 = vrot.slane %v5690_v7, 3 }
 0x917   : > { %v5586_v44 = vpop.permute.xlu1 %5585  ;;  %v5727_v8 = vadd.f32 %v5712_v24, %v5682_v37  ;;  %v5798_v10 = vadd.f32 %v5782_v15, %v5771_v48  ;;  %v6093_v24 = vand.u32 2147483647, %v6087_v27  ;;  %v5823_v12 = vsel %vm15293_vm0, %v5820_v11, %v5822_v0 }
 0x918   : > { %v5624_v14 = vpop.permute.xlu0 %5623  ;;  %v5605_v28 = vadd.f32 %v5586_v44, %v5569_v42  ;;  %v5784_v7 = vsel %vm15292_vm13, %v5781_v58, %v5783_v57  ;;  %vm15303_vm13 = vmmov %vm15299_vm1 }
 0x919   : > { %v5642_v9 = vadd.f32 %v5624_v14, %v5606_v56  ;;  %v5772_v30 = vadd.f32 %v5757_v40, %v5727_v8  ;;  %v5837_v29 = vadd.f32 %v5821_v34, %v5798_v10  ;;  %v6100_v8 = vsel %vm6099_vm9, %v6093_v24, 0.0 }
 0x91b   : > { %v5622_v43 = vpop.permute.xlu1 %5621  ;;  %v5799_v42 = vadd.f32 %v5784_v7, %v5772_v30  ;;  %v5957_v48 = vadd.f32 %v13854_v41, %v5837_v29 }
 0x91c   : > { %v5641_v25 = vadd.f32 %v5622_v43, %v5605_v28  ;;  %v5658_v60 = vpop.permute.xlu0 %5657 }
 0x91d   : > { %v5993_v41 = vadd.f32 %v13911_v53, %v5957_v48 }
 0x91e   : > { %v5677_v46 = vadd.f32 %v5658_v60, %v5641_v25  ;;  %v5838_v25 = vadd.f32 %v5823_v12, %v5799_v42 }
 0x91f   : > { %v5660_v21 = vpop.permute.xlu1 %5659 }
 0x920   : > { %v5678_v33 = vadd.f32 %v5660_v21, %v5642_v9  ;;  %v5548_v4 = vpop.permute.xlu0 %5547  ;;  %v13932_v26 = vmul.f32 0.023647603, %v5677_v46  ;;  %v13936_v54 = vmul.f32 0.030364122, %v5677_v46  ;;  %v5684_v37 = vmul.f32 0.011170336, %v5677_v46 }
 0x921   : > { %v5568_v35 = vadd.f32 %v5548_v4, %v13809_v47  ;;  %v5958_v15 = vadd.f32 %v13861_v17, %v5838_v25 }
 0x922   : > { %v5693_v20 = vmul.f32 0.023647603, %v5678_v33  ;;  %v5738_v16 = vmul.f32 0.030364122, %v5678_v33  ;;  %v5714_v14 = vrot.slane %v13932_v26, 1  ;;  %v5759_v28 = vrot.slane %v13936_v54, 2 }
 0x923   : > { %v6066_v44 = vpop.permute.xlu1 %6065  ;;  %v5804_v27 = vmul.f32 0.011170336, %v5678_v33  ;;  %v5786_v11 = vrot.slane %v13932_v26, 3  ;;  %v5825_v4 = vrot.slane %v5684_v37, 4  ;;  %v6029_v26 = vadd.f32 %v13915_v39, %v5993_v41 }
 0x924   : > { %v6082_v3 = vadd.f32 %v6066_v44, %v6052_v62  ;;  %v5584_v22 = vpop.permute.xlu0 %5583  ;;  %v5716_v51 = vrot.slane %v5693_v20, 1  ;;  %v5761_v61 = vrot.slane %v5738_v16, 2  ;;  %v5788_v31 = vrot.slane %v5693_v20, 3 }
 0x925   : > { %v5604_v23 = vadd.f32 %v5584_v22, %v5568_v35  ;;  %v5827_v57 = vrot.slane %v5804_v27, 4  ;;  %v5994_v54 = vadd.f32 %v13905_v59, %v5958_v15 }
 0x926   : > { %v6088_v52 = vsub.f32 %v13476_v49, %v6082_v3  ;;  %8550 = vmatmul.mubr.msk.f32.vlgmr.msra.gmra.mrb[24].mxu1 %vm6099_vm9, %v6082_v3  ;;  %v5717_v43 = vsel %vm1384_vm7, %v5714_v14, %v5716_v51  ;;  %v5762_v49 = vsel %vm1538_vm8, %v5759_v28, %v5761_v61  ;;  %v5789_v10 = vsel %vm15294_vm10, %v5786_v11, %v5788_v31  ;;  %vm15305_vm10 = vmmov %vm15302_vm2 }
 0x927   : > { %v5656_v58 = vpop.permute.xlu1 %5655  ;;  %v5729_v55 = vadd.f32 %v5717_v43, %v5684_v37  ;;  %v5828_v16 = vsel %vm15295_vm6, %v5825_v4, %v5827_v57  ;;  %vm15306_vm6 = vmmov %vm15302_vm2 }
 0x928   : > { %v6094_v47 = vand.u32 2147483647, %v6088_v52  ;;  %v5620_v56 = vpop.permute.xlu0 %5619 }
 0x929   : > { %v5640_v60 = vadd.f32 %v5620_v56, %v5604_v23  ;;  %v5774_v1 = vadd.f32 %v5762_v49, %v5729_v55 }
 0x92a   : > { %v6101_v6 = vsel %vm6099_vm9, %v6094_v47, 0.0 }
 0x92b   : > { %v6102_v32 = vadd.f32 %v6101_v6, %v6100_v8  ;;  %v5676_v9 = vadd.f32 %v5656_v58, %v5640_v60  ;;  %v6038_v46 = vpop.permute.xlu1 %6037  ;;  %v5801_v33 = vadd.f32 %v5789_v10, %v5774_v1 }
 0x92c   : > { %v6016_v40 = vpop.permute.xlu0 %6015  ;;  %v6053_v7 = vadd.f32 %v6038_v46, %v6029_v26 }
 0x92d   : > { %v5691_v21 = vmul.f32 0.023647603, %v5676_v9  ;;  %v5736_v50 = vmul.f32 0.030364122, %v5676_v9  ;;  %v5683_v30 = vmul.f32 0.011170336, %v5676_v9  ;;  %v6030_v29 = vadd.f32 %v6016_v40, %v5994_v54 }
 0x92e   : > { %v5840_v3 = vadd.f32 %v5828_v16, %v5801_v33 }
 0x92f   : > { %v5713_v62 = vrot.slane %v5691_v21, 1  ;;  %v5758_v34 = vrot.slane %v5736_v50, 2  ;;  %v6040_v0 = vpop.permute.xlu1 %6039  ;;  %v5785_v17 = vrot.slane %v5691_v21, 3  ;;  %v5824_v22 = vrot.slane %v5683_v30, 4 }
 0x930   : > { %v5984_v20 = vpop.permute.xlu0 %5983  ;;  %v6054_v59 = vadd.f32 %v6040_v0, %v6030_v29  ;;  %v5960_v37 = vadd.f32 %v13868_v19, %v5840_v3 }
 0x931   : > { %v5715_v53 = vsel %vm1384_vm7, %v5713_v62, %v5714_v14  ;;  %v5760_v51 = vsel %vm1538_vm8, %v5758_v34, %v5759_v28  ;;  %v5787_v39 = vsel %vm15296_vm14, %v5785_v17, %v5786_v11  ;;  %v5826_v58 = vsel %vm15297_vm5, %v5824_v22, %v5825_v4  ;;  %vm15307_vm14 = vmmov %vm15299_vm1 }
 0x932   : > { %v5728_v44 = vadd.f32 %v5715_v53, %v5683_v30  ;;  %v5996_v47 = vadd.f32 %v5984_v20, %v5960_v37  ;;  %v8932_v30 = vmov 0.0|0.0  }
 0x933   : > { %v6068_v42 = vpop.permute.xlu1 %6067  ;;  %8735 = vmatprep.subr.bf16.mxu0 %v8932_v30 }
 0x934   : > { %v6083_v61 = vadd.f32 %v6068_v42, %v6053_v7  ;;  %v6020_v35 = vpop.permute.xlu0 %6019  ;;  %v5773_v24 = vadd.f32 %v5760_v51, %v5728_v44 }
 0x935   : > { %v6032_v31 = vadd.f32 %v6020_v35, %v5996_v47 }
 0x936   : > { %v6089_v14 = vsub.f32 %v13526_v5, %v6083_v61  ;;  %8552 = vmatprep.mubr.msk.f32.mxu1 %vm6099_vm9, %v6083_v61  ;;  %v5800_v52 = vadd.f32 %v5787_v39, %v5773_v24 }
 0x937   : > { %v6070_v23 = vpop.permute.xlu1 %6069 }
 0x938   : > { %v6095_v12 = vand.u32 2147483647, %v6089_v14  ;;  %v6084_v43 = vadd.f32 %v6070_v23, %v6054_v59  ;;  %v5839_v48 = vadd.f32 %v5826_v58, %v5800_v52  ;;  %v5982_v28 = vpop.permute.xlu0 %5981 }
 0x93a   : > { %v6103_v56 = vsel %vm6099_vm9, %v6095_v12, 0.0  ;;  %v6090_v25 = vsub.f32 %v13521_v18, %v6084_v43  ;;  %v5959_v55 = vadd.f32 %v13873_v38, %v5839_v48  ;;  %8553 = vmatmul.mubr.msk.f32.gmra.mrb[26].mxu1 %vm6099_vm9, %v6084_v43 }
 0x93b   : > { %v6104_v5 = vadd.f32 %v6103_v56, %v6102_v32  ;;  %v6044_v19 = vpop.permute.xlu1 %6043 }
 0x93c   : > { %v6096_v27 = vand.u32 2147483647, %v6090_v25  ;;  %v5995_v60 = vadd.f32 %v5982_v28, %v5959_v55  ;;  %v6018_v49 = vpop.permute.xlu0 %6017  ;;  %v6056_v6 = vadd.f32 %v6044_v19, %v6032_v31 }
 0x93e   : > { %v6105_v8 = vsel %vm6099_vm9, %v6096_v27, 0.0  ;;  %v6031_v11 = vadd.f32 %v6018_v49, %v5995_v60 }
 0x93f   : > { %v6106_v1 = vadd.f32 %v6105_v8, %v6104_v5  ;;  %v6074_v9 = vpop.permute.xlu1 %6073 }
 0x940   : > { %v6086_v46 = vadd.f32 %v6074_v9, %v6056_v6  ;;  %v6042_v41 = vpop.permute.xlu0 %6041 }
 0x941   : > { %v6055_v15 = vadd.f32 %v6042_v41, %v6031_v11 }
 0x942   : > { %v6092_v18 = vsub.f32 %v13564_v45, %v6086_v46 }
 0x944   : > { %v6072_v38 = vpop.permute.xlu0 %6071  ;;  %v6098_v57 = vand.u32 2147483647, %v6092_v18 }
 0x945   : > { %v6085_v40 = vadd.f32 %v6072_v38, %v6055_v15 }
 0x946   : > { %v6109_v33 = vsel %vm6099_vm9, %v6098_v57, 0.0 }
 0x947   : > { %v6091_v32 = vsub.f32 %v13571_v36, %v6085_v40  ;;  %8555 = vmatprep.mubr.msk.f32.mxu1 %vm6099_vm9, %v6085_v40 }
 0x948   : > { %8556 = vmatmul.mubr.msk.f32.gmra.mrb[28].mxu1 %vm6099_vm9, %v6086_v46 }
 0x949   : > { %v6097_v21 = vand.u32 2147483647, %v6091_v32  ;;  %8581 = vmatprep.mubr.msk.f32.mxu1 %vm8933_vm4, %v15204_v13 }
 0x94b   : > { %v6107_v50 = vsel %vm6099_vm9, %v6097_v21, 0.0 }
 0x94c   : > { %v6108_v10 = vadd.f32 %v6107_v50, %v6106_v1 }
 0x94e   : > { %v13978_v4 = vadd.f32 %v6109_v33, %v6108_v10 }
 0x9f9   : > { %v8551_v45 = vpop.f32.mrb[24].mxu1 }
 0x9fa   : > { %v6206_v36 = vpop.f32.mrb[25].mxu1 }
 0x9fb   : > { %v8736_v62 = vpack.c.bf16 %v8551_v45, %v6206_v36 }
 0x9fd   : > { %8737 = vmatpush3.bf16.msra.mxu0 %v8736_v62 }
 0x9fe   : > { %8738 = vmatprep.subr.bf16.mxu0 %v8932_v30 }
 0xa00   : > { %8563 = vmatmul.mubr.msk.f32.vlgmr.msra.gmra.mrb[30].mxu0 %vm6099_vm9, %v15250_v2 }
 0xa01   : > { %8569 = vmatprep.mubr.msk.f32.mxu0 %vm8933_vm4, %v15204_v13 }
 0xa0d   : > { %v8554_v34 = vpop.f32.mrb[26].mxu1 }
 0xa0e   : > { %v6216_v0 = vpop.f32.mrb[27].mxu1 }
 0xa0f   : > { %v8739_v26 = vpack.c.bf16 %v8554_v34, %v6216_v0 }
 0xa11   : > { %8740 = vmatpush3.bf16.msra.mxu0 %v8739_v26 }
 0xa12   : > { %8741 = vmatprep.subr.bf16.mxu0 %v8932_v30 }
 0xa14   : > { %8570 = vmatmul.mubr.msk.f32.vlgmr.msra.gmra.mrb[32].mxu0 %vm6099_vm9, %v15250_v2 }
 0xa15   : > { %8576 = vmatprep.mubr.msk.f32.mxu0 %vm8933_vm4, %v15204_v13 }
 0xa1b   : > { %v8557_v54 = vpop.f32.mrb[28].mxu1 }
 0xa1c   : > { %v6226_v20 = vpop.f32.mrb[29].mxu1 }
 0xa1d   : > { %v8742_v53 = vpack.c.bf16 %v8557_v54, %v6226_v20 }
 0xa1f   : > { %8743 = vmatpush3.bf16.msra.mxu0 %v8742_v53 }
 0xa20   : > { %8590 = vmatprep.subr.mxu0 %v15204_v13 }
 0xa22   : > { %8577 = vmatmul.mubr.msk.f32.vlgmr.msra.gmra.mrb[34].mxu0 %vm6099_vm9, %v15250_v2  ;;  %vm15300_vm9 = vcmask 1042432  }
 0xa23   : > { %8592 = vmatprep.mubr.msk.f32.mxu0 %vm8933_vm4, %v15204_v13  ;;  %vm15304_vm0 = vmmov %vm15300_vm9 }
 0xa24   : > { %vm15308_vm5 = vmmov %vm15304_vm0 }
 0xad3   : > { %v13997_v17 = vpop.f32.mrb[30].mxu0 }
 0xad4   : > { %v6450_v16 = vrot.slane %v13997_v17, 7  ;;  %v6456_v44 = vrot.slane %v13997_v17, 6  ;;  %v6462_v7 = vrot.slane %v13997_v17, 5  ;;  %v6468_v29 = vrot.slane %v13997_v17, 4  ;;  %v8564_v3 = vpop.f32.mrb[31].mxu0 }
 0xad6   : > { %v6480_v22 = vsel %vm15298_vm11, %v6456_v44, %v6462_v7  ;;  %v6474_v42 = vsel %vm15299_vm1, %v13997_v17, %v6450_v16  ;;  %vm15309_vm11 = vmmov %vm15302_vm2  ;;  %vm6576_vm1 = vcmask 80896  }
 0xad7   : > { %v6483_v51 = vsel %vm15300_vm9, %v6480_v22, %v6468_v29  ;;  %v6477_v61 = vsel %vm15301_vm12, %v6474_v42, %v6456_v44  ;;  %vm6583_vm9 = vcmask 89088   ;;  %vm15310_vm12 = vcmask 15360  }
 0xad8   : > { %6494 = vrot.lane.b32.xlu1 %v6483_v51, %s8922_s18  ;;  %6492 = vrot.lane.b32.xlu0 %v6477_v61, %s8922_s18 }
 0xadc   : > { %6512 = vrot.lane.b32.xlu1 %v6483_v51, %s8923_s16  ;;  %6510 = vrot.lane.b32.xlu0 %v6477_v61, %s8923_s16 }
 0xae0   : > { %6530 = vrot.lane.b32.xlu1 %v6483_v51, %s8924_s23  ;;  %6528 = vrot.lane.b32.xlu0 %v6477_v61, %s8924_s23 }
 0xae4   : > { %6548 = vrot.lane.b32.xlu1 %v6483_v51, %s8925_s29  ;;  %6546 = vrot.lane.b32.xlu0 %v6477_v61, %s8925_s29 }
 0xae7   : > { %v14016_v35 = vpop.f32.mrb[32].mxu0 }
 0xae8   : > { %v6451_v24 = vrot.slane %v14016_v35, 7  ;;  %v6457_v39 = vrot.slane %v14016_v35, 6  ;;  %v6463_v59 = vrot.slane %v14016_v35, 5  ;;  %v6469_v37 = vrot.slane %v14016_v35, 4  ;;  %v8571_v14 = vpop.f32.mrb[33].mxu0 }
 0xaea   : > { %v6481_v52 = vsel %vm15302_vm2, %v6457_v39, %v6463_v59  ;;  %v6475_v23 = vsel %vm15303_vm13, %v14016_v35, %v6451_v24  ;;  %vm15311_vm2 = vmmov %vm15310_vm12 }
 0xaeb   : > { %v6484_v58 = vsel %vm15304_vm0, %v6481_v52, %v6469_v37  ;;  %v6478_v12 = vsel %vm15305_vm10, %v6475_v23, %v6457_v39  ;;  %vm15312_vm13 = vmmov %vm15311_vm2 }
 0xaec   : > { %6498 = vrot.lane.b32.xlu1 %v6484_v58, %s8922_s18  ;;  %6496 = vrot.lane.b32.xlu0 %v6478_v12, %s8922_s18  ;;  %vm15313_vm0 = vmmov %vm15311_vm2 }
 0xaed   : > { %vm15314_vm10 = vmmov %vm15313_vm0 }
 0xaf0   : > { %6516 = vrot.lane.b32.xlu1 %v6484_v58, %s8923_s16  ;;  %6514 = vrot.lane.b32.xlu0 %v6478_v12, %s8923_s16 }
 0xaf4   : > { %6534 = vrot.lane.b32.xlu1 %v6484_v58, %s8924_s23  ;;  %6532 = vrot.lane.b32.xlu0 %v6478_v12, %s8924_s23 }
 0xaf5   : > { %v14033_v43 = vpop.f32.mrb[34].mxu0 }
 0xaf6   : > { %v6452_v48 = vrot.slane %v14033_v43, 7  ;;  %v6458_v28 = vrot.slane %v14033_v43, 6  ;;  %v6464_v47 = vrot.slane %v14033_v43, 5  ;;  %v6470_v56 = vrot.slane %v14033_v43, 4  ;;  %v8578_v25 = vpop.f32.mrb[35].mxu0 }
 0xaf8   : > { %6552 = vrot.lane.b32.xlu1 %v6484_v58, %s8925_s29  ;;  %6550 = vrot.lane.b32.xlu0 %v6478_v12, %s8925_s29  ;;  %v6482_v55 = vsel %vm15306_vm6, %v6458_v28, %v6464_v47  ;;  %v6476_v5 = vsel %vm15307_vm14, %v14033_v43, %v6452_v48  ;;  %vm15315_vm6 = vmmov %vm15313_vm0  ;;  %vm15316_vm14 = vcmask 1044480  }
 0xaf9   : > { %v14045_v19 = vsel %vm15308_vm5, %v6482_v55, %v6470_v56  ;;  %v14048_v31 = vsel %vm15309_vm11, %v6476_v5, %v6458_v28  ;;  %vm15317_vm5 = vcmask 1043456   ;;  %vm15318_vm11 = vmmov %vm15316_vm14 }
 0xafc   : > { %6502 = vrot.lane.b32.xlu1 %v14045_v19, %s8922_s18  ;;  %6500 = vrot.lane.b32.xlu0 %v14048_v31, %s8922_s18 }
 0xb00   : > { %6520 = vrot.lane.b32.xlu1 %v14045_v19, %s8923_s16  ;;  %6518 = vrot.lane.b32.xlu0 %v14048_v31, %s8923_s16 }
 0xb04   : > { %6538 = vrot.lane.b32.xlu1 %v14045_v19, %s8924_s23  ;;  %6536 = vrot.lane.b32.xlu0 %v14048_v31, %s8924_s23 }
 0xb08   : > { %6556 = vrot.lane.b32.xlu1 %v14045_v19, %s8925_s29  ;;  %6554 = vrot.lane.b32.xlu0 %v14048_v31, %s8925_s29 }
 0xb4a   : > { %v6495_v27 = vpop.permute.xlu1 %6494  ;;  %v6493_v60 = vpop.permute.xlu0 %6492 }
 0xb4b   : > { %v6565_v11 = vsel %vm735_vm3, %v6483_v51, %v6495_v27  ;;  %v6564_v9 = vsel %vm735_vm3, %v6477_v61, %v6493_v60 }
 0xb4e   : > { %v6513_v49 = vpop.permute.xlu1 %6512  ;;  %v6511_v8 = vpop.permute.xlu0 %6510 }
 0xb4f   : > { %v6571_v46 = vsel %vm15310_vm12, %v6565_v11, %v6513_v49  ;;  %v6570_v41 = vsel %vm15311_vm2, %v6564_v9, %v6511_v8 }
 0xb52   : > { %v6531_v6 = vpop.permute.xlu1 %6530  ;;  %v6529_v1 = vpop.permute.xlu0 %6528 }
 0xb53   : > { %v6578_v18 = vsel %vm6576_vm1, %v6571_v46, %v6531_v6  ;;  %v6577_v15 = vsel %vm6576_vm1, %v6570_v41, %v6529_v1 }
 0xb56   : > { %v6549_v38 = vpop.permute.xlu1 %6548  ;;  %v6547_v40 = vpop.permute.xlu0 %6546 }
 0xb57   : > { %v14073_v32 = vsel %vm6583_vm9, %v6578_v18, %v6549_v38  ;;  %v14076_v57 = vsel %vm6583_vm9, %v6577_v15, %v6547_v40 }
 0xb58   : > { %6598 = vrot.lane.b32.xlu1 %v14073_v32, %s8926_s30  ;;  %6596 = vrot.lane.b32.xlu0 %v14076_v57, %s8926_s30  ;;  %v6789_v42 = vrot.slane %v14073_v32, 1  ;;  %v6788_v51 = vrot.slane %v14076_v57, 1  ;;  %v6804_v48 = vrot.slane %v14073_v32, 2  ;;  %v6818_v27 = vrot.slane %v14076_v57, 3 }
 0xb59   : > { %v6819_v49 = vrot.slane %v14073_v32, 3  ;;  %v6833_v41 = vrot.slane %v14076_v57, 4  ;;  %v6834_v18 = vrot.slane %v14073_v32, 4 }
 0xb5a   : > { %v6790_v59 = vsel %vm1384_vm7, %v6788_v51, %v6789_v42 }
 0xb5b   : > { %v6800_v55 = vadd.f32 %v6790_v59, %v14076_v57  ;;  %v6820_v15 = vsel %vm15316_vm14, %v6818_v27, %v6819_v49 }
 0xb5c   : > { %6622 = vrot.lane.b32.xlu1 %v14073_v32, %s8927_s4  ;;  %6620 = vrot.lane.b32.xlu0 %v14076_v57, %s8927_s4 }
 0xb5e   : > { %v6499_v21 = vpop.permute.xlu1 %6498  ;;  %v6497_v50 = vpop.permute.xlu0 %6496 }
 0xb5f   : > { %v6567_v36 = vsel %vm735_vm3, %v6484_v58, %v6499_v21  ;;  %v6566_v62 = vsel %vm735_vm3, %v6478_v12, %v6497_v50  ;;  %v6803_v12 = vrot.slane %v14076_v57, 2 }
 0xb60   : > { %6646 = vrot.lane.b32.xlu1 %v14073_v32, %s8928_s25  ;;  %6644 = vrot.lane.b32.xlu0 %v14076_v57, %s8928_s25 }
 0xb61   : > { %v6805_v60 = vsel %vm1538_vm8, %v6803_v12, %v6804_v48 }
 0xb62   : > { %v6517_v10 = vpop.permute.xlu1 %6516  ;;  %v6515_v33 = vpop.permute.xlu0 %6514  ;;  %v6815_v1 = vadd.f32 %v6805_v60, %v6800_v55 }
 0xb63   : > { %v6573_v34 = vsel %vm15312_vm13, %v6567_v36, %v6517_v10  ;;  %v6572_v0 = vsel %vm15313_vm0, %v6566_v62, %v6515_v33 }
 0xb64   : > { %6670 = vrot.lane.b32.xlu1 %v14073_v32, %s8929_s27  ;;  %6668 = vrot.lane.b32.xlu0 %v14076_v57, %s8929_s27  ;;  %v6830_v50 = vadd.f32 %v6820_v15, %v6815_v1 }
 0xb66   : > { %v6535_v30 = vpop.permute.xlu1 %6534  ;;  %v6533_v45 = vpop.permute.xlu0 %6532 }
 0xb67   : > { %v6580_v26 = vsel %vm6576_vm1, %v6573_v34, %v6535_v30  ;;  %v6579_v54 = vsel %vm6576_vm1, %v6572_v0, %v6533_v45  ;;  %v6835_v30 = vsel %vm15317_vm5, %v6833_v41, %v6834_v18 }
 0xb6a   : > { %v6553_v20 = vpop.permute.xlu1 %6552  ;;  %v6551_v53 = vpop.permute.xlu0 %6550 }
 0xb6b   : > { %v14101_v16 = vsel %vm6583_vm9, %v6580_v26, %v6553_v20  ;;  %v14104_v44 = vsel %vm6583_vm9, %v6579_v54, %v6551_v53  ;;  %v6845_v26 = vadd.f32 %v6835_v30, %v6830_v50 }
 0xb6c   : > { %6602 = vrot.lane.b32.xlu1 %v14101_v16, %s8926_s30  ;;  %6600 = vrot.lane.b32.xlu0 %v14104_v44, %s8926_s30  ;;  %v6792_v39 = vrot.slane %v14101_v16, 1  ;;  %v6791_v37 = vrot.slane %v14104_v44, 1  ;;  %v6806_v8 = vrot.slane %v14104_v44, 2  ;;  %v6807_v6 = vrot.slane %v14101_v16, 2 }
 0xb6d   : > { %v6821_v40 = vrot.slane %v14104_v44, 3  ;;  %v6822_v21 = vrot.slane %v14101_v16, 3  ;;  %v6836_v45 = vrot.slane %v14104_v44, 4  ;;  %v6837_v62 = vrot.slane %v14101_v16, 4 }
 0xb6e   : > { %v6503_v7 = vpop.permute.xlu1 %6502  ;;  %v6501_v29 = vpop.permute.xlu0 %6500  ;;  %v6808_v38 = vsel %vm1538_vm8, %v6806_v8, %v6807_v6  ;;  %v6854_v42 = vmul.f32 0.023647603, %v6845_v26  ;;  %v14198_v12 = vmul.f32 0.011170336, %v6845_v26 }
 0xb6f   : > { %v6569_v14 = vsel %vm735_vm3, %v14045_v19, %v6503_v7  ;;  %v6568_v52 = vsel %vm735_vm3, %v14048_v31, %v6501_v29  ;;  %v6793_v31 = vsel %vm1384_vm7, %v6791_v37, %v6792_v39  ;;  %v6823_v36 = vsel %vm15318_vm11, %v6821_v40, %v6822_v21 }
 0xb70   : > { %6626 = vrot.lane.b32.xlu1 %v14101_v16, %s8927_s4  ;;  %6624 = vrot.lane.b32.xlu0 %v14104_v44, %s8927_s4  ;;  %v6801_v11 = vadd.f32 %v6793_v31, %v14104_v44 }
 0xb72   : > { %v6521_v3 = vpop.permute.xlu1 %6520  ;;  %v6519_v22 = vpop.permute.xlu0 %6518  ;;  %v6816_v10 = vadd.f32 %v6808_v38, %v6801_v11 }
 0xb73   : > { %v6575_v23 = vsel %vm15314_vm10, %v6569_v14, %v6521_v3  ;;  %v6574_v58 = vsel %vm15315_vm6, %v6568_v52, %v6519_v22  ;;  %v6872_v22 = vmul.f32 0.030364122, %v6845_v26  ;;  %v8934_v52 = vmov 0.5  }
 0xb74   : > { %6650 = vrot.lane.b32.xlu1 %v14101_v16, %s8928_s25  ;;  %6648 = vrot.lane.b32.xlu0 %v14104_v44, %s8928_s25  ;;  %v6831_v54 = vadd.f32 %v6823_v36, %v6816_v10  ;;  %vm6923_vm6 = vcmask 64512  }
 0xb75   : > { %8580 = vmatpush3.msk.msra.mxu1 %vm10163_vm15, %v8934_v52 }
 0xb76   : > { %v6539_v61 = vpop.permute.xlu1 %6538  ;;  %v6537_v24 = vpop.permute.xlu0 %6536  ;;  %8605 = vmatprep.subr.mxu1 %v15204_v13 }
 0xb77   : > { %v6582_v28 = vsel %vm6576_vm1, %v6575_v23, %v6539_v61  ;;  %v6581_v47 = vsel %vm6576_vm1, %v6574_v58, %v6537_v24  ;;  %vm15319_vm1 = vmmov %vm15317_vm5 }
 0xb78   : > { %6674 = vrot.lane.b32.xlu1 %v14101_v16, %s8929_s27  ;;  %6672 = vrot.lane.b32.xlu0 %v14104_v44, %s8929_s27  ;;  %v6838_v53 = vsel %vm15319_vm1, %v6836_v45, %v6837_v62  ;;  %vm15322_vm12 = vmmov %vm15319_vm1 }
 0xb79   : > { %v6846_v51 = vadd.f32 %v6838_v53, %v6831_v54  ;;  %vm15324_vm13 = vmmov %vm15319_vm1 }
 0xb7a   : > { %v6557_v56 = vpop.permute.xlu1 %6556  ;;  %v6555_v25 = vpop.permute.xlu0 %6554  ;;  %vm15326_vm10 = vmmov %vm15319_vm1 }
 0xb7b   : > { %v14139_v5 = vsel %vm6583_vm9, %v6582_v28, %v6557_v56  ;;  %v14142_v19 = vsel %vm6583_vm9, %v6581_v47, %v6555_v25  ;;  %vm15320_vm9 = vmmov %vm15318_vm11  ;;  %v6855_v37 = vmul.f32 0.023647603, %v6846_v51  ;;  %v6873_v48 = vmul.f32 0.030364122, %v6846_v51 }
 0xb7c   : > { %6606 = vrot.lane.b32.xlu1 %v14139_v5, %s8926_s30  ;;  %6604 = vrot.lane.b32.xlu0 %v14142_v19, %s8926_s30  ;;  %v6795_v9 = vrot.slane %v14139_v5, 1  ;;  %v6794_v46 = vrot.slane %v14142_v19, 1  ;;  %v6809_v34 = vrot.slane %v14142_v19, 2  ;;  %v6810_v0 = vrot.slane %v14139_v5, 2  ;;  %vm15323_vm2 = vmmov %vm15320_vm9 }
 0xb7d   : > { %v6824_v29 = vrot.slane %v14142_v19, 3  ;;  %v6825_v3 = vrot.slane %v14139_v5, 3  ;;  %v6839_v39 = vrot.slane %v14142_v19, 4  ;;  %v6840_v59 = vrot.slane %v14139_v5, 4  ;;  %vm15325_vm0 = vmmov %vm15323_vm2 }
 0xb7e   : > { %v6796_v33 = vsel %vm1384_vm7, %v6794_v46, %v6795_v9  ;;  %v6811_v7 = vsel %vm1538_vm8, %v6809_v34, %v6810_v0  ;;  %v14205_v56 = vmul.f32 0.011170336, %v6846_v51  ;;  %vm15327_vm14 = vmmov %vm15325_vm0  ;;  %vm15329_vm11 = vcmask 1040384  }
 0xb7f   : > { %v6802_v20 = vadd.f32 %v6796_v33, %v14142_v19  ;;  %v6826_v24 = vsel %vm15320_vm9, %v6824_v29, %v6825_v3  ;;  %v6841_v58 = vsel %vm15322_vm12, %v6839_v39, %v6840_v59  ;;  %vm15328_vm5 = vmmov %vm15319_vm1  ;;  %vm15330_vm1 = vcmask 1041408  }
 0xb80   : > { %6630 = vrot.lane.b32.xlu1 %v14139_v5, %s8927_s4  ;;  %6628 = vrot.lane.b32.xlu0 %v14142_v19, %s8927_s4  ;;  %vm15331_vm9 = vmmov %vm15329_vm11 }
 0xb81   : > { %v6817_v61 = vadd.f32 %v6811_v7, %v6802_v20  ;;  %vm15332_vm12 = vmmov %vm15330_vm1 }
 0xb83   : > { %v6832_v14 = vadd.f32 %v6826_v24, %v6817_v61 }
 0xb84   : > { %6654 = vrot.lane.b32.xlu1 %v14139_v5, %s8928_s25  ;;  %6652 = vrot.lane.b32.xlu0 %v14142_v19, %s8928_s25 }
 0xb85   : > { %v6847_v28 = vadd.f32 %v6841_v58, %v6832_v14 }
 0xb87   : > { %v6856_v47 = vmul.f32 0.023647603, %v6847_v28  ;;  %v6874_v25 = vmul.f32 0.030364122, %v6847_v28  ;;  %v14210_v55 = vmul.f32 0.011170336, %v6847_v28 }
 0xb88   : > { %6678 = vrot.lane.b32.xlu1 %v14139_v5, %s8929_s27  ;;  %6676 = vrot.lane.b32.xlu0 %v14142_v19, %s8929_s27 }
 0xb8c   : > { %6878 = vrot.lane.b32.xlu1 %v6872_v22, %s8927_s4  ;;  %6860 = vrot.lane.b32.xlu0 %v6854_v42, %s8926_s30 }
 0xb90   : > { %6890 = vrot.lane.b32.xlu1 %v6854_v42, %s8928_s25  ;;  %6862 = vrot.lane.b32.xlu0 %v6855_v37, %s8926_s30 }
 0xb94   : > { %6905 = vrot.lane.b32.xlu1 %v14198_v12, %s8929_s27  ;;  %6880 = vrot.lane.b32.xlu0 %v6873_v48, %s8927_s4 }
 0xb98   : > { %6892 = vrot.lane.b32.xlu1 %v6855_v37, %s8928_s25  ;;  %6864 = vrot.lane.b32.xlu0 %v6856_v47, %s8926_s30 }
 0xb9c   : > { %6907 = vrot.lane.b32.xlu1 %v14205_v56, %s8929_s27  ;;  %6882 = vrot.lane.b32.xlu0 %v6874_v25, %s8927_s4 }
 0xba0   : > { %6894 = vrot.lane.b32.xlu0 %v6856_v47, %s8928_s25  ;;  %6909 = vrot.lane.b32.xlu1 %v14210_v55, %s8929_s27 }
 0xbca   : > { %v6599_v31 = vpop.permute.xlu1 %6598  ;;  %v6597_v27 = vpop.permute.xlu0 %6596 }
 0xbcb   : > { %v6615_v1 = vadd.f32 %v6599_v31, %v14073_v32  ;;  %v6614_v11 = vadd.f32 %v6597_v27, %v14076_v57 }
 0xbce   : > { %v6623_v60 = vpop.permute.xlu1 %6622  ;;  %v6621_v49 = vpop.permute.xlu0 %6620 }
 0xbcf   : > { %v6639_v41 = vadd.f32 %v6623_v60, %v6615_v1  ;;  %v6638_v18 = vadd.f32 %v6621_v49, %v6614_v11 }
 0xbd2   : > { %v6647_v8 = vpop.permute.xlu1 %6646  ;;  %v6645_v6 = vpop.permute.xlu0 %6644 }
 0xbd3   : > { %v6663_v15 = vadd.f32 %v6647_v8, %v6639_v41  ;;  %v6662_v38 = vadd.f32 %v6645_v6, %v6638_v18 }
 0xbd6   : > { %v6671_v9 = vpop.permute.xlu1 %6670  ;;  %v6669_v46 = vpop.permute.xlu0 %6668 }
 0xbd7   : > { %v6687_v50 = vadd.f32 %v6671_v9, %v6663_v15  ;;  %v6686_v10 = vadd.f32 %v6669_v46, %v6662_v38 }
 0xbd9   : > { %v6696_v45 = vmul.f32 0.023647603, %v6687_v50  ;;  %v6695_v36 = vmul.f32 0.023647603, %v6686_v10  ;;  %v6723_v29 = vmul.f32 0.030364122, %v6687_v50 }
 0xbda   : > { %v6722_v3 = vmul.f32 0.030364122, %v6686_v10  ;;  %v6692_v39 = vmul.f32 0.011170336, %v6686_v10  ;;  %v6764_v25 = vmul.f32 0.011170336, %v6687_v50 }
 0xbdb   : > { %v6708_v54 = vrot.slane %v6696_v45, 1  ;;  %v6707_v20 = vrot.slane %v6695_v36, 1  ;;  %v6735_v59 = vrot.slane %v6723_v29, 2  ;;  %v6750_v47 = vrot.slane %v6696_v45, 3 }
 0xbdc   : > { %v6749_v31 = vrot.slane %v6695_v36, 3  ;;  %v6774_v9 = vrot.slane %v6764_v25, 4  ;;  %v6773_v15 = vrot.slane %v6692_v39, 4 }
 0xbdd   : > { %v6709_v24 = vsel %vm1384_vm7, %v6707_v20, %v6708_v54 }
 0xbde   : > { %v6603_v40 = vpop.permute.xlu1 %6602  ;;  %v6601_v21 = vpop.permute.xlu0 %6600  ;;  %v6719_v58 = vadd.f32 %v6709_v24, %v6692_v39  ;;  %v6751_v10 = vsel %vm15323_vm2, %v6749_v31, %v6750_v47  ;;  %vm15333_vm2 = vmmov %vm15331_vm9 }
 0xbdf   : > { %v6617_v62 = vadd.f32 %v6603_v40, %v14101_v16  ;;  %v6616_v32 = vadd.f32 %v6601_v21, %v14104_v44  ;;  %v6734_v44 = vrot.slane %v6722_v3, 2 }
 0xbe1   : > { %v6736_v6 = vsel %vm1538_vm8, %v6734_v44, %v6735_v59 }
 0xbe2   : > { %v6627_v33 = vpop.permute.xlu1 %6626  ;;  %v6625_v30 = vpop.permute.xlu0 %6624  ;;  %v6746_v1 = vadd.f32 %v6736_v6, %v6719_v58 }
 0xbe3   : > { %v6641_v0 = vadd.f32 %v6627_v33, %v6617_v62  ;;  %v6640_v26 = vadd.f32 %v6625_v30, %v6616_v32 }
 0xbe4   : > { %v6761_v36 = vadd.f32 %v6751_v10, %v6746_v1 }
 0xbe6   : > { %v6651_v34 = vpop.permute.xlu1 %6650  ;;  %v6649_v57 = vpop.permute.xlu0 %6648 }
 0xbe7   : > { %v6665_v53 = vadd.f32 %v6651_v34, %v6641_v0  ;;  %v6664_v7 = vadd.f32 %v6649_v57, %v6640_v26 }
 0xbea   : > { %v6675_v22 = vpop.permute.xlu1 %6674  ;;  %v6673_v42 = vpop.permute.xlu0 %6672 }
 0xbeb   : > { %v6689_v51 = vadd.f32 %v6675_v22, %v6665_v53  ;;  %v6688_v61 = vadd.f32 %v6673_v42, %v6664_v7 }
 0xbed   : > { %v6698_v16 = vmul.f32 0.023647603, %v6689_v51  ;;  %v6697_v37 = vmul.f32 0.023647603, %v6688_v61  ;;  %v6725_v27 = vmul.f32 0.030364122, %v6689_v51 }
 0xbee   : > { %v6607_v14 = vpop.permute.xlu1 %6606  ;;  %v6605_v52 = vpop.permute.xlu0 %6604  ;;  %v6724_v60 = vmul.f32 0.030364122, %v6688_v61  ;;  %v6693_v46 = vmul.f32 0.011170336, %v6688_v61  ;;  %v6765_v62 = vmul.f32 0.011170336, %v6689_v51 }
 0xbef   : > { %v6711_v48 = vrot.slane %v6698_v16, 1  ;;  %v6710_v28 = vrot.slane %v6697_v37, 1  ;;  %v6619_v41 = vadd.f32 %v6607_v14, %v14139_v5  ;;  %v6618_v18 = vadd.f32 %v6605_v52, %v14142_v19 }
 0xbf0   : > { %v6738_v38 = vrot.slane %v6725_v27, 2  ;;  %v6737_v40 = vrot.slane %v6724_v60, 2  ;;  %v6753_v57 = vrot.slane %v6698_v16, 3  ;;  %v6752_v0 = vrot.slane %v6697_v37, 3 }
 0xbf1   : > { %v6712_v11 = vsel %vm1384_vm7, %v6710_v28, %v6711_v48  ;;  %v6775_v19 = vsel %vm15324_vm13, %v6773_v15, %v6774_v9  ;;  %v6777_v3 = vrot.slane %v6765_v62, 4  ;;  %v6776_v61 = vrot.slane %v6693_v46, 4  ;;  %vm15334_vm13 = vmmov %vm15330_vm1 }
 0xbf2   : > { %v6631_v49 = vpop.permute.xlu1 %6630  ;;  %v6629_v8 = vpop.permute.xlu0 %6628  ;;  %v6720_v33 = vadd.f32 %v6712_v11, %v6693_v46  ;;  %v6739_v54 = vsel %vm1538_vm8, %v6737_v40, %v6738_v38  ;;  %v6785_v7 = vadd.f32 %v6775_v19, %v6761_v36  ;;  %v6754_v16 = vsel %vm15325_vm0, %v6752_v0, %v6753_v57 }
 0xbf3   : > { %v6643_v30 = vadd.f32 %v6631_v49, %v6619_v41  ;;  %v6642_v45 = vadd.f32 %v6629_v8, %v6618_v18  ;;  %v6778_v8 = vsel %vm15326_vm10, %v6776_v61, %v6777_v3  ;;  %vm7325_vm0 = vcmask 48128  }
 0xbf4   : > { %v6747_v29 = vadd.f32 %v6739_v54, %v6720_v33  ;;  %v6851_v14 = vadd.f32 %v14198_v12, %v6785_v7  ;;  %vm7329_vm10 = vcmask 56320  }
 0xbf6   : > { %v6655_v21 = vpop.permute.xlu1 %6654  ;;  %v6653_v50 = vpop.permute.xlu0 %6652  ;;  %v6762_v52 = vadd.f32 %v6754_v16, %v6747_v29 }
 0xbf7   : > { %v6667_v32 = vadd.f32 %v6655_v21, %v6643_v30  ;;  %v6666_v34 = vadd.f32 %v6653_v50, %v6642_v45 }
 0xbf8   : > { %v6786_v9 = vadd.f32 %v6778_v8, %v6762_v52 }
 0xbfa   : > { %v6679_v26 = vpop.permute.xlu1 %6678  ;;  %v6677_v5 = vpop.permute.xlu0 %6676  ;;  %v6852_v50 = vadd.f32 %v14205_v56, %v6786_v9 }
 0xbfb   : > { %v6691_v20 = vadd.f32 %v6679_v26, %v6667_v32  ;;  %v6690_v53 = vadd.f32 %v6677_v5, %v6666_v34 }
 0xbfd   : > { %v6700_v22 = vmul.f32 0.023647603, %v6691_v20  ;;  %v6727_v42 = vmul.f32 0.030364122, %v6691_v20  ;;  %v6699_v24 = vmul.f32 0.023647603, %v6690_v53 }
 0xbfe   : > { %v6726_v51 = vmul.f32 0.030364122, %v6690_v53  ;;  %v6879_v39 = vpop.permute.xlu1 %6878  ;;  %v6861_v59 = vpop.permute.xlu0 %6860  ;;  %v6766_v37 = vmul.f32 0.011170336, %v6691_v20  ;;  %v6694_v48 = vmul.f32 0.011170336, %v6690_v53 }
 0xbff   : > { %v6714_v44 = vrot.slane %v6700_v22, 1  ;;  %v6741_v58 = vrot.slane %v6727_v42, 2  ;;  %v6713_v28 = vrot.slane %v6699_v24, 1  ;;  %v6869_v25 = vadd.f32 %v6861_v59, %v6851_v14 }
 0xc00   : > { %v6740_v47 = vrot.slane %v6726_v51, 2  ;;  %v6756_v31 = vrot.slane %v6700_v22, 3  ;;  %v6755_v60 = vrot.slane %v6699_v24, 3  ;;  %v6780_v46 = vrot.slane %v6766_v37, 4 }
 0xc01   : > { %v6715_v27 = vsel %vm1384_vm7, %v6713_v28, %v6714_v44  ;;  %v6887_v11 = vadd.f32 %v6879_v39, %v6869_v25  ;;  %v6779_v41 = vrot.slane %v6694_v48, 4 }
 0xc02   : > { %v6891_v49 = vpop.permute.xlu1 %6890  ;;  %v6863_v6 = vpop.permute.xlu0 %6862  ;;  %v6721_v1 = vadd.f32 %v6715_v27, %v6694_v48  ;;  %v6742_v12 = vsel %vm1538_vm8, %v6740_v47, %v6741_v58  ;;  %v6757_v21 = vsel %vm15327_vm14, %v6755_v60, %v6756_v31 }
 0xc03   : > { %v6899_v18 = vadd.f32 %v6891_v49, %v6887_v11  ;;  %v6781_v30 = vsel %vm15328_vm5, %v6779_v41, %v6780_v46  ;;  %v6870_v45 = vadd.f32 %v6863_v6, %v6852_v50 }
 0xc04   : > { %v6748_v15 = vadd.f32 %v6742_v12, %v6721_v1 }
 0xc06   : > { %v6906_v38 = vpop.permute.xlu1 %6905  ;;  %v6881_v40 = vpop.permute.xlu0 %6880  ;;  %v6763_v33 = vadd.f32 %v6757_v21, %v6748_v15 }
 0xc07   : > { %v6914_v10 = vadd.f32 %v6906_v38, %v6899_v18  ;;  %v6888_v57 = vadd.f32 %v6881_v40, %v6870_v45 }
 0xc08   : > { %v6787_v62 = vadd.f32 %v6781_v30, %v6763_v33 }
 0xc09   : > { %v6917_v36 = vsub.f32 %v13997_v17, %v6914_v10  ;;  %8582 = vmatmul.mubr.msk.f32.vlgmr.msra.gmra.mrb[30].mxu1 %vm6923_vm6, %v6914_v10 }
 0xc0a   : > { %v6893_v32 = vpop.permute.xlu1 %6892  ;;  %v6865_v34 = vpop.permute.xlu0 %6864  ;;  %8584 = vmatprep.mubr.msk.f32.mxu1 %vm8933_vm4, %v15204_v13  ;;  %v6853_v0 = vadd.f32 %v14210_v55, %v6787_v62 }
 0xc0b   : > { %v6900_v26 = vadd.f32 %v6893_v32, %v6888_v57  ;;  %v6920_v20 = vand.u32 2147483647, %v6917_v36 }
 0xc0c   : > { %v6871_v56 = vadd.f32 %v6865_v34, %v6853_v0 }
 0xc0d   : > { %v6924_v55 = vsel %vm6923_vm6, %v6920_v20, 0.0 }
 0xc0e   : > { %v6908_v5 = vpop.permute.xlu1 %6907  ;;  %v6883_v19 = vpop.permute.xlu0 %6882 }
 0xc0f   : > { %v6915_v54 = vadd.f32 %v6908_v5, %v6900_v26  ;;  %v6889_v17 = vadd.f32 %v6883_v19, %v6871_v56 }
 0xc11   : > { %v6918_v53 = vsub.f32 %v14016_v35, %v6915_v54  ;;  %8585 = vmatmul.mubr.msk.f32.gmra.mrb[32].mxu1 %vm6923_vm6, %v6915_v54 }
 0xc12   : > { %v6895_v7 = vpop.permute.xlu0 %6894  ;;  %8587 = vmatprep.mubr.msk.f32.mxu1 %vm8933_vm4, %v15204_v13  ;;  %v6910_v22 = vpop.permute.xlu1 %6909 }
 0xc13   : > { %v6921_v29 = vand.u32 2147483647, %v6918_v53  ;;  %v6901_v3 = vadd.f32 %v6895_v7, %v6889_v17 }
 0xc15   : > { %v6925_v42 = vsel %vm6923_vm6, %v6921_v29, 0.0  ;;  %v6916_v61 = vadd.f32 %v6910_v22, %v6901_v3 }
 0xc16   : > { %v6926_v24 = vadd.f32 %v6925_v42, %v6924_v55 }
 0xc17   : > { %v6919_v51 = vsub.f32 %v14033_v43, %v6916_v61  ;;  %8588 = vmatmul.mubr.msk.f32.gmra.mrb[34].mxu1 %vm6923_vm6, %v6916_v61 }
 0xc18   : > { %8607 = vmatprep.mubr.msk.f32.mxu1 %vm8933_vm4, %v15204_v13 }
 0xc19   : > { %v6922_v35 = vand.u32 2147483647, %v6919_v51 }
 0xc1b   : > { %v6927_v39 = vsel %vm6923_vm6, %v6922_v35, 0.0 }
 0xc1c   : > { %v14251_v59 = vadd.f32 %v6927_v39, %v6926_v24 }
 0xcdc   : > { %v7015_v16 = vpop.f32.mrb[30].mxu1 }
 0xcdd   : > { %v8583_v44 = vpop.f32.mrb[31].mxu1  ;;  %8591 = vmatpush3.msra.mxu0 %v7015_v16 }
 0xcde   : > { %8593 = vmatmul.mubr.msk.f32.vlgmr.msra.gmra.mrb[36].mxu0 %vm6923_vm6, %v15250_v2  ;;  %8595 = vmatprep.subr.mxu0 %v15204_v13 }
 0xcdf   : > { %8597 = vmatprep.mubr.msk.f32.mxu0 %vm8933_vm4, %v15204_v13 }
 0xce4   : > { %v7020_v43 = vpop.f32.mrb[32].mxu1 }
 0xce5   : > { %v8586_v37 = vpop.f32.mrb[33].mxu1  ;;  %8596 = vmatpush3.msra.mxu0 %v7020_v43 }
 0xce6   : > { %8598 = vmatmul.mubr.msk.f32.vlgmr.msra.gmra.mrb[38].mxu0 %vm6923_vm6, %v15250_v2  ;;  %8600 = vmatprep.subr.mxu0 %v15204_v13 }
 0xce7   : > { %8602 = vmatprep.mubr.msk.f32.mxu0 %vm8933_vm4, %v15204_v13 }
 0xcea   : > { %v7025_v14 = vpop.f32.mrb[34].mxu1 }
 0xceb   : > { %v8589_v52 = vpop.f32.mrb[35].mxu1  ;;  %8601 = vmatpush3.msra.mxu0 %v7025_v14 }
 0xcec   : > { %8603 = vmatmul.mubr.msk.f32.vlgmr.msra.gmra.mrb[40].mxu0 %vm6923_vm6, %v15250_v2  ;;  %8610 = vmatprep.subr.mxu0 %v15204_v13 }
 0xced   : > { %8612 = vmatprep.mubr.msk.f32.mxu0 %vm8933_vm4, %v15204_v13 }
 0xdb1   : > { %v14268_v58 = vpop.f32.mrb[36].mxu0 }
 0xdb2   : > { %v7244_v48 = vrot.slane %v14268_v58, 7  ;;  %v7250_v28 = vrot.slane %v14268_v58, 6  ;;  %v7256_v47 = vrot.slane %v14268_v58, 5  ;;  %v8594_v25 = vpop.f32.mrb[37].mxu0  ;;  %v7262_v27 = vrot.slane %v14268_v58, 4 }
 0xdb4   : > { %v7268_v31 = vsel %vm15329_vm11, %v14268_v58, %v7244_v48  ;;  %vm7549_vm11 = vcmask 27648  }
 0xdb5   : > { %v7271_v60 = vsel %vm15330_vm1, %v7268_v31, %v7250_v28 }
 0xdb6   : > { %v7274_v49 = vsel %vm1538_vm8, %v7271_v60, %v7256_v47 }
 0xdb7   : > { %v7277_v8 = vsel %vm1384_vm7, %v7274_v49, %v7262_v27 }
 0xdb8   : > { %7292 = vrot.lane.b32.xlu1 %v7277_v8, %s8923_s16  ;;  %7283 = vrot.lane.b32.xlu0 %v7277_v8, %s8922_s18 }
 0xdb9   : > { %v14281_v6 = vpop.f32.mrb[38].mxu0 }
 0xdba   : > { %v7245_v1 = vrot.slane %v14281_v6, 7  ;;  %v7251_v11 = vrot.slane %v14281_v6, 6  ;;  %v8599_v9 = vpop.f32.mrb[39].mxu0  ;;  %v7257_v46 = vrot.slane %v14281_v6, 5  ;;  %v7263_v12 = vrot.slane %v14281_v6, 4 }
 0xdbc   : > { %v7269_v41 = vsel %vm15331_vm9, %v14281_v6, %v7245_v1  ;;  %7301 = vrot.lane.b32.xlu1 %v7277_v8, %s8924_s23 }
 0xdbd   : > { %v7272_v18 = vsel %vm15332_vm12, %v7269_v41, %v7251_v11 }
 0xdbe   : > { %v7275_v15 = vsel %vm1538_vm8, %v7272_v18, %v7257_v46 }
 0xdbf   : > { %v7278_v38 = vsel %vm1384_vm7, %v7275_v15, %v7263_v12  ;;  %v14293_v40 = vpop.f32.mrb[40].mxu0 }
 0xdc0   : > { %7310 = vrot.lane.b32.xlu1 %v7277_v8, %s8925_s29  ;;  %7285 = vrot.lane.b32.xlu0 %v7278_v38, %s8922_s18  ;;  %v7246_v21 = vrot.slane %v14293_v40, 7  ;;  %v7252_v50 = vrot.slane %v14293_v40, 6  ;;  %v7258_v10 = vrot.slane %v14293_v40, 5  ;;  %v8604_v33 = vpop.f32.mrb[41].mxu0  ;;  %v7264_v45 = vrot.slane %v14293_v40, 4 }
 0xdc2   : > { %v7270_v30 = vsel %vm15333_vm2, %v14293_v40, %v7246_v21  ;;  %vm8013_vm2 = vcmask 9216  }
 0xdc3   : > { %v7273_v36 = vsel %vm15334_vm13, %v7270_v30, %v7252_v50 }
 0xdc4   : > { %7303 = vrot.lane.b32.xlu1 %v7278_v38, %s8924_s23  ;;  %7294 = vrot.lane.b32.xlu0 %v7278_v38, %s8923_s16  ;;  %v7276_v62 = vsel %vm1538_vm8, %v7273_v36, %v7258_v10  ;;  %vm15335_vm8 = vcmask 15360   ;;  %v14375_v10 = vsel %vm10163_vm15, 0.5, %v15204_v13  ;;  %vm7566_vm15 = vcmask 31744  }
 0xdc5   : > { %v7279_v32 = vsel %vm1384_vm7, %v7276_v62, %v7264_v45  ;;  %vm15336_vm7 = vmmov %vm15335_vm8 }
 0xdc6   : > { %vm15337_vm6 = vmmov %vm15336_vm7 }
 0xdc8   : > { %7312 = vrot.lane.b32.xlu1 %v7278_v38, %s8925_s29  ;;  %7287 = vrot.lane.b32.xlu0 %v7279_v32, %s8922_s18 }
 0xdcc   : > { %7296 = vrot.lane.b32.xlu0 %v7279_v32, %s8923_s16  ;;  %7314 = vrot.lane.b32.xlu1 %v7279_v32, %s8925_s29  ;;  %s203_s29 = scalar_lea.vmem %s14455_s2, %s15350_s13 }
 0xdd0   : > { %7305 = vrot.lane.b32.xlu0 %v7279_v32, %s8924_s23 }
 0xe2a   : > { %v7293_v34 = vpop.permute.xlu1 %7292  ;;  %v7284_v57 = vpop.permute.xlu0 %7283 }
 0xe2b   : > { %v7319_v0 = vsel %vm735_vm3, %v7277_v8, %v7284_v57 }
 0xe2c   : > { %v7322_v56 = vsel %vm15335_vm8, %v7319_v0, %v7293_v34  ;;  %v15340_v0 = vld [vmem:[#allocation12_spill] sm:$0xff] }
 0xe2e   : > { %v7302_v26 = vpop.permute.xlu1 %7301 }
 0xe2f   : > { %v7326_v5 = vsel %vm7325_vm0, %v7322_v56, %v7302_v26 }
 0xe32   : > { %v7311_v19 = vpop.permute.xlu1 %7310  ;;  %v7286_v54 = vpop.permute.xlu0 %7285 }
 0xe33   : > { %v14317_v20 = vsel %vm7329_vm10, %v7326_v5, %v7311_v19  ;;  %v7320_v53 = vsel %vm735_vm3, %v7278_v38, %v7286_v54 }
 0xe34   : > { %7360 = vrot.lane.b32.xlu1 %v14317_v20, %s8928_s25  ;;  %7336 = vrot.lane.b32.xlu0 %v14317_v20, %s8926_s30  ;;  %v7438_v29 = vrot.slane %v14317_v20, 1  ;;  %v7447_v51 = vrot.slane %v14317_v20, 2  ;;  %v7456_v43 = vrot.slane %v14317_v20, 3  ;;  %v7465_v60 = vrot.slane %v14317_v20, 4 }
 0xe36   : > { %v7304_v17 = vpop.permute.xlu1 %7303  ;;  %v7295_v7 = vpop.permute.xlu0 %7294  ;;  %v7444_v61 = vadd.f32 %v7438_v29, %v14317_v20 }
 0xe37   : > { %v7323_v3 = vsel %vm15336_vm7, %v7320_v53, %v7295_v7 }
 0xe38   : > { %7348 = vrot.lane.b32.xlu0 %v14317_v20, %s8927_s4  ;;  %v7327_v55 = vsel %vm7325_vm0, %v7323_v3, %v7304_v17  ;;  %v7453_v16 = vadd.f32 %v7447_v51, %v7444_v61 }
 0xe3a   : > { %v7313_v22 = vpop.permute.xlu1 %7312  ;;  %v7288_v42 = vpop.permute.xlu0 %7287  ;;  %v7462_v28 = vadd.f32 %v7456_v43, %v7453_v16 }
 0xe3b   : > { %v14331_v24 = vsel %vm7329_vm10, %v7327_v55, %v7313_v22  ;;  %v7321_v37 = vsel %vm735_vm3, %v7279_v32, %v7288_v42  ;;  %vm15338_vm3 = vmmov %vm15328_vm5 }
 0xe3c   : > { %7372 = vrot.lane.b32.xlu0 %v14317_v20, %s8929_s27  ;;  %7338 = vrot.lane.b32.xlu1 %v14331_v24, %s8926_s30  ;;  %v7439_v35 = vrot.slane %v14331_v24, 1  ;;  %v7448_v14 = vrot.slane %v14331_v24, 2  ;;  %v7457_v49 = vrot.slane %v14331_v24, 3  ;;  %v7471_v8 = vadd.f32 %v7465_v60, %v7462_v28  ;;  %vm15339_vm14 = vmmov %vm15338_vm3 }
 0xe3d   : > { %v7466_v9 = vrot.slane %v14331_v24, 4  ;;  %8606 = vmatpush3.msk.msra.mxu1 %vm15338_vm3, %v14375_v10  ;;  %8611 = vmatpush3.msk.msra.mxu0 %vm15339_vm14, %v14375_v10  ;;  %vm15341_vm5 = vmmov %vm15338_vm3 }
 0xe3e   : > { %v7297_v39 = vpop.permute.xlu0 %7296  ;;  %v7445_v44 = vadd.f32 %v7439_v35, %v14331_v24  ;;  %v7315_v25 = vpop.permute.xlu1 %7314  ;;  %v7480_v46 = vmul.f32 0.023647603, %v7471_v8  ;;  %v7498_v15 = vmul.f32 0.030364122, %v7471_v8  ;;  %8615 = vmatprep.subr.mxu1 %v15204_v13  ;;  %8620 = vmatprep.subr.mxu0 %v15204_v13  ;;  %v7474_v23 = vmul.f32 0.011170336, %v7471_v8  ;;  %vm15342_vm1 = vmmov %vm15338_vm3 }
 0xe3f   : > { %v7324_v52 = vsel %vm15337_vm6, %v7321_v37, %v7297_v39  ;;  %vm15343_vm9 = vmmov %vm15342_vm1 }
 0xe40   : > { %7350 = vrot.lane.b32.xlu0 %v14331_v24, %s8927_s4  ;;  %7362 = vrot.lane.b32.xlu1 %v14331_v24, %s8928_s25  ;;  %v7454_v31 = vadd.f32 %v7448_v14, %v7445_v44  ;;  %vm15344_vm12 = vmmov %vm15342_vm1 }
 0xe42   : > { %v7306_v48 = vpop.permute.xlu0 %7305  ;;  %v7463_v11 = vadd.f32 %v7457_v49, %v7454_v31 }
 0xe43   : > { %v7328_v47 = vsel %vm7325_vm0, %v7324_v52, %v7306_v48 }
 0xe44   : > { %v14350_v27 = vsel %vm7329_vm10, %v7328_v47, %v7315_v25  ;;  %7374 = vrot.lane.b32.xlu0 %v14331_v24, %s8929_s27  ;;  %v7472_v12 = vadd.f32 %v7466_v9, %v7463_v11 }
 0xe45   : > { %7340 = vrot.lane.b32.xlu1 %v14350_v27, %s8926_s30  ;;  %v7440_v1 = vrot.slane %v14350_v27, 1  ;;  %v7449_v18 = vrot.slane %v14350_v27, 2  ;;  %v7458_v50 = vrot.slane %v14350_v27, 3  ;;  %v7467_v45 = vrot.slane %v14350_v27, 4 }
 0xe46   : > { %v7481_v21 = vmul.f32 0.023647603, %v7472_v12  ;;  %v7499_v33 = vmul.f32 0.030364122, %v7472_v12  ;;  %v14390_v34 = vmul.f32 0.011170336, %v7472_v12 }
 0xe47   : > { %v7446_v41 = vadd.f32 %v7440_v1, %v14350_v27 }
 0xe48   : > { %7352 = vrot.lane.b32.xlu0 %v14350_v27, %s8927_s4 }
 0xe49   : > { %7364 = vrot.lane.b32.xlu1 %v14350_v27, %s8928_s25  ;;  %v7455_v38 = vadd.f32 %v7449_v18, %v7446_v41 }
 0xe4b   : > { %v7464_v30 = vadd.f32 %v7458_v50, %v7455_v38 }
 0xe4c   : > { %7486 = vrot.lane.b32.xlu0 %v7480_v46, %s8926_s30 }
 0xe4d   : > { %7376 = vrot.lane.b32.xlu1 %v14350_v27, %s8929_s27  ;;  %v7473_v36 = vadd.f32 %v7467_v45, %v7464_v30 }
 0xe4f   : > { %v7500_v62 = vmul.f32 0.030364122, %v7473_v36  ;;  %v7482_v32 = vmul.f32 0.023647603, %v7473_v36  ;;  %v14395_v57 = vmul.f32 0.011170336, %v7473_v36 }
 0xe50   : > { %7504 = vrot.lane.b32.xlu0 %v7498_v15, %s8927_s4 }
 0xe51   : > { %7488 = vrot.lane.b32.xlu1 %v7481_v21, %s8926_s30 }
 0xe54   : > { %7506 = vrot.lane.b32.xlu0 %v7499_v33, %s8927_s4 }
 0xe55   : > { %7516 = vrot.lane.b32.xlu1 %v7480_v46, %s8928_s25 }
 0xe58   : > { %7531 = vrot.lane.b32.xlu0 %v7474_v23, %s8929_s27 }
 0xe59   : > { %7518 = vrot.lane.b32.xlu1 %v7481_v21, %s8928_s25 }
 0xe5c   : > { %7508 = vrot.lane.b32.xlu0 %v7500_v62, %s8927_s4 }
 0xe5d   : > { %7490 = vrot.lane.b32.xlu1 %v7482_v32, %s8926_s30 }
 0xe60   : > { %7533 = vrot.lane.b32.xlu0 %v14390_v34, %s8929_s27 }
 0xe61   : > { %7520 = vrot.lane.b32.xlu1 %v7482_v32, %s8928_s25 }
 0xe65   : > { %7535 = vrot.lane.b32.xlu1 %v14395_v57, %s8929_s27 }
 0xe7f   : > { %2912 = vadd.xlane.f32.xlu0 %v15340_v0 }
 0xe83   : > { %6111 = vadd.xlane.f32.xlu0 %v13978_v4 }
 0xe87   : > { %6929 = vadd.xlane.f32.xlu0 %v14251_v59 }
 0xe89   : > { %4919 = vadd.xlane.f32.xlu1 %v13464_v63 }
 0xea6   : > { %v7337_v26 = vpop.permute.xlu0 %7336  ;;  %v7361_v5 = vpop.permute.xlu1 %7360 }
 0xea7   : > { %v7345_v56 = vadd.f32 %v7337_v26, %v14317_v20 }
 0xeaa   : > { %v7349_v19 = vpop.permute.xlu0 %7348 }
 0xeab   : > { %v7357_v54 = vadd.f32 %v7349_v19, %v7345_v56 }
 0xead   : > { %v7369_v53 = vadd.f32 %v7361_v5, %v7357_v54 }
 0xeae   : > { %v7339_v17 = vpop.permute.xlu1 %7338  ;;  %v7373_v7 = vpop.permute.xlu0 %7372 }
 0xeaf   : > { %v7381_v29 = vadd.f32 %v7373_v7, %v7369_v53  ;;  %v7346_v3 = vadd.f32 %v7339_v17, %v14331_v24 }
 0xeb1   : > { %v7387_v22 = vmul.f32 0.023647603, %v7381_v29  ;;  %v7402_v55 = vmul.f32 0.030364122, %v7381_v29  ;;  %v7384_v61 = vmul.f32 0.011170336, %v7381_v29 }
 0xeb2   : > { %v7363_v42 = vpop.permute.xlu1 %7362  ;;  %v7351_v4 = vpop.permute.xlu0 %7350 }
 0xeb3   : > { %v7393_v59 = vrot.slane %v7387_v22, 1  ;;  %v7358_v51 = vadd.f32 %v7351_v4, %v7346_v3  ;;  %v7408_v35 = vrot.slane %v7402_v55, 2  ;;  %v7417_v44 = vrot.slane %v7387_v22, 3 }
 0xeb4   : > { %v7429_v47 = vrot.slane %v7384_v61, 4 }
 0xeb5   : > { %v7399_v63 = vadd.f32 %v7393_v59, %v7384_v61  ;;  %v7370_v39 = vadd.f32 %v7363_v42, %v7358_v51 }
 0xeb6   : > { %v7375_v20 = vpop.permute.xlu0 %7374 }
 0xeb7   : > { %v7414_v16 = vadd.f32 %v7408_v35, %v7399_v63  ;;  %v7382_v43 = vadd.f32 %v7375_v20, %v7370_v39  ;;  %v7341_v37 = vpop.permute.xlu1 %7340 }
 0xeb8   : > { %v7347_v14 = vadd.f32 %v7341_v37, %v14350_v27 }
 0xeb9   : > { %v7388_v52 = vmul.f32 0.023647603, %v7382_v43  ;;  %v7403_v48 = vmul.f32 0.030364122, %v7382_v43  ;;  %v7423_v24 = vadd.f32 %v7417_v44, %v7414_v16  ;;  %v7385_v25 = vmul.f32 0.011170336, %v7382_v43 }
 0xeba   : > { %v7353_v28 = vpop.permute.xlu0 %7352 }
 0xebb   : > { %v7394_v31 = vrot.slane %v7388_v52, 1  ;;  %v7359_v60 = vadd.f32 %v7353_v28, %v7347_v14  ;;  %v7365_v49 = vpop.permute.xlu1 %7364  ;;  %v7435_v8 = vadd.f32 %v7429_v47, %v7423_v24  ;;  %v7409_v11 = vrot.slane %v7403_v48, 2 }
 0xebc   : > { %v7418_v12 = vrot.slane %v7388_v52, 3  ;;  %v7430_v21 = vrot.slane %v7385_v25, 4 }
 0xebd   : > { %v7400_v1 = vadd.f32 %v7394_v31, %v7385_v25  ;;  %v7371_v9 = vadd.f32 %v7365_v49, %v7359_v60  ;;  %v7477_v15 = vadd.f32 %v7474_v23, %v7435_v8 }
 0xebe   : > { %v7487_v46 = vpop.permute.xlu0 %7486 }
 0xebf   : > { %v7415_v41 = vadd.f32 %v7409_v11, %v7400_v1  ;;  %v7377_v18 = vpop.permute.xlu1 %7376  ;;  %v7495_v62 = vadd.f32 %v7487_v46, %v7477_v15 }
 0xec0   : > { %v7383_v38 = vadd.f32 %v7377_v18, %v7371_v9 }
 0xec1   : > { %v7424_v27 = vadd.f32 %v7418_v12, %v7415_v41 }
 0xec2   : > { %v7389_v50 = vmul.f32 0.023647603, %v7383_v38  ;;  %v7404_v33 = vmul.f32 0.030364122, %v7383_v38  ;;  %v7505_v30 = vpop.permute.xlu0 %7504  ;;  %v7386_v32 = vmul.f32 0.011170336, %v7383_v38 }
 0xec3   : > { %v7489_v45 = vpop.permute.xlu1 %7488  ;;  %v7436_v36 = vadd.f32 %v7430_v21, %v7424_v27  ;;  %v7513_v19 = vadd.f32 %v7505_v30, %v7495_v62 }
 0xec4   : > { %v7395_v0 = vrot.slane %v7389_v50, 1  ;;  %v7410_v5 = vrot.slane %v7404_v33, 2  ;;  %v7419_v23 = vrot.slane %v7389_v50, 3  ;;  %v7431_v55 = vrot.slane %v7386_v32, 4 }
 0xec5   : > { %v7478_v26 = vadd.f32 %v14390_v34, %v7436_v36 }
 0xec6   : > { %v7401_v56 = vadd.f32 %v7395_v0, %v7386_v32  ;;  %v7507_v54 = vpop.permute.xlu0 %7506 }
 0xec7   : > { %v7517_v53 = vpop.permute.xlu1 %7516  ;;  %v7496_v29 = vadd.f32 %v7489_v45, %v7478_v26 }
 0xec8   : > { %v7416_v17 = vadd.f32 %v7410_v5, %v7401_v56  ;;  %v7525_v7 = vadd.f32 %v7517_v53, %v7513_v19 }
 0xec9   : > { %v7514_v59 = vadd.f32 %v7507_v54, %v7496_v29 }
 0xeca   : > { %v7532_v3 = vpop.permute.xlu0 %7531  ;;  %v7425_v22 = vadd.f32 %v7419_v23, %v7416_v17 }
 0xecb   : > { %v7540_v42 = vadd.f32 %v7532_v3, %v7525_v7  ;;  %v7519_v4 = vpop.permute.xlu1 %7518 }
 0xecc   : > { %v7437_v61 = vadd.f32 %v7431_v55, %v7425_v22  ;;  %v7526_v20 = vadd.f32 %v7519_v4, %v7514_v59 }
 0xecd   : > { %8608 = vmatmul.mubr.msk.f32.vlgmr.msra.gmra.mrb[36].mxu1 %vm7566_vm15, %v7540_v42  ;;  %v7543_v39 = vsub.f32 %v14268_v58, %v7540_v42 }
 0xece   : > { %v7509_v34 = vpop.permute.xlu0 %7508  ;;  %v7479_v51 = vadd.f32 %v14395_v57, %v7437_v61  ;;  %8616 = vmatpush3.msk.msra.mxu1 %vm15341_vm5, %v14375_v10  ;;  %8617 = vmatprep.mubr.msk.f32.mxu1 %vm8933_vm4, %v15204_v13 }
 0xecf   : > { %v7491_v63 = vpop.permute.xlu1 %7490  ;;  %8625 = vmatprep.subr.mxu1 %v15204_v13  ;;  %v7546_v14 = vand.u32 2147483647, %v7543_v39 }
 0xed0   : > { %v7497_v35 = vadd.f32 %v7491_v63, %v7479_v51 }
 0xed1   : > { %v7550_v28 = vsel %vm7549_vm11, %v7546_v14, 0.0 }
 0xed2   : > { %v7534_v16 = vpop.permute.xlu0 %7533  ;;  %v7515_v44 = vadd.f32 %v7509_v34, %v7497_v35 }
 0xed3   : > { %v7541_v43 = vadd.f32 %v7534_v16, %v7526_v20  ;;  %v7521_v37 = vpop.permute.xlu1 %7520 }
 0xed4   : > { %v7527_v10 = vadd.f32 %v7521_v37, %v7515_v44 }
 0xed5   : > { %v7544_v57 = vsub.f32 %v14281_v6, %v7541_v43  ;;  %8613 = vmatmul.mubr.msk.f32.vlgmr.msra.gmra.mrb[42].mxu0 %vm7566_vm15, %v7541_v43 }
 0xed6   : > { %8622 = vmatprep.mubr.msk.f32.mxu0 %vm8933_vm4, %v15204_v13 }
 0xed7   : > { %v7547_v52 = vand.u32 2147483647, %v7544_v57  ;;  %v7536_v48 = vpop.permute.xlu1 %7535 }
 0xed8   : > { %v7542_v24 = vadd.f32 %v7536_v48, %v7527_v10 }
 0xed9   : > { %v7551_v58 = vsel %vm7549_vm11, %v7547_v52, 0.0 }
 0xeda   : > { %v7545_v47 = vsub.f32 %v14293_v40, %v7542_v24  ;;  %8618 = vmatmul.mubr.msk.f32.vlgmr.msra.gmra.mrb[38].mxu1 %vm7566_vm15, %v7542_v24  ;;  %v7552_v25 = vadd.f32 %v7551_v58, %v7550_v28 }
 0xedb   : > { %8627 = vmatprep.mubr.msk.f32.mxu1 %vm8933_vm4, %v15204_v13 }
 0xedc   : > { %v7548_v6 = vand.u32 2147483647, %v7545_v47 }
 0xede   : > { %v7553_v31 = vsel %vm7549_vm11, %v7548_v6, 0.0 }
 0xedf   : > { %v7554_v60 = vadd.f32 %v7553_v31, %v7552_v25 }
 0xee1   : > { %7555 = vadd.xlane.f32.xlu1 %v7554_v60 }
 0xf0c   : > { %v2913_v49 = vpop.xlane.xlu0 %2912 }
 0xf0d   : > { %v2914_v8 = vrot.slane %v2913_v49, 4 }
 0xf0f   : > { %v2915_v1 = vadd.f32 %v2914_v8, %v2913_v49 }
 0xf10   : > { %v6112_v11 = vpop.xlane.xlu0 %6111 }
 0xf11   : > { %v2916_v9 = vrot.slane %v2915_v1, 2  ;;  %v6113_v46 = vrot.slane %v6112_v11, 4 }
 0xf13   : > { %v6114_v41 = vadd.f32 %v6113_v46, %v6112_v11  ;;  %v2917_v12 = vadd.f32 %v2916_v9, %v2915_v1 }
 0xf14   : > { %v6930_v18 = vpop.xlane.xlu0 %6929 }
 0xf15   : > { %v6931_v40 = vrot.slane %v6930_v18, 4  ;;  %v2918_v15 = vrot.slane %v2917_v12, 1  ;;  %v6115_v38 = vrot.slane %v6114_v41, 2 }
 0xf16   : > { %v4920_v27 = vpop.xlane.xlu1 %4919 }
 0xf17   : > { %v6932_v21 = vadd.f32 %v6931_v40, %v6930_v18  ;;  %v4921_v50 = vrot.slane %v4920_v27, 4  ;;  %v2919_v33 = vadd.f32 %v2918_v15, %v2917_v12  ;;  %v6116_v36 = vadd.f32 %v6115_v38, %v6114_v41 }
 0xf19   : > { %v6933_v30 = vrot.slane %v6932_v21, 2  ;;  %v4922_v45 = vadd.f32 %v4921_v50, %v4920_v27  ;;  %8747 = vpush %v2919_v33  ;;  %v6117_v26 = vrot.slane %v6116_v36, 1 }
 0xf1b   : > { %v4923_v62 = vrot.slane %v4922_v45, 2  ;;  %v6934_v32 = vadd.f32 %v6933_v30, %v6932_v21  ;;  %v6118_v54 = vadd.f32 %v6117_v26, %v6116_v36 }
 0xf1d   : > { %v4924_v0 = vadd.f32 %v4923_v62, %v4922_v45  ;;  %v6935_v5 = vrot.slane %v6934_v32, 1 }
 0xf1f   : > { %v4925_v56 = vrot.slane %v4924_v0, 1  ;;  %v6936_v53 = vadd.f32 %v6935_v5, %v6934_v32 }
 0xf21   : > { %v4926_v19 = vadd.f32 %v4925_v56, %v4924_v0 }
 0xf23   : > { %8749 = vpush %v4926_v19 }
 0xf24   : > { %8751 = vpush %v6118_v54 }
 0xf25   : > { %8753 = vpush %v6936_v53 }
 0xf4a   : > { %s8748_s12 = spop %8747 }
 0xf4b   : > { %s2921_s5 = smul.f32 4.0690105e-05, %s8748_s12 }
 0xf54   : > { %s8750_s21 = spop %8749 }
 0xf55   : > { %s4928_s28 = smul.f32 0.00016276042, %s8750_s21  ;;  %s8752_s6 = spop %8751 }
 0xf56   : > { %s6120_s7 = smul.f32 0.0006510417, %s8752_s6  ;;  %s8754_s8 = spop %8753 }
 0xf57   : > { %s4929_s20 = sadd.f32 %s4928_s28, %s2921_s5  ;;  %s6938_s24 = smul.f32 0.0026041667, %s8754_s8 }
 0xf59   : > { %s6121_s9 = sadd.f32 %s6120_s7, %s4929_s20 }
 0xf5b   : > { %s6939_s3 = sadd.f32 %s6938_s24, %s6121_s9 }
 0xf6e   : > { %v7556_v17 = vpop.xlane.xlu1 %7555 }
 0xf6f   : > { %v7557_v23 = vrot.slane %v7556_v17, 4 }
 0xf71   : > { %v7558_v7 = vadd.f32 %v7557_v23, %v7556_v17 }
 0xf73   : > { %v7559_v29 = vrot.slane %v7558_v7, 2 }
 0xf75   : > { %v7560_v3 = vadd.f32 %v7559_v29, %v7558_v7 }
 0xf77   : > { %v7561_v22 = vrot.slane %v7560_v3, 1 }
 0xf79   : > { %v7562_v55 = vadd.f32 %v7561_v22, %v7560_v3 }
 0xf7b   : > { %8755 = vpush %v7562_v55 }
 0xfa0   : > { %v7639_v42 = vpop.f32.mrb[36].mxu1 }
 0xfa1   : > { %v8609_v4 = vpop.f32.mrb[37].mxu1  ;;  %8621 = vmatpush3.msk.msra.mxu0 %vm15342_vm1, %v7639_v42 }
 0xfa2   : > { %8623 = vmatmul.mubr.msk.f32.vlgmr.msra.gmra.mrb[44].mxu0 %vm7566_vm15, %v15250_v2  ;;  %8630 = vmatprep.subr.mxu0 %v15204_v13 }
 0xfa3   : > { %8632 = vmatprep.mubr.msk.f32.mxu0 %vm8933_vm4, %v15204_v13  ;;  %vm8031_vm4 = vcmask 0  }
 0xfa8   : > { %v7712_v61 = vpop.f32.mrb[42].mxu0 }
 0xfa9   : > { %v8614_v59 = vpop.f32.mrb[43].mxu0  ;;  %8626 = vmatpush3.msk.msra.mxu1 %vm15343_vm9, %v7712_v61 }
 0xfaa   : > { %8628 = vmatmul.mubr.msk.f32.vlgmr.msra.gmra.mrb[40].mxu1 %vm7566_vm15, %v15250_v2 }
 0xfac   : > { %s8756_s15 = spop %8755 }
 0xfad   : > { %v7785_v34 = vpop.f32.mrb[38].mxu1  ;;  %s7564_s26 = smul.f32 0.010416667, %s8756_s15 }
 0xfae   : > { %v8619_v51 = vpop.f32.mrb[39].mxu1  ;;  %8631 = vmatpush3.msk.msra.mxu0 %vm15344_vm12, %v7785_v34 }
 0xfaf   : > { %8633 = vmatmul.mubr.msk.f32.vlgmr.msra.gmra.mrb[46].mxu0 %vm7566_vm15, %v15250_v2  ;;  %s7565_s22 = sadd.f32 %s7564_s26, %s6939_s3 }
0x1075   : > { %v7860_v63 = vpop.f32.mrb[44].mxu0 }
0x1076   : > { %v8624_v35 = vpop.f32.mrb[45].mxu0  ;;  %v8010_v39 = vand.u32 2147483647, %v7860_v63 }
0x1078   : > { %v8014_v13 = vsel %vm8013_vm2, %v8010_v39, 0.0 }
0x107d   : > { %v7933_v20 = vpop.f32.mrb[40].mxu1 }
0x107e   : > { %v8011_v16 = vand.u32 2147483647, %v7933_v20  ;;  %v8629_v44 = vpop.f32.mrb[41].mxu1 }
0x1080   : > { %v8015_v43 = vsel %vm8013_vm2, %v8011_v16, 0.0 }
0x1081   : > { %v8016_v37 = vadd.f32 %v8015_v43, %v8014_v13 }
0x1082   : > { %v8006_v14 = vpop.f32.mrb[46].mxu0 }
0x1083   : > { %v8012_v57 = vand.u32 2147483647, %v8006_v14  ;;  %v8634_v10 = vpop.f32.mrb[47].mxu0 }
0x1085   : > { %v8017_v52 = vsel %vm8013_vm2, %v8012_v57, 0.0 }
0x1086   : > { %v8018_v48 = vadd.f32 %v8017_v52, %v8016_v37 }
0x1088   : > { %8019 = vadd.xlane.f32.xlu0 %v8018_v48 }
0x1115   : > { %v8020_v24 = vpop.xlane.xlu0 %8019 }
0x1116   : > { %v8021_v28 = vrot.slane %v8020_v24, 4 }
0x1118   : > { %v8022_v58 = vadd.f32 %v8021_v28, %v8020_v24 }
0x111a   : > { %v8023_v2 = vrot.slane %v8022_v58, 2 }
0x111c   : > { %v8024_v47 = vadd.f32 %v8023_v2, %v8022_v58 }
0x111e   : > { %v8025_v25 = vrot.slane %v8024_v47, 1 }
0x1120   : > { %v8026_v6 = vadd.f32 %v8025_v25, %v8024_v47 }
0x1122   : > { %8757 = vpush %v8026_v6 }
0x1153   : > { %s8758_s19 = spop %8757 }
0x1154   : > { %s8028_s18 = smul.f32 0.041666668, %s8758_s19 }
0x1156   : > { %s8029_s30 = sadd.f32 %s8028_s18, %s7565_s22 }
0x1158   : > { %v8030_v31 = vstv %s8029_s30 }
0x1159   : > { %8032 = vst.msk [vmem:[%s203_s29] sm:$0x1] %vm8031_vm4, %v8030_v31 }
0x115a PF: > { %p15_p11 = scmp.ge.s32.totalorder %s8972_s14, 4   ;;  %s15345_s9 = smov %s8908_s10 }
0x115b   : > { %s15346_s10 = smov %s8912_s11  ;;  %s15347_s11 = smov %s8982_s17 }
0x115c   : > { %s15348_s12 = smov %s8972_s14  ;;  %17 = sbr.rel (!%p15_p11) target bundleno = 5 (0x5), region = 81 }
0x1163   :  { %8050 = vsyncpa [#allocation3], 1 }
0x1164   :  { %8052 = vsyncpa [#allocation3 + $0x1], 1 }
0x1165   :  { %8053 = vsyncpa [#allocation5], 1 }
0x1166   :  { %8055 = vsyncpa [#allocation5 + $0x1], 1 }

</bundles_post_ra>
